<compile_context>
chip_gen: v7x
topology: tpu7x:2x2x1
jax: 0.10.0
libtpu: 0.0.40
codegen_flags: <defaults>
</compile_context>

<pallas_src>
import numpy as np
import jax
import jax.numpy as jnp
from jax.experimental import pallas as pl
from jax.experimental.pallas import tpu as pltpu

BN_EPS = 1e-5
SEL_DTYPE = jnp.bfloat16   # exact for 0/1 selection matrices; halves DMA bytes


# ----------------------------------------------------------------------------
# Trace-time (numpy) spatial-selection matrices.  Activations are kept flat as
# (N*H*W, C) inside the kernel; a 3x3 tap / pool window / stride-2 pick is an
# exact 0/1 matmul  S @ x  done on the MXU.
# ----------------------------------------------------------------------------
def _conv_out(h, stride):
    return (h + 2 - 3) // stride + 1


def _conv_sel(N, H, W, stride):
    """(9, N*Ho*Wo, N*H*W) selection matrices for a 3x3, pad=1 window.
    Out-of-bounds taps give all-zero rows (== zero padding)."""
    Ho, Wo = _conv_out(H, stride), _conv_out(W, stride)
    S = np.zeros((9, N * Ho * Wo, N * H * W), np.float32)
    for k in range(9):
        dy, dx = divmod(k, 3)
        for n in range(N):
            for i in range(Ho):
                for j in range(Wo):
                    yi, xj = i * stride + dy - 1, j * stride + dx - 1
                    if 0 <= yi < H and 0 <= xj < W:
                        S[k, (n * Ho + i) * Wo + j, (n * H + yi) * W + xj] = 1.0
    return S, Ho, Wo


def _maxpool_sel(N, H, W):
    """3x3 / stride-2 / pad-1 max-pool selections.  Out-of-bounds taps are
    clamped to the nearest valid position (always inside the same window), so
    a plain max over the 9 taps equals the padded max-pool."""
    Ho, Wo = _conv_out(H, 2), _conv_out(W, 2)
    S = np.zeros((9, N * Ho * Wo, N * H * W), np.float32)
    for k in range(9):
        dy, dx = divmod(k, 3)
        for n in range(N):
            for i in range(Ho):
                for j in range(Wo):
                    yi = min(max(i * 2 + dy - 1, 0), H - 1)
                    xj = min(max(j * 2 + dx - 1, 0), W - 1)
                    S[k, (n * Ho + i) * Wo + j, (n * H + yi) * W + xj] = 1.0
    return S


def _downsample_sel(N, H, W):
    """1x1 conv, stride 2, pad 0: picks positions (2i, 2j)."""
    Ho, Wo = (H - 1) // 2 + 1, (W - 1) // 2 + 1
    D = np.zeros((N * Ho * Wo, N * H * W), np.float32)
    for n in range(N):
        for i in range(Ho):
            for j in range(Wo):
                D[(n * Ho + i) * Wo + j, (n * H + 2 * i) * W + 2 * j] = 1.0
    return D


def _avg_sel(N, M):
    """(N, N*M) block-diagonal averaging matrix (global average pool)."""
    A = np.zeros((N, N * M), np.float32)
    for n in range(N):
        A[n, n * M:(n + 1) * M] = 1.0 / M
    return A


def _nonzero_taps(S):
    keep = [k for k in range(9) if S[k].any()]
    return S[keep], keep


# ----------------------------------------------------------------------------
# Parameter preprocessing (BN folding, weight layout) — tiny, outside the kernel
# ----------------------------------------------------------------------------
def _bn_fold(bn):
    s = bn['gamma'] * jax.lax.rsqrt(bn['var'] + BN_EPS)
    t = bn['beta'] - bn['mean'] * s
    return s, t


# ----------------------------------------------------------------------------
# Full forward: ONE pallas_call
# ----------------------------------------------------------------------------
def lpc_v1_forward(params, x_nchw):
    p = params
    N, Cin, H0, W0 = x_nchw.shape
    x = jnp.transpose(x_nchw, (0, 2, 3, 1)).astype(jnp.float32)       # NHWC

    # Spatial sizes along the network.
    H1, W1 = _conv_out(H0, 2), _conv_out(W0, 2)   # conv1(s2) / conv2 / sep1 / sep2
    H2, W2 = _conv_out(H1, 2), _conv_out(W1, 2)   # after maxpool1 (sep3 / sep4)
    H3, W3 = _conv_out(H2, 2), _conv_out(W2, 2)   # after maxpool2 (sep5 / sep6)
    H4, W4 = _conv_out(H3, 2), _conv_out(W3, 2)   # after maxpool3 (sep7)

    # ---- conv1 im2col on the network input only (XLA glue, tiny) -----------
    xp = jnp.pad(x, ((0, 0), (1, 1), (1, 1), (0, 0)))
    taps = [xp[:, dy:dy + 2 * (H1 - 1) + 1:2, dx:dx + 2 * (W1 - 1) + 1:2, :]
            for dy in range(3) for dx in range(3)]
    patches = jnp.concatenate(taps, axis=-1).reshape(N * H1 * W1, 9 * Cin)
    K1 = 9 * Cin
    K1p = -(-K1 // 32) * 32                       # pad K 27 -> 32 (aligned MXU feed)
    patches = jnp.pad(patches, ((0, 0), (0, K1p - K1)))

    # ---- conv1 / conv2 weights with BN scale folded in ----------------------
    s1, t1 = _bn_fold(p['conv1']['bn'])
    w1 = p['conv1']['conv']['w']                                       # (32,Cin,3,3)
    W1m = jnp.transpose(w1, (2, 3, 1, 0)).reshape(K1, 32) * s1[None, :]
    W1m = jnp.pad(W1m, ((0, K1p - K1), (0, 0)))
    sh1 = (p['conv1']['conv']['b'] * s1 + t1).reshape(1, 32)

    s2, t2 = _bn_fold(p['conv2']['bn'])
    w2 = p['conv2']['conv']['w']                                       # (64,32,3,3)
    W2m = jnp.transpose(w2, (2, 3, 1, 0)).reshape(9, 32, 64) * s2[None, None, :]
    sh2 = (p['conv2']['conv']['b'] * s2 + t2).reshape(1, 64)

    # ---- selection matrices (and kept-tap lists) -----------------------------
    S8, _, _ = _conv_sel(N, H1, W1, 1); S8, keep8 = _nonzero_taps(S8)
    S4, _, _ = _conv_sel(N, H2, W2, 1); S4, keep4 = _nonzero_taps(S4)
    S2, _, _ = _conv_sel(N, H3, W3, 1); S2, keep2 = _nonzero_taps(S2)
    S1, _, _ = _conv_sel(N, H4, W4, 1); S1, keep1 = _nonzero_taps(S1)
    MP8, MP4, MP2 = _maxpool_sel(N, H1, W1), _maxpool_sel(N, H2, W2), _maxpool_sel(N, H3, W3)
    D8, D4, D2 = _downsample_sel(N, H1, W1), _downsample_sel(N, H2, W2), _downsample_sel(N, H3, W3)
    W2m = W2m[np.asarray(keep8)]
    nt8, nt4, nt2, nt1 = len(keep8), len(keep4), len(keep2), len(keep1)

    sep7_1x1 = (H4 == 1 and W4 == 1)      # S1 is a block identity -> elementwise
    gap_identity = sep7_1x1               # 1x1 spatial -> global-avg-pool == identity

    # ---- separable / residual / fc weights (BN scale folded in pointwise) ---
    def sep_mats(q, keep):
        dw_w, dw_b = q['dw']['w'], q['dw']['b']          # (C,1,3,3), (C,)
        pw_w, pw_b = q['pw']['w'], q['pw']['b']          # (Co,C,1,1), (Co,)
        C, Co = dw_w.shape[0], pw_w.shape[0]
        s, t = _bn_fold(q['bn'])
        w9 = jnp.transpose(dw_w[:, 0], (1, 2, 0)).reshape(9, 1, C)[np.asarray(keep)]
        Wp = pw_w.reshape(Co, C).T * s[None, :]
        return w9, dw_b.reshape(1, C), Wp, (pw_b * s + t).reshape(1, Co)

    def res_mats(q):
        w, b = q['w'], q['b']                            # (Co,Ci,1,1), (Co,)
        Co, Ci = w.shape[0], w.shape[1]
        return w.reshape(Co, Ci).T, b.reshape(1, Co)

    dw1, db1, pw1, ps1 = sep_mats(p['sep1'], keep8)
    dw2, db2, pw2, ps2 = sep_mats(p['sep2'], keep8)
    dw3, db3, pw3, ps3 = sep_mats(p['sep3'], keep4)
    dw4, db4, pw4, ps4 = sep_mats(p['sep4'], keep4)
    dw5, db5, pw5, ps5 = sep_mats(p['sep5'], keep2)
    dw6, db6, pw6, ps6 = sep_mats(p['sep6'], keep2)
    dw7, db7, pw7, ps7 = sep_mats(p['sep7'], keep1)
    rw1, rb1 = res_mats(p['res1'])
    rw2, rb2 = res_mats(p['res2'])
    rw3, rb3 = res_mats(p['res3'])
    fw = p['fc']['w'].T                                  # (256, num_classes)
    fb = p['fc']['b'].reshape(1, -1)
    nc = fw.shape[1]

    # ---- flat (name, array) inputs ------------------------------------------
    items = [
        ('p1', patches), ('w1', W1m), ('sh1', sh1),
        ('S8', S8), ('w2', W2m), ('sh2', sh2),
        ('dw1', dw1), ('db1', db1), ('pw1', pw1), ('ps1', ps1),
        ('dw2', dw2), ('db2', db2), ('pw2', pw2), ('ps2', ps2),
        ('MP8', MP8), ('D8', D8), ('rw1', rw1), ('rb1', rb1),
        ('S4', S4),
        ('dw3', dw3), ('db3', db3), ('pw3', pw3), ('ps3', ps3),
        ('dw4', dw4), ('db4', db4), ('pw4', pw4), ('ps4', ps4),
        ('MP4', MP4), ('D4', D4), ('rw2', rw2), ('rb2', rb2),
        ('S2', S2),
        ('dw5', dw5), ('db5', db5), ('pw5', pw5), ('ps5', ps5),
        ('dw6', dw6), ('db6', db6), ('pw6', pw6), ('ps6', ps6),
        ('MP2', MP2), ('D2', D2), ('rw3', rw3), ('rb3', rb3),
        ('dw7', dw7), ('db7', db7), ('pw7', pw7), ('ps7', ps7),
        ('fw', fw), ('fb', fb),
    ]
    if not sep7_1x1:
        items.append(('S1', S1))
    if not gap_identity:
        items.append(('A', _avg_sel(N, H4 * W4)))

    # 0/1 selection matrices travel as bf16 (exact) to halve their DMA bytes;
    # everything carrying real weights / data stays f32.
    sel_names = {'S8', 'S4', 'S2', 'S1', 'MP8', 'MP4', 'MP2', 'D8', 'D4', 'D2'}
    names = [n for n, _ in items]
    arrays = [jnp.asarray(a, SEL_DTYPE if n in sel_names else jnp.float32)
              for n, a in items]

    # ---- the single fused kernel --------------------------------------------
    def kernel(*refs):
        o_ref = refs[-1]
        r = dict(zip(names, refs[:-1]))

        def dot(a, b):
            return jnp.dot(a, b, preferred_element_type=jnp.float32)

        def relu(v):
            return jnp.maximum(v, 0.0)

        def sel2d(name):                       # full 2-D selection matrix -> f32
            return r[name][...].astype(jnp.float32)

        def sel_tap(name, k):                  # tap k of a 3-D selection stack -> f32
            return r[name][k].astype(jnp.float32)

        def conv3x3(x, S, W, sh, nt):
            acc = r[sh][...]
            for k in range(nt):
                acc = acc + dot(dot(sel_tap(S, k), x), r[W][k])
            return acc

        def dwconv(x, S, w, b, nt):
            acc = r[b][...]
            for k in range(nt):
                acc = acc + dot(sel_tap(S, k), x) * r[w][k]
            return acc

        def sep(x, S, w, b, pw, ps, nt, relu_out):
            y = dot(dwconv(x, S, w, b, nt), r[pw][...]) + r[ps][...]
            return relu(y) if relu_out else y

        def maxpool(x, S):
            m = dot(sel_tap(S, 0), x)
            for k in range(1, 9):
                m = jnp.maximum(m, dot(sel_tap(S, k), x))
            return m

        def residual(prev, D, w, b):
            return dot(dot(sel2d(D), prev), r[w][...]) + r[b][...]

        # conv1 + BN + ReLU (im2col precomputed on the input)
        x = relu(dot(r['p1'][...], r['w1'][...]) + r['sh1'][...])       # (M8, 32)
        # conv2 + BN + ReLU
        x = relu(conv3x3(x, 'S8', 'w2', 'sh2', nt8))                    # (M8, 64)
        prev = x

        # ----- block 1 -----
        x = sep(x, 'S8', 'dw1', 'db1', 'pw1', 'ps1', nt8, True)         # (M8, 32)
        x = sep(x, 'S8', 'dw2', 'db2', 'pw2', 'ps2', nt8, False)        # (M8, 32)
        x = maxpool(x, 'MP8') + residual(prev, 'D8', 'rw1', 'rb1')      # (M4, 32)
        prev = x
        x = relu(x)

        # ----- block 2 -----
        x = sep(x, 'S4', 'dw3', 'db3', 'pw3', 'ps3', nt4, True)         # (M4, 64)
        x = sep(x, 'S4', 'dw4', 'db4', 'pw4', 'ps4', nt4, False)        # (M4, 64)
        x = maxpool(x, 'MP4') + residual(prev, 'D4', 'rw2', 'rb2')      # (M2, 64)
        prev = x
        x = relu(x)

        # ----- block 3 -----
        x = sep(x, 'S2', 'dw5', 'db5', 'pw5', 'ps5', nt2, True)         # (M2, 128)
        x = sep(x, 'S2', 'dw6', 'db6', 'pw6', 'ps6', nt2, False)        # (M2, 128)
        x = maxpool(x, 'MP2') + residual(prev, 'D2', 'rw3', 'rb3')      # (M1, 128)

        # ----- sep7 + ReLU (no ReLU on its input, per the PyTorch graph) -----
        if sep7_1x1:
            d = x * r['dw7'][0] + r['db7'][...]
            x = relu(dot(d, r['pw7'][...]) + r['ps7'][...])             # (M1, 256)
        else:
            x = sep(x, 'S1', 'dw7', 'db7', 'pw7', 'ps7', nt1, True)

        # ----- global avg pool + (Dropout = identity) + FC + softmax -----
        pooled = x if gap_identity else dot(sel2d('A'), x)              # (N, 256)
        logits = dot(pooled, r['fw'][...]) + r['fb'][...]
        z = logits - jnp.max(logits, axis=1, keepdims=True)
        e = jnp.exp(z)
        o_ref[...] = e / jnp.sum(e, axis=1, keepdims=True)

    return pl.pallas_call(
        kernel,
        out_shape=jax.ShapeDtypeStruct((N, nc), jnp.float32),
        in_specs=[pl.BlockSpec(memory_space=pltpu.MemorySpace.VMEM) for _ in arrays],
        out_specs=pl.BlockSpec(memory_space=pltpu.MemorySpace.VMEM),
    )(*arrays)


# ----------------------------------------------------------------------------
# Deterministic parameter init (shapes per LPC_V1.__init__)
# ----------------------------------------------------------------------------
def init_params(key, num_classes):
    keys = iter(jax.random.split(key, 200))

    def nrm(shape, scale=0.1):
        return scale * jax.random.normal(next(keys), shape, dtype=jnp.float32)

    def conv(cout, cin, k):
        return {'w': nrm((cout, cin, k, k)), 'b': nrm((cout,))}

    def bn(c):
        return {'gamma': 1.0 + nrm((c,)),
                'beta': nrm((c,)),
                'mean': nrm((c,)),
                'var': 1.0 + 0.1 * jnp.abs(jax.random.normal(next(keys), (c,), jnp.float32))}

    def sep(cin, cout):
        return {'dw': conv(cin, 1, 3), 'pw': conv(cout, cin, 1), 'bn': bn(cout)}

    return {
        'conv1': {'conv': conv(32, 3, 3), 'bn': bn(32)},
        'conv2': {'conv': conv(64, 32, 3), 'bn': bn(64)},
        'sep1': sep(64, 32), 'sep2': sep(32, 32), 'res1': conv(32, 64, 1),
        'sep3': sep(32, 64), 'sep4': sep(64, 64), 'res2': conv(64, 32, 1),
        'sep5': sep(64, 128), 'sep6': sep(128, 128), 'res3': conv(128, 64, 1),
        'sep7': sep(128, 256),
        'fc': {'w': nrm((num_classes, 256)), 'b': nrm((num_classes,))},
    }


# ----------------------------------------------------------------------------
# Pure-JAX reference (for correctness check only)
# ----------------------------------------------------------------------------
def ref_forward(params, x_nchw):
    x = jnp.transpose(x_nchw, (0, 2, 3, 1)).astype(jnp.float32)

    def conv(x, w, b, stride=1, pad=1, groups=1):
        rhs = jnp.transpose(w, (2, 3, 1, 0))
        y = jax.lax.conv_general_dilated(
            x, rhs, window_strides=(stride, stride),
            padding=((pad, pad), (pad, pad)),
            dimension_numbers=('NHWC', 'HWIO', 'NHWC'),
            feature_group_count=groups,
            precision=jax.lax.Precision.HIGHEST)
        return y + b.reshape(1, 1, 1, -1)

    def bn(x, q):
        s = q['gamma'] / jnp.sqrt(q['var'] + BN_EPS)
        return x * s + (q['beta'] - q['mean'] * s)

    def sep(x, q):
        c = x.shape[-1]
        y = conv(x, q['dw']['w'], q['dw']['b'], groups=c)
        y = conv(y, q['pw']['w'], q['pw']['b'], pad=0)
        return bn(y, q['bn'])

    def maxpool(x):
        return jax.lax.reduce_window(
            x, -jnp.inf, jax.lax.max, (1, 3, 3, 1), (1, 2, 2, 1),
            ((0, 0), (1, 1), (1, 1), (0, 0)))

    relu = lambda v: jnp.maximum(v, 0.0)
    p = params
    x = relu(bn(conv(x, p['conv1']['conv']['w'], p['conv1']['conv']['b'], stride=2), p['conv1']['bn']))
    x = relu(bn(conv(x, p['conv2']['conv']['w'], p['conv2']['conv']['b']), p['conv2']['bn']))
    prev = x
    x = relu(sep(x, p['sep1'])); x = sep(x, p['sep2'])
    x = maxpool(x) + conv(prev, p['res1']['w'], p['res1']['b'], stride=2, pad=0)
    prev = x; x = relu(x)
    x = relu(sep(x, p['sep3'])); x = sep(x, p['sep4'])
    x = maxpool(x) + conv(prev, p['res2']['w'], p['res2']['b'], stride=2, pad=0)
    prev = x; x = relu(x)
    x = relu(sep(x, p['sep5'])); x = sep(x, p['sep6'])
    x = maxpool(x) + conv(prev, p['res3']['w'], p['res3']['b'], stride=2, pad=0)
    x = relu(sep(x, p['sep7']))
    x = jnp.mean(x, axis=(1, 2))
    logits = x @ p['fc']['w'].T + p['fc']['b']
    z = logits - jnp.max(logits, axis=1, keepdims=True)
    e = jnp.exp(z)
    return e / jnp.sum(e, axis=1, keepdims=True)


if __name__ == "__main__":
    num_classes = 10
    key = jax.random.PRNGKey(0)
    pkey, xkey = jax.random.split(key)
    params = init_params(pkey, num_classes)
    x = jax.random.normal(xkey, (2, 3, 16, 16), dtype=jnp.float32)

    fwd = jax.jit(lambda xx: lpc_v1_forward(params, xx))
    out = jax.block_until_ready(fwd(x))
    assert out.shape == (2, num_classes)

    ref = ref_forward(params, x)
    np.testing.assert_allclose(np.asarray(out), np.asarray(ref), atol=2e-3, rtol=2e-2)
    print("KERNEL_OK")
</pallas_src>

<mosaic_0001>
module attributes {stable_mosaic.version = 11 : i64} {
  func.func @kernel(%arg0: memref<128x32xf32, #tpu.memory_space<vmem>>, %arg1: memref<32x32xf32, #tpu.memory_space<vmem>>, %arg2: memref<1x32xf32, #tpu.memory_space<vmem>>, %arg3: memref<9x128x128xbf16, #tpu.memory_space<vmem>>, %arg4: memref<9x32x64xf32, #tpu.memory_space<vmem>>, %arg5: memref<1x64xf32, #tpu.memory_space<vmem>>, %arg6: memref<9x1x64xf32, #tpu.memory_space<vmem>>, %arg7: memref<1x64xf32, #tpu.memory_space<vmem>>, %arg8: memref<64x32xf32, #tpu.memory_space<vmem>>, %arg9: memref<1x32xf32, #tpu.memory_space<vmem>>, %arg10: memref<9x1x32xf32, #tpu.memory_space<vmem>>, %arg11: memref<1x32xf32, #tpu.memory_space<vmem>>, %arg12: memref<32x32xf32, #tpu.memory_space<vmem>>, %arg13: memref<1x32xf32, #tpu.memory_space<vmem>>, %arg14: memref<9x32x128xbf16, #tpu.memory_space<vmem>>, %arg15: memref<32x128xbf16, #tpu.memory_space<vmem>>, %arg16: memref<64x32xf32, #tpu.memory_space<vmem>>, %arg17: memref<1x32xf32, #tpu.memory_space<vmem>>, %arg18: memref<9x32x32xbf16, #tpu.memory_space<vmem>>, %arg19: memref<9x1x32xf32, #tpu.memory_space<vmem>>, %arg20: memref<1x32xf32, #tpu.memory_space<vmem>>, %arg21: memref<32x64xf32, #tpu.memory_space<vmem>>, %arg22: memref<1x64xf32, #tpu.memory_space<vmem>>, %arg23: memref<9x1x64xf32, #tpu.memory_space<vmem>>, %arg24: memref<1x64xf32, #tpu.memory_space<vmem>>, %arg25: memref<64x64xf32, #tpu.memory_space<vmem>>, %arg26: memref<1x64xf32, #tpu.memory_space<vmem>>, %arg27: memref<9x8x32xbf16, #tpu.memory_space<vmem>>, %arg28: memref<8x32xbf16, #tpu.memory_space<vmem>>, %arg29: memref<32x64xf32, #tpu.memory_space<vmem>>, %arg30: memref<1x64xf32, #tpu.memory_space<vmem>>, %arg31: memref<9x8x8xbf16, #tpu.memory_space<vmem>>, %arg32: memref<9x1x64xf32, #tpu.memory_space<vmem>>, %arg33: memref<1x64xf32, #tpu.memory_space<vmem>>, %arg34: memref<64x128xf32, #tpu.memory_space<vmem>>, %arg35: memref<1x128xf32, #tpu.memory_space<vmem>>, %arg36: memref<9x1x128xf32, #tpu.memory_space<vmem>>, %arg37: memref<1x128xf32, #tpu.memory_space<vmem>>, %arg38: memref<128x128xf32, #tpu.memory_space<vmem>>, %arg39: memref<1x128xf32, #tpu.memory_space<vmem>>, %arg40: memref<9x2x8xbf16, #tpu.memory_space<vmem>>, %arg41: memref<2x8xbf16, #tpu.memory_space<vmem>>, %arg42: memref<64x128xf32, #tpu.memory_space<vmem>>, %arg43: memref<1x128xf32, #tpu.memory_space<vmem>>, %arg44: memref<1x1x128xf32, #tpu.memory_space<vmem>>, %arg45: memref<1x128xf32, #tpu.memory_space<vmem>>, %arg46: memref<128x256xf32, #tpu.memory_space<vmem>>, %arg47: memref<1x256xf32, #tpu.memory_space<vmem>>, %arg48: memref<256x10xf32, #tpu.memory_space<vmem>>, %arg49: memref<1x10xf32, #tpu.memory_space<vmem>>, %arg50: memref<2x10xf32, #tpu.memory_space<vmem>>) attributes {dimension_semantics = [], scalar_prefetch = 0 : i64, scratch_operands = 0 : i64, tpu.core_type = #tpu.core_type<tc>} {
    %c0 = arith.constant 0 : index
    %c0_0 = arith.constant 0 : index
    %0 = vector.load %arg0[%c0, %c0_0] : memref<128x32xf32, #tpu.memory_space<vmem>>, vector<128x32xf32>
    %c0_1 = arith.constant 0 : index
    %c0_2 = arith.constant 0 : index
    %1 = vector.load %arg1[%c0_1, %c0_2] : memref<32x32xf32, #tpu.memory_space<vmem>>, vector<32x32xf32>
    %cst = arith.constant dense<0.000000e+00> : vector<128x32xf32>
    %2 = tpu.matmul %0, %1, %cst {dimension_numbers = #tpu.dot_dimension_numbers<[1], [0], [0], [1], [0, 0, 1, 1], [], []>} : vector<128x32xf32>, vector<32x32xf32>, vector<128x32xf32> -> vector<128x32xf32>
    %c0_3 = arith.constant 0 : index
    %c0_4 = arith.constant 0 : index
    %3 = vector.load %arg2[%c0_3, %c0_4] : memref<1x32xf32, #tpu.memory_space<vmem>>, vector<1x32xf32>
    %4 = vector.broadcast %3 : vector<1x32xf32> to vector<128x32xf32>
    %5 = arith.addf %2, %4 : vector<128x32xf32>
    %cst_5 = arith.constant 0.000000e+00 : f32
    %6 = vector.broadcast %cst_5 : f32 to vector<128x32xf32>
    %7 = arith.maximumf %5, %6 : vector<128x32xf32>
    %c0_6 = arith.constant 0 : index
    %c0_7 = arith.constant 0 : index
    %8 = vector.load %arg5[%c0_6, %c0_7] : memref<1x64xf32, #tpu.memory_space<vmem>>, vector<1x64xf32>
    %c0_8 = arith.constant 0 : index
    %c0_9 = arith.constant 0 : index
    %c0_10 = arith.constant 0 : index
    %9 = vector.load %arg3[%c0_8, %c0_9, %c0_10] : memref<9x128x128xbf16, #tpu.memory_space<vmem>>, vector<1x128x128xbf16>
    %10 = vector.shape_cast %9 : vector<1x128x128xbf16> to vector<128x128xbf16>
    %11 = arith.extf %10 : vector<128x128xbf16> to vector<128x128xf32>
    %cst_11 = arith.constant dense<0.000000e+00> : vector<128x32xf32>
    %12 = tpu.matmul %11, %7, %cst_11 {dimension_numbers = #tpu.dot_dimension_numbers<[1], [0], [0], [1], [0, 0, 1, 1], [], []>} : vector<128x128xf32>, vector<128x32xf32>, vector<128x32xf32> -> vector<128x32xf32>
    %c0_12 = arith.constant 0 : index
    %c0_13 = arith.constant 0 : index
    %c0_14 = arith.constant 0 : index
    %13 = vector.load %arg4[%c0_12, %c0_13, %c0_14] : memref<9x32x64xf32, #tpu.memory_space<vmem>>, vector<1x32x64xf32>
    %14 = vector.shape_cast %13 : vector<1x32x64xf32> to vector<32x64xf32>
    %cst_15 = arith.constant dense<0.000000e+00> : vector<128x64xf32>
    %15 = tpu.matmul %12, %14, %cst_15 {dimension_numbers = #tpu.dot_dimension_numbers<[1], [0], [0], [1], [0, 0, 1, 1], [], []>} : vector<128x32xf32>, vector<32x64xf32>, vector<128x64xf32> -> vector<128x64xf32>
    %16 = vector.broadcast %8 : vector<1x64xf32> to vector<128x64xf32>
    %17 = arith.addf %16, %15 : vector<128x64xf32>
    %c1 = arith.constant 1 : index
    %c0_16 = arith.constant 0 : index
    %c0_17 = arith.constant 0 : index
    %18 = vector.load %arg3[%c1, %c0_16, %c0_17] : memref<9x128x128xbf16, #tpu.memory_space<vmem>>, vector<1x128x128xbf16>
    %19 = vector.shape_cast %18 : vector<1x128x128xbf16> to vector<128x128xbf16>
    %20 = arith.extf %19 : vector<128x128xbf16> to vector<128x128xf32>
    %cst_18 = arith.constant dense<0.000000e+00> : vector<128x32xf32>
    %21 = tpu.matmul %20, %7, %cst_18 {dimension_numbers = #tpu.dot_dimension_numbers<[1], [0], [0], [1], [0, 0, 1, 1], [], []>} : vector<128x128xf32>, vector<128x32xf32>, vector<128x32xf32> -> vector<128x32xf32>
    %c1_19 = arith.constant 1 : index
    %c0_20 = arith.constant 0 : index
    %c0_21 = arith.constant 0 : index
    %22 = vector.load %arg4[%c1_19, %c0_20, %c0_21] : memref<9x32x64xf32, #tpu.memory_space<vmem>>, vector<1x32x64xf32>
    %23 = vector.shape_cast %22 : vector<1x32x64xf32> to vector<32x64xf32>
    %cst_22 = arith.constant dense<0.000000e+00> : vector<128x64xf32>
    %24 = tpu.matmul %21, %23, %cst_22 {dimension_numbers = #tpu.dot_dimension_numbers<[1], [0], [0], [1], [0, 0, 1, 1], [], []>} : vector<128x32xf32>, vector<32x64xf32>, vector<128x64xf32> -> vector<128x64xf32>
    %25 = arith.addf %17, %24 : vector<128x64xf32>
    %c2 = arith.constant 2 : index
    %c0_23 = arith.constant 0 : index
    %c0_24 = arith.constant 0 : index
    %26 = vector.load %arg3[%c2, %c0_23, %c0_24] : memref<9x128x128xbf16, #tpu.memory_space<vmem>>, vector<1x128x128xbf16>
    %27 = vector.shape_cast %26 : vector<1x128x128xbf16> to vector<128x128xbf16>
    %28 = arith.extf %27 : vector<128x128xbf16> to vector<128x128xf32>
    %cst_25 = arith.constant dense<0.000000e+00> : vector<128x32xf32>
    %29 = tpu.matmul %28, %7, %cst_25 {dimension_numbers = #tpu.dot_dimension_numbers<[1], [0], [0], [1], [0, 0, 1, 1], [], []>} : vector<128x128xf32>, vector<128x32xf32>, vector<128x32xf32> -> vector<128x32xf32>
    %c2_26 = arith.constant 2 : index
    %c0_27 = arith.constant 0 : index
    %c0_28 = arith.constant 0 : index
    %30 = vector.load %arg4[%c2_26, %c0_27, %c0_28] : memref<9x32x64xf32, #tpu.memory_space<vmem>>, vector<1x32x64xf32>
    %31 = vector.shape_cast %30 : vector<1x32x64xf32> to vector<32x64xf32>
    %cst_29 = arith.constant dense<0.000000e+00> : vector<128x64xf32>
    %32 = tpu.matmul %29, %31, %cst_29 {dimension_numbers = #tpu.dot_dimension_numbers<[1], [0], [0], [1], [0, 0, 1, 1], [], []>} : vector<128x32xf32>, vector<32x64xf32>, vector<128x64xf32> -> vector<128x64xf32>
    %33 = arith.addf %25, %32 : vector<128x64xf32>
    %c3 = arith.constant 3 : index
    %c0_30 = arith.constant 0 : index
    %c0_31 = arith.constant 0 : index
    %34 = vector.load %arg3[%c3, %c0_30, %c0_31] : memref<9x128x128xbf16, #tpu.memory_space<vmem>>, vector<1x128x128xbf16>
    %35 = vector.shape_cast %34 : vector<1x128x128xbf16> to vector<128x128xbf16>
    %36 = arith.extf %35 : vector<128x128xbf16> to vector<128x128xf32>
    %cst_32 = arith.constant dense<0.000000e+00> : vector<128x32xf32>
    %37 = tpu.matmul %36, %7, %cst_32 {dimension_numbers = #tpu.dot_dimension_numbers<[1], [0], [0], [1], [0, 0, 1, 1], [], []>} : vector<128x128xf32>, vector<128x32xf32>, vector<128x32xf32> -> vector<128x32xf32>
    %c3_33 = arith.constant 3 : index
    %c0_34 = arith.constant 0 : index
    %c0_35 = arith.constant 0 : index
    %38 = vector.load %arg4[%c3_33, %c0_34, %c0_35] : memref<9x32x64xf32, #tpu.memory_space<vmem>>, vector<1x32x64xf32>
    %39 = vector.shape_cast %38 : vector<1x32x64xf32> to vector<32x64xf32>
    %cst_36 = arith.constant dense<0.000000e+00> : vector<128x64xf32>
    %40 = tpu.matmul %37, %39, %cst_36 {dimension_numbers = #tpu.dot_dimension_numbers<[1], [0], [0], [1], [0, 0, 1, 1], [], []>} : vector<128x32xf32>, vector<32x64xf32>, vector<128x64xf32> -> vector<128x64xf32>
    %41 = arith.addf %33, %40 : vector<128x64xf32>
    %c4 = arith.constant 4 : index
    %c0_37 = arith.constant 0 : index
    %c0_38 = arith.constant 0 : index
    %42 = vector.load %arg3[%c4, %c0_37, %c0_38] : memref<9x128x128xbf16, #tpu.memory_space<vmem>>, vector<1x128x128xbf16>
    %43 = vector.shape_cast %42 : vector<1x128x128xbf16> to vector<128x128xbf16>
    %44 = arith.extf %43 : vector<128x128xbf16> to vector<128x128xf32>
    %cst_39 = arith.constant dense<0.000000e+00> : vector<128x32xf32>
    %45 = tpu.matmul %44, %7, %cst_39 {dimension_numbers = #tpu.dot_dimension_numbers<[1], [0], [0], [1], [0, 0, 1, 1], [], []>} : vector<128x128xf32>, vector<128x32xf32>, vector<128x32xf32> -> vector<128x32xf32>
    %c4_40 = arith.constant 4 : index
    %c0_41 = arith.constant 0 : index
    %c0_42 = arith.constant 0 : index
    %46 = vector.load %arg4[%c4_40, %c0_41, %c0_42] : memref<9x32x64xf32, #tpu.memory_space<vmem>>, vector<1x32x64xf32>
    %47 = vector.shape_cast %46 : vector<1x32x64xf32> to vector<32x64xf32>
    %cst_43 = arith.constant dense<0.000000e+00> : vector<128x64xf32>
    %48 = tpu.matmul %45, %47, %cst_43 {dimension_numbers = #tpu.dot_dimension_numbers<[1], [0], [0], [1], [0, 0, 1, 1], [], []>} : vector<128x32xf32>, vector<32x64xf32>, vector<128x64xf32> -> vector<128x64xf32>
    %49 = arith.addf %41, %48 : vector<128x64xf32>
    %c5 = arith.constant 5 : index
    %c0_44 = arith.constant 0 : index
    %c0_45 = arith.constant 0 : index
    %50 = vector.load %arg3[%c5, %c0_44, %c0_45] : memref<9x128x128xbf16, #tpu.memory_space<vmem>>, vector<1x128x128xbf16>
    %51 = vector.shape_cast %50 : vector<1x128x128xbf16> to vector<128x128xbf16>
    %52 = arith.extf %51 : vector<128x128xbf16> to vector<128x128xf32>
    %cst_46 = arith.constant dense<0.000000e+00> : vector<128x32xf32>
    %53 = tpu.matmul %52, %7, %cst_46 {dimension_numbers = #tpu.dot_dimension_numbers<[1], [0], [0], [1], [0, 0, 1, 1], [], []>} : vector<128x128xf32>, vector<128x32xf32>, vector<128x32xf32> -> vector<128x32xf32>
    %c5_47 = arith.constant 5 : index
    %c0_48 = arith.constant 0 : index
    %c0_49 = arith.constant 0 : index
    %54 = vector.load %arg4[%c5_47, %c0_48, %c0_49] : memref<9x32x64xf32, #tpu.memory_space<vmem>>, vector<1x32x64xf32>
    %55 = vector.shape_cast %54 : vector<1x32x64xf32> to vector<32x64xf32>
    %cst_50 = arith.constant dense<0.000000e+00> : vector<128x64xf32>
    %56 = tpu.matmul %53, %55, %cst_50 {dimension_numbers = #tpu.dot_dimension_numbers<[1], [0], [0], [1], [0, 0, 1, 1], [], []>} : vector<128x32xf32>, vector<32x64xf32>, vector<128x64xf32> -> vector<128x64xf32>
    %57 = arith.addf %49, %56 : vector<128x64xf32>
    %c6 = arith.constant 6 : index
    %c0_51 = arith.constant 0 : index
    %c0_52 = arith.constant 0 : index
    %58 = vector.load %arg3[%c6, %c0_51, %c0_52] : memref<9x128x128xbf16, #tpu.memory_space<vmem>>, vector<1x128x128xbf16>
    %59 = vector.shape_cast %58 : vector<1x128x128xbf16> to vector<128x128xbf16>
    %60 = arith.extf %59 : vector<128x128xbf16> to vector<128x128xf32>
    %cst_53 = arith.constant dense<0.000000e+00> : vector<128x32xf32>
    %61 = tpu.matmul %60, %7, %cst_53 {dimension_numbers = #tpu.dot_dimension_numbers<[1], [0], [0], [1], [0, 0, 1, 1], [], []>} : vector<128x128xf32>, vector<128x32xf32>, vector<128x32xf32> -> vector<128x32xf32>
    %c6_54 = arith.constant 6 : index
    %c0_55 = arith.constant 0 : index
    %c0_56 = arith.constant 0 : index
    %62 = vector.load %arg4[%c6_54, %c0_55, %c0_56] : memref<9x32x64xf32, #tpu.memory_space<vmem>>, vector<1x32x64xf32>
    %63 = vector.shape_cast %62 : vector<1x32x64xf32> to vector<32x64xf32>
    %cst_57 = arith.constant dense<0.000000e+00> : vector<128x64xf32>
    %64 = tpu.matmul %61, %63, %cst_57 {dimension_numbers = #tpu.dot_dimension_numbers<[1], [0], [0], [1], [0, 0, 1, 1], [], []>} : vector<128x32xf32>, vector<32x64xf32>, vector<128x64xf32> -> vector<128x64xf32>
    %65 = arith.addf %57, %64 : vector<128x64xf32>
    %c7 = arith.constant 7 : index
    %c0_58 = arith.constant 0 : index
    %c0_59 = arith.constant 0 : index
    %66 = vector.load %arg3[%c7, %c0_58, %c0_59] : memref<9x128x128xbf16, #tpu.memory_space<vmem>>, vector<1x128x128xbf16>
    %67 = vector.shape_cast %66 : vector<1x128x128xbf16> to vector<128x128xbf16>
    %68 = arith.extf %67 : vector<128x128xbf16> to vector<128x128xf32>
    %cst_60 = arith.constant dense<0.000000e+00> : vector<128x32xf32>
    %69 = tpu.matmul %68, %7, %cst_60 {dimension_numbers = #tpu.dot_dimension_numbers<[1], [0], [0], [1], [0, 0, 1, 1], [], []>} : vector<128x128xf32>, vector<128x32xf32>, vector<128x32xf32> -> vector<128x32xf32>
    %c7_61 = arith.constant 7 : index
    %c0_62 = arith.constant 0 : index
    %c0_63 = arith.constant 0 : index
    %70 = vector.load %arg4[%c7_61, %c0_62, %c0_63] : memref<9x32x64xf32, #tpu.memory_space<vmem>>, vector<1x32x64xf32>
    %71 = vector.shape_cast %70 : vector<1x32x64xf32> to vector<32x64xf32>
    %cst_64 = arith.constant dense<0.000000e+00> : vector<128x64xf32>
    %72 = tpu.matmul %69, %71, %cst_64 {dimension_numbers = #tpu.dot_dimension_numbers<[1], [0], [0], [1], [0, 0, 1, 1], [], []>} : vector<128x32xf32>, vector<32x64xf32>, vector<128x64xf32> -> vector<128x64xf32>
    %73 = arith.addf %65, %72 : vector<128x64xf32>
    %c8 = arith.constant 8 : index
    %c0_65 = arith.constant 0 : index
    %c0_66 = arith.constant 0 : index
    %74 = vector.load %arg3[%c8, %c0_65, %c0_66] : memref<9x128x128xbf16, #tpu.memory_space<vmem>>, vector<1x128x128xbf16>
    %75 = vector.shape_cast %74 : vector<1x128x128xbf16> to vector<128x128xbf16>
    %76 = arith.extf %75 : vector<128x128xbf16> to vector<128x128xf32>
    %cst_67 = arith.constant dense<0.000000e+00> : vector<128x32xf32>
    %77 = tpu.matmul %76, %7, %cst_67 {dimension_numbers = #tpu.dot_dimension_numbers<[1], [0], [0], [1], [0, 0, 1, 1], [], []>} : vector<128x128xf32>, vector<128x32xf32>, vector<128x32xf32> -> vector<128x32xf32>
    %c8_68 = arith.constant 8 : index
    %c0_69 = arith.constant 0 : index
    %c0_70 = arith.constant 0 : index
    %78 = vector.load %arg4[%c8_68, %c0_69, %c0_70] : memref<9x32x64xf32, #tpu.memory_space<vmem>>, vector<1x32x64xf32>
    %79 = vector.shape_cast %78 : vector<1x32x64xf32> to vector<32x64xf32>
    %cst_71 = arith.constant dense<0.000000e+00> : vector<128x64xf32>
    %80 = tpu.matmul %77, %79, %cst_71 {dimension_numbers = #tpu.dot_dimension_numbers<[1], [0], [0], [1], [0, 0, 1, 1], [], []>} : vector<128x32xf32>, vector<32x64xf32>, vector<128x64xf32> -> vector<128x64xf32>
    %81 = arith.addf %73, %80 : vector<128x64xf32>
    %cst_72 = arith.constant 0.000000e+00 : f32
    %82 = vector.broadcast %cst_72 : f32 to vector<128x64xf32>
    %83 = arith.maximumf %81, %82 : vector<128x64xf32>
    %c0_73 = arith.constant 0 : index
    %c0_74 = arith.constant 0 : index
    %84 = vector.load %arg7[%c0_73, %c0_74] : memref<1x64xf32, #tpu.memory_space<vmem>>, vector<1x64xf32>
    %c0_75 = arith.constant 0 : index
    %c0_76 = arith.constant 0 : index
    %c0_77 = arith.constant 0 : index
    %85 = vector.load %arg3[%c0_75, %c0_76, %c0_77] : memref<9x128x128xbf16, #tpu.memory_space<vmem>>, vector<1x128x128xbf16>
    %86 = vector.shape_cast %85 : vector<1x128x128xbf16> to vector<128x128xbf16>
    %87 = arith.extf %86 : vector<128x128xbf16> to vector<128x128xf32>
    %cst_78 = arith.constant dense<0.000000e+00> : vector<128x64xf32>
    %88 = tpu.matmul %87, %83, %cst_78 {dimension_numbers = #tpu.dot_dimension_numbers<[1], [0], [0], [1], [0, 0, 1, 1], [], []>} : vector<128x128xf32>, vector<128x64xf32>, vector<128x64xf32> -> vector<128x64xf32>
    %c0_79 = arith.constant 0 : index
    %c0_80 = arith.constant 0 : index
    %c0_81 = arith.constant 0 : index
    %89 = vector.load %arg6[%c0_79, %c0_80, %c0_81] : memref<9x1x64xf32, #tpu.memory_space<vmem>>, vector<1x1x64xf32>
    %90 = vector.shape_cast %89 : vector<1x1x64xf32> to vector<1x64xf32>
    %91 = vector.broadcast %90 : vector<1x64xf32> to vector<128x64xf32>
    %92 = arith.mulf %88, %91 : vector<128x64xf32>
    %93 = vector.broadcast %84 : vector<1x64xf32> to vector<128x64xf32>
    %94 = arith.addf %93, %92 : vector<128x64xf32>
    %c1_82 = arith.constant 1 : index
    %c0_83 = arith.constant 0 : index
    %c0_84 = arith.constant 0 : index
    %95 = vector.load %arg3[%c1_82, %c0_83, %c0_84] : memref<9x128x128xbf16, #tpu.memory_space<vmem>>, vector<1x128x128xbf16>
    %96 = vector.shape_cast %95 : vector<1x128x128xbf16> to vector<128x128xbf16>
    %97 = arith.extf %96 : vector<128x128xbf16> to vector<128x128xf32>
    %cst_85 = arith.constant dense<0.000000e+00> : vector<128x64xf32>
    %98 = tpu.matmul %97, %83, %cst_85 {dimension_numbers = #tpu.dot_dimension_numbers<[1], [0], [0], [1], [0, 0, 1, 1], [], []>} : vector<128x128xf32>, vector<128x64xf32>, vector<128x64xf32> -> vector<128x64xf32>
    %c1_86 = arith.constant 1 : index
    %c0_87 = arith.constant 0 : index
    %c0_88 = arith.constant 0 : index
    %99 = vector.load %arg6[%c1_86, %c0_87, %c0_88] : memref<9x1x64xf32, #tpu.memory_space<vmem>>, vector<1x1x64xf32>
    %100 = vector.shape_cast %99 : vector<1x1x64xf32> to vector<1x64xf32>
    %101 = vector.broadcast %100 : vector<1x64xf32> to vector<128x64xf32>
    %102 = arith.mulf %98, %101 : vector<128x64xf32>
    %103 = arith.addf %94, %102 : vector<128x64xf32>
    %c2_89 = arith.constant 2 : index
    %c0_90 = arith.constant 0 : index
    %c0_91 = arith.constant 0 : index
    %104 = vector.load %arg3[%c2_89, %c0_90, %c0_91] : memref<9x128x128xbf16, #tpu.memory_space<vmem>>, vector<1x128x128xbf16>
    %105 = vector.shape_cast %104 : vector<1x128x128xbf16> to vector<128x128xbf16>
    %106 = arith.extf %105 : vector<128x128xbf16> to vector<128x128xf32>
    %cst_92 = arith.constant dense<0.000000e+00> : vector<128x64xf32>
    %107 = tpu.matmul %106, %83, %cst_92 {dimension_numbers = #tpu.dot_dimension_numbers<[1], [0], [0], [1], [0, 0, 1, 1], [], []>} : vector<128x128xf32>, vector<128x64xf32>, vector<128x64xf32> -> vector<128x64xf32>
    %c2_93 = arith.constant 2 : index
    %c0_94 = arith.constant 0 : index
    %c0_95 = arith.constant 0 : index
    %108 = vector.load %arg6[%c2_93, %c0_94, %c0_95] : memref<9x1x64xf32, #tpu.memory_space<vmem>>, vector<1x1x64xf32>
    %109 = vector.shape_cast %108 : vector<1x1x64xf32> to vector<1x64xf32>
    %110 = vector.broadcast %109 : vector<1x64xf32> to vector<128x64xf32>
    %111 = arith.mulf %107, %110 : vector<128x64xf32>
    %112 = arith.addf %103, %111 : vector<128x64xf32>
    %c3_96 = arith.constant 3 : index
    %c0_97 = arith.constant 0 : index
    %c0_98 = arith.constant 0 : index
    %113 = vector.load %arg3[%c3_96, %c0_97, %c0_98] : memref<9x128x128xbf16, #tpu.memory_space<vmem>>, vector<1x128x128xbf16>
    %114 = vector.shape_cast %113 : vector<1x128x128xbf16> to vector<128x128xbf16>
    %115 = arith.extf %114 : vector<128x128xbf16> to vector<128x128xf32>
    %cst_99 = arith.constant dense<0.000000e+00> : vector<128x64xf32>
    %116 = tpu.matmul %115, %83, %cst_99 {dimension_numbers = #tpu.dot_dimension_numbers<[1], [0], [0], [1], [0, 0, 1, 1], [], []>} : vector<128x128xf32>, vector<128x64xf32>, vector<128x64xf32> -> vector<128x64xf32>
    %c3_100 = arith.constant 3 : index
    %c0_101 = arith.constant 0 : index
    %c0_102 = arith.constant 0 : index
    %117 = vector.load %arg6[%c3_100, %c0_101, %c0_102] : memref<9x1x64xf32, #tpu.memory_space<vmem>>, vector<1x1x64xf32>
    %118 = vector.shape_cast %117 : vector<1x1x64xf32> to vector<1x64xf32>
    %119 = vector.broadcast %118 : vector<1x64xf32> to vector<128x64xf32>
    %120 = arith.mulf %116, %119 : vector<128x64xf32>
    %121 = arith.addf %112, %120 : vector<128x64xf32>
    %c4_103 = arith.constant 4 : index
    %c0_104 = arith.constant 0 : index
    %c0_105 = arith.constant 0 : index
    %122 = vector.load %arg3[%c4_103, %c0_104, %c0_105] : memref<9x128x128xbf16, #tpu.memory_space<vmem>>, vector<1x128x128xbf16>
    %123 = vector.shape_cast %122 : vector<1x128x128xbf16> to vector<128x128xbf16>
    %124 = arith.extf %123 : vector<128x128xbf16> to vector<128x128xf32>
    %cst_106 = arith.constant dense<0.000000e+00> : vector<128x64xf32>
    %125 = tpu.matmul %124, %83, %cst_106 {dimension_numbers = #tpu.dot_dimension_numbers<[1], [0], [0], [1], [0, 0, 1, 1], [], []>} : vector<128x128xf32>, vector<128x64xf32>, vector<128x64xf32> -> vector<128x64xf32>
    %c4_107 = arith.constant 4 : index
    %c0_108 = arith.constant 0 : index
    %c0_109 = arith.constant 0 : index
    %126 = vector.load %arg6[%c4_107, %c0_108, %c0_109] : memref<9x1x64xf32, #tpu.memory_space<vmem>>, vector<1x1x64xf32>
    %127 = vector.shape_cast %126 : vector<1x1x64xf32> to vector<1x64xf32>
    %128 = vector.broadcast %127 : vector<1x64xf32> to vector<128x64xf32>
    %129 = arith.mulf %125, %128 : vector<128x64xf32>
    %130 = arith.addf %121, %129 : vector<128x64xf32>
    %c5_110 = arith.constant 5 : index
    %c0_111 = arith.constant 0 : index
    %c0_112 = arith.constant 0 : index
    %131 = vector.load %arg3[%c5_110, %c0_111, %c0_112] : memref<9x128x128xbf16, #tpu.memory_space<vmem>>, vector<1x128x128xbf16>
    %132 = vector.shape_cast %131 : vector<1x128x128xbf16> to vector<128x128xbf16>
    %133 = arith.extf %132 : vector<128x128xbf16> to vector<128x128xf32>
    %cst_113 = arith.constant dense<0.000000e+00> : vector<128x64xf32>
    %134 = tpu.matmul %133, %83, %cst_113 {dimension_numbers = #tpu.dot_dimension_numbers<[1], [0], [0], [1], [0, 0, 1, 1], [], []>} : vector<128x128xf32>, vector<128x64xf32>, vector<128x64xf32> -> vector<128x64xf32>
    %c5_114 = arith.constant 5 : index
    %c0_115 = arith.constant 0 : index
    %c0_116 = arith.constant 0 : index
    %135 = vector.load %arg6[%c5_114, %c0_115, %c0_116] : memref<9x1x64xf32, #tpu.memory_space<vmem>>, vector<1x1x64xf32>
    %136 = vector.shape_cast %135 : vector<1x1x64xf32> to vector<1x64xf32>
    %137 = vector.broadcast %136 : vector<1x64xf32> to vector<128x64xf32>
    %138 = arith.mulf %134, %137 : vector<128x64xf32>
    %139 = arith.addf %130, %138 : vector<128x64xf32>
    %c6_117 = arith.constant 6 : index
    %c0_118 = arith.constant 0 : index
    %c0_119 = arith.constant 0 : index
    %140 = vector.load %arg3[%c6_117, %c0_118, %c0_119] : memref<9x128x128xbf16, #tpu.memory_space<vmem>>, vector<1x128x128xbf16>
    %141 = vector.shape_cast %140 : vector<1x128x128xbf16> to vector<128x128xbf16>
    %142 = arith.extf %141 : vector<128x128xbf16> to vector<128x128xf32>
    %cst_120 = arith.constant dense<0.000000e+00> : vector<128x64xf32>
    %143 = tpu.matmul %142, %83, %cst_120 {dimension_numbers = #tpu.dot_dimension_numbers<[1], [0], [0], [1], [0, 0, 1, 1], [], []>} : vector<128x128xf32>, vector<128x64xf32>, vector<128x64xf32> -> vector<128x64xf32>
    %c6_121 = arith.constant 6 : index
    %c0_122 = arith.constant 0 : index
    %c0_123 = arith.constant 0 : index
    %144 = vector.load %arg6[%c6_121, %c0_122, %c0_123] : memref<9x1x64xf32, #tpu.memory_space<vmem>>, vector<1x1x64xf32>
    %145 = vector.shape_cast %144 : vector<1x1x64xf32> to vector<1x64xf32>
    %146 = vector.broadcast %145 : vector<1x64xf32> to vector<128x64xf32>
    %147 = arith.mulf %143, %146 : vector<128x64xf32>
    %148 = arith.addf %139, %147 : vector<128x64xf32>
    %c7_124 = arith.constant 7 : index
    %c0_125 = arith.constant 0 : index
    %c0_126 = arith.constant 0 : index
    %149 = vector.load %arg3[%c7_124, %c0_125, %c0_126] : memref<9x128x128xbf16, #tpu.memory_space<vmem>>, vector<1x128x128xbf16>
    %150 = vector.shape_cast %149 : vector<1x128x128xbf16> to vector<128x128xbf16>
    %151 = arith.extf %150 : vector<128x128xbf16> to vector<128x128xf32>
    %cst_127 = arith.constant dense<0.000000e+00> : vector<128x64xf32>
    %152 = tpu.matmul %151, %83, %cst_127 {dimension_numbers = #tpu.dot_dimension_numbers<[1], [0], [0], [1], [0, 0, 1, 1], [], []>} : vector<128x128xf32>, vector<128x64xf32>, vector<128x64xf32> -> vector<128x64xf32>
    %c7_128 = arith.constant 7 : index
    %c0_129 = arith.constant 0 : index
    %c0_130 = arith.constant 0 : index
    %153 = vector.load %arg6[%c7_128, %c0_129, %c0_130] : memref<9x1x64xf32, #tpu.memory_space<vmem>>, vector<1x1x64xf32>
    %154 = vector.shape_cast %153 : vector<1x1x64xf32> to vector<1x64xf32>
    %155 = vector.broadcast %154 : vector<1x64xf32> to vector<128x64xf32>
    %156 = arith.mulf %152, %155 : vector<128x64xf32>
    %157 = arith.addf %148, %156 : vector<128x64xf32>
    %c8_131 = arith.constant 8 : index
    %c0_132 = arith.constant 0 : index
    %c0_133 = arith.constant 0 : index
    %158 = vector.load %arg3[%c8_131, %c0_132, %c0_133] : memref<9x128x128xbf16, #tpu.memory_space<vmem>>, vector<1x128x128xbf16>
    %159 = vector.shape_cast %158 : vector<1x128x128xbf16> to vector<128x128xbf16>
    %160 = arith.extf %159 : vector<128x128xbf16> to vector<128x128xf32>
    %cst_134 = arith.constant dense<0.000000e+00> : vector<128x64xf32>
    %161 = tpu.matmul %160, %83, %cst_134 {dimension_numbers = #tpu.dot_dimension_numbers<[1], [0], [0], [1], [0, 0, 1, 1], [], []>} : vector<128x128xf32>, vector<128x64xf32>, vector<128x64xf32> -> vector<128x64xf32>
    %c8_135 = arith.constant 8 : index
    %c0_136 = arith.constant 0 : index
    %c0_137 = arith.constant 0 : index
    %162 = vector.load %arg6[%c8_135, %c0_136, %c0_137] : memref<9x1x64xf32, #tpu.memory_space<vmem>>, vector<1x1x64xf32>
    %163 = vector.shape_cast %162 : vector<1x1x64xf32> to vector<1x64xf32>
    %164 = vector.broadcast %163 : vector<1x64xf32> to vector<128x64xf32>
    %165 = arith.mulf %161, %164 : vector<128x64xf32>
    %166 = arith.addf %157, %165 : vector<128x64xf32>
    %c0_138 = arith.constant 0 : index
    %c0_139 = arith.constant 0 : index
    %167 = vector.load %arg8[%c0_138, %c0_139] : memref<64x32xf32, #tpu.memory_space<vmem>>, vector<64x32xf32>
    %cst_140 = arith.constant dense<0.000000e+00> : vector<128x32xf32>
    %168 = tpu.matmul %166, %167, %cst_140 {dimension_numbers = #tpu.dot_dimension_numbers<[1], [0], [0], [1], [0, 0, 1, 1], [], []>} : vector<128x64xf32>, vector<64x32xf32>, vector<128x32xf32> -> vector<128x32xf32>
    %c0_141 = arith.constant 0 : index
    %c0_142 = arith.constant 0 : index
    %169 = vector.load %arg9[%c0_141, %c0_142] : memref<1x32xf32, #tpu.memory_space<vmem>>, vector<1x32xf32>
    %170 = vector.broadcast %169 : vector<1x32xf32> to vector<128x32xf32>
    %171 = arith.addf %168, %170 : vector<128x32xf32>
    %cst_143 = arith.constant 0.000000e+00 : f32
    %172 = vector.broadcast %cst_143 : f32 to vector<128x32xf32>
    %173 = arith.maximumf %171, %172 : vector<128x32xf32>
    %c0_144 = arith.constant 0 : index
    %c0_145 = arith.constant 0 : index
    %174 = vector.load %arg11[%c0_144, %c0_145] : memref<1x32xf32, #tpu.memory_space<vmem>>, vector<1x32xf32>
    %c0_146 = arith.constant 0 : index
    %c0_147 = arith.constant 0 : index
    %c0_148 = arith.constant 0 : index
    %175 = vector.load %arg3[%c0_146, %c0_147, %c0_148] : memref<9x128x128xbf16, #tpu.memory_space<vmem>>, vector<1x128x128xbf16>
    %176 = vector.shape_cast %175 : vector<1x128x128xbf16> to vector<128x128xbf16>
    %177 = arith.extf %176 : vector<128x128xbf16> to vector<128x128xf32>
    %cst_149 = arith.constant dense<0.000000e+00> : vector<128x32xf32>
    %178 = tpu.matmul %177, %173, %cst_149 {dimension_numbers = #tpu.dot_dimension_numbers<[1], [0], [0], [1], [0, 0, 1, 1], [], []>} : vector<128x128xf32>, vector<128x32xf32>, vector<128x32xf32> -> vector<128x32xf32>
    %c0_150 = arith.constant 0 : index
    %c0_151 = arith.constant 0 : index
    %c0_152 = arith.constant 0 : index
    %179 = vector.load %arg10[%c0_150, %c0_151, %c0_152] : memref<9x1x32xf32, #tpu.memory_space<vmem>>, vector<1x1x32xf32>
    %180 = vector.shape_cast %179 : vector<1x1x32xf32> to vector<1x32xf32>
    %181 = vector.broadcast %180 : vector<1x32xf32> to vector<128x32xf32>
    %182 = arith.mulf %178, %181 : vector<128x32xf32>
    %183 = vector.broadcast %174 : vector<1x32xf32> to vector<128x32xf32>
    %184 = arith.addf %183, %182 : vector<128x32xf32>
    %c1_153 = arith.constant 1 : index
    %c0_154 = arith.constant 0 : index
    %c0_155 = arith.constant 0 : index
    %185 = vector.load %arg3[%c1_153, %c0_154, %c0_155] : memref<9x128x128xbf16, #tpu.memory_space<vmem>>, vector<1x128x128xbf16>
    %186 = vector.shape_cast %185 : vector<1x128x128xbf16> to vector<128x128xbf16>
    %187 = arith.extf %186 : vector<128x128xbf16> to vector<128x128xf32>
    %cst_156 = arith.constant dense<0.000000e+00> : vector<128x32xf32>
    %188 = tpu.matmul %187, %173, %cst_156 {dimension_numbers = #tpu.dot_dimension_numbers<[1], [0], [0], [1], [0, 0, 1, 1], [], []>} : vector<128x128xf32>, vector<128x32xf32>, vector<128x32xf32> -> vector<128x32xf32>
    %c1_157 = arith.constant 1 : index
    %c0_158 = arith.constant 0 : index
    %c0_159 = arith.constant 0 : index
    %189 = vector.load %arg10[%c1_157, %c0_158, %c0_159] : memref<9x1x32xf32, #tpu.memory_space<vmem>>, vector<1x1x32xf32>
    %190 = vector.shape_cast %189 : vector<1x1x32xf32> to vector<1x32xf32>
    %191 = vector.broadcast %190 : vector<1x32xf32> to vector<128x32xf32>
    %192 = arith.mulf %188, %191 : vector<128x32xf32>
    %193 = arith.addf %184, %192 : vector<128x32xf32>
    %c2_160 = arith.constant 2 : index
    %c0_161 = arith.constant 0 : index
    %c0_162 = arith.constant 0 : index
    %194 = vector.load %arg3[%c2_160, %c0_161, %c0_162] : memref<9x128x128xbf16, #tpu.memory_space<vmem>>, vector<1x128x128xbf16>
    %195 = vector.shape_cast %194 : vector<1x128x128xbf16> to vector<128x128xbf16>
    %196 = arith.extf %195 : vector<128x128xbf16> to vector<128x128xf32>
    %cst_163 = arith.constant dense<0.000000e+00> : vector<128x32xf32>
    %197 = tpu.matmul %196, %173, %cst_163 {dimension_numbers = #tpu.dot_dimension_numbers<[1], [0], [0], [1], [0, 0, 1, 1], [], []>} : vector<128x128xf32>, vector<128x32xf32>, vector<128x32xf32> -> vector<128x32xf32>
    %c2_164 = arith.constant 2 : index
    %c0_165 = arith.constant 0 : index
    %c0_166 = arith.constant 0 : index
    %198 = vector.load %arg10[%c2_164, %c0_165, %c0_166] : memref<9x1x32xf32, #tpu.memory_space<vmem>>, vector<1x1x32xf32>
    %199 = vector.shape_cast %198 : vector<1x1x32xf32> to vector<1x32xf32>
    %200 = vector.broadcast %199 : vector<1x32xf32> to vector<128x32xf32>
    %201 = arith.mulf %197, %200 : vector<128x32xf32>
    %202 = arith.addf %193, %201 : vector<128x32xf32>
    %c3_167 = arith.constant 3 : index
    %c0_168 = arith.constant 0 : index
    %c0_169 = arith.constant 0 : index
    %203 = vector.load %arg3[%c3_167, %c0_168, %c0_169] : memref<9x128x128xbf16, #tpu.memory_space<vmem>>, vector<1x128x128xbf16>
    %204 = vector.shape_cast %203 : vector<1x128x128xbf16> to vector<128x128xbf16>
    %205 = arith.extf %204 : vector<128x128xbf16> to vector<128x128xf32>
    %cst_170 = arith.constant dense<0.000000e+00> : vector<128x32xf32>
    %206 = tpu.matmul %205, %173, %cst_170 {dimension_numbers = #tpu.dot_dimension_numbers<[1], [0], [0], [1], [0, 0, 1, 1], [], []>} : vector<128x128xf32>, vector<128x32xf32>, vector<128x32xf32> -> vector<128x32xf32>
    %c3_171 = arith.constant 3 : index
    %c0_172 = arith.constant 0 : index
    %c0_173 = arith.constant 0 : index
    %207 = vector.load %arg10[%c3_171, %c0_172, %c0_173] : memref<9x1x32xf32, #tpu.memory_space<vmem>>, vector<1x1x32xf32>
    %208 = vector.shape_cast %207 : vector<1x1x32xf32> to vector<1x32xf32>
    %209 = vector.broadcast %208 : vector<1x32xf32> to vector<128x32xf32>
    %210 = arith.mulf %206, %209 : vector<128x32xf32>
    %211 = arith.addf %202, %210 : vector<128x32xf32>
    %c4_174 = arith.constant 4 : index
    %c0_175 = arith.constant 0 : index
    %c0_176 = arith.constant 0 : index
    %212 = vector.load %arg3[%c4_174, %c0_175, %c0_176] : memref<9x128x128xbf16, #tpu.memory_space<vmem>>, vector<1x128x128xbf16>
    %213 = vector.shape_cast %212 : vector<1x128x128xbf16> to vector<128x128xbf16>
    %214 = arith.extf %213 : vector<128x128xbf16> to vector<128x128xf32>
    %cst_177 = arith.constant dense<0.000000e+00> : vector<128x32xf32>
    %215 = tpu.matmul %214, %173, %cst_177 {dimension_numbers = #tpu.dot_dimension_numbers<[1], [0], [0], [1], [0, 0, 1, 1], [], []>} : vector<128x128xf32>, vector<128x32xf32>, vector<128x32xf32> -> vector<128x32xf32>
    %c4_178 = arith.constant 4 : index
    %c0_179 = arith.constant 0 : index
    %c0_180 = arith.constant 0 : index
    %216 = vector.load %arg10[%c4_178, %c0_179, %c0_180] : memref<9x1x32xf32, #tpu.memory_space<vmem>>, vector<1x1x32xf32>
    %217 = vector.shape_cast %216 : vector<1x1x32xf32> to vector<1x32xf32>
    %218 = vector.broadcast %217 : vector<1x32xf32> to vector<128x32xf32>
    %219 = arith.mulf %215, %218 : vector<128x32xf32>
    %220 = arith.addf %211, %219 : vector<128x32xf32>
    %c5_181 = arith.constant 5 : index
    %c0_182 = arith.constant 0 : index
    %c0_183 = arith.constant 0 : index
    %221 = vector.load %arg3[%c5_181, %c0_182, %c0_183] : memref<9x128x128xbf16, #tpu.memory_space<vmem>>, vector<1x128x128xbf16>
    %222 = vector.shape_cast %221 : vector<1x128x128xbf16> to vector<128x128xbf16>
    %223 = arith.extf %222 : vector<128x128xbf16> to vector<128x128xf32>
    %cst_184 = arith.constant dense<0.000000e+00> : vector<128x32xf32>
    %224 = tpu.matmul %223, %173, %cst_184 {dimension_numbers = #tpu.dot_dimension_numbers<[1], [0], [0], [1], [0, 0, 1, 1], [], []>} : vector<128x128xf32>, vector<128x32xf32>, vector<128x32xf32> -> vector<128x32xf32>
    %c5_185 = arith.constant 5 : index
    %c0_186 = arith.constant 0 : index
    %c0_187 = arith.constant 0 : index
    %225 = vector.load %arg10[%c5_185, %c0_186, %c0_187] : memref<9x1x32xf32, #tpu.memory_space<vmem>>, vector<1x1x32xf32>
    %226 = vector.shape_cast %225 : vector<1x1x32xf32> to vector<1x32xf32>
    %227 = vector.broadcast %226 : vector<1x32xf32> to vector<128x32xf32>
    %228 = arith.mulf %224, %227 : vector<128x32xf32>
    %229 = arith.addf %220, %228 : vector<128x32xf32>
    %c6_188 = arith.constant 6 : index
    %c0_189 = arith.constant 0 : index
    %c0_190 = arith.constant 0 : index
    %230 = vector.load %arg3[%c6_188, %c0_189, %c0_190] : memref<9x128x128xbf16, #tpu.memory_space<vmem>>, vector<1x128x128xbf16>
    %231 = vector.shape_cast %230 : vector<1x128x128xbf16> to vector<128x128xbf16>
    %232 = arith.extf %231 : vector<128x128xbf16> to vector<128x128xf32>
    %cst_191 = arith.constant dense<0.000000e+00> : vector<128x32xf32>
    %233 = tpu.matmul %232, %173, %cst_191 {dimension_numbers = #tpu.dot_dimension_numbers<[1], [0], [0], [1], [0, 0, 1, 1], [], []>} : vector<128x128xf32>, vector<128x32xf32>, vector<128x32xf32> -> vector<128x32xf32>
    %c6_192 = arith.constant 6 : index
    %c0_193 = arith.constant 0 : index
    %c0_194 = arith.constant 0 : index
    %234 = vector.load %arg10[%c6_192, %c0_193, %c0_194] : memref<9x1x32xf32, #tpu.memory_space<vmem>>, vector<1x1x32xf32>
    %235 = vector.shape_cast %234 : vector<1x1x32xf32> to vector<1x32xf32>
    %236 = vector.broadcast %235 : vector<1x32xf32> to vector<128x32xf32>
    %237 = arith.mulf %233, %236 : vector<128x32xf32>
    %238 = arith.addf %229, %237 : vector<128x32xf32>
    %c7_195 = arith.constant 7 : index
    %c0_196 = arith.constant 0 : index
    %c0_197 = arith.constant 0 : index
    %239 = vector.load %arg3[%c7_195, %c0_196, %c0_197] : memref<9x128x128xbf16, #tpu.memory_space<vmem>>, vector<1x128x128xbf16>
    %240 = vector.shape_cast %239 : vector<1x128x128xbf16> to vector<128x128xbf16>
    %241 = arith.extf %240 : vector<128x128xbf16> to vector<128x128xf32>
    %cst_198 = arith.constant dense<0.000000e+00> : vector<128x32xf32>
    %242 = tpu.matmul %241, %173, %cst_198 {dimension_numbers = #tpu.dot_dimension_numbers<[1], [0], [0], [1], [0, 0, 1, 1], [], []>} : vector<128x128xf32>, vector<128x32xf32>, vector<128x32xf32> -> vector<128x32xf32>
    %c7_199 = arith.constant 7 : index
    %c0_200 = arith.constant 0 : index
    %c0_201 = arith.constant 0 : index
    %243 = vector.load %arg10[%c7_199, %c0_200, %c0_201] : memref<9x1x32xf32, #tpu.memory_space<vmem>>, vector<1x1x32xf32>
    %244 = vector.shape_cast %243 : vector<1x1x32xf32> to vector<1x32xf32>
    %245 = vector.broadcast %244 : vector<1x32xf32> to vector<128x32xf32>
    %246 = arith.mulf %242, %245 : vector<128x32xf32>
    %247 = arith.addf %238, %246 : vector<128x32xf32>
    %c8_202 = arith.constant 8 : index
    %c0_203 = arith.constant 0 : index
    %c0_204 = arith.constant 0 : index
    %248 = vector.load %arg3[%c8_202, %c0_203, %c0_204] : memref<9x128x128xbf16, #tpu.memory_space<vmem>>, vector<1x128x128xbf16>
    %249 = vector.shape_cast %248 : vector<1x128x128xbf16> to vector<128x128xbf16>
    %250 = arith.extf %249 : vector<128x128xbf16> to vector<128x128xf32>
    %cst_205 = arith.constant dense<0.000000e+00> : vector<128x32xf32>
    %251 = tpu.matmul %250, %173, %cst_205 {dimension_numbers = #tpu.dot_dimension_numbers<[1], [0], [0], [1], [0, 0, 1, 1], [], []>} : vector<128x128xf32>, vector<128x32xf32>, vector<128x32xf32> -> vector<128x32xf32>
    %c8_206 = arith.constant 8 : index
    %c0_207 = arith.constant 0 : index
    %c0_208 = arith.constant 0 : index
    %252 = vector.load %arg10[%c8_206, %c0_207, %c0_208] : memref<9x1x32xf32, #tpu.memory_space<vmem>>, vector<1x1x32xf32>
    %253 = vector.shape_cast %252 : vector<1x1x32xf32> to vector<1x32xf32>
    %254 = vector.broadcast %253 : vector<1x32xf32> to vector<128x32xf32>
    %255 = arith.mulf %251, %254 : vector<128x32xf32>
    %256 = arith.addf %247, %255 : vector<128x32xf32>
    %c0_209 = arith.constant 0 : index
    %c0_210 = arith.constant 0 : index
    %257 = vector.load %arg12[%c0_209, %c0_210] : memref<32x32xf32, #tpu.memory_space<vmem>>, vector<32x32xf32>
    %cst_211 = arith.constant dense<0.000000e+00> : vector<128x32xf32>
    %258 = tpu.matmul %256, %257, %cst_211 {dimension_numbers = #tpu.dot_dimension_numbers<[1], [0], [0], [1], [0, 0, 1, 1], [], []>} : vector<128x32xf32>, vector<32x32xf32>, vector<128x32xf32> -> vector<128x32xf32>
    %c0_212 = arith.constant 0 : index
    %c0_213 = arith.constant 0 : index
    %259 = vector.load %arg13[%c0_212, %c0_213] : memref<1x32xf32, #tpu.memory_space<vmem>>, vector<1x32xf32>
    %260 = vector.broadcast %259 : vector<1x32xf32> to vector<128x32xf32>
    %261 = arith.addf %258, %260 : vector<128x32xf32>
    %c0_214 = arith.constant 0 : index
    %c0_215 = arith.constant 0 : index
    %c0_216 = arith.constant 0 : index
    %262 = vector.load %arg14[%c0_214, %c0_215, %c0_216] : memref<9x32x128xbf16, #tpu.memory_space<vmem>>, vector<1x32x128xbf16>
    %263 = vector.shape_cast %262 : vector<1x32x128xbf16> to vector<32x128xbf16>
    %264 = arith.extf %263 : vector<32x128xbf16> to vector<32x128xf32>
    %cst_217 = arith.constant dense<0.000000e+00> : vector<32x32xf32>
    %265 = tpu.matmul %264, %261, %cst_217 {dimension_numbers = #tpu.dot_dimension_numbers<[1], [0], [0], [1], [0, 0, 1, 1], [], []>} : vector<32x128xf32>, vector<128x32xf32>, vector<32x32xf32> -> vector<32x32xf32>
    %c1_218 = arith.constant 1 : index
    %c0_219 = arith.constant 0 : index
    %c0_220 = arith.constant 0 : index
    %266 = vector.load %arg14[%c1_218, %c0_219, %c0_220] : memref<9x32x128xbf16, #tpu.memory_space<vmem>>, vector<1x32x128xbf16>
    %267 = vector.shape_cast %266 : vector<1x32x128xbf16> to vector<32x128xbf16>
    %268 = arith.extf %267 : vector<32x128xbf16> to vector<32x128xf32>
    %cst_221 = arith.constant dense<0.000000e+00> : vector<32x32xf32>
    %269 = tpu.matmul %268, %261, %cst_221 {dimension_numbers = #tpu.dot_dimension_numbers<[1], [0], [0], [1], [0, 0, 1, 1], [], []>} : vector<32x128xf32>, vector<128x32xf32>, vector<32x32xf32> -> vector<32x32xf32>
    %270 = arith.maximumf %265, %269 : vector<32x32xf32>
    %c2_222 = arith.constant 2 : index
    %c0_223 = arith.constant 0 : index
    %c0_224 = arith.constant 0 : index
    %271 = vector.load %arg14[%c2_222, %c0_223, %c0_224] : memref<9x32x128xbf16, #tpu.memory_space<vmem>>, vector<1x32x128xbf16>
    %272 = vector.shape_cast %271 : vector<1x32x128xbf16> to vector<32x128xbf16>
    %273 = arith.extf %272 : vector<32x128xbf16> to vector<32x128xf32>
    %cst_225 = arith.constant dense<0.000000e+00> : vector<32x32xf32>
    %274 = tpu.matmul %273, %261, %cst_225 {dimension_numbers = #tpu.dot_dimension_numbers<[1], [0], [0], [1], [0, 0, 1, 1], [], []>} : vector<32x128xf32>, vector<128x32xf32>, vector<32x32xf32> -> vector<32x32xf32>
    %275 = arith.maximumf %270, %274 : vector<32x32xf32>
    %c3_226 = arith.constant 3 : index
    %c0_227 = arith.constant 0 : index
    %c0_228 = arith.constant 0 : index
    %276 = vector.load %arg14[%c3_226, %c0_227, %c0_228] : memref<9x32x128xbf16, #tpu.memory_space<vmem>>, vector<1x32x128xbf16>
    %277 = vector.shape_cast %276 : vector<1x32x128xbf16> to vector<32x128xbf16>
    %278 = arith.extf %277 : vector<32x128xbf16> to vector<32x128xf32>
    %cst_229 = arith.constant dense<0.000000e+00> : vector<32x32xf32>
    %279 = tpu.matmul %278, %261, %cst_229 {dimension_numbers = #tpu.dot_dimension_numbers<[1], [0], [0], [1], [0, 0, 1, 1], [], []>} : vector<32x128xf32>, vector<128x32xf32>, vector<32x32xf32> -> vector<32x32xf32>
    %280 = arith.maximumf %275, %279 : vector<32x32xf32>
    %c4_230 = arith.constant 4 : index
    %c0_231 = arith.constant 0 : index
    %c0_232 = arith.constant 0 : index
    %281 = vector.load %arg14[%c4_230, %c0_231, %c0_232] : memref<9x32x128xbf16, #tpu.memory_space<vmem>>, vector<1x32x128xbf16>
    %282 = vector.shape_cast %281 : vector<1x32x128xbf16> to vector<32x128xbf16>
    %283 = arith.extf %282 : vector<32x128xbf16> to vector<32x128xf32>
    %cst_233 = arith.constant dense<0.000000e+00> : vector<32x32xf32>
    %284 = tpu.matmul %283, %261, %cst_233 {dimension_numbers = #tpu.dot_dimension_numbers<[1], [0], [0], [1], [0, 0, 1, 1], [], []>} : vector<32x128xf32>, vector<128x32xf32>, vector<32x32xf32> -> vector<32x32xf32>
    %285 = arith.maximumf %280, %284 : vector<32x32xf32>
    %c5_234 = arith.constant 5 : index
    %c0_235 = arith.constant 0 : index
    %c0_236 = arith.constant 0 : index
    %286 = vector.load %arg14[%c5_234, %c0_235, %c0_236] : memref<9x32x128xbf16, #tpu.memory_space<vmem>>, vector<1x32x128xbf16>
    %287 = vector.shape_cast %286 : vector<1x32x128xbf16> to vector<32x128xbf16>
    %288 = arith.extf %287 : vector<32x128xbf16> to vector<32x128xf32>
    %cst_237 = arith.constant dense<0.000000e+00> : vector<32x32xf32>
    %289 = tpu.matmul %288, %261, %cst_237 {dimension_numbers = #tpu.dot_dimension_numbers<[1], [0], [0], [1], [0, 0, 1, 1], [], []>} : vector<32x128xf32>, vector<128x32xf32>, vector<32x32xf32> -> vector<32x32xf32>
    %290 = arith.maximumf %285, %289 : vector<32x32xf32>
    %c6_238 = arith.constant 6 : index
    %c0_239 = arith.constant 0 : index
    %c0_240 = arith.constant 0 : index
    %291 = vector.load %arg14[%c6_238, %c0_239, %c0_240] : memref<9x32x128xbf16, #tpu.memory_space<vmem>>, vector<1x32x128xbf16>
    %292 = vector.shape_cast %291 : vector<1x32x128xbf16> to vector<32x128xbf16>
    %293 = arith.extf %292 : vector<32x128xbf16> to vector<32x128xf32>
    %cst_241 = arith.constant dense<0.000000e+00> : vector<32x32xf32>
    %294 = tpu.matmul %293, %261, %cst_241 {dimension_numbers = #tpu.dot_dimension_numbers<[1], [0], [0], [1], [0, 0, 1, 1], [], []>} : vector<32x128xf32>, vector<128x32xf32>, vector<32x32xf32> -> vector<32x32xf32>
    %295 = arith.maximumf %290, %294 : vector<32x32xf32>
    %c7_242 = arith.constant 7 : index
    %c0_243 = arith.constant 0 : index
    %c0_244 = arith.constant 0 : index
    %296 = vector.load %arg14[%c7_242, %c0_243, %c0_244] : memref<9x32x128xbf16, #tpu.memory_space<vmem>>, vector<1x32x128xbf16>
    %297 = vector.shape_cast %296 : vector<1x32x128xbf16> to vector<32x128xbf16>
    %298 = arith.extf %297 : vector<32x128xbf16> to vector<32x128xf32>
    %cst_245 = arith.constant dense<0.000000e+00> : vector<32x32xf32>
    %299 = tpu.matmul %298, %261, %cst_245 {dimension_numbers = #tpu.dot_dimension_numbers<[1], [0], [0], [1], [0, 0, 1, 1], [], []>} : vector<32x128xf32>, vector<128x32xf32>, vector<32x32xf32> -> vector<32x32xf32>
    %300 = arith.maximumf %295, %299 : vector<32x32xf32>
    %c8_246 = arith.constant 8 : index
    %c0_247 = arith.constant 0 : index
    %c0_248 = arith.constant 0 : index
    %301 = vector.load %arg14[%c8_246, %c0_247, %c0_248] : memref<9x32x128xbf16, #tpu.memory_space<vmem>>, vector<1x32x128xbf16>
    %302 = vector.shape_cast %301 : vector<1x32x128xbf16> to vector<32x128xbf16>
    %303 = arith.extf %302 : vector<32x128xbf16> to vector<32x128xf32>
    %cst_249 = arith.constant dense<0.000000e+00> : vector<32x32xf32>
    %304 = tpu.matmul %303, %261, %cst_249 {dimension_numbers = #tpu.dot_dimension_numbers<[1], [0], [0], [1], [0, 0, 1, 1], [], []>} : vector<32x128xf32>, vector<128x32xf32>, vector<32x32xf32> -> vector<32x32xf32>
    %305 = arith.maximumf %300, %304 : vector<32x32xf32>
    %c0_250 = arith.constant 0 : index
    %c0_251 = arith.constant 0 : index
    %306 = vector.load %arg15[%c0_250, %c0_251] : memref<32x128xbf16, #tpu.memory_space<vmem>>, vector<32x128xbf16>
    %307 = arith.extf %306 : vector<32x128xbf16> to vector<32x128xf32>
    %cst_252 = arith.constant dense<0.000000e+00> : vector<32x64xf32>
    %308 = tpu.matmul %307, %83, %cst_252 {dimension_numbers = #tpu.dot_dimension_numbers<[1], [0], [0], [1], [0, 0, 1, 1], [], []>} : vector<32x128xf32>, vector<128x64xf32>, vector<32x64xf32> -> vector<32x64xf32>
    %c0_253 = arith.constant 0 : index
    %c0_254 = arith.constant 0 : index
    %309 = vector.load %arg16[%c0_253, %c0_254] : memref<64x32xf32, #tpu.memory_space<vmem>>, vector<64x32xf32>
    %cst_255 = arith.constant dense<0.000000e+00> : vector<32x32xf32>
    %310 = tpu.matmul %308, %309, %cst_255 {dimension_numbers = #tpu.dot_dimension_numbers<[1], [0], [0], [1], [0, 0, 1, 1], [], []>} : vector<32x64xf32>, vector<64x32xf32>, vector<32x32xf32> -> vector<32x32xf32>
    %c0_256 = arith.constant 0 : index
    %c0_257 = arith.constant 0 : index
    %311 = vector.load %arg17[%c0_256, %c0_257] : memref<1x32xf32, #tpu.memory_space<vmem>>, vector<1x32xf32>
    %312 = vector.broadcast %311 : vector<1x32xf32> to vector<32x32xf32>
    %313 = arith.addf %310, %312 : vector<32x32xf32>
    %314 = arith.addf %305, %313 : vector<32x32xf32>
    %cst_258 = arith.constant 0.000000e+00 : f32
    %315 = vector.broadcast %cst_258 : f32 to vector<32x32xf32>
    %316 = arith.maximumf %314, %315 : vector<32x32xf32>
    %c0_259 = arith.constant 0 : index
    %c0_260 = arith.constant 0 : index
    %317 = vector.load %arg20[%c0_259, %c0_260] : memref<1x32xf32, #tpu.memory_space<vmem>>, vector<1x32xf32>
    %c0_261 = arith.constant 0 : index
    %c0_262 = arith.constant 0 : index
    %c0_263 = arith.constant 0 : index
    %318 = vector.load %arg18[%c0_261, %c0_262, %c0_263] : memref<9x32x32xbf16, #tpu.memory_space<vmem>>, vector<1x32x32xbf16>
    %319 = vector.shape_cast %318 : vector<1x32x32xbf16> to vector<32x32xbf16>
    %320 = arith.extf %319 : vector<32x32xbf16> to vector<32x32xf32>
    %cst_264 = arith.constant dense<0.000000e+00> : vector<32x32xf32>
    %321 = tpu.matmul %320, %316, %cst_264 {dimension_numbers = #tpu.dot_dimension_numbers<[1], [0], [0], [1], [0, 0, 1, 1], [], []>} : vector<32x32xf32>, vector<32x32xf32>, vector<32x32xf32> -> vector<32x32xf32>
    %c0_265 = arith.constant 0 : index
    %c0_266 = arith.constant 0 : index
    %c0_267 = arith.constant 0 : index
    %322 = vector.load %arg19[%c0_265, %c0_266, %c0_267] : memref<9x1x32xf32, #tpu.memory_space<vmem>>, vector<1x1x32xf32>
    %323 = vector.shape_cast %322 : vector<1x1x32xf32> to vector<1x32xf32>
    %324 = vector.broadcast %323 : vector<1x32xf32> to vector<32x32xf32>
    %325 = arith.mulf %321, %324 : vector<32x32xf32>
    %326 = vector.broadcast %317 : vector<1x32xf32> to vector<32x32xf32>
    %327 = arith.addf %326, %325 : vector<32x32xf32>
    %c1_268 = arith.constant 1 : index
    %c0_269 = arith.constant 0 : index
    %c0_270 = arith.constant 0 : index
    %328 = vector.load %arg18[%c1_268, %c0_269, %c0_270] : memref<9x32x32xbf16, #tpu.memory_space<vmem>>, vector<1x32x32xbf16>
    %329 = vector.shape_cast %328 : vector<1x32x32xbf16> to vector<32x32xbf16>
    %330 = arith.extf %329 : vector<32x32xbf16> to vector<32x32xf32>
    %cst_271 = arith.constant dense<0.000000e+00> : vector<32x32xf32>
    %331 = tpu.matmul %330, %316, %cst_271 {dimension_numbers = #tpu.dot_dimension_numbers<[1], [0], [0], [1], [0, 0, 1, 1], [], []>} : vector<32x32xf32>, vector<32x32xf32>, vector<32x32xf32> -> vector<32x32xf32>
    %c1_272 = arith.constant 1 : index
    %c0_273 = arith.constant 0 : index
    %c0_274 = arith.constant 0 : index
    %332 = vector.load %arg19[%c1_272, %c0_273, %c0_274] : memref<9x1x32xf32, #tpu.memory_space<vmem>>, vector<1x1x32xf32>
    %333 = vector.shape_cast %332 : vector<1x1x32xf32> to vector<1x32xf32>
    %334 = vector.broadcast %333 : vector<1x32xf32> to vector<32x32xf32>
    %335 = arith.mulf %331, %334 : vector<32x32xf32>
    %336 = arith.addf %327, %335 : vector<32x32xf32>
    %c2_275 = arith.constant 2 : index
    %c0_276 = arith.constant 0 : index
    %c0_277 = arith.constant 0 : index
    %337 = vector.load %arg18[%c2_275, %c0_276, %c0_277] : memref<9x32x32xbf16, #tpu.memory_space<vmem>>, vector<1x32x32xbf16>
    %338 = vector.shape_cast %337 : vector<1x32x32xbf16> to vector<32x32xbf16>
    %339 = arith.extf %338 : vector<32x32xbf16> to vector<32x32xf32>
    %cst_278 = arith.constant dense<0.000000e+00> : vector<32x32xf32>
    %340 = tpu.matmul %339, %316, %cst_278 {dimension_numbers = #tpu.dot_dimension_numbers<[1], [0], [0], [1], [0, 0, 1, 1], [], []>} : vector<32x32xf32>, vector<32x32xf32>, vector<32x32xf32> -> vector<32x32xf32>
    %c2_279 = arith.constant 2 : index
    %c0_280 = arith.constant 0 : index
    %c0_281 = arith.constant 0 : index
    %341 = vector.load %arg19[%c2_279, %c0_280, %c0_281] : memref<9x1x32xf32, #tpu.memory_space<vmem>>, vector<1x1x32xf32>
    %342 = vector.shape_cast %341 : vector<1x1x32xf32> to vector<1x32xf32>
    %343 = vector.broadcast %342 : vector<1x32xf32> to vector<32x32xf32>
    %344 = arith.mulf %340, %343 : vector<32x32xf32>
    %345 = arith.addf %336, %344 : vector<32x32xf32>
    %c3_282 = arith.constant 3 : index
    %c0_283 = arith.constant 0 : index
    %c0_284 = arith.constant 0 : index
    %346 = vector.load %arg18[%c3_282, %c0_283, %c0_284] : memref<9x32x32xbf16, #tpu.memory_space<vmem>>, vector<1x32x32xbf16>
    %347 = vector.shape_cast %346 : vector<1x32x32xbf16> to vector<32x32xbf16>
    %348 = arith.extf %347 : vector<32x32xbf16> to vector<32x32xf32>
    %cst_285 = arith.constant dense<0.000000e+00> : vector<32x32xf32>
    %349 = tpu.matmul %348, %316, %cst_285 {dimension_numbers = #tpu.dot_dimension_numbers<[1], [0], [0], [1], [0, 0, 1, 1], [], []>} : vector<32x32xf32>, vector<32x32xf32>, vector<32x32xf32> -> vector<32x32xf32>
    %c3_286 = arith.constant 3 : index
    %c0_287 = arith.constant 0 : index
    %c0_288 = arith.constant 0 : index
    %350 = vector.load %arg19[%c3_286, %c0_287, %c0_288] : memref<9x1x32xf32, #tpu.memory_space<vmem>>, vector<1x1x32xf32>
    %351 = vector.shape_cast %350 : vector<1x1x32xf32> to vector<1x32xf32>
    %352 = vector.broadcast %351 : vector<1x32xf32> to vector<32x32xf32>
    %353 = arith.mulf %349, %352 : vector<32x32xf32>
    %354 = arith.addf %345, %353 : vector<32x32xf32>
    %c4_289 = arith.constant 4 : index
    %c0_290 = arith.constant 0 : index
    %c0_291 = arith.constant 0 : index
    %355 = vector.load %arg18[%c4_289, %c0_290, %c0_291] : memref<9x32x32xbf16, #tpu.memory_space<vmem>>, vector<1x32x32xbf16>
    %356 = vector.shape_cast %355 : vector<1x32x32xbf16> to vector<32x32xbf16>
    %357 = arith.extf %356 : vector<32x32xbf16> to vector<32x32xf32>
    %cst_292 = arith.constant dense<0.000000e+00> : vector<32x32xf32>
    %358 = tpu.matmul %357, %316, %cst_292 {dimension_numbers = #tpu.dot_dimension_numbers<[1], [0], [0], [1], [0, 0, 1, 1], [], []>} : vector<32x32xf32>, vector<32x32xf32>, vector<32x32xf32> -> vector<32x32xf32>
    %c4_293 = arith.constant 4 : index
    %c0_294 = arith.constant 0 : index
    %c0_295 = arith.constant 0 : index
    %359 = vector.load %arg19[%c4_293, %c0_294, %c0_295] : memref<9x1x32xf32, #tpu.memory_space<vmem>>, vector<1x1x32xf32>
    %360 = vector.shape_cast %359 : vector<1x1x32xf32> to vector<1x32xf32>
    %361 = vector.broadcast %360 : vector<1x32xf32> to vector<32x32xf32>
    %362 = arith.mulf %358, %361 : vector<32x32xf32>
    %363 = arith.addf %354, %362 : vector<32x32xf32>
    %c5_296 = arith.constant 5 : index
    %c0_297 = arith.constant 0 : index
    %c0_298 = arith.constant 0 : index
    %364 = vector.load %arg18[%c5_296, %c0_297, %c0_298] : memref<9x32x32xbf16, #tpu.memory_space<vmem>>, vector<1x32x32xbf16>
    %365 = vector.shape_cast %364 : vector<1x32x32xbf16> to vector<32x32xbf16>
    %366 = arith.extf %365 : vector<32x32xbf16> to vector<32x32xf32>
    %cst_299 = arith.constant dense<0.000000e+00> : vector<32x32xf32>
    %367 = tpu.matmul %366, %316, %cst_299 {dimension_numbers = #tpu.dot_dimension_numbers<[1], [0], [0], [1], [0, 0, 1, 1], [], []>} : vector<32x32xf32>, vector<32x32xf32>, vector<32x32xf32> -> vector<32x32xf32>
    %c5_300 = arith.constant 5 : index
    %c0_301 = arith.constant 0 : index
    %c0_302 = arith.constant 0 : index
    %368 = vector.load %arg19[%c5_300, %c0_301, %c0_302] : memref<9x1x32xf32, #tpu.memory_space<vmem>>, vector<1x1x32xf32>
    %369 = vector.shape_cast %368 : vector<1x1x32xf32> to vector<1x32xf32>
    %370 = vector.broadcast %369 : vector<1x32xf32> to vector<32x32xf32>
    %371 = arith.mulf %367, %370 : vector<32x32xf32>
    %372 = arith.addf %363, %371 : vector<32x32xf32>
    %c6_303 = arith.constant 6 : index
    %c0_304 = arith.constant 0 : index
    %c0_305 = arith.constant 0 : index
    %373 = vector.load %arg18[%c6_303, %c0_304, %c0_305] : memref<9x32x32xbf16, #tpu.memory_space<vmem>>, vector<1x32x32xbf16>
    %374 = vector.shape_cast %373 : vector<1x32x32xbf16> to vector<32x32xbf16>
    %375 = arith.extf %374 : vector<32x32xbf16> to vector<32x32xf32>
    %cst_306 = arith.constant dense<0.000000e+00> : vector<32x32xf32>
    %376 = tpu.matmul %375, %316, %cst_306 {dimension_numbers = #tpu.dot_dimension_numbers<[1], [0], [0], [1], [0, 0, 1, 1], [], []>} : vector<32x32xf32>, vector<32x32xf32>, vector<32x32xf32> -> vector<32x32xf32>
    %c6_307 = arith.constant 6 : index
    %c0_308 = arith.constant 0 : index
    %c0_309 = arith.constant 0 : index
    %377 = vector.load %arg19[%c6_307, %c0_308, %c0_309] : memref<9x1x32xf32, #tpu.memory_space<vmem>>, vector<1x1x32xf32>
    %378 = vector.shape_cast %377 : vector<1x1x32xf32> to vector<1x32xf32>
    %379 = vector.broadcast %378 : vector<1x32xf32> to vector<32x32xf32>
    %380 = arith.mulf %376, %379 : vector<32x32xf32>
    %381 = arith.addf %372, %380 : vector<32x32xf32>
    %c7_310 = arith.constant 7 : index
    %c0_311 = arith.constant 0 : index
    %c0_312 = arith.constant 0 : index
    %382 = vector.load %arg18[%c7_310, %c0_311, %c0_312] : memref<9x32x32xbf16, #tpu.memory_space<vmem>>, vector<1x32x32xbf16>
    %383 = vector.shape_cast %382 : vector<1x32x32xbf16> to vector<32x32xbf16>
    %384 = arith.extf %383 : vector<32x32xbf16> to vector<32x32xf32>
    %cst_313 = arith.constant dense<0.000000e+00> : vector<32x32xf32>
    %385 = tpu.matmul %384, %316, %cst_313 {dimension_numbers = #tpu.dot_dimension_numbers<[1], [0], [0], [1], [0, 0, 1, 1], [], []>} : vector<32x32xf32>, vector<32x32xf32>, vector<32x32xf32> -> vector<32x32xf32>
    %c7_314 = arith.constant 7 : index
    %c0_315 = arith.constant 0 : index
    %c0_316 = arith.constant 0 : index
    %386 = vector.load %arg19[%c7_314, %c0_315, %c0_316] : memref<9x1x32xf32, #tpu.memory_space<vmem>>, vector<1x1x32xf32>
    %387 = vector.shape_cast %386 : vector<1x1x32xf32> to vector<1x32xf32>
    %388 = vector.broadcast %387 : vector<1x32xf32> to vector<32x32xf32>
    %389 = arith.mulf %385, %388 : vector<32x32xf32>
    %390 = arith.addf %381, %389 : vector<32x32xf32>
    %c8_317 = arith.constant 8 : index
    %c0_318 = arith.constant 0 : index
    %c0_319 = arith.constant 0 : index
    %391 = vector.load %arg18[%c8_317, %c0_318, %c0_319] : memref<9x32x32xbf16, #tpu.memory_space<vmem>>, vector<1x32x32xbf16>
    %392 = vector.shape_cast %391 : vector<1x32x32xbf16> to vector<32x32xbf16>
    %393 = arith.extf %392 : vector<32x32xbf16> to vector<32x32xf32>
    %cst_320 = arith.constant dense<0.000000e+00> : vector<32x32xf32>
    %394 = tpu.matmul %393, %316, %cst_320 {dimension_numbers = #tpu.dot_dimension_numbers<[1], [0], [0], [1], [0, 0, 1, 1], [], []>} : vector<32x32xf32>, vector<32x32xf32>, vector<32x32xf32> -> vector<32x32xf32>
    %c8_321 = arith.constant 8 : index
    %c0_322 = arith.constant 0 : index
    %c0_323 = arith.constant 0 : index
    %395 = vector.load %arg19[%c8_321, %c0_322, %c0_323] : memref<9x1x32xf32, #tpu.memory_space<vmem>>, vector<1x1x32xf32>
    %396 = vector.shape_cast %395 : vector<1x1x32xf32> to vector<1x32xf32>
    %397 = vector.broadcast %396 : vector<1x32xf32> to vector<32x32xf32>
    %398 = arith.mulf %394, %397 : vector<32x32xf32>
    %399 = arith.addf %390, %398 : vector<32x32xf32>
    %c0_324 = arith.constant 0 : index
    %c0_325 = arith.constant 0 : index
    %400 = vector.load %arg21[%c0_324, %c0_325] : memref<32x64xf32, #tpu.memory_space<vmem>>, vector<32x64xf32>
    %cst_326 = arith.constant dense<0.000000e+00> : vector<32x64xf32>
    %401 = tpu.matmul %399, %400, %cst_326 {dimension_numbers = #tpu.dot_dimension_numbers<[1], [0], [0], [1], [0, 0, 1, 1], [], []>} : vector<32x32xf32>, vector<32x64xf32>, vector<32x64xf32> -> vector<32x64xf32>
    %c0_327 = arith.constant 0 : index
    %c0_328 = arith.constant 0 : index
    %402 = vector.load %arg22[%c0_327, %c0_328] : memref<1x64xf32, #tpu.memory_space<vmem>>, vector<1x64xf32>
    %403 = vector.broadcast %402 : vector<1x64xf32> to vector<32x64xf32>
    %404 = arith.addf %401, %403 : vector<32x64xf32>
    %cst_329 = arith.constant 0.000000e+00 : f32
    %405 = vector.broadcast %cst_329 : f32 to vector<32x64xf32>
    %406 = arith.maximumf %404, %405 : vector<32x64xf32>
    %c0_330 = arith.constant 0 : index
    %c0_331 = arith.constant 0 : index
    %407 = vector.load %arg24[%c0_330, %c0_331] : memref<1x64xf32, #tpu.memory_space<vmem>>, vector<1x64xf32>
    %c0_332 = arith.constant 0 : index
    %c0_333 = arith.constant 0 : index
    %c0_334 = arith.constant 0 : index
    %408 = vector.load %arg18[%c0_332, %c0_333, %c0_334] : memref<9x32x32xbf16, #tpu.memory_space<vmem>>, vector<1x32x32xbf16>
    %409 = vector.shape_cast %408 : vector<1x32x32xbf16> to vector<32x32xbf16>
    %410 = arith.extf %409 : vector<32x32xbf16> to vector<32x32xf32>
    %cst_335 = arith.constant dense<0.000000e+00> : vector<32x64xf32>
    %411 = tpu.matmul %410, %406, %cst_335 {dimension_numbers = #tpu.dot_dimension_numbers<[1], [0], [0], [1], [0, 0, 1, 1], [], []>} : vector<32x32xf32>, vector<32x64xf32>, vector<32x64xf32> -> vector<32x64xf32>
    %c0_336 = arith.constant 0 : index
    %c0_337 = arith.constant 0 : index
    %c0_338 = arith.constant 0 : index
    %412 = vector.load %arg23[%c0_336, %c0_337, %c0_338] : memref<9x1x64xf32, #tpu.memory_space<vmem>>, vector<1x1x64xf32>
    %413 = vector.shape_cast %412 : vector<1x1x64xf32> to vector<1x64xf32>
    %414 = vector.broadcast %413 : vector<1x64xf32> to vector<32x64xf32>
    %415 = arith.mulf %411, %414 : vector<32x64xf32>
    %416 = vector.broadcast %407 : vector<1x64xf32> to vector<32x64xf32>
    %417 = arith.addf %416, %415 : vector<32x64xf32>
    %c1_339 = arith.constant 1 : index
    %c0_340 = arith.constant 0 : index
    %c0_341 = arith.constant 0 : index
    %418 = vector.load %arg18[%c1_339, %c0_340, %c0_341] : memref<9x32x32xbf16, #tpu.memory_space<vmem>>, vector<1x32x32xbf16>
    %419 = vector.shape_cast %418 : vector<1x32x32xbf16> to vector<32x32xbf16>
    %420 = arith.extf %419 : vector<32x32xbf16> to vector<32x32xf32>
    %cst_342 = arith.constant dense<0.000000e+00> : vector<32x64xf32>
    %421 = tpu.matmul %420, %406, %cst_342 {dimension_numbers = #tpu.dot_dimension_numbers<[1], [0], [0], [1], [0, 0, 1, 1], [], []>} : vector<32x32xf32>, vector<32x64xf32>, vector<32x64xf32> -> vector<32x64xf32>
    %c1_343 = arith.constant 1 : index
    %c0_344 = arith.constant 0 : index
    %c0_345 = arith.constant 0 : index
    %422 = vector.load %arg23[%c1_343, %c0_344, %c0_345] : memref<9x1x64xf32, #tpu.memory_space<vmem>>, vector<1x1x64xf32>
    %423 = vector.shape_cast %422 : vector<1x1x64xf32> to vector<1x64xf32>
    %424 = vector.broadcast %423 : vector<1x64xf32> to vector<32x64xf32>
    %425 = arith.mulf %421, %424 : vector<32x64xf32>
    %426 = arith.addf %417, %425 : vector<32x64xf32>
    %c2_346 = arith.constant 2 : index
    %c0_347 = arith.constant 0 : index
    %c0_348 = arith.constant 0 : index
    %427 = vector.load %arg18[%c2_346, %c0_347, %c0_348] : memref<9x32x32xbf16, #tpu.memory_space<vmem>>, vector<1x32x32xbf16>
    %428 = vector.shape_cast %427 : vector<1x32x32xbf16> to vector<32x32xbf16>
    %429 = arith.extf %428 : vector<32x32xbf16> to vector<32x32xf32>
    %cst_349 = arith.constant dense<0.000000e+00> : vector<32x64xf32>
    %430 = tpu.matmul %429, %406, %cst_349 {dimension_numbers = #tpu.dot_dimension_numbers<[1], [0], [0], [1], [0, 0, 1, 1], [], []>} : vector<32x32xf32>, vector<32x64xf32>, vector<32x64xf32> -> vector<32x64xf32>
    %c2_350 = arith.constant 2 : index
    %c0_351 = arith.constant 0 : index
    %c0_352 = arith.constant 0 : index
    %431 = vector.load %arg23[%c2_350, %c0_351, %c0_352] : memref<9x1x64xf32, #tpu.memory_space<vmem>>, vector<1x1x64xf32>
    %432 = vector.shape_cast %431 : vector<1x1x64xf32> to vector<1x64xf32>
    %433 = vector.broadcast %432 : vector<1x64xf32> to vector<32x64xf32>
    %434 = arith.mulf %430, %433 : vector<32x64xf32>
    %435 = arith.addf %426, %434 : vector<32x64xf32>
    %c3_353 = arith.constant 3 : index
    %c0_354 = arith.constant 0 : index
    %c0_355 = arith.constant 0 : index
    %436 = vector.load %arg18[%c3_353, %c0_354, %c0_355] : memref<9x32x32xbf16, #tpu.memory_space<vmem>>, vector<1x32x32xbf16>
    %437 = vector.shape_cast %436 : vector<1x32x32xbf16> to vector<32x32xbf16>
    %438 = arith.extf %437 : vector<32x32xbf16> to vector<32x32xf32>
    %cst_356 = arith.constant dense<0.000000e+00> : vector<32x64xf32>
    %439 = tpu.matmul %438, %406, %cst_356 {dimension_numbers = #tpu.dot_dimension_numbers<[1], [0], [0], [1], [0, 0, 1, 1], [], []>} : vector<32x32xf32>, vector<32x64xf32>, vector<32x64xf32> -> vector<32x64xf32>
    %c3_357 = arith.constant 3 : index
    %c0_358 = arith.constant 0 : index
    %c0_359 = arith.constant 0 : index
    %440 = vector.load %arg23[%c3_357, %c0_358, %c0_359] : memref<9x1x64xf32, #tpu.memory_space<vmem>>, vector<1x1x64xf32>
    %441 = vector.shape_cast %440 : vector<1x1x64xf32> to vector<1x64xf32>
    %442 = vector.broadcast %441 : vector<1x64xf32> to vector<32x64xf32>
    %443 = arith.mulf %439, %442 : vector<32x64xf32>
    %444 = arith.addf %435, %443 : vector<32x64xf32>
    %c4_360 = arith.constant 4 : index
    %c0_361 = arith.constant 0 : index
    %c0_362 = arith.constant 0 : index
    %445 = vector.load %arg18[%c4_360, %c0_361, %c0_362] : memref<9x32x32xbf16, #tpu.memory_space<vmem>>, vector<1x32x32xbf16>
    %446 = vector.shape_cast %445 : vector<1x32x32xbf16> to vector<32x32xbf16>
    %447 = arith.extf %446 : vector<32x32xbf16> to vector<32x32xf32>
    %cst_363 = arith.constant dense<0.000000e+00> : vector<32x64xf32>
    %448 = tpu.matmul %447, %406, %cst_363 {dimension_numbers = #tpu.dot_dimension_numbers<[1], [0], [0], [1], [0, 0, 1, 1], [], []>} : vector<32x32xf32>, vector<32x64xf32>, vector<32x64xf32> -> vector<32x64xf32>
    %c4_364 = arith.constant 4 : index
    %c0_365 = arith.constant 0 : index
    %c0_366 = arith.constant 0 : index
    %449 = vector.load %arg23[%c4_364, %c0_365, %c0_366] : memref<9x1x64xf32, #tpu.memory_space<vmem>>, vector<1x1x64xf32>
    %450 = vector.shape_cast %449 : vector<1x1x64xf32> to vector<1x64xf32>
    %451 = vector.broadcast %450 : vector<1x64xf32> to vector<32x64xf32>
    %452 = arith.mulf %448, %451 : vector<32x64xf32>
    %453 = arith.addf %444, %452 : vector<32x64xf32>
    %c5_367 = arith.constant 5 : index
    %c0_368 = arith.constant 0 : index
    %c0_369 = arith.constant 0 : index
    %454 = vector.load %arg18[%c5_367, %c0_368, %c0_369] : memref<9x32x32xbf16, #tpu.memory_space<vmem>>, vector<1x32x32xbf16>
    %455 = vector.shape_cast %454 : vector<1x32x32xbf16> to vector<32x32xbf16>
    %456 = arith.extf %455 : vector<32x32xbf16> to vector<32x32xf32>
    %cst_370 = arith.constant dense<0.000000e+00> : vector<32x64xf32>
    %457 = tpu.matmul %456, %406, %cst_370 {dimension_numbers = #tpu.dot_dimension_numbers<[1], [0], [0], [1], [0, 0, 1, 1], [], []>} : vector<32x32xf32>, vector<32x64xf32>, vector<32x64xf32> -> vector<32x64xf32>
    %c5_371 = arith.constant 5 : index
    %c0_372 = arith.constant 0 : index
    %c0_373 = arith.constant 0 : index
    %458 = vector.load %arg23[%c5_371, %c0_372, %c0_373] : memref<9x1x64xf32, #tpu.memory_space<vmem>>, vector<1x1x64xf32>
    %459 = vector.shape_cast %458 : vector<1x1x64xf32> to vector<1x64xf32>
    %460 = vector.broadcast %459 : vector<1x64xf32> to vector<32x64xf32>
    %461 = arith.mulf %457, %460 : vector<32x64xf32>
    %462 = arith.addf %453, %461 : vector<32x64xf32>
    %c6_374 = arith.constant 6 : index
    %c0_375 = arith.constant 0 : index
    %c0_376 = arith.constant 0 : index
    %463 = vector.load %arg18[%c6_374, %c0_375, %c0_376] : memref<9x32x32xbf16, #tpu.memory_space<vmem>>, vector<1x32x32xbf16>
    %464 = vector.shape_cast %463 : vector<1x32x32xbf16> to vector<32x32xbf16>
    %465 = arith.extf %464 : vector<32x32xbf16> to vector<32x32xf32>
    %cst_377 = arith.constant dense<0.000000e+00> : vector<32x64xf32>
    %466 = tpu.matmul %465, %406, %cst_377 {dimension_numbers = #tpu.dot_dimension_numbers<[1], [0], [0], [1], [0, 0, 1, 1], [], []>} : vector<32x32xf32>, vector<32x64xf32>, vector<32x64xf32> -> vector<32x64xf32>
    %c6_378 = arith.constant 6 : index
    %c0_379 = arith.constant 0 : index
    %c0_380 = arith.constant 0 : index
    %467 = vector.load %arg23[%c6_378, %c0_379, %c0_380] : memref<9x1x64xf32, #tpu.memory_space<vmem>>, vector<1x1x64xf32>
    %468 = vector.shape_cast %467 : vector<1x1x64xf32> to vector<1x64xf32>
    %469 = vector.broadcast %468 : vector<1x64xf32> to vector<32x64xf32>
    %470 = arith.mulf %466, %469 : vector<32x64xf32>
    %471 = arith.addf %462, %470 : vector<32x64xf32>
    %c7_381 = arith.constant 7 : index
    %c0_382 = arith.constant 0 : index
    %c0_383 = arith.constant 0 : index
    %472 = vector.load %arg18[%c7_381, %c0_382, %c0_383] : memref<9x32x32xbf16, #tpu.memory_space<vmem>>, vector<1x32x32xbf16>
    %473 = vector.shape_cast %472 : vector<1x32x32xbf16> to vector<32x32xbf16>
    %474 = arith.extf %473 : vector<32x32xbf16> to vector<32x32xf32>
    %cst_384 = arith.constant dense<0.000000e+00> : vector<32x64xf32>
    %475 = tpu.matmul %474, %406, %cst_384 {dimension_numbers = #tpu.dot_dimension_numbers<[1], [0], [0], [1], [0, 0, 1, 1], [], []>} : vector<32x32xf32>, vector<32x64xf32>, vector<32x64xf32> -> vector<32x64xf32>
    %c7_385 = arith.constant 7 : index
    %c0_386 = arith.constant 0 : index
    %c0_387 = arith.constant 0 : index
    %476 = vector.load %arg23[%c7_385, %c0_386, %c0_387] : memref<9x1x64xf32, #tpu.memory_space<vmem>>, vector<1x1x64xf32>
    %477 = vector.shape_cast %476 : vector<1x1x64xf32> to vector<1x64xf32>
    %478 = vector.broadcast %477 : vector<1x64xf32> to vector<32x64xf32>
    %479 = arith.mulf %475, %478 : vector<32x64xf32>
    %480 = arith.addf %471, %479 : vector<32x64xf32>
    %c8_388 = arith.constant 8 : index
    %c0_389 = arith.constant 0 : index
    %c0_390 = arith.constant 0 : index
    %481 = vector.load %arg18[%c8_388, %c0_389, %c0_390] : memref<9x32x32xbf16, #tpu.memory_space<vmem>>, vector<1x32x32xbf16>
    %482 = vector.shape_cast %481 : vector<1x32x32xbf16> to vector<32x32xbf16>
    %483 = arith.extf %482 : vector<32x32xbf16> to vector<32x32xf32>
    %cst_391 = arith.constant dense<0.000000e+00> : vector<32x64xf32>
    %484 = tpu.matmul %483, %406, %cst_391 {dimension_numbers = #tpu.dot_dimension_numbers<[1], [0], [0], [1], [0, 0, 1, 1], [], []>} : vector<32x32xf32>, vector<32x64xf32>, vector<32x64xf32> -> vector<32x64xf32>
    %c8_392 = arith.constant 8 : index
    %c0_393 = arith.constant 0 : index
    %c0_394 = arith.constant 0 : index
    %485 = vector.load %arg23[%c8_392, %c0_393, %c0_394] : memref<9x1x64xf32, #tpu.memory_space<vmem>>, vector<1x1x64xf32>
    %486 = vector.shape_cast %485 : vector<1x1x64xf32> to vector<1x64xf32>
    %487 = vector.broadcast %486 : vector<1x64xf32> to vector<32x64xf32>
    %488 = arith.mulf %484, %487 : vector<32x64xf32>
    %489 = arith.addf %480, %488 : vector<32x64xf32>
    %c0_395 = arith.constant 0 : index
    %c0_396 = arith.constant 0 : index
    %490 = vector.load %arg25[%c0_395, %c0_396] : memref<64x64xf32, #tpu.memory_space<vmem>>, vector<64x64xf32>
    %cst_397 = arith.constant dense<0.000000e+00> : vector<32x64xf32>
    %491 = tpu.matmul %489, %490, %cst_397 {dimension_numbers = #tpu.dot_dimension_numbers<[1], [0], [0], [1], [0, 0, 1, 1], [], []>} : vector<32x64xf32>, vector<64x64xf32>, vector<32x64xf32> -> vector<32x64xf32>
    %c0_398 = arith.constant 0 : index
    %c0_399 = arith.constant 0 : index
    %492 = vector.load %arg26[%c0_398, %c0_399] : memref<1x64xf32, #tpu.memory_space<vmem>>, vector<1x64xf32>
    %493 = vector.broadcast %492 : vector<1x64xf32> to vector<32x64xf32>
    %494 = arith.addf %491, %493 : vector<32x64xf32>
    %c0_400 = arith.constant 0 : index
    %c0_401 = arith.constant 0 : index
    %c0_402 = arith.constant 0 : index
    %495 = vector.load %arg27[%c0_400, %c0_401, %c0_402] : memref<9x8x32xbf16, #tpu.memory_space<vmem>>, vector<1x8x32xbf16>
    %496 = vector.shape_cast %495 : vector<1x8x32xbf16> to vector<8x32xbf16>
    %497 = arith.extf %496 : vector<8x32xbf16> to vector<8x32xf32>
    %cst_403 = arith.constant dense<0.000000e+00> : vector<8x64xf32>
    %498 = tpu.matmul %497, %494, %cst_403 {dimension_numbers = #tpu.dot_dimension_numbers<[1], [0], [0], [1], [0, 0, 1, 1], [], []>} : vector<8x32xf32>, vector<32x64xf32>, vector<8x64xf32> -> vector<8x64xf32>
    %c1_404 = arith.constant 1 : index
    %c0_405 = arith.constant 0 : index
    %c0_406 = arith.constant 0 : index
    %499 = vector.load %arg27[%c1_404, %c0_405, %c0_406] : memref<9x8x32xbf16, #tpu.memory_space<vmem>>, vector<1x8x32xbf16>
    %500 = vector.shape_cast %499 : vector<1x8x32xbf16> to vector<8x32xbf16>
    %501 = arith.extf %500 : vector<8x32xbf16> to vector<8x32xf32>
    %cst_407 = arith.constant dense<0.000000e+00> : vector<8x64xf32>
    %502 = tpu.matmul %501, %494, %cst_407 {dimension_numbers = #tpu.dot_dimension_numbers<[1], [0], [0], [1], [0, 0, 1, 1], [], []>} : vector<8x32xf32>, vector<32x64xf32>, vector<8x64xf32> -> vector<8x64xf32>
    %503 = arith.maximumf %498, %502 : vector<8x64xf32>
    %c2_408 = arith.constant 2 : index
    %c0_409 = arith.constant 0 : index
    %c0_410 = arith.constant 0 : index
    %504 = vector.load %arg27[%c2_408, %c0_409, %c0_410] : memref<9x8x32xbf16, #tpu.memory_space<vmem>>, vector<1x8x32xbf16>
    %505 = vector.shape_cast %504 : vector<1x8x32xbf16> to vector<8x32xbf16>
    %506 = arith.extf %505 : vector<8x32xbf16> to vector<8x32xf32>
    %cst_411 = arith.constant dense<0.000000e+00> : vector<8x64xf32>
    %507 = tpu.matmul %506, %494, %cst_411 {dimension_numbers = #tpu.dot_dimension_numbers<[1], [0], [0], [1], [0, 0, 1, 1], [], []>} : vector<8x32xf32>, vector<32x64xf32>, vector<8x64xf32> -> vector<8x64xf32>
    %508 = arith.maximumf %503, %507 : vector<8x64xf32>
    %c3_412 = arith.constant 3 : index
    %c0_413 = arith.constant 0 : index
    %c0_414 = arith.constant 0 : index
    %509 = vector.load %arg27[%c3_412, %c0_413, %c0_414] : memref<9x8x32xbf16, #tpu.memory_space<vmem>>, vector<1x8x32xbf16>
    %510 = vector.shape_cast %509 : vector<1x8x32xbf16> to vector<8x32xbf16>
    %511 = arith.extf %510 : vector<8x32xbf16> to vector<8x32xf32>
    %cst_415 = arith.constant dense<0.000000e+00> : vector<8x64xf32>
    %512 = tpu.matmul %511, %494, %cst_415 {dimension_numbers = #tpu.dot_dimension_numbers<[1], [0], [0], [1], [0, 0, 1, 1], [], []>} : vector<8x32xf32>, vector<32x64xf32>, vector<8x64xf32> -> vector<8x64xf32>
    %513 = arith.maximumf %508, %512 : vector<8x64xf32>
    %c4_416 = arith.constant 4 : index
    %c0_417 = arith.constant 0 : index
    %c0_418 = arith.constant 0 : index
    %514 = vector.load %arg27[%c4_416, %c0_417, %c0_418] : memref<9x8x32xbf16, #tpu.memory_space<vmem>>, vector<1x8x32xbf16>
    %515 = vector.shape_cast %514 : vector<1x8x32xbf16> to vector<8x32xbf16>
    %516 = arith.extf %515 : vector<8x32xbf16> to vector<8x32xf32>
    %cst_419 = arith.constant dense<0.000000e+00> : vector<8x64xf32>
    %517 = tpu.matmul %516, %494, %cst_419 {dimension_numbers = #tpu.dot_dimension_numbers<[1], [0], [0], [1], [0, 0, 1, 1], [], []>} : vector<8x32xf32>, vector<32x64xf32>, vector<8x64xf32> -> vector<8x64xf32>
    %518 = arith.maximumf %513, %517 : vector<8x64xf32>
    %c5_420 = arith.constant 5 : index
    %c0_421 = arith.constant 0 : index
    %c0_422 = arith.constant 0 : index
    %519 = vector.load %arg27[%c5_420, %c0_421, %c0_422] : memref<9x8x32xbf16, #tpu.memory_space<vmem>>, vector<1x8x32xbf16>
    %520 = vector.shape_cast %519 : vector<1x8x32xbf16> to vector<8x32xbf16>
    %521 = arith.extf %520 : vector<8x32xbf16> to vector<8x32xf32>
    %cst_423 = arith.constant dense<0.000000e+00> : vector<8x64xf32>
    %522 = tpu.matmul %521, %494, %cst_423 {dimension_numbers = #tpu.dot_dimension_numbers<[1], [0], [0], [1], [0, 0, 1, 1], [], []>} : vector<8x32xf32>, vector<32x64xf32>, vector<8x64xf32> -> vector<8x64xf32>
    %523 = arith.maximumf %518, %522 : vector<8x64xf32>
    %c6_424 = arith.constant 6 : index
    %c0_425 = arith.constant 0 : index
    %c0_426 = arith.constant 0 : index
    %524 = vector.load %arg27[%c6_424, %c0_425, %c0_426] : memref<9x8x32xbf16, #tpu.memory_space<vmem>>, vector<1x8x32xbf16>
    %525 = vector.shape_cast %524 : vector<1x8x32xbf16> to vector<8x32xbf16>
    %526 = arith.extf %525 : vector<8x32xbf16> to vector<8x32xf32>
    %cst_427 = arith.constant dense<0.000000e+00> : vector<8x64xf32>
    %527 = tpu.matmul %526, %494, %cst_427 {dimension_numbers = #tpu.dot_dimension_numbers<[1], [0], [0], [1], [0, 0, 1, 1], [], []>} : vector<8x32xf32>, vector<32x64xf32>, vector<8x64xf32> -> vector<8x64xf32>
    %528 = arith.maximumf %523, %527 : vector<8x64xf32>
    %c7_428 = arith.constant 7 : index
    %c0_429 = arith.constant 0 : index
    %c0_430 = arith.constant 0 : index
    %529 = vector.load %arg27[%c7_428, %c0_429, %c0_430] : memref<9x8x32xbf16, #tpu.memory_space<vmem>>, vector<1x8x32xbf16>
    %530 = vector.shape_cast %529 : vector<1x8x32xbf16> to vector<8x32xbf16>
    %531 = arith.extf %530 : vector<8x32xbf16> to vector<8x32xf32>
    %cst_431 = arith.constant dense<0.000000e+00> : vector<8x64xf32>
    %532 = tpu.matmul %531, %494, %cst_431 {dimension_numbers = #tpu.dot_dimension_numbers<[1], [0], [0], [1], [0, 0, 1, 1], [], []>} : vector<8x32xf32>, vector<32x64xf32>, vector<8x64xf32> -> vector<8x64xf32>
    %533 = arith.maximumf %528, %532 : vector<8x64xf32>
    %c8_432 = arith.constant 8 : index
    %c0_433 = arith.constant 0 : index
    %c0_434 = arith.constant 0 : index
    %534 = vector.load %arg27[%c8_432, %c0_433, %c0_434] : memref<9x8x32xbf16, #tpu.memory_space<vmem>>, vector<1x8x32xbf16>
    %535 = vector.shape_cast %534 : vector<1x8x32xbf16> to vector<8x32xbf16>
    %536 = arith.extf %535 : vector<8x32xbf16> to vector<8x32xf32>
    %cst_435 = arith.constant dense<0.000000e+00> : vector<8x64xf32>
    %537 = tpu.matmul %536, %494, %cst_435 {dimension_numbers = #tpu.dot_dimension_numbers<[1], [0], [0], [1], [0, 0, 1, 1], [], []>} : vector<8x32xf32>, vector<32x64xf32>, vector<8x64xf32> -> vector<8x64xf32>
    %538 = arith.maximumf %533, %537 : vector<8x64xf32>
    %c0_436 = arith.constant 0 : index
    %c0_437 = arith.constant 0 : index
    %539 = vector.load %arg28[%c0_436, %c0_437] : memref<8x32xbf16, #tpu.memory_space<vmem>>, vector<8x32xbf16>
    %540 = arith.extf %539 : vector<8x32xbf16> to vector<8x32xf32>
    %cst_438 = arith.constant dense<0.000000e+00> : vector<8x32xf32>
    %541 = tpu.matmul %540, %314, %cst_438 {dimension_numbers = #tpu.dot_dimension_numbers<[1], [0], [0], [1], [0, 0, 1, 1], [], []>} : vector<8x32xf32>, vector<32x32xf32>, vector<8x32xf32> -> vector<8x32xf32>
    %c0_439 = arith.constant 0 : index
    %c0_440 = arith.constant 0 : index
    %542 = vector.load %arg29[%c0_439, %c0_440] : memref<32x64xf32, #tpu.memory_space<vmem>>, vector<32x64xf32>
    %cst_441 = arith.constant dense<0.000000e+00> : vector<8x64xf32>
    %543 = tpu.matmul %541, %542, %cst_441 {dimension_numbers = #tpu.dot_dimension_numbers<[1], [0], [0], [1], [0, 0, 1, 1], [], []>} : vector<8x32xf32>, vector<32x64xf32>, vector<8x64xf32> -> vector<8x64xf32>
    %c0_442 = arith.constant 0 : index
    %c0_443 = arith.constant 0 : index
    %544 = vector.load %arg30[%c0_442, %c0_443] : memref<1x64xf32, #tpu.memory_space<vmem>>, vector<1x64xf32>
    %545 = vector.broadcast %544 : vector<1x64xf32> to vector<8x64xf32>
    %546 = arith.addf %543, %545 : vector<8x64xf32>
    %547 = arith.addf %538, %546 : vector<8x64xf32>
    %cst_444 = arith.constant 0.000000e+00 : f32
    %548 = vector.broadcast %cst_444 : f32 to vector<8x64xf32>
    %549 = arith.maximumf %547, %548 : vector<8x64xf32>
    %c0_445 = arith.constant 0 : index
    %c0_446 = arith.constant 0 : index
    %550 = vector.load %arg33[%c0_445, %c0_446] : memref<1x64xf32, #tpu.memory_space<vmem>>, vector<1x64xf32>
    %c0_447 = arith.constant 0 : index
    %c0_448 = arith.constant 0 : index
    %c0_449 = arith.constant 0 : index
    %551 = vector.load %arg31[%c0_447, %c0_448, %c0_449] : memref<9x8x8xbf16, #tpu.memory_space<vmem>>, vector<1x8x8xbf16>
    %552 = vector.shape_cast %551 : vector<1x8x8xbf16> to vector<8x8xbf16>
    %553 = arith.extf %552 : vector<8x8xbf16> to vector<8x8xf32>
    %cst_450 = arith.constant dense<0.000000e+00> : vector<8x64xf32>
    %554 = tpu.matmul %553, %549, %cst_450 {dimension_numbers = #tpu.dot_dimension_numbers<[1], [0], [0], [1], [0, 0, 1, 1], [], []>} : vector<8x8xf32>, vector<8x64xf32>, vector<8x64xf32> -> vector<8x64xf32>
    %c0_451 = arith.constant 0 : index
    %c0_452 = arith.constant 0 : index
    %c0_453 = arith.constant 0 : index
    %555 = vector.load %arg32[%c0_451, %c0_452, %c0_453] : memref<9x1x64xf32, #tpu.memory_space<vmem>>, vector<1x1x64xf32>
    %556 = vector.shape_cast %555 : vector<1x1x64xf32> to vector<1x64xf32>
    %557 = vector.broadcast %556 : vector<1x64xf32> to vector<8x64xf32>
    %558 = arith.mulf %554, %557 : vector<8x64xf32>
    %559 = vector.broadcast %550 : vector<1x64xf32> to vector<8x64xf32>
    %560 = arith.addf %559, %558 : vector<8x64xf32>
    %c1_454 = arith.constant 1 : index
    %c0_455 = arith.constant 0 : index
    %c0_456 = arith.constant 0 : index
    %561 = vector.load %arg31[%c1_454, %c0_455, %c0_456] : memref<9x8x8xbf16, #tpu.memory_space<vmem>>, vector<1x8x8xbf16>
    %562 = vector.shape_cast %561 : vector<1x8x8xbf16> to vector<8x8xbf16>
    %563 = arith.extf %562 : vector<8x8xbf16> to vector<8x8xf32>
    %cst_457 = arith.constant dense<0.000000e+00> : vector<8x64xf32>
    %564 = tpu.matmul %563, %549, %cst_457 {dimension_numbers = #tpu.dot_dimension_numbers<[1], [0], [0], [1], [0, 0, 1, 1], [], []>} : vector<8x8xf32>, vector<8x64xf32>, vector<8x64xf32> -> vector<8x64xf32>
    %c1_458 = arith.constant 1 : index
    %c0_459 = arith.constant 0 : index
    %c0_460 = arith.constant 0 : index
    %565 = vector.load %arg32[%c1_458, %c0_459, %c0_460] : memref<9x1x64xf32, #tpu.memory_space<vmem>>, vector<1x1x64xf32>
    %566 = vector.shape_cast %565 : vector<1x1x64xf32> to vector<1x64xf32>
    %567 = vector.broadcast %566 : vector<1x64xf32> to vector<8x64xf32>
    %568 = arith.mulf %564, %567 : vector<8x64xf32>
    %569 = arith.addf %560, %568 : vector<8x64xf32>
    %c2_461 = arith.constant 2 : index
    %c0_462 = arith.constant 0 : index
    %c0_463 = arith.constant 0 : index
    %570 = vector.load %arg31[%c2_461, %c0_462, %c0_463] : memref<9x8x8xbf16, #tpu.memory_space<vmem>>, vector<1x8x8xbf16>
    %571 = vector.shape_cast %570 : vector<1x8x8xbf16> to vector<8x8xbf16>
    %572 = arith.extf %571 : vector<8x8xbf16> to vector<8x8xf32>
    %cst_464 = arith.constant dense<0.000000e+00> : vector<8x64xf32>
    %573 = tpu.matmul %572, %549, %cst_464 {dimension_numbers = #tpu.dot_dimension_numbers<[1], [0], [0], [1], [0, 0, 1, 1], [], []>} : vector<8x8xf32>, vector<8x64xf32>, vector<8x64xf32> -> vector<8x64xf32>
    %c2_465 = arith.constant 2 : index
    %c0_466 = arith.constant 0 : index
    %c0_467 = arith.constant 0 : index
    %574 = vector.load %arg32[%c2_465, %c0_466, %c0_467] : memref<9x1x64xf32, #tpu.memory_space<vmem>>, vector<1x1x64xf32>
    %575 = vector.shape_cast %574 : vector<1x1x64xf32> to vector<1x64xf32>
    %576 = vector.broadcast %575 : vector<1x64xf32> to vector<8x64xf32>
    %577 = arith.mulf %573, %576 : vector<8x64xf32>
    %578 = arith.addf %569, %577 : vector<8x64xf32>
    %c3_468 = arith.constant 3 : index
    %c0_469 = arith.constant 0 : index
    %c0_470 = arith.constant 0 : index
    %579 = vector.load %arg31[%c3_468, %c0_469, %c0_470] : memref<9x8x8xbf16, #tpu.memory_space<vmem>>, vector<1x8x8xbf16>
    %580 = vector.shape_cast %579 : vector<1x8x8xbf16> to vector<8x8xbf16>
    %581 = arith.extf %580 : vector<8x8xbf16> to vector<8x8xf32>
    %cst_471 = arith.constant dense<0.000000e+00> : vector<8x64xf32>
    %582 = tpu.matmul %581, %549, %cst_471 {dimension_numbers = #tpu.dot_dimension_numbers<[1], [0], [0], [1], [0, 0, 1, 1], [], []>} : vector<8x8xf32>, vector<8x64xf32>, vector<8x64xf32> -> vector<8x64xf32>
    %c3_472 = arith.constant 3 : index
    %c0_473 = arith.constant 0 : index
    %c0_474 = arith.constant 0 : index
    %583 = vector.load %arg32[%c3_472, %c0_473, %c0_474] : memref<9x1x64xf32, #tpu.memory_space<vmem>>, vector<1x1x64xf32>
    %584 = vector.shape_cast %583 : vector<1x1x64xf32> to vector<1x64xf32>
    %585 = vector.broadcast %584 : vector<1x64xf32> to vector<8x64xf32>
    %586 = arith.mulf %582, %585 : vector<8x64xf32>
    %587 = arith.addf %578, %586 : vector<8x64xf32>
    %c4_475 = arith.constant 4 : index
    %c0_476 = arith.constant 0 : index
    %c0_477 = arith.constant 0 : index
    %588 = vector.load %arg31[%c4_475, %c0_476, %c0_477] : memref<9x8x8xbf16, #tpu.memory_space<vmem>>, vector<1x8x8xbf16>
    %589 = vector.shape_cast %588 : vector<1x8x8xbf16> to vector<8x8xbf16>
    %590 = arith.extf %589 : vector<8x8xbf16> to vector<8x8xf32>
    %cst_478 = arith.constant dense<0.000000e+00> : vector<8x64xf32>
    %591 = tpu.matmul %590, %549, %cst_478 {dimension_numbers = #tpu.dot_dimension_numbers<[1], [0], [0], [1], [0, 0, 1, 1], [], []>} : vector<8x8xf32>, vector<8x64xf32>, vector<8x64xf32> -> vector<8x64xf32>
    %c4_479 = arith.constant 4 : index
    %c0_480 = arith.constant 0 : index
    %c0_481 = arith.constant 0 : index
    %592 = vector.load %arg32[%c4_479, %c0_480, %c0_481] : memref<9x1x64xf32, #tpu.memory_space<vmem>>, vector<1x1x64xf32>
    %593 = vector.shape_cast %592 : vector<1x1x64xf32> to vector<1x64xf32>
    %594 = vector.broadcast %593 : vector<1x64xf32> to vector<8x64xf32>
    %595 = arith.mulf %591, %594 : vector<8x64xf32>
    %596 = arith.addf %587, %595 : vector<8x64xf32>
    %c5_482 = arith.constant 5 : index
    %c0_483 = arith.constant 0 : index
    %c0_484 = arith.constant 0 : index
    %597 = vector.load %arg31[%c5_482, %c0_483, %c0_484] : memref<9x8x8xbf16, #tpu.memory_space<vmem>>, vector<1x8x8xbf16>
    %598 = vector.shape_cast %597 : vector<1x8x8xbf16> to vector<8x8xbf16>
    %599 = arith.extf %598 : vector<8x8xbf16> to vector<8x8xf32>
    %cst_485 = arith.constant dense<0.000000e+00> : vector<8x64xf32>
    %600 = tpu.matmul %599, %549, %cst_485 {dimension_numbers = #tpu.dot_dimension_numbers<[1], [0], [0], [1], [0, 0, 1, 1], [], []>} : vector<8x8xf32>, vector<8x64xf32>, vector<8x64xf32> -> vector<8x64xf32>
    %c5_486 = arith.constant 5 : index
    %c0_487 = arith.constant 0 : index
    %c0_488 = arith.constant 0 : index
    %601 = vector.load %arg32[%c5_486, %c0_487, %c0_488] : memref<9x1x64xf32, #tpu.memory_space<vmem>>, vector<1x1x64xf32>
    %602 = vector.shape_cast %601 : vector<1x1x64xf32> to vector<1x64xf32>
    %603 = vector.broadcast %602 : vector<1x64xf32> to vector<8x64xf32>
    %604 = arith.mulf %600, %603 : vector<8x64xf32>
    %605 = arith.addf %596, %604 : vector<8x64xf32>
    %c6_489 = arith.constant 6 : index
    %c0_490 = arith.constant 0 : index
    %c0_491 = arith.constant 0 : index
    %606 = vector.load %arg31[%c6_489, %c0_490, %c0_491] : memref<9x8x8xbf16, #tpu.memory_space<vmem>>, vector<1x8x8xbf16>
    %607 = vector.shape_cast %606 : vector<1x8x8xbf16> to vector<8x8xbf16>
    %608 = arith.extf %607 : vector<8x8xbf16> to vector<8x8xf32>
    %cst_492 = arith.constant dense<0.000000e+00> : vector<8x64xf32>
    %609 = tpu.matmul %608, %549, %cst_492 {dimension_numbers = #tpu.dot_dimension_numbers<[1], [0], [0], [1], [0, 0, 1, 1], [], []>} : vector<8x8xf32>, vector<8x64xf32>, vector<8x64xf32> -> vector<8x64xf32>
    %c6_493 = arith.constant 6 : index
    %c0_494 = arith.constant 0 : index
    %c0_495 = arith.constant 0 : index
    %610 = vector.load %arg32[%c6_493, %c0_494, %c0_495] : memref<9x1x64xf32, #tpu.memory_space<vmem>>, vector<1x1x64xf32>
    %611 = vector.shape_cast %610 : vector<1x1x64xf32> to vector<1x64xf32>
    %612 = vector.broadcast %611 : vector<1x64xf32> to vector<8x64xf32>
    %613 = arith.mulf %609, %612 : vector<8x64xf32>
    %614 = arith.addf %605, %613 : vector<8x64xf32>
    %c7_496 = arith.constant 7 : index
    %c0_497 = arith.constant 0 : index
    %c0_498 = arith.constant 0 : index
    %615 = vector.load %arg31[%c7_496, %c0_497, %c0_498] : memref<9x8x8xbf16, #tpu.memory_space<vmem>>, vector<1x8x8xbf16>
    %616 = vector.shape_cast %615 : vector<1x8x8xbf16> to vector<8x8xbf16>
    %617 = arith.extf %616 : vector<8x8xbf16> to vector<8x8xf32>
    %cst_499 = arith.constant dense<0.000000e+00> : vector<8x64xf32>
    %618 = tpu.matmul %617, %549, %cst_499 {dimension_numbers = #tpu.dot_dimension_numbers<[1], [0], [0], [1], [0, 0, 1, 1], [], []>} : vector<8x8xf32>, vector<8x64xf32>, vector<8x64xf32> -> vector<8x64xf32>
    %c7_500 = arith.constant 7 : index
    %c0_501 = arith.constant 0 : index
    %c0_502 = arith.constant 0 : index
    %619 = vector.load %arg32[%c7_500, %c0_501, %c0_502] : memref<9x1x64xf32, #tpu.memory_space<vmem>>, vector<1x1x64xf32>
    %620 = vector.shape_cast %619 : vector<1x1x64xf32> to vector<1x64xf32>
    %621 = vector.broadcast %620 : vector<1x64xf32> to vector<8x64xf32>
    %622 = arith.mulf %618, %621 : vector<8x64xf32>
    %623 = arith.addf %614, %622 : vector<8x64xf32>
    %c8_503 = arith.constant 8 : index
    %c0_504 = arith.constant 0 : index
    %c0_505 = arith.constant 0 : index
    %624 = vector.load %arg31[%c8_503, %c0_504, %c0_505] : memref<9x8x8xbf16, #tpu.memory_space<vmem>>, vector<1x8x8xbf16>
    %625 = vector.shape_cast %624 : vector<1x8x8xbf16> to vector<8x8xbf16>
    %626 = arith.extf %625 : vector<8x8xbf16> to vector<8x8xf32>
    %cst_506 = arith.constant dense<0.000000e+00> : vector<8x64xf32>
    %627 = tpu.matmul %626, %549, %cst_506 {dimension_numbers = #tpu.dot_dimension_numbers<[1], [0], [0], [1], [0, 0, 1, 1], [], []>} : vector<8x8xf32>, vector<8x64xf32>, vector<8x64xf32> -> vector<8x64xf32>
    %c8_507 = arith.constant 8 : index
    %c0_508 = arith.constant 0 : index
    %c0_509 = arith.constant 0 : index
    %628 = vector.load %arg32[%c8_507, %c0_508, %c0_509] : memref<9x1x64xf32, #tpu.memory_space<vmem>>, vector<1x1x64xf32>
    %629 = vector.shape_cast %628 : vector<1x1x64xf32> to vector<1x64xf32>
    %630 = vector.broadcast %629 : vector<1x64xf32> to vector<8x64xf32>
    %631 = arith.mulf %627, %630 : vector<8x64xf32>
    %632 = arith.addf %623, %631 : vector<8x64xf32>
    %c0_510 = arith.constant 0 : index
    %c0_511 = arith.constant 0 : index
    %633 = vector.load %arg34[%c0_510, %c0_511] : memref<64x128xf32, #tpu.memory_space<vmem>>, vector<64x128xf32>
    %cst_512 = arith.constant dense<0.000000e+00> : vector<8x128xf32>
    %634 = tpu.matmul %632, %633, %cst_512 {dimension_numbers = #tpu.dot_dimension_numbers<[1], [0], [0], [1], [0, 0, 1, 1], [], []>} : vector<8x64xf32>, vector<64x128xf32>, vector<8x128xf32> -> vector<8x128xf32>
    %c0_513 = arith.constant 0 : index
    %c0_514 = arith.constant 0 : index
    %635 = vector.load %arg35[%c0_513, %c0_514] : memref<1x128xf32, #tpu.memory_space<vmem>>, vector<1x128xf32>
    %636 = vector.broadcast %635 : vector<1x128xf32> to vector<8x128xf32>
    %637 = arith.addf %634, %636 : vector<8x128xf32>
    %cst_515 = arith.constant 0.000000e+00 : f32
    %638 = vector.broadcast %cst_515 : f32 to vector<8x128xf32>
    %639 = arith.maximumf %637, %638 : vector<8x128xf32>
    %c0_516 = arith.constant 0 : index
    %c0_517 = arith.constant 0 : index
    %640 = vector.load %arg37[%c0_516, %c0_517] : memref<1x128xf32, #tpu.memory_space<vmem>>, vector<1x128xf32>
    %c0_518 = arith.constant 0 : index
    %c0_519 = arith.constant 0 : index
    %c0_520 = arith.constant 0 : index
    %641 = vector.load %arg31[%c0_518, %c0_519, %c0_520] : memref<9x8x8xbf16, #tpu.memory_space<vmem>>, vector<1x8x8xbf16>
    %642 = vector.shape_cast %641 : vector<1x8x8xbf16> to vector<8x8xbf16>
    %643 = arith.extf %642 : vector<8x8xbf16> to vector<8x8xf32>
    %cst_521 = arith.constant dense<0.000000e+00> : vector<8x128xf32>
    %644 = tpu.matmul %643, %639, %cst_521 {dimension_numbers = #tpu.dot_dimension_numbers<[1], [0], [0], [1], [0, 0, 1, 1], [], []>} : vector<8x8xf32>, vector<8x128xf32>, vector<8x128xf32> -> vector<8x128xf32>
    %c0_522 = arith.constant 0 : index
    %c0_523 = arith.constant 0 : index
    %c0_524 = arith.constant 0 : index
    %645 = vector.load %arg36[%c0_522, %c0_523, %c0_524] : memref<9x1x128xf32, #tpu.memory_space<vmem>>, vector<1x1x128xf32>
    %646 = vector.shape_cast %645 : vector<1x1x128xf32> to vector<1x128xf32>
    %647 = vector.broadcast %646 : vector<1x128xf32> to vector<8x128xf32>
    %648 = arith.mulf %644, %647 : vector<8x128xf32>
    %649 = vector.broadcast %640 : vector<1x128xf32> to vector<8x128xf32>
    %650 = arith.addf %649, %648 : vector<8x128xf32>
    %c1_525 = arith.constant 1 : index
    %c0_526 = arith.constant 0 : index
    %c0_527 = arith.constant 0 : index
    %651 = vector.load %arg31[%c1_525, %c0_526, %c0_527] : memref<9x8x8xbf16, #tpu.memory_space<vmem>>, vector<1x8x8xbf16>
    %652 = vector.shape_cast %651 : vector<1x8x8xbf16> to vector<8x8xbf16>
    %653 = arith.extf %652 : vector<8x8xbf16> to vector<8x8xf32>
    %cst_528 = arith.constant dense<0.000000e+00> : vector<8x128xf32>
    %654 = tpu.matmul %653, %639, %cst_528 {dimension_numbers = #tpu.dot_dimension_numbers<[1], [0], [0], [1], [0, 0, 1, 1], [], []>} : vector<8x8xf32>, vector<8x128xf32>, vector<8x128xf32> -> vector<8x128xf32>
    %c1_529 = arith.constant 1 : index
    %c0_530 = arith.constant 0 : index
    %c0_531 = arith.constant 0 : index
    %655 = vector.load %arg36[%c1_529, %c0_530, %c0_531] : memref<9x1x128xf32, #tpu.memory_space<vmem>>, vector<1x1x128xf32>
    %656 = vector.shape_cast %655 : vector<1x1x128xf32> to vector<1x128xf32>
    %657 = vector.broadcast %656 : vector<1x128xf32> to vector<8x128xf32>
    %658 = arith.mulf %654, %657 : vector<8x128xf32>
    %659 = arith.addf %650, %658 : vector<8x128xf32>
    %c2_532 = arith.constant 2 : index
    %c0_533 = arith.constant 0 : index
    %c0_534 = arith.constant 0 : index
    %660 = vector.load %arg31[%c2_532, %c0_533, %c0_534] : memref<9x8x8xbf16, #tpu.memory_space<vmem>>, vector<1x8x8xbf16>
    %661 = vector.shape_cast %660 : vector<1x8x8xbf16> to vector<8x8xbf16>
    %662 = arith.extf %661 : vector<8x8xbf16> to vector<8x8xf32>
    %cst_535 = arith.constant dense<0.000000e+00> : vector<8x128xf32>
    %663 = tpu.matmul %662, %639, %cst_535 {dimension_numbers = #tpu.dot_dimension_numbers<[1], [0], [0], [1], [0, 0, 1, 1], [], []>} : vector<8x8xf32>, vector<8x128xf32>, vector<8x128xf32> -> vector<8x128xf32>
    %c2_536 = arith.constant 2 : index
    %c0_537 = arith.constant 0 : index
    %c0_538 = arith.constant 0 : index
    %664 = vector.load %arg36[%c2_536, %c0_537, %c0_538] : memref<9x1x128xf32, #tpu.memory_space<vmem>>, vector<1x1x128xf32>
    %665 = vector.shape_cast %664 : vector<1x1x128xf32> to vector<1x128xf32>
    %666 = vector.broadcast %665 : vector<1x128xf32> to vector<8x128xf32>
    %667 = arith.mulf %663, %666 : vector<8x128xf32>
    %668 = arith.addf %659, %667 : vector<8x128xf32>
    %c3_539 = arith.constant 3 : index
    %c0_540 = arith.constant 0 : index
    %c0_541 = arith.constant 0 : index
    %669 = vector.load %arg31[%c3_539, %c0_540, %c0_541] : memref<9x8x8xbf16, #tpu.memory_space<vmem>>, vector<1x8x8xbf16>
    %670 = vector.shape_cast %669 : vector<1x8x8xbf16> to vector<8x8xbf16>
    %671 = arith.extf %670 : vector<8x8xbf16> to vector<8x8xf32>
    %cst_542 = arith.constant dense<0.000000e+00> : vector<8x128xf32>
    %672 = tpu.matmul %671, %639, %cst_542 {dimension_numbers = #tpu.dot_dimension_numbers<[1], [0], [0], [1], [0, 0, 1, 1], [], []>} : vector<8x8xf32>, vector<8x128xf32>, vector<8x128xf32> -> vector<8x128xf32>
    %c3_543 = arith.constant 3 : index
    %c0_544 = arith.constant 0 : index
    %c0_545 = arith.constant 0 : index
    %673 = vector.load %arg36[%c3_543, %c0_544, %c0_545] : memref<9x1x128xf32, #tpu.memory_space<vmem>>, vector<1x1x128xf32>
    %674 = vector.shape_cast %673 : vector<1x1x128xf32> to vector<1x128xf32>
    %675 = vector.broadcast %674 : vector<1x128xf32> to vector<8x128xf32>
    %676 = arith.mulf %672, %675 : vector<8x128xf32>
    %677 = arith.addf %668, %676 : vector<8x128xf32>
    %c4_546 = arith.constant 4 : index
    %c0_547 = arith.constant 0 : index
    %c0_548 = arith.constant 0 : index
    %678 = vector.load %arg31[%c4_546, %c0_547, %c0_548] : memref<9x8x8xbf16, #tpu.memory_space<vmem>>, vector<1x8x8xbf16>
    %679 = vector.shape_cast %678 : vector<1x8x8xbf16> to vector<8x8xbf16>
    %680 = arith.extf %679 : vector<8x8xbf16> to vector<8x8xf32>
    %cst_549 = arith.constant dense<0.000000e+00> : vector<8x128xf32>
    %681 = tpu.matmul %680, %639, %cst_549 {dimension_numbers = #tpu.dot_dimension_numbers<[1], [0], [0], [1], [0, 0, 1, 1], [], []>} : vector<8x8xf32>, vector<8x128xf32>, vector<8x128xf32> -> vector<8x128xf32>
    %c4_550 = arith.constant 4 : index
    %c0_551 = arith.constant 0 : index
    %c0_552 = arith.constant 0 : index
    %682 = vector.load %arg36[%c4_550, %c0_551, %c0_552] : memref<9x1x128xf32, #tpu.memory_space<vmem>>, vector<1x1x128xf32>
    %683 = vector.shape_cast %682 : vector<1x1x128xf32> to vector<1x128xf32>
    %684 = vector.broadcast %683 : vector<1x128xf32> to vector<8x128xf32>
    %685 = arith.mulf %681, %684 : vector<8x128xf32>
    %686 = arith.addf %677, %685 : vector<8x128xf32>
    %c5_553 = arith.constant 5 : index
    %c0_554 = arith.constant 0 : index
    %c0_555 = arith.constant 0 : index
    %687 = vector.load %arg31[%c5_553, %c0_554, %c0_555] : memref<9x8x8xbf16, #tpu.memory_space<vmem>>, vector<1x8x8xbf16>
    %688 = vector.shape_cast %687 : vector<1x8x8xbf16> to vector<8x8xbf16>
    %689 = arith.extf %688 : vector<8x8xbf16> to vector<8x8xf32>
    %cst_556 = arith.constant dense<0.000000e+00> : vector<8x128xf32>
    %690 = tpu.matmul %689, %639, %cst_556 {dimension_numbers = #tpu.dot_dimension_numbers<[1], [0], [0], [1], [0, 0, 1, 1], [], []>} : vector<8x8xf32>, vector<8x128xf32>, vector<8x128xf32> -> vector<8x128xf32>
    %c5_557 = arith.constant 5 : index
    %c0_558 = arith.constant 0 : index
    %c0_559 = arith.constant 0 : index
    %691 = vector.load %arg36[%c5_557, %c0_558, %c0_559] : memref<9x1x128xf32, #tpu.memory_space<vmem>>, vector<1x1x128xf32>
    %692 = vector.shape_cast %691 : vector<1x1x128xf32> to vector<1x128xf32>
    %693 = vector.broadcast %692 : vector<1x128xf32> to vector<8x128xf32>
    %694 = arith.mulf %690, %693 : vector<8x128xf32>
    %695 = arith.addf %686, %694 : vector<8x128xf32>
    %c6_560 = arith.constant 6 : index
    %c0_561 = arith.constant 0 : index
    %c0_562 = arith.constant 0 : index
    %696 = vector.load %arg31[%c6_560, %c0_561, %c0_562] : memref<9x8x8xbf16, #tpu.memory_space<vmem>>, vector<1x8x8xbf16>
    %697 = vector.shape_cast %696 : vector<1x8x8xbf16> to vector<8x8xbf16>
    %698 = arith.extf %697 : vector<8x8xbf16> to vector<8x8xf32>
    %cst_563 = arith.constant dense<0.000000e+00> : vector<8x128xf32>
    %699 = tpu.matmul %698, %639, %cst_563 {dimension_numbers = #tpu.dot_dimension_numbers<[1], [0], [0], [1], [0, 0, 1, 1], [], []>} : vector<8x8xf32>, vector<8x128xf32>, vector<8x128xf32> -> vector<8x128xf32>
    %c6_564 = arith.constant 6 : index
    %c0_565 = arith.constant 0 : index
    %c0_566 = arith.constant 0 : index
    %700 = vector.load %arg36[%c6_564, %c0_565, %c0_566] : memref<9x1x128xf32, #tpu.memory_space<vmem>>, vector<1x1x128xf32>
    %701 = vector.shape_cast %700 : vector<1x1x128xf32> to vector<1x128xf32>
    %702 = vector.broadcast %701 : vector<1x128xf32> to vector<8x128xf32>
    %703 = arith.mulf %699, %702 : vector<8x128xf32>
    %704 = arith.addf %695, %703 : vector<8x128xf32>
    %c7_567 = arith.constant 7 : index
    %c0_568 = arith.constant 0 : index
    %c0_569 = arith.constant 0 : index
    %705 = vector.load %arg31[%c7_567, %c0_568, %c0_569] : memref<9x8x8xbf16, #tpu.memory_space<vmem>>, vector<1x8x8xbf16>
    %706 = vector.shape_cast %705 : vector<1x8x8xbf16> to vector<8x8xbf16>
    %707 = arith.extf %706 : vector<8x8xbf16> to vector<8x8xf32>
    %cst_570 = arith.constant dense<0.000000e+00> : vector<8x128xf32>
    %708 = tpu.matmul %707, %639, %cst_570 {dimension_numbers = #tpu.dot_dimension_numbers<[1], [0], [0], [1], [0, 0, 1, 1], [], []>} : vector<8x8xf32>, vector<8x128xf32>, vector<8x128xf32> -> vector<8x128xf32>
    %c7_571 = arith.constant 7 : index
    %c0_572 = arith.constant 0 : index
    %c0_573 = arith.constant 0 : index
    %709 = vector.load %arg36[%c7_571, %c0_572, %c0_573] : memref<9x1x128xf32, #tpu.memory_space<vmem>>, vector<1x1x128xf32>
    %710 = vector.shape_cast %709 : vector<1x1x128xf32> to vector<1x128xf32>
    %711 = vector.broadcast %710 : vector<1x128xf32> to vector<8x128xf32>
    %712 = arith.mulf %708, %711 : vector<8x128xf32>
    %713 = arith.addf %704, %712 : vector<8x128xf32>
    %c8_574 = arith.constant 8 : index
    %c0_575 = arith.constant 0 : index
    %c0_576 = arith.constant 0 : index
    %714 = vector.load %arg31[%c8_574, %c0_575, %c0_576] : memref<9x8x8xbf16, #tpu.memory_space<vmem>>, vector<1x8x8xbf16>
    %715 = vector.shape_cast %714 : vector<1x8x8xbf16> to vector<8x8xbf16>
    %716 = arith.extf %715 : vector<8x8xbf16> to vector<8x8xf32>
    %cst_577 = arith.constant dense<0.000000e+00> : vector<8x128xf32>
    %717 = tpu.matmul %716, %639, %cst_577 {dimension_numbers = #tpu.dot_dimension_numbers<[1], [0], [0], [1], [0, 0, 1, 1], [], []>} : vector<8x8xf32>, vector<8x128xf32>, vector<8x128xf32> -> vector<8x128xf32>
    %c8_578 = arith.constant 8 : index
    %c0_579 = arith.constant 0 : index
    %c0_580 = arith.constant 0 : index
    %718 = vector.load %arg36[%c8_578, %c0_579, %c0_580] : memref<9x1x128xf32, #tpu.memory_space<vmem>>, vector<1x1x128xf32>
    %719 = vector.shape_cast %718 : vector<1x1x128xf32> to vector<1x128xf32>
    %720 = vector.broadcast %719 : vector<1x128xf32> to vector<8x128xf32>
    %721 = arith.mulf %717, %720 : vector<8x128xf32>
    %722 = arith.addf %713, %721 : vector<8x128xf32>
    %c0_581 = arith.constant 0 : index
    %c0_582 = arith.constant 0 : index
    %723 = vector.load %arg38[%c0_581, %c0_582] : memref<128x128xf32, #tpu.memory_space<vmem>>, vector<128x128xf32>
    %cst_583 = arith.constant dense<0.000000e+00> : vector<8x128xf32>
    %724 = tpu.matmul %722, %723, %cst_583 {dimension_numbers = #tpu.dot_dimension_numbers<[1], [0], [0], [1], [0, 0, 1, 1], [], []>} : vector<8x128xf32>, vector<128x128xf32>, vector<8x128xf32> -> vector<8x128xf32>
    %c0_584 = arith.constant 0 : index
    %c0_585 = arith.constant 0 : index
    %725 = vector.load %arg39[%c0_584, %c0_585] : memref<1x128xf32, #tpu.memory_space<vmem>>, vector<1x128xf32>
    %726 = vector.broadcast %725 : vector<1x128xf32> to vector<8x128xf32>
    %727 = arith.addf %724, %726 : vector<8x128xf32>
    %c0_586 = arith.constant 0 : index
    %c0_587 = arith.constant 0 : index
    %c0_588 = arith.constant 0 : index
    %728 = vector.load %arg40[%c0_586, %c0_587, %c0_588] : memref<9x2x8xbf16, #tpu.memory_space<vmem>>, vector<1x2x8xbf16>
    %729 = vector.shape_cast %728 : vector<1x2x8xbf16> to vector<2x8xbf16>
    %730 = arith.extf %729 : vector<2x8xbf16> to vector<2x8xf32>
    %cst_589 = arith.constant dense<0.000000e+00> : vector<2x128xf32>
    %731 = tpu.matmul %730, %727, %cst_589 {dimension_numbers = #tpu.dot_dimension_numbers<[1], [0], [0], [1], [0, 0, 1, 1], [], []>} : vector<2x8xf32>, vector<8x128xf32>, vector<2x128xf32> -> vector<2x128xf32>
    %c1_590 = arith.constant 1 : index
    %c0_591 = arith.constant 0 : index
    %c0_592 = arith.constant 0 : index
    %732 = vector.load %arg40[%c1_590, %c0_591, %c0_592] : memref<9x2x8xbf16, #tpu.memory_space<vmem>>, vector<1x2x8xbf16>
    %733 = vector.shape_cast %732 : vector<1x2x8xbf16> to vector<2x8xbf16>
    %734 = arith.extf %733 : vector<2x8xbf16> to vector<2x8xf32>
    %cst_593 = arith.constant dense<0.000000e+00> : vector<2x128xf32>
    %735 = tpu.matmul %734, %727, %cst_593 {dimension_numbers = #tpu.dot_dimension_numbers<[1], [0], [0], [1], [0, 0, 1, 1], [], []>} : vector<2x8xf32>, vector<8x128xf32>, vector<2x128xf32> -> vector<2x128xf32>
    %736 = arith.maximumf %731, %735 : vector<2x128xf32>
    %c2_594 = arith.constant 2 : index
    %c0_595 = arith.constant 0 : index
    %c0_596 = arith.constant 0 : index
    %737 = vector.load %arg40[%c2_594, %c0_595, %c0_596] : memref<9x2x8xbf16, #tpu.memory_space<vmem>>, vector<1x2x8xbf16>
    %738 = vector.shape_cast %737 : vector<1x2x8xbf16> to vector<2x8xbf16>
    %739 = arith.extf %738 : vector<2x8xbf16> to vector<2x8xf32>
    %cst_597 = arith.constant dense<0.000000e+00> : vector<2x128xf32>
    %740 = tpu.matmul %739, %727, %cst_597 {dimension_numbers = #tpu.dot_dimension_numbers<[1], [0], [0], [1], [0, 0, 1, 1], [], []>} : vector<2x8xf32>, vector<8x128xf32>, vector<2x128xf32> -> vector<2x128xf32>
    %741 = arith.maximumf %736, %740 : vector<2x128xf32>
    %c3_598 = arith.constant 3 : index
    %c0_599 = arith.constant 0 : index
    %c0_600 = arith.constant 0 : index
    %742 = vector.load %arg40[%c3_598, %c0_599, %c0_600] : memref<9x2x8xbf16, #tpu.memory_space<vmem>>, vector<1x2x8xbf16>
    %743 = vector.shape_cast %742 : vector<1x2x8xbf16> to vector<2x8xbf16>
    %744 = arith.extf %743 : vector<2x8xbf16> to vector<2x8xf32>
    %cst_601 = arith.constant dense<0.000000e+00> : vector<2x128xf32>
    %745 = tpu.matmul %744, %727, %cst_601 {dimension_numbers = #tpu.dot_dimension_numbers<[1], [0], [0], [1], [0, 0, 1, 1], [], []>} : vector<2x8xf32>, vector<8x128xf32>, vector<2x128xf32> -> vector<2x128xf32>
    %746 = arith.maximumf %741, %745 : vector<2x128xf32>
    %c4_602 = arith.constant 4 : index
    %c0_603 = arith.constant 0 : index
    %c0_604 = arith.constant 0 : index
    %747 = vector.load %arg40[%c4_602, %c0_603, %c0_604] : memref<9x2x8xbf16, #tpu.memory_space<vmem>>, vector<1x2x8xbf16>
    %748 = vector.shape_cast %747 : vector<1x2x8xbf16> to vector<2x8xbf16>
    %749 = arith.extf %748 : vector<2x8xbf16> to vector<2x8xf32>
    %cst_605 = arith.constant dense<0.000000e+00> : vector<2x128xf32>
    %750 = tpu.matmul %749, %727, %cst_605 {dimension_numbers = #tpu.dot_dimension_numbers<[1], [0], [0], [1], [0, 0, 1, 1], [], []>} : vector<2x8xf32>, vector<8x128xf32>, vector<2x128xf32> -> vector<2x128xf32>
    %751 = arith.maximumf %746, %750 : vector<2x128xf32>
    %c5_606 = arith.constant 5 : index
    %c0_607 = arith.constant 0 : index
    %c0_608 = arith.constant 0 : index
    %752 = vector.load %arg40[%c5_606, %c0_607, %c0_608] : memref<9x2x8xbf16, #tpu.memory_space<vmem>>, vector<1x2x8xbf16>
    %753 = vector.shape_cast %752 : vector<1x2x8xbf16> to vector<2x8xbf16>
    %754 = arith.extf %753 : vector<2x8xbf16> to vector<2x8xf32>
    %cst_609 = arith.constant dense<0.000000e+00> : vector<2x128xf32>
    %755 = tpu.matmul %754, %727, %cst_609 {dimension_numbers = #tpu.dot_dimension_numbers<[1], [0], [0], [1], [0, 0, 1, 1], [], []>} : vector<2x8xf32>, vector<8x128xf32>, vector<2x128xf32> -> vector<2x128xf32>
    %756 = arith.maximumf %751, %755 : vector<2x128xf32>
    %c6_610 = arith.constant 6 : index
    %c0_611 = arith.constant 0 : index
    %c0_612 = arith.constant 0 : index
    %757 = vector.load %arg40[%c6_610, %c0_611, %c0_612] : memref<9x2x8xbf16, #tpu.memory_space<vmem>>, vector<1x2x8xbf16>
    %758 = vector.shape_cast %757 : vector<1x2x8xbf16> to vector<2x8xbf16>
    %759 = arith.extf %758 : vector<2x8xbf16> to vector<2x8xf32>
    %cst_613 = arith.constant dense<0.000000e+00> : vector<2x128xf32>
    %760 = tpu.matmul %759, %727, %cst_613 {dimension_numbers = #tpu.dot_dimension_numbers<[1], [0], [0], [1], [0, 0, 1, 1], [], []>} : vector<2x8xf32>, vector<8x128xf32>, vector<2x128xf32> -> vector<2x128xf32>
    %761 = arith.maximumf %756, %760 : vector<2x128xf32>
    %c7_614 = arith.constant 7 : index
    %c0_615 = arith.constant 0 : index
    %c0_616 = arith.constant 0 : index
    %762 = vector.load %arg40[%c7_614, %c0_615, %c0_616] : memref<9x2x8xbf16, #tpu.memory_space<vmem>>, vector<1x2x8xbf16>
    %763 = vector.shape_cast %762 : vector<1x2x8xbf16> to vector<2x8xbf16>
    %764 = arith.extf %763 : vector<2x8xbf16> to vector<2x8xf32>
    %cst_617 = arith.constant dense<0.000000e+00> : vector<2x128xf32>
    %765 = tpu.matmul %764, %727, %cst_617 {dimension_numbers = #tpu.dot_dimension_numbers<[1], [0], [0], [1], [0, 0, 1, 1], [], []>} : vector<2x8xf32>, vector<8x128xf32>, vector<2x128xf32> -> vector<2x128xf32>
    %766 = arith.maximumf %761, %765 : vector<2x128xf32>
    %c8_618 = arith.constant 8 : index
    %c0_619 = arith.constant 0 : index
    %c0_620 = arith.constant 0 : index
    %767 = vector.load %arg40[%c8_618, %c0_619, %c0_620] : memref<9x2x8xbf16, #tpu.memory_space<vmem>>, vector<1x2x8xbf16>
    %768 = vector.shape_cast %767 : vector<1x2x8xbf16> to vector<2x8xbf16>
    %769 = arith.extf %768 : vector<2x8xbf16> to vector<2x8xf32>
    %cst_621 = arith.constant dense<0.000000e+00> : vector<2x128xf32>
    %770 = tpu.matmul %769, %727, %cst_621 {dimension_numbers = #tpu.dot_dimension_numbers<[1], [0], [0], [1], [0, 0, 1, 1], [], []>} : vector<2x8xf32>, vector<8x128xf32>, vector<2x128xf32> -> vector<2x128xf32>
    %771 = arith.maximumf %766, %770 : vector<2x128xf32>
    %c0_622 = arith.constant 0 : index
    %c0_623 = arith.constant 0 : index
    %772 = vector.load %arg41[%c0_622, %c0_623] : memref<2x8xbf16, #tpu.memory_space<vmem>>, vector<2x8xbf16>
    %773 = arith.extf %772 : vector<2x8xbf16> to vector<2x8xf32>
    %cst_624 = arith.constant dense<0.000000e+00> : vector<2x64xf32>
    %774 = tpu.matmul %773, %547, %cst_624 {dimension_numbers = #tpu.dot_dimension_numbers<[1], [0], [0], [1], [0, 0, 1, 1], [], []>} : vector<2x8xf32>, vector<8x64xf32>, vector<2x64xf32> -> vector<2x64xf32>
    %c0_625 = arith.constant 0 : index
    %c0_626 = arith.constant 0 : index
    %775 = vector.load %arg42[%c0_625, %c0_626] : memref<64x128xf32, #tpu.memory_space<vmem>>, vector<64x128xf32>
    %cst_627 = arith.constant dense<0.000000e+00> : vector<2x128xf32>
    %776 = tpu.matmul %774, %775, %cst_627 {dimension_numbers = #tpu.dot_dimension_numbers<[1], [0], [0], [1], [0, 0, 1, 1], [], []>} : vector<2x64xf32>, vector<64x128xf32>, vector<2x128xf32> -> vector<2x128xf32>
    %c0_628 = arith.constant 0 : index
    %c0_629 = arith.constant 0 : index
    %777 = vector.load %arg43[%c0_628, %c0_629] : memref<1x128xf32, #tpu.memory_space<vmem>>, vector<1x128xf32>
    %778 = vector.broadcast %777 : vector<1x128xf32> to vector<2x128xf32>
    %779 = arith.addf %776, %778 : vector<2x128xf32>
    %780 = arith.addf %771, %779 : vector<2x128xf32>
    %c0_630 = arith.constant 0 : index
    %c0_631 = arith.constant 0 : index
    %c0_632 = arith.constant 0 : index
    %781 = vector.load %arg44[%c0_630, %c0_631, %c0_632] : memref<1x1x128xf32, #tpu.memory_space<vmem>>, vector<1x1x128xf32>
    %782 = vector.shape_cast %781 : vector<1x1x128xf32> to vector<1x128xf32>
    %783 = vector.broadcast %782 : vector<1x128xf32> to vector<2x128xf32>
    %784 = arith.mulf %780, %783 : vector<2x128xf32>
    %c0_633 = arith.constant 0 : index
    %c0_634 = arith.constant 0 : index
    %785 = vector.load %arg45[%c0_633, %c0_634] : memref<1x128xf32, #tpu.memory_space<vmem>>, vector<1x128xf32>
    %786 = vector.broadcast %785 : vector<1x128xf32> to vector<2x128xf32>
    %787 = arith.addf %784, %786 : vector<2x128xf32>
    %c0_635 = arith.constant 0 : index
    %c0_636 = arith.constant 0 : index
    %788 = vector.load %arg46[%c0_635, %c0_636] : memref<128x256xf32, #tpu.memory_space<vmem>>, vector<128x256xf32>
    %cst_637 = arith.constant dense<0.000000e+00> : vector<2x256xf32>
    %789 = tpu.matmul %787, %788, %cst_637 {dimension_numbers = #tpu.dot_dimension_numbers<[1], [0], [0], [1], [0, 0, 1, 1], [], []>} : vector<2x128xf32>, vector<128x256xf32>, vector<2x256xf32> -> vector<2x256xf32>
    %c0_638 = arith.constant 0 : index
    %c0_639 = arith.constant 0 : index
    %790 = vector.load %arg47[%c0_638, %c0_639] : memref<1x256xf32, #tpu.memory_space<vmem>>, vector<1x256xf32>
    %791 = vector.broadcast %790 : vector<1x256xf32> to vector<2x256xf32>
    %792 = arith.addf %789, %791 : vector<2x256xf32>
    %cst_640 = arith.constant 0.000000e+00 : f32
    %793 = vector.broadcast %cst_640 : f32 to vector<2x256xf32>
    %794 = arith.maximumf %792, %793 : vector<2x256xf32>
    %c0_641 = arith.constant 0 : index
    %c0_642 = arith.constant 0 : index
    %795 = vector.load %arg48[%c0_641, %c0_642] : memref<256x10xf32, #tpu.memory_space<vmem>>, vector<256x10xf32>
    %cst_643 = arith.constant dense<0.000000e+00> : vector<2x10xf32>
    %796 = tpu.matmul %794, %795, %cst_643 {dimension_numbers = #tpu.dot_dimension_numbers<[1], [0], [0], [1], [0, 0, 1, 1], [], []>} : vector<2x256xf32>, vector<256x10xf32>, vector<2x10xf32> -> vector<2x10xf32>
    %c0_644 = arith.constant 0 : index
    %c0_645 = arith.constant 0 : index
    %797 = vector.load %arg49[%c0_644, %c0_645] : memref<1x10xf32, #tpu.memory_space<vmem>>, vector<1x10xf32>
    %798 = vector.broadcast %797 : vector<1x10xf32> to vector<2x10xf32>
    %799 = arith.addf %796, %798 : vector<2x10xf32>
    %cst_646 = arith.constant dense<0xFF800000> : vector<2xf32>
    %800 = vector.multi_reduction <maximumf>, %799, %cst_646 [1] : vector<2x10xf32> to vector<2xf32>
    %801 = vector.shape_cast %800 : vector<2xf32> to vector<2x1xf32>
    %802 = vector.broadcast %801 : vector<2x1xf32> to vector<2x10xf32>
    %803 = arith.subf %799, %802 : vector<2x10xf32>
    %804 = math.exp %803 : vector<2x10xf32>
    %cst_647 = arith.constant dense<0.000000e+00> : vector<2xf32>
    %805 = vector.multi_reduction <add>, %804, %cst_647 [1] : vector<2x10xf32> to vector<2xf32>
    %806 = vector.shape_cast %805 : vector<2xf32> to vector<2x1xf32>
    %807 = vector.broadcast %806 : vector<2x1xf32> to vector<2x10xf32>
    %808 = arith.divf %804, %807 : vector<2x10xf32>
    %c0_648 = arith.constant 0 : index
    %c0_649 = arith.constant 0 : index
    %809 = vector.load %arg50[%c0_648, %c0_649] : memref<2x10xf32, #tpu.memory_space<vmem>>, vector<2x10xf32>
    tpu.vector_store %arg50[%c0_648, %c0_649], %808 {strides = array<i32>} : memref<2x10xf32, #tpu.memory_space<vmem>>, vector<2x10xf32>,
    return
  }
}

</mosaic_0001>

<bundles_post_ra>
// kernel: _lambda_.1
= control target key start
LH: loop header
LB: loop body
LE: loop exit
PB: predicated region body
PF: predicated region fallthrough
CT: control target
= control target key end

     0   :  { %s22838_s6 = smov 1   ;;  %s22839_s10 = smov 2   ;;  %s26608_s0 = inlined_call_operand.smem [shape: u32[51], index: -1, kind: input, shape index: {}] }
   0x1   :  { %s22909_s5 = sld [smem:[%s26608_s0]]   ;;  %s22840_s14 = smov 3  }
   0x2   :  { %s22914_s9 = sld [smem:[%s26608_s0 + %s22838_s6]]   ;;  %s22841_s18 = smov 4  }
   0x3   :  { %s22919_s13 = sld [smem:[%s26608_s0 + %s22839_s10]]   ;;  %s22842_s22 = smov 5  }
   0x4   :  { %s22924_s17 = sld [smem:[%s26608_s0 + %s22840_s14]]   ;;  %s22843_s26 = smov 6  }
   0x5   :  { %s22929_s21 = sld [smem:[%s26608_s0 + %s22841_s18]]   ;;  %s22844_s30 = smov 7  }
   0x6   :  { %s22934_s25 = sld [smem:[%s26608_s0 + %s22842_s22]]   ;;  %s22845_s4 = smov 8  }
   0x7   :  { %s22939_s29 = sld [smem:[%s26608_s0 + %s22843_s26]]   ;;  %s22846_s10 = smov 9  }
   0x8   :  { %s22944_s3 = sld [smem:[%s26608_s0 + %s22844_s30]]   ;;  %s22847_s15 = smov 10  }
   0x9   :  { %s22949_s8 = sld [smem:[%s26608_s0 + %s22845_s4]]   ;;  %s22848_s20 = smov 11  }
   0xa   :  { %s22954_s14 = sld [smem:[%s26608_s0 + %s22846_s10]]   ;;  %s22849_s26 = smov 12  }
   0xb   :  { %s22959_s19 = sld [smem:[%s26608_s0 + %s22847_s15]]   ;;  %s22850_s1 = smov 13  }
   0xc   :  { %s22964_s24 = sld [smem:[%s26608_s0 + %s22848_s20]]   ;;  %s22851_s7 = smov 14  }
   0xd   :  { %26886 = sst [smem:[#allocation24_spill]] %s22939_s29  ;;  %s22852_s15 = smov 15  }
   0xe   :  { %26887 = sst [smem:[#allocation25_spill]] %s22944_s3  ;;  %s22853_s22 = smov 16  }
   0xf   :  { %26888 = sst [smem:[#allocation26_spill]] %s22949_s8  ;;  %s22854_s28 = smov 17  }
  0x10   :  { %26889 = sst [smem:[#allocation27_spill]] %s22954_s14 }
  0x11   :  { %26890 = sst [smem:[#allocation28_spill]] %s22959_s19 }
  0x12   :  { %26891 = sst [smem:[#allocation29_spill]] %s22964_s24 }
  0x13   :  { %s22969_s30 = sld [smem:[%s26608_s0 + %s22849_s26]]  }
  0x14   :  { %s22974_s6 = sld [smem:[%s26608_s0 + %s22850_s1]]  }
  0x15   :  { %s22979_s12 = sld [smem:[%s26608_s0 + %s22851_s7]]   ;;  %s22855_s7 = smov 18  }
  0x16   :  { %s22984_s20 = sld [smem:[%s26608_s0 + %s22852_s15]]   ;;  %s22856_s15 = smov 19  }
  0x17   :  { %s22989_s27 = sld [smem:[%s26608_s0 + %s22853_s22]]   ;;  %s22857_s22 = smov 20  }
  0x18   :  { %s22994_s4 = sld [smem:[%s26608_s0 + %s22854_s28]]   ;;  %s22858_s28 = smov 21  }
  0x19   :  { %26892 = sst [smem:[#allocation30_spill]] %s22969_s30 }
  0x1a   :  { %26893 = sst [smem:[#allocation31_spill]] %s22974_s6 }
  0x1b   :  { %26894 = sst [smem:[#allocation32_spill]] %s22979_s12 }
  0x1c   :  { %26895 = sst [smem:[#allocation33_spill]] %s22984_s20 }
  0x1d   :  { %26896 = sst [smem:[#allocation34_spill]] %s22989_s27 }
  0x1e   :  { %s22999_s6 = sld [smem:[%s26608_s0 + %s22855_s7]]   ;;  %s22859_s7 = smov 22  }
  0x1f   :  { %s23004_s20 = sld [smem:[%s26608_s0 + %s22856_s15]]   ;;  %s22860_s15 = smov 23  }
  0x20   :  { %s23009_s27 = sld [smem:[%s26608_s0 + %s22857_s22]]   ;;  %s22861_s22 = smov 24  }
  0x21   :  { %s23014_s12 = sld [smem:[%s26608_s0 + %s22858_s28]]   ;;  %s22862_s28 = smov 25  }
  0x24   :  { %26897 = sst [smem:[#allocation35_spill]] %s22999_s6 }
  0x25   :  { %26898 = sst [smem:[#allocation36_spill]] %s23004_s20 }
  0x26   :  { %26899 = sst [smem:[#allocation37_spill]] %s23009_s27 }
  0x27   :  { %26900 = sst [smem:[#allocation38_spill]] %s23014_s12 }
  0x28   :  { %s23019_s6 = sld [smem:[%s26608_s0 + %s22859_s7]]   ;;  %s22863_s7 = smov 26  }
  0x29   :  { %s23024_s20 = sld [smem:[%s26608_s0 + %s22860_s15]]   ;;  %s22864_s15 = smov 27  }
  0x2a   :  { %s23029_s27 = sld [smem:[%s26608_s0 + %s22861_s22]]   ;;  %s22865_s22 = smov 28  }
  0x2b   :  { %s23034_s12 = sld [smem:[%s26608_s0 + %s22862_s28]]   ;;  %s22866_s28 = smov 29  }
  0x2e   :  { %26901 = sst [smem:[#allocation39_spill]] %s23019_s6 }
  0x2f   :  { %26902 = sst [smem:[#allocation40_spill]] %s23024_s20 }
  0x30   :  { %26903 = sst [smem:[#allocation41_spill]] %s23029_s27 }
  0x31   :  { %26904 = sst [smem:[#allocation42_spill]] %s23034_s12 }
  0x32   :  { %s23039_s6 = sld [smem:[%s26608_s0 + %s22863_s7]]   ;;  %s22867_s7 = smov 30  }
  0x33   :  { %s23044_s20 = sld [smem:[%s26608_s0 + %s22864_s15]]   ;;  %s22868_s15 = smov 31  }
  0x34   :  { %s23049_s27 = sld [smem:[%s26608_s0 + %s22865_s22]]   ;;  %s22869_s22 = smov 32  }
  0x35   :  { %s23054_s12 = sld [smem:[%s26608_s0 + %s22866_s28]]   ;;  %s22870_s28 = smov 33  }
  0x38   :  { %26905 = sst [smem:[#allocation43_spill]] %s23039_s6 }
  0x39   :  { %26906 = sst [smem:[#allocation44_spill]] %s23044_s20 }
  0x3a   :  { %26907 = sst [smem:[#allocation45_spill]] %s23049_s27 }
  0x3b   :  { %26908 = sst [smem:[#allocation46_spill]] %s23054_s12 }
  0x3c   :  { %s23059_s6 = sld [smem:[%s26608_s0 + %s22867_s7]]   ;;  %s22871_s7 = smov 34  }
  0x3d   :  { %s23064_s20 = sld [smem:[%s26608_s0 + %s22868_s15]]   ;;  %s22872_s15 = smov 35  }
  0x3e   :  { %s23069_s27 = sld [smem:[%s26608_s0 + %s22869_s22]]   ;;  %s22873_s22 = smov 36  }
  0x3f   :  { %s23074_s12 = sld [smem:[%s26608_s0 + %s22870_s28]]   ;;  %s22874_s28 = smov 37  }
  0x40   :  { %s23079_s24 = sld [smem:[%s26608_s0 + %s22871_s7]]   ;;  %s22875_s7 = smov 38  }
  0x41   :  { %s23094_s19 = sld [smem:[%s26608_s0 + %s22874_s28]]   ;;  %s22878_s28 = smov 41  }
  0x42   :  { %s23114_s14 = sld [smem:[%s26608_s0 + %s22878_s28]]   ;;  %s22882_s28 = smov 45  }
  0x43   :  { %26909 = sst [smem:[#allocation47_spill]] %s23064_s20 }
  0x44   :  { %26910 = sst [smem:[#allocation48_spill]] %s23069_s27 }
  0x45   :  { %s23084_s20 = sld [smem:[%s26608_s0 + %s22872_s15]]   ;;  %s22876_s15 = smov 39  }
  0x46   :  { %26911 = sst [smem:[#allocation49_spill]] %s23079_s24 }
  0x47   :  { %s23089_s27 = sld [smem:[%s26608_s0 + %s22873_s22]]   ;;  %s22877_s22 = smov 40  }
  0x48   :  { %s23099_s24 = sld [smem:[%s26608_s0 + %s22875_s7]]   ;;  %s22879_s7 = smov 42  }
  0x49   :  { %s23104_s30 = sld [smem:[%s26608_s0 + %s22876_s15]]   ;;  %s22880_s15 = smov 43  }
  0x4a   :  { %26915 = sst [smem:[#allocation53_spill]] %s23114_s14 }
  0x4b   :  { %s23124_s3 = sld [smem:[%s26608_s0 + %s22880_s15]]   ;;  %s22884_s15 = smov 47  }
  0x4c   :  { %s23134_s14 = sld [smem:[%s26608_s0 + %s22882_s28]]   ;;  %s22886_s28 = smov 49  }
  0x4d   :  { %26912 = sst [smem:[#allocation50_spill]] %s23089_s27 }
  0x4e   :  { %26913 = sst [smem:[#allocation51_spill]] %s23099_s24 }
  0x4f   :  { %s23109_s27 = sld [smem:[%s26608_s0 + %s22877_s22]]   ;;  %s22881_s22 = smov 44  }
  0x50   :  { %s23119_s24 = sld [smem:[%s26608_s0 + %s22879_s7]]   ;;  %s22883_s7 = smov 46  }
  0x51   :  { %s23144_s29 = sld [smem:[%s26608_s0 + %s22884_s15]]  }
  0x52   :  { %s23154_s8 = sld [smem:[%s26608_s0 + %s22886_s28]]  }
  0x55   :  { %26914 = sst [smem:[#allocation52_spill]] %s23109_s27 }
  0x56   :  { %26916 = sst [smem:[#allocation54_spill]] %s23119_s24 }
  0x57   :  { %s23129_s27 = sld [smem:[%s26608_s0 + %s22881_s22]]   ;;  %s22885_s22 = smov 48  }
  0x58   :  { %s23139_s24 = sld [smem:[%s26608_s0 + %s22883_s7]]   ;;  %s22887_s7 = smov 50  }
  0x5d   :  { %26917 = sst [smem:[#allocation55_spill]] %s23129_s27 }
  0x5e   :  { %26918 = sst [smem:[#allocation56_spill]] %s23139_s24 }
  0x5f   :  { %s23149_s27 = sld [smem:[%s26608_s0 + %s22885_s22]]  }
  0x60   :  { %s23159_s24 = sld [smem:[%s26608_s0 + %s22887_s7]]  }
  0x61   :  { %106 = vsyncpa [#allocation3], 0 }
  0x62   :  { %107 = vsyncpa [#allocation6], 0 }
  0x63   :  { %108 = vsyncpa [#allocation9], 0 }
  0x64   :  { %109 = vsyncpa [#allocation12], 0 }
  0x65   :  { %110 = vsyncpa [#allocation15], 0 }
  0x66   :  { %111 = vsyncpa [#allocation4], 0  ;;  %s22888_s15 = smov [#allocation5]   ;;  %s22889_s18 = smov [#allocation8]  }
  0x67   :  { %s186_s16 = sshll.u32 %s22888_s15, 4  ;;  %s212_s22 = sshll.u32 %s22889_s18, 4  ;;  %s187_s16 = int_to_ptr.vmem [resolvable:$true] %s186_s16  ;;  %s213_s22 = int_to_ptr.vmem [resolvable:$true] %s212_s22 }
  0x68   :  { %s22606_s23 = scalar_lea.hbm %s23059_s6, 16 }
  0x69   :  { %p22607_p0 = scmp.ne.s32.totalorder %s23059_s6, %s22606_s23  ;;  %p22610_p1 = scmp.lt.u32.totalorder %s22606_s23, %s23059_s6 }
  0x6b   :  { %p22612_p2 = pnand %p22610_p1, %p22607_p0 }
  0x6d   :  { %22615 = shalt.err (!%p22612_p2)
}
  0x6e   :  { %s22616_s0 = scalar_lea.vmem %s187_s16, 16  ;;  %s22620_s26 = scalar_lea.vmem %s187_s16, 32 }
  0x6f   :  { %p22617_p3 = scmp.ne.s32.totalorder %s187_s16, %s22616_s0  ;;  %p22621_p4 = scmp.lt.s32.totalorder %s187_s16, %s187_s16 }
  0x70   :  { %p22622_p5 = scmp.lt.s32.totalorder %s22620_s26, %s22616_s0 }
  0x72   :  { %p22623_p6 = por %p22622_p5, %p22621_p4 }
  0x74   :  { %p22624_p7 = pnand %p22623_p6, %p22617_p3 }
  0x76   :  { %22627 = shalt.err (!%p22624_p7)
}
  0x77   :  { %189 = dma.hbm_to_vmem [thread:$0]  %s23059_s6, 16, %s187_s16, [#allocation6]  }
  0x78   :  { %s22628_s28 = scalar_lea.hbm %s23084_s20, 16 }
  0x79   :  { %p22629_p8 = scmp.ne.s32.totalorder %s23084_s20, %s22628_s28  ;;  %p22632_p9 = scmp.lt.u32.totalorder %s22628_s28, %s23084_s20 }
  0x7b   :  { %p22634_p10 = pnand %p22632_p9, %p22629_p8 }
  0x7d   :  { %22637 = shalt.err (!%p22634_p10)
}
  0x7e   :  { %s22638_s1 = scalar_lea.vmem %s213_s22, 16  ;;  %s22642_s2 = scalar_lea.vmem %s213_s22, 32 }
  0x7f   :  { %p22639_p11 = scmp.ne.s32.totalorder %s213_s22, %s22638_s1  ;;  %p22643_p12 = scmp.lt.s32.totalorder %s213_s22, %s213_s22 }
  0x80   :  { %p22644_p13 = scmp.lt.s32.totalorder %s22642_s2, %s22638_s1 }
  0x82   :  { %p22645_p0 = por %p22644_p13, %p22643_p12 }
  0x84   :  { %p22646_p1 = pnand %p22645_p0, %p22639_p11 }
  0x86   :  { %22649 = shalt.err (!%p22646_p1)
}
  0x87   :  { %215 = dma.hbm_to_vmem [thread:$0]  %s23084_s20, 16, %s213_s22, [#allocation9]  }
  0x88   :  { %s22890_s7 = smov [#allocation11]   ;;  %s22891_s10 = smov [#allocation14]  }
  0x89   :  { %s236_s6 = sshll.u32 %s22890_s7, 4  ;;  %s264_s11 = sshll.u32 %s22891_s10, 4  ;;  %s237_s6 = int_to_ptr.vmem [resolvable:$true] %s236_s6  ;;  %s265_s11 = int_to_ptr.vmem [resolvable:$true] %s264_s11 }
  0x8a   :  { %s22650_s15 = scalar_lea.hbm %s23104_s30, 16 }
  0x8b   :  { %p22651_p2 = scmp.ne.s32.totalorder %s23104_s30, %s22650_s15  ;;  %p22654_p3 = scmp.lt.u32.totalorder %s22650_s15, %s23104_s30 }
  0x8d   :  { %p22656_p4 = pnand %p22654_p3, %p22651_p2 }
  0x8f   :  { %22659 = shalt.err (!%p22656_p4)
}
  0x90   :  { %s22660_s16 = scalar_lea.vmem %s237_s6, 16  ;;  %s22664_s18 = scalar_lea.vmem %s237_s6, 32 }
  0x91   :  { %p22661_p5 = scmp.ne.s32.totalorder %s237_s6, %s22660_s16  ;;  %p22665_p6 = scmp.lt.s32.totalorder %s237_s6, %s237_s6 }
  0x92   :  { %p22666_p7 = scmp.lt.s32.totalorder %s22664_s18, %s22660_s16 }
  0x94   :  { %p22667_p8 = por %p22666_p7, %p22665_p6 }
  0x96   :  { %p22668_p9 = pnand %p22667_p8, %p22661_p5 }
  0x98   :  { %22671 = shalt.err (!%p22668_p9)
}
  0x99   :  { %239 = dma.hbm_to_vmem [thread:$0]  %s23104_s30, 16, %s237_s6, [#allocation12]  }
  0x9a   :  { %s22672_s20 = scalar_lea.hbm %s23134_s14, 16 }
  0x9b   :  { %p22673_p10 = scmp.ne.s32.totalorder %s23134_s14, %s22672_s20  ;;  %p22676_p11 = scmp.lt.u32.totalorder %s22672_s20, %s23134_s14 }
  0x9d   :  { %p22678_p12 = pnand %p22676_p11, %p22673_p10 }
  0x9f   :  { %22681 = shalt.err (!%p22678_p12)
}
  0xa0   :  { %s22682_s22 = scalar_lea.vmem %s265_s11, 16  ;;  %s22686_s23 = scalar_lea.vmem %s265_s11, 32 }
  0xa1   :  { %p22683_p13 = scmp.ne.s32.totalorder %s265_s11, %s22682_s22  ;;  %p22687_p0 = scmp.lt.s32.totalorder %s265_s11, %s265_s11 }
  0xa2   :  { %p22688_p1 = scmp.lt.s32.totalorder %s22686_s23, %s22682_s22 }
  0xa4   :  { %p22689_p2 = por %p22688_p1, %p22687_p0 }
  0xa6   :  { %p22690_p3 = pnand %p22689_p2, %p22683_p13 }
  0xa8   :  { %22693 = shalt.err (!%p22690_p3)
}
  0xa9   :  { %267 = dma.hbm_to_vmem [thread:$0]  %s23134_s14, 16, %s265_s11, [#allocation15]  }
  0xaa   :  { %s22892_s0 = smov [#allocation2]   ;;  %s22893_s26 = smov [#allocation7]  }
  0xab   :  { %s152_s30 = sshll.u32 %s22892_s0, 4  ;;  %s200_s28 = sshll.u32 %s22893_s26, 4  ;;  %s153_s30 = int_to_ptr.vmem [resolvable:$true] %s152_s30  ;;  %s201_s28 = int_to_ptr.vmem [resolvable:$true] %s200_s28 }
  0xac   :  { %s22694_s1 = scalar_lea.hbm %s22994_s4, 16 }
  0xad   :  { %p22695_p4 = scmp.ne.s32.totalorder %s22994_s4, %s22694_s1  ;;  %p22698_p5 = scmp.lt.u32.totalorder %s22694_s1, %s22994_s4 }
  0xaf   :  { %p22700_p6 = pnand %p22698_p5, %p22695_p4 }
  0xb1   :  { %22703 = shalt.err (!%p22700_p6)
}
  0xb2   :  { %s22704_s2 = scalar_lea.vmem %s153_s30, 16  ;;  %s22708_s7 = scalar_lea.vmem %s153_s30, 32 }
  0xb3   :  { %p22705_p7 = scmp.ne.s32.totalorder %s153_s30, %s22704_s2  ;;  %p22709_p8 = scmp.lt.s32.totalorder %s153_s30, %s153_s30 }
  0xb4   :  { %p22710_p9 = scmp.lt.s32.totalorder %s22708_s7, %s22704_s2 }
  0xb6   :  { %p22711_p10 = por %p22710_p9, %p22709_p8 }
  0xb8   :  { %p22712_p11 = pnand %p22711_p10, %p22705_p7 }
  0xba   :  { %22715 = shalt.err (!%p22712_p11)
}
  0xbb   :  { %155 = dma.hbm_to_vmem [thread:$0]  %s22994_s4, 16, %s153_s30, [#allocation3]  }
  0xbc   :  { %s22716_s14 = scalar_lea.hbm %s23074_s12, 16 }
  0xbd   :  { %p22717_p12 = scmp.ne.s32.totalorder %s23074_s12, %s22716_s14  ;;  %p22720_p13 = scmp.lt.u32.totalorder %s22716_s14, %s23074_s12 }
  0xbf   :  { %p22722_p0 = pnand %p22720_p13, %p22717_p12 }
  0xc1   :  { %22725 = shalt.err (!%p22722_p0)
}
  0xc2   :  { %s22726_s6 = scalar_lea.vmem %s201_s28, 16  ;;  %s22730_s10 = scalar_lea.vmem %s201_s28, 32 }
  0xc3   :  { %p22727_p1 = scmp.ne.s32.totalorder %s201_s28, %s22726_s6  ;;  %p22731_p2 = scmp.lt.s32.totalorder %s201_s28, %s201_s28 }
  0xc4   :  { %p22732_p3 = scmp.lt.s32.totalorder %s22730_s10, %s22726_s6 }
  0xc6   :  { %p22733_p4 = por %p22732_p3, %p22731_p2 }
  0xc8   :  { %p22734_p5 = pnand %p22733_p4, %p22727_p1 }
  0xca   :  { %22737 = shalt.err (!%p22734_p5)
}
  0xcb   :  { %203 = dma.hbm_to_vmem [thread:$0]  %s23074_s12, 16, %s201_s28, [#allocation6]  }
  0xcc   :  { %s22894_s11 = smov [#allocation10]   ;;  %s22895_s15 = smov [#allocation13]  }
  0xcd   :  { %s224_s4 = sshll.u32 %s22894_s11, 4  ;;  %s252_s16 = sshll.u32 %s22895_s15, 4  ;;  %s225_s4 = int_to_ptr.vmem [resolvable:$true] %s224_s4  ;;  %s253_s16 = int_to_ptr.vmem [resolvable:$true] %s252_s16 }
  0xce   :  { %s22738_s18 = scalar_lea.hbm %s23094_s19, 16 }
  0xcf   :  { %p22739_p6 = scmp.ne.s32.totalorder %s23094_s19, %s22738_s18  ;;  %p22742_p7 = scmp.lt.u32.totalorder %s22738_s18, %s23094_s19 }
  0xd1   :  { %p22744_p8 = pnand %p22742_p7, %p22739_p6 }
  0xd3   :  { %22747 = shalt.err (!%p22744_p8)
}
  0xd4   :  { %s22748_s20 = scalar_lea.vmem %s225_s4, 16  ;;  %s22752_s22 = scalar_lea.vmem %s225_s4, 32 }
  0xd5   :  { %p22749_p9 = scmp.ne.s32.totalorder %s225_s4, %s22748_s20  ;;  %p22753_p10 = scmp.lt.s32.totalorder %s225_s4, %s225_s4 }
  0xd6   :  { %p22754_p11 = scmp.lt.s32.totalorder %s22752_s22, %s22748_s20 }
  0xd8   :  { %p22755_p12 = por %p22754_p11, %p22753_p10 }
  0xda   :  { %p22756_p13 = pnand %p22755_p12, %p22749_p9 }
  0xdc   :  { %22759 = shalt.err (!%p22756_p13)
}
  0xdd   :  { %227 = dma.hbm_to_vmem [thread:$0]  %s23094_s19, 16, %s225_s4, [#allocation9]  }
  0xde   :  { %s22760_s12 = scalar_lea.hbm %s23124_s3, 16 }
  0xdf   :  { %p22761_p0 = scmp.ne.s32.totalorder %s23124_s3, %s22760_s12  ;;  %p22764_p1 = scmp.lt.u32.totalorder %s22760_s12, %s23124_s3 }
  0xe1   :  { %p22766_p2 = pnand %p22764_p1, %p22761_p0 }
  0xe3   :  { %22769 = shalt.err (!%p22766_p2)
}
  0xe4   :  { %s22770_s23 = scalar_lea.vmem %s253_s16, 16  ;;  %s22774_s0 = scalar_lea.vmem %s253_s16, 32 }
  0xe5   :  { %p22771_p3 = scmp.ne.s32.totalorder %s253_s16, %s22770_s23  ;;  %p22775_p4 = scmp.lt.s32.totalorder %s253_s16, %s253_s16 }
  0xe6   :  { %p22776_p5 = scmp.lt.s32.totalorder %s22774_s0, %s22770_s23 }
  0xe8   :  { %p22777_p6 = por %p22776_p5, %p22775_p4 }
  0xea   :  { %p22778_p7 = pnand %p22777_p6, %p22771_p3 }
  0xec   :  { %22781 = shalt.err (!%p22778_p7)
}
  0xed   :  { %255 = dma.hbm_to_vmem [thread:$0]  %s23124_s3, 16, %s253_s16, [#allocation12]  }
  0xee   :  { %s22896_s30 = smov [#allocation16]   ;;  %s22782_s26 = scalar_lea.hbm %s23154_s8, 16 }
  0xef   :  { %s280_s19 = sshll.u32 %s22896_s30, 4  ;;  %p22783_p8 = scmp.ne.s32.totalorder %s23154_s8, %s22782_s26  ;;  %s281_s19 = int_to_ptr.vmem [resolvable:$true] %s280_s19 }
  0xf0   :  { %p22786_p9 = scmp.lt.u32.totalorder %s22782_s26, %s23154_s8 }
  0xf2   :  { %p22788_p10 = pnand %p22786_p9, %p22783_p8 }
  0xf4   :  { %22791 = shalt.err (!%p22788_p10)
}
  0xf5   :  { %s22792_s28 = scalar_lea.vmem %s281_s19, 16  ;;  %s22796_s1 = scalar_lea.vmem %s281_s19, 32 }
  0xf6   :  { %p22793_p11 = scmp.ne.s32.totalorder %s281_s19, %s22792_s28  ;;  %p22797_p12 = scmp.lt.s32.totalorder %s281_s19, %s281_s19 }
  0xf7   :  { %p22798_p13 = scmp.lt.s32.totalorder %s22796_s1, %s22792_s28 }
  0xf9   :  { %p22799_p0 = por %p22798_p13, %p22797_p12 }
  0xfb   :  { %p22800_p1 = pnand %p22799_p0, %p22793_p11 }
  0xfd   :  { %22803 = shalt.err (!%p22800_p1)
}
  0xfe   :  { %283 = dma.hbm_to_vmem [thread:$0]  %s23154_s8, 16, %s281_s19, [#allocation15]  }
  0xff   :  { %22826 = dma.done.wait [#allocation3], 16  }
 0x100   :  { %22827 = vsyncadd [#allocation3], 4294967280 }
 0x101   :  { %22828 = dma.done.wait [#allocation6], 32  }
 0x102   :  { %22829 = vsyncadd [#allocation6], 4294967264 }
 0x103   :  { %22830 = dma.done.wait [#allocation9], 32  }
 0x104   :  { %22831 = vsyncadd [#allocation9], 4294967264 }
 0x105   :  { %22832 = dma.done.wait [#allocation12], 32  }
 0x106   :  { %22833 = vsyncadd [#allocation12], 4294967264 }
 0x107   :  { %22834 = dma.done.wait [#allocation15], 32  }
 0x108   :  { %22835 = vsyncadd [#allocation15], 4294967264  ;;  %vm338_vm0 = vcmask 261120   ;;  %v327_v0 = vld [vmem:[%s22914_s9] sm:$0xff]  ;;  %v328_v1 = vld [vmem:[%s22914_s9 + $0x8] sm:$0xff]  ;;  %vm5783_vm1 = vcmask 523264  }
 0x109   :  { %v329_v2 = vld [vmem:[%s22914_s9 + $0x10] sm:$0xff]  ;;  %v20745_v3 = vpack.c.bf16 %v328_v1, %v327_v0  ;;  %v330_v4 = vld [vmem:[%s22914_s9 + $0x18] sm:$0xff]  ;;  %v311_v5 = vld [vmem:[%s22909_s5] sm:$0xff]  ;;  %s27139_s9 = sld [smem:[#allocation24_spill]]  ;;  %s27256_s3 = sld [smem:[#allocation29_spill]]  ;;  %vm22898_vm2 = vmmov 0  }
 0x10a   :  { %v20749_v6 = vpack.c.bf16 %v330_v4, %v329_v2  ;;  %17825 = vmatprep.mubr.msk.f32.mxu1 %vm338_vm0, %v311_v5  ;;  %v312_v7 = vld [vmem:[%s22909_s5 + $0x8] sm:$0xff]  ;;  %v313_v8 = vld [vmem:[%s22909_s5 + $0x10] sm:$0xff]  ;;  %v314_v9 = vld [vmem:[%s22909_s5 + $0x18] sm:$0xff]  ;;  %s27260_s8 = sld [smem:[#allocation32_spill]]  ;;  %s27261_s2 = sld [smem:[#allocation31_spill]]  ;;  %vm12055_vm3 = vcmask 64512  }
 0x10b   :  { %20746 = vmatprep.subr.bf16.mxu1 %v20745_v3  ;;  %v315_v10 = vld [vmem:[%s22909_s5 + $0x20] sm:$0xff]  ;;  %v316_v11 = vld [vmem:[%s22909_s5 + $0x28] sm:$0xff]  ;;  %v317_v12 = vld [vmem:[%s22909_s5 + $0x30] sm:$0xff]  ;;  %s27262_s7 = sld [smem:[#allocation33_spill]]  ;;  %s27271_s14 = sld [smem:[#allocation34_spill]]  ;;  %vm14837_vm4 = vcmask 74752  }
 0x10c   :  { %20748 = vmatpush3.bf16.msra.mxu1 %v20745_v3  ;;  %v318_v13 = vld [vmem:[%s22909_s5 + $0x38] sm:$0xff]  ;;  %v319_v14 = vld [vmem:[%s22909_s5 + $0x40] sm:$0xff]  ;;  %v320_v15 = vld [vmem:[%s22909_s5 + $0x48] sm:$0xff]  ;;  %s27272_s6 = sld [smem:[#allocation35_spill]]  ;;  %s27273_s10 = sld [smem:[#allocation38_spill]] }
 0x10d   :  { %20750 = vmatprep.subr.bf16.mxu1 %v20749_v6  ;;  %v321_v16 = vld [vmem:[%s22909_s5 + $0x50] sm:$0xff]  ;;  %v322_v17 = vld [vmem:[%s22909_s5 + $0x58] sm:$0xff]  ;;  %v323_v18 = vld [vmem:[%s22909_s5 + $0x60] sm:$0xff]  ;;  %s27274_s11 = sld [smem:[#allocation36_spill]]  ;;  %s27275_s4 = sld [smem:[#allocation37_spill]] }
 0x10e   :  { %v324_v19 = vld [vmem:[%s22909_s5 + $0x68] sm:$0xff]  ;;  %v325_v20 = vld [vmem:[%s22909_s5 + $0x70] sm:$0xff]  ;;  %v326_v21 = vld [vmem:[%s22909_s5 + $0x78] sm:$0xff]  ;;  %s27125_s5 = sld [smem:[#allocation26_spill]]  ;;  %s27276_s15 = sld [smem:[#allocation39_spill]] }
 0x10f   :  { %v23234_v22 = vld [vmem:[%s22924_s17] sm:$0xff]   ;;  %s27294_s16 = sld [smem:[#allocation42_spill]]  ;;  %s27306_s18 = sld [smem:[#allocation40_spill]] }
 0x110   :  { %20752 = vmatpush3.bf16.msra.mxu1 %v20749_v6  ;;  %v23237_v23 = vunpack.c.l.bf16 %v23234_v22  ;;  %v23241_v24 = vld [vmem:[%s22919_s13] ss:$0 sm:$0xff]  ;;  %s27141_s13 = sld [smem:[#allocation25_spill]]  ;;  %s27308_s22 = sld [smem:[#allocation43_spill]] }
 0x111   :  { %s27307_s20 = sld [smem:[#allocation41_spill]]  ;;  %s27309_s12 = sld [smem:[#allocation44_spill]] }
 0x112   :  { %26919 = vst [vmem:[#allocation57_spill] sm:$0xff] %v23237_v23  ;;  %s27310_s23 = sld [smem:[#allocation45_spill]]  ;;  %s27311_s0 = sld [smem:[#allocation46_spill]] }
 0x113   :  { %17826 = vmatmul.mubr.msk.f32.vlgmr.msra.gmra.mrb[0].mxu1 %vm338_vm0, %v312_v7  ;;  %s27314_s30 = sld [smem:[#allocation47_spill]]  ;;  %s27315_s19 = sld [smem:[#allocation49_spill]] }
 0x114   :  { %17828 = vmatprep.mubr.msk.f32.mxu1 %vm338_vm0, %v313_v8  ;;  %s27316_s26 = sld [smem:[#allocation48_spill]]  ;;  %s27317_s28 = sld [smem:[#allocation51_spill]] }
 0x115   :  { %s27318_s1 = sld [smem:[#allocation50_spill]] }
 0x117   :  { %17829 = vmatmul.mubr.msk.f32.gmra.mrb[2].mxu1 %vm338_vm0, %v314_v9 }
 0x118   :  { %17831 = vmatprep.mubr.msk.f32.mxu1 %vm338_vm0, %v315_v10 }
 0x11b   :  { %17832 = vmatmul.mubr.msk.f32.gmra.mrb[4].mxu1 %vm338_vm0, %v316_v11 }
 0x11c   :  { %17834 = vmatprep.mubr.msk.f32.mxu1 %vm338_vm0, %v317_v12 }
 0x11f   :  { %17835 = vmatmul.mubr.msk.f32.gmra.mrb[6].mxu1 %vm338_vm0, %v318_v13 }
 0x120   :  { %17837 = vmatprep.mubr.msk.f32.mxu1 %vm338_vm0, %v319_v14 }
 0x123   :  { %17838 = vmatmul.mubr.msk.f32.gmra.mrb[8].mxu1 %vm338_vm0, %v320_v15 }
 0x124   :  { %17840 = vmatprep.mubr.msk.f32.mxu1 %vm338_vm0, %v321_v16 }
 0x127   :  { %17841 = vmatmul.mubr.msk.f32.gmra.mrb[10].mxu1 %vm338_vm0, %v322_v17  ;;  %v16046_v17 = vld [vmem:[%s22924_s17 + $0x8] sm:$0xff]  }
 0x128   :  { %17843 = vmatprep.mubr.msk.f32.mxu1 %vm338_vm0, %v323_v18  ;;  %v23292_v18 = vunpack.c.h.bf16 %v23234_v22  ;;  %v16048_v22 = vld [vmem:[%s22924_s17 + $0x18] sm:$0xff]  }
 0x12b   :  { %17844 = vmatmul.mubr.msk.f32.gmra.mrb[12].mxu1 %vm338_vm0, %v324_v19  ;;  %v23295_v19 = vunpack.c.l.bf16 %v16046_v17 }
 0x12c   :  { %17846 = vmatprep.mubr.msk.f32.mxu1 %vm338_vm0, %v325_v20  ;;  %v16047_v20 = vld [vmem:[%s22924_s17 + $0x10] sm:$0xff]  }
 0x12f   :  { %17847 = vmatmul.mubr.msk.f32.gmra.mrb[14].mxu1 %vm338_vm0, %v326_v21  ;;  %v23300_v21 = vunpack.c.h.bf16 %v16046_v17 }
 0x130   :  { %17881 = vmatprep.mubr.f32.mxu1 %v23237_v23 }
 0x1e6   :  { %v17827_v25 = vpop.f32.mrb[0].mxu1 }
 0x1e7   :  { %v459_v26 = vadd.f32 %v17827_v25, %v23241_v24  ;;  %v453_v27 = vpop.f32.mrb[1].mxu1  ;;  %v23309_v25 = vunpack.c.h.bf16 %v16047_v20 }
 0x1e8   :  { %v454_v28 = vadd.f32 %v23241_v24, %v453_v27  ;;  %v16049_v27 = vld [vmem:[%s22924_s17 + $0x20] sm:$0xff]  }
 0x1e9   :  { %v533_v29 = vmax.f32 %v459_v26, 0.0  ;;  %v23313_v26 = vunpack.c.l.bf16 %v16048_v22 }
 0x1ea   :  { %v532_v30 = vmax.f32 %v454_v28, 0.0  ;;  %v17830_v31 = vpop.f32.mrb[2].mxu1  ;;  %v23318_v28 = vunpack.c.h.bf16 %v16048_v22  ;;  %v16065_v22 = vld [vmem:[%s22924_s17 + $0xa0] sm:$0xff]  }
 0x1eb   :  { %v469_v32 = vadd.f32 %v17830_v31, %v23241_v24  ;;  %v463_v33 = vpop.f32.mrb[3].mxu1  ;;  %v23327_v31 = vunpack.c.h.bf16 %v16049_v27 }
 0x1ec   :  { %v23246_v34 = vpack.c.bf16 %v533_v29, %v532_v30  ;;  %v464_v35 = vadd.f32 %v23241_v24, %v463_v33  ;;  %v23322_v29 = vunpack.c.l.bf16 %v16049_v27  ;;  %v16050_v30 = vld [vmem:[%s22924_s17 + $0x28] sm:$0xff]   ;;  %v16051_v33 = vld [vmem:[%s22924_s17 + $0x30] sm:$0xff]  }
 0x1ed   :  { %v535_v36 = vmax.f32 %v469_v32, 0.0  ;;  %v23331_v32 = vunpack.c.l.bf16 %v16050_v30 }
 0x1ee   :  { %v534_v37 = vmax.f32 %v464_v35, 0.0  ;;  %v17833_v38 = vpop.f32.mrb[4].mxu1  ;;  %20754 = vmatprep.subr.bf16.mxu1 %v23246_v34  ;;  %v23336_v35 = vunpack.c.h.bf16 %v16050_v30  ;;  %v23466_v30 = vunpack.c.l.bf16 %v16065_v22 }
 0x1ef   :  { %v479_v39 = vadd.f32 %v17833_v38, %v23241_v24  ;;  %v473_v40 = vpop.f32.mrb[5].mxu1  ;;  %20756 = vmatpush3.bf16.msra.mxu1 %v23246_v34  ;;  %v23345_v38 = vunpack.c.h.bf16 %v16051_v33 }
 0x1f0   :  { %v23252_v41 = vpack.c.bf16 %v535_v36, %v534_v37  ;;  %v474_v42 = vadd.f32 %v23241_v24, %v473_v40  ;;  %v23340_v36 = vunpack.c.l.bf16 %v16051_v33  ;;  %v16052_v37 = vld [vmem:[%s22924_s17 + $0x38] sm:$0xff]   ;;  %v16053_v40 = vld [vmem:[%s22924_s17 + $0x40] sm:$0xff]   ;;  %26930 = vst [vmem:[#allocation68_spill] sm:$0xff] %v23466_v30  ;;  %v16066_v33 = vld [vmem:[%s22924_s17 + $0xa8] sm:$0xff]  }
 0x1f1   :  { %v537_v43 = vmax.f32 %v479_v39, 0.0  ;;  %v23349_v39 = vunpack.c.l.bf16 %v16052_v37 }
 0x1f2   :  { %v536_v44 = vmax.f32 %v474_v42, 0.0  ;;  %v17836_v45 = vpop.f32.mrb[6].mxu1  ;;  %20758 = vmatprep.subr.bf16.mxu1 %v23252_v41  ;;  %v23354_v42 = vunpack.c.h.bf16 %v16052_v37  ;;  %v726_v37 = vld [vmem:[%s22929_s21] sm:$0xff] }
 0x1f3   :  { %v489_v46 = vadd.f32 %v17836_v45, %v23241_v24  ;;  %v483_v47 = vpop.f32.mrb[7].mxu1  ;;  %20760 = vmatpush3.bf16.msra.mxu1 %v23252_v41  ;;  %v23363_v45 = vunpack.c.h.bf16 %v16053_v40 }
 0x1f4   :  { %v23258_v48 = vpack.c.bf16 %v537_v43, %v536_v44  ;;  %v484_v49 = vadd.f32 %v23241_v24, %v483_v47  ;;  %v23358_v43 = vunpack.c.l.bf16 %v16053_v40  ;;  %v16054_v44 = vld [vmem:[%s22924_s17 + $0x48] sm:$0xff]   ;;  %v16055_v47 = vld [vmem:[%s22924_s17 + $0x50] sm:$0xff]  }
 0x1f5   :  { %v539_v50 = vmax.f32 %v489_v46, 0.0  ;;  %v23367_v46 = vunpack.c.l.bf16 %v16054_v44  ;;  %v727_v40 = vld [vmem:[%s22929_s21 + $0x8] sm:$0xff] }
 0x1f6   :  { %v538_v51 = vmax.f32 %v484_v49, 0.0  ;;  %v17839_v52 = vpop.f32.mrb[8].mxu1  ;;  %20762 = vmatprep.subr.bf16.mxu1 %v23258_v48  ;;  %26920 = vst [vmem:[#allocation58_spill] sm:$0xff] %v23358_v43  ;;  %v23372_v49 = vunpack.c.h.bf16 %v16054_v44  ;;  %v23473_v44 = vunpack.c.h.bf16 %v16065_v22 }
 0x1f7   :  { %v499_v53 = vadd.f32 %v17839_v52, %v23241_v24  ;;  %v493_v54 = vpop.f32.mrb[9].mxu1  ;;  %20764 = vmatpush3.bf16.msra.mxu1 %v23258_v48  ;;  %v23381_v52 = vunpack.c.h.bf16 %v16055_v47 }
 0x1f8   :  { %v23264_v55 = vpack.c.bf16 %v539_v50, %v538_v51  ;;  %v494_v56 = vadd.f32 %v23241_v24, %v493_v54  ;;  %v23376_v50 = vunpack.c.l.bf16 %v16055_v47  ;;  %v16056_v51 = vld [vmem:[%s22924_s17 + $0x58] sm:$0xff]   ;;  %v16057_v54 = vld [vmem:[%s22924_s17 + $0x60] sm:$0xff]   ;;  %26931 = vst [vmem:[#allocation69_spill] sm:$0xff] %v23473_v44  ;;  %v20785_v47 = vpack.c.bf16 %v727_v40, %v726_v37 }
 0x1f9   :  { %v541_v57 = vmax.f32 %v499_v53, 0.0  ;;  %v23385_v53 = vunpack.c.l.bf16 %v16056_v51  ;;  %v14969_v40 = vld [vmem:[%s22929_s21 + $0x20] sm:$0xff] }
 0x1fa   :  { %v540_v58 = vmax.f32 %v494_v56, 0.0  ;;  %v17842_v59 = vpop.f32.mrb[10].mxu1  ;;  %20766 = vmatprep.subr.bf16.mxu1 %v23264_v55  ;;  %v23390_v56 = vunpack.c.h.bf16 %v16056_v51  ;;  %v23477_v51 = vunpack.c.l.bf16 %v16066_v33  ;;  %20786 = vmatprep.subr.bf16.mxu0 %v20785_v47 }
 0x1fb   :  { %v509_v60 = vadd.f32 %v17842_v59, %v23241_v24  ;;  %v503_v61 = vpop.f32.mrb[11].mxu1  ;;  %20768 = vmatpush3.bf16.msra.mxu1 %v23264_v55  ;;  %v23399_v59 = vunpack.c.h.bf16 %v16057_v54  ;;  %20788 = vmatpush3.bf16.msra.mxu0 %v20785_v47  ;;  %v14970_v47 = vld [vmem:[%s22929_s21 + $0x28] sm:$0xff] }
 0x1fc   :  { %v23270_v62 = vpack.c.bf16 %v541_v57, %v540_v58  ;;  %v504_v63 = vadd.f32 %v23241_v24, %v503_v61  ;;  %v23394_v57 = vunpack.c.l.bf16 %v16057_v54  ;;  %v16058_v58 = vld [vmem:[%s22924_s17 + $0x68] sm:$0xff]   ;;  %v16059_v61 = vld [vmem:[%s22924_s17 + $0x70] sm:$0xff]   ;;  %26932 = vst [vmem:[#allocation70_spill] sm:$0xff] %v23477_v51 }
 0x1fd   :  { %v543_v0 = vmax.f32 %v509_v60, 0.0  ;;  %v23403_v60 = vunpack.c.l.bf16 %v16058_v58  ;;  %v16067_v54 = vld [vmem:[%s22924_s17 + $0xb0] sm:$0xff]  }
 0x1fe   :  { %v542_v1 = vmax.f32 %v504_v63, 0.0  ;;  %v17845_v2 = vpop.f32.mrb[12].mxu1  ;;  %20770 = vmatprep.subr.bf16.mxu1 %v23270_v62  ;;  %v23408_v63 = vunpack.c.h.bf16 %v16058_v58  ;;  %v728_v58 = vld [vmem:[%s22929_s21 + $0x10] sm:$0xff] }
 0x1ff   :  { %v519_v3 = vadd.f32 %v17845_v2, %v23241_v24  ;;  %v513_v4 = vpop.f32.mrb[13].mxu1  ;;  %20772 = vmatpush3.bf16.msra.mxu1 %v23270_v62  ;;  %v23417_v2 = vunpack.c.h.bf16 %v16059_v61 }
 0x200   :  { %v23276_v5 = vpack.c.bf16 %v543_v0, %v542_v1  ;;  %v514_v6 = vadd.f32 %v23241_v24, %v513_v4  ;;  %v23412_v0 = vunpack.c.l.bf16 %v16059_v61  ;;  %v16060_v1 = vld [vmem:[%s22924_s17 + $0x78] sm:$0xff]   ;;  %v16061_v4 = vld [vmem:[%s22924_s17 + $0x80] sm:$0xff]  }
 0x201   :  { %v545_v7 = vmax.f32 %v519_v3, 0.0  ;;  %v23421_v3 = vunpack.c.l.bf16 %v16060_v1  ;;  %v729_v61 = vld [vmem:[%s22929_s21 + $0x18] sm:$0xff] }
 0x202   :  { %v544_v8 = vmax.f32 %v514_v6, 0.0  ;;  %v17848_v9 = vpop.f32.mrb[14].mxu1  ;;  %20774 = vmatprep.subr.bf16.mxu1 %v23276_v5  ;;  %v23426_v6 = vunpack.c.h.bf16 %v16060_v1  ;;  %v23484_v1 = vunpack.c.h.bf16 %v16066_v33  ;;  %v16069_v33 = vld [vmem:[%s22924_s17 + $0xc0] sm:$0xff]  }
 0x203   :  { %v529_v10 = vadd.f32 %v17848_v9, %v23241_v24  ;;  %v523_v11 = vpop.f32.mrb[15].mxu1  ;;  %20776 = vmatpush3.bf16.msra.mxu1 %v23276_v5  ;;  %v23435_v9 = vunpack.c.h.bf16 %v16061_v4 }
 0x204   :  { %v23282_v12 = vpack.c.bf16 %v545_v7, %v544_v8  ;;  %v524_v13 = vadd.f32 %v23241_v24, %v523_v11  ;;  %v23304_v24 = vunpack.c.l.bf16 %v16047_v20  ;;  %26921 = vst [vmem:[#allocation59_spill] sm:$0xff] %v23426_v6  ;;  %v23430_v7 = vunpack.c.l.bf16 %v16061_v4  ;;  %v16062_v8 = vld [vmem:[%s22924_s17 + $0x88] sm:$0xff]   ;;  %v16063_v11 = vld [vmem:[%s22924_s17 + $0x90] sm:$0xff]   ;;  %26933 = vst [vmem:[#allocation71_spill] sm:$0xff] %v23484_v1 }
 0x205   :  { %v547_v14 = vmax.f32 %v529_v10, 0.0  ;;  %26923 = vst [vmem:[#allocation61_spill] sm:$0xff] %v23435_v9  ;;  %v23439_v10 = vunpack.c.l.bf16 %v16062_v8  ;;  %v23453_v17 = vunpack.c.h.bf16 %v16063_v11  ;;  %v20789_v4 = vpack.c.bf16 %v729_v61, %v728_v58  ;;  %v16070_v61 = vld [vmem:[%s22924_s17 + $0xc8] sm:$0xff]  }
 0x206   :  { %v546_v15 = vmax.f32 %v524_v13, 0.0  ;;  %20778 = vmatprep.subr.bf16.mxu1 %v23282_v12  ;;  %26922 = vst [vmem:[#allocation60_spill] sm:$0xff] %v23430_v7  ;;  %v23444_v13 = vunpack.c.h.bf16 %v16062_v8  ;;  %v23488_v8 = vunpack.c.l.bf16 %v16067_v54  ;;  %v23510_v58 = vpack.c.bf16 %v14970_v47, %v14969_v40  ;;  %v16071_v40 = vld [vmem:[%s22924_s17 + $0xd0] sm:$0xff]  }
 0x207   :  { %20780 = vmatpush3.bf16.msra.mxu1 %v23282_v12  ;;  %26924 = vst [vmem:[#allocation62_spill] sm:$0xff] %v23439_v10  ;;  %26927 = vst [vmem:[#allocation65_spill] sm:$0xff] %v23453_v17  ;;  %20790 = vmatprep.subr.bf16.mxu0 %v20789_v4  ;;  %v23525_v47 = vunpack.c.h.bf16 %v16070_v61 }
 0x208   :  { %v23287_v16 = vpack.c.bf16 %v547_v14, %v546_v15  ;;  %26925 = vst [vmem:[#allocation63_spill] sm:$0xff] %v23444_v13  ;;  %v23448_v14 = vunpack.c.l.bf16 %v16063_v11  ;;  %v16064_v15 = vld [vmem:[%s22924_s17 + $0x98] sm:$0xff]   ;;  %26934 = vst [vmem:[#allocation72_spill] sm:$0xff] %v23488_v8  ;;  %20792 = vmatpush3.bf16.msra.mxu0 %v20789_v4  ;;  %v23516_v4 = vunpack.c.h.bf16 %v16069_v33 }
 0x209   :  { %v23457_v20 = vunpack.c.l.bf16 %v16064_v15  ;;  %v23462_v27 = vunpack.c.h.bf16 %v16064_v15  ;;  %v16068_v11 = vld [vmem:[%s22924_s17 + $0xb8] sm:$0xff]   ;;  %v23493_v15 = vunpack.c.h.bf16 %v16067_v54  ;;  %v23508_v54 = vunpack.c.l.bf16 %v16069_v33  ;;  %20826 = vmatprep.subr.bf16.mxu0 %v23510_v58  ;;  %26941 = vst [vmem:[#allocation79_spill] sm:$0xff] %v23525_v47 }
 0x20a   :  { %20782 = vmatprep.subr.bf16.mxu1 %v23287_v16  ;;  %26926 = vst [vmem:[#allocation64_spill] sm:$0xff] %v23448_v14  ;;  %v23497_v22 = vunpack.c.l.bf16 %v16068_v11  ;;  %v23502_v37 = vunpack.c.h.bf16 %v16068_v11  ;;  %26939 = vst [vmem:[#allocation77_spill] sm:$0xff] %v23516_v4  ;;  %v23520_v11 = vunpack.c.l.bf16 %v16070_v61  ;;  %v23529_v33 = vunpack.c.l.bf16 %v16071_v40 }
 0x20b   :  { %20784 = vmatpush3.bf16.msra.mxu1 %v23287_v16  ;;  %26928 = vst [vmem:[#allocation66_spill] sm:$0xff] %v23457_v20  ;;  %26929 = vst [vmem:[#allocation67_spill] sm:$0xff] %v23462_v27 }
 0x20c   :  { %20794 = vmatprep.subr.bf16.mxu1 %v23246_v34  ;;  %26935 = vst [vmem:[#allocation73_spill] sm:$0xff] %v23493_v15  ;;  %26936 = vst [vmem:[#allocation74_spill] sm:$0xff] %v23497_v22 }
 0x20d   :  { %26937 = vst [vmem:[#allocation75_spill] sm:$0xff] %v23502_v37  ;;  %26938 = vst [vmem:[#allocation76_spill] sm:$0xff] %v23508_v54 }
 0x20e   :  { %17882 = vmatmul.mubr.f32.vlgmr.msra.gmra.mrb[16].mxu1 %v23292_v18  ;;  %26940 = vst [vmem:[#allocation78_spill] sm:$0xff] %v23520_v11  ;;  %26942 = vst [vmem:[#allocation80_spill] sm:$0xff] %v23529_v33 }
 0x20f   :  { %20796 = vmatpush3.bf16.msra.mxu1 %v23246_v34  ;;  %17884 = vmatprep.mubr.f32.mxu1 %v23295_v19 }
 0x210   :  { %20798 = vmatprep.subr.bf16.mxu1 %v23252_v41 }
 0x212   :  { %17885 = vmatmul.mubr.f32.gmra.mrb[18].mxu1 %v23300_v21 }
 0x213   :  { %20800 = vmatpush3.bf16.msra.mxu1 %v23252_v41  ;;  %17887 = vmatprep.mubr.f32.mxu1 %v23304_v24 }
 0x214   :  { %20802 = vmatprep.subr.bf16.mxu1 %v23258_v48 }
 0x216   :  { %17888 = vmatmul.mubr.f32.gmra.mrb[20].mxu1 %v23309_v25 }
 0x217   :  { %20804 = vmatpush3.bf16.msra.mxu1 %v23258_v48  ;;  %17890 = vmatprep.mubr.f32.mxu1 %v23313_v26 }
 0x218   :  { %20806 = vmatprep.subr.bf16.mxu1 %v23264_v55 }
 0x21a   :  { %17891 = vmatmul.mubr.f32.gmra.mrb[22].mxu1 %v23318_v28 }
 0x21b   :  { %20808 = vmatpush3.bf16.msra.mxu1 %v23264_v55  ;;  %17893 = vmatprep.mubr.f32.mxu1 %v23322_v29 }
 0x21c   :  { %20810 = vmatprep.subr.bf16.mxu1 %v23270_v62 }
 0x21e   :  { %17894 = vmatmul.mubr.f32.gmra.mrb[24].mxu1 %v23327_v31 }
 0x21f   :  { %20812 = vmatpush3.bf16.msra.mxu1 %v23270_v62  ;;  %17896 = vmatprep.mubr.f32.mxu1 %v23331_v32 }
 0x220   :  { %20814 = vmatprep.subr.bf16.mxu1 %v23276_v5 }
 0x222   :  { %17897 = vmatmul.mubr.f32.gmra.mrb[26].mxu1 %v23336_v35 }
 0x223   :  { %20816 = vmatpush3.bf16.msra.mxu1 %v23276_v5  ;;  %17899 = vmatprep.mubr.f32.mxu1 %v23340_v36 }
 0x224   :  { %20818 = vmatprep.subr.bf16.mxu1 %v23282_v12 }
 0x226   :  { %17900 = vmatmul.mubr.f32.gmra.mrb[28].mxu1 %v23345_v38 }
 0x227   :  { %20820 = vmatpush3.bf16.msra.mxu1 %v23282_v12  ;;  %17902 = vmatprep.mubr.f32.mxu1 %v23349_v39 }
 0x228   :  { %20822 = vmatprep.subr.bf16.mxu1 %v23287_v16 }
 0x22a   :  { %17903 = vmatmul.mubr.f32.gmra.mrb[30].mxu1 %v23354_v42 }
 0x22b   :  { %20824 = vmatpush3.bf16.msra.mxu1 %v23287_v16  ;;  %17969 = vmatprep.mubr.f32.mxu1 %v23358_v43 }
 0x22c   :  { %20834 = vmatprep.subr.bf16.mxu1 %v23246_v34 }
 0x22e   :  { %17970 = vmatmul.mubr.f32.vlgmr.msra.gmra.mrb[32].mxu1 %v23363_v45 }
 0x22f   :  { %20836 = vmatpush3.bf16.msra.mxu1 %v23246_v34  ;;  %17972 = vmatprep.mubr.f32.mxu1 %v23367_v46 }
 0x230   :  { %20838 = vmatprep.subr.bf16.mxu1 %v23252_v41 }
 0x232   :  { %17973 = vmatmul.mubr.f32.gmra.mrb[34].mxu1 %v23372_v49 }
 0x233   :  { %20840 = vmatpush3.bf16.msra.mxu1 %v23252_v41  ;;  %17975 = vmatprep.mubr.f32.mxu1 %v23376_v50 }
 0x234   :  { %20842 = vmatprep.subr.bf16.mxu1 %v23258_v48 }
 0x236   :  { %17976 = vmatmul.mubr.f32.gmra.mrb[36].mxu1 %v23381_v52 }
 0x237   :  { %20844 = vmatpush3.bf16.msra.mxu1 %v23258_v48  ;;  %17978 = vmatprep.mubr.f32.mxu1 %v23385_v53 }
 0x238   :  { %20846 = vmatprep.subr.bf16.mxu1 %v23264_v55 }
 0x23a   :  { %17979 = vmatmul.mubr.f32.gmra.mrb[38].mxu1 %v23390_v56 }
 0x23b   :  { %20848 = vmatpush3.bf16.msra.mxu1 %v23264_v55  ;;  %17981 = vmatprep.mubr.f32.mxu1 %v23394_v57 }
 0x23c   :  { %20850 = vmatprep.subr.bf16.mxu1 %v23270_v62 }
 0x23e   :  { %17982 = vmatmul.mubr.f32.gmra.mrb[40].mxu1 %v23399_v59 }
 0x23f   :  { %20852 = vmatpush3.bf16.msra.mxu1 %v23270_v62  ;;  %17984 = vmatprep.mubr.f32.mxu1 %v23403_v60 }
 0x240   :  { %20854 = vmatprep.subr.bf16.mxu1 %v23276_v5 }
 0x242   :  { %17985 = vmatmul.mubr.f32.gmra.mrb[42].mxu1 %v23408_v63 }
 0x243   :  { %20856 = vmatpush3.bf16.msra.mxu1 %v23276_v5  ;;  %17987 = vmatprep.mubr.f32.mxu1 %v23412_v0 }
 0x244   :  { %20858 = vmatprep.subr.bf16.mxu1 %v23282_v12 }
 0x246   :  { %17988 = vmatmul.mubr.f32.gmra.mrb[44].mxu1 %v23417_v2 }
 0x247   :  { %20860 = vmatpush3.bf16.msra.mxu1 %v23282_v12  ;;  %17990 = vmatprep.mubr.f32.mxu1 %v23421_v3 }
 0x248   :  { %20862 = vmatprep.subr.bf16.mxu1 %v23287_v16 }
 0x24a   :  { %17991 = vmatmul.mubr.f32.gmra.mrb[46].mxu1 %v23426_v6 }
 0x24b   :  { %20864 = vmatpush3.bf16.msra.mxu1 %v23287_v16  ;;  %18057 = vmatprep.mubr.f32.mxu1 %v23430_v7 }
 0x24c   :  { %20874 = vmatprep.subr.bf16.mxu1 %v23246_v34 }
 0x24e   :  { %18058 = vmatmul.mubr.f32.vlgmr.msra.gmra.mrb[48].mxu1 %v23435_v9 }
 0x24f   :  { %20876 = vmatpush3.bf16.msra.mxu1 %v23246_v34  ;;  %18060 = vmatprep.mubr.f32.mxu1 %v23439_v10 }
 0x250   :  { %20878 = vmatprep.subr.bf16.mxu1 %v23252_v41 }
 0x252   :  { %18061 = vmatmul.mubr.f32.gmra.mrb[50].mxu1 %v23444_v13 }
 0x253   :  { %20880 = vmatpush3.bf16.msra.mxu1 %v23252_v41  ;;  %18063 = vmatprep.mubr.f32.mxu1 %v23448_v14 }
 0x254   :  { %20882 = vmatprep.subr.bf16.mxu1 %v23258_v48 }
 0x256   :  { %18064 = vmatmul.mubr.f32.gmra.mrb[52].mxu1 %v23453_v17 }
 0x257   :  { %20884 = vmatpush3.bf16.msra.mxu1 %v23258_v48  ;;  %18066 = vmatprep.mubr.f32.mxu1 %v23457_v20 }
 0x258   :  { %20886 = vmatprep.subr.bf16.mxu1 %v23264_v55 }
 0x25a   :  { %18067 = vmatmul.mubr.f32.gmra.mrb[54].mxu1 %v23462_v27 }
 0x25b   :  { %20888 = vmatpush3.bf16.msra.mxu1 %v23264_v55  ;;  %18069 = vmatprep.mubr.f32.mxu1 %v23466_v30 }
 0x25c   :  { %20890 = vmatprep.subr.bf16.mxu1 %v23270_v62 }
 0x25e   :  { %18070 = vmatmul.mubr.f32.gmra.mrb[56].mxu1 %v23473_v44  ;;  %v16075_v44 = vld [vmem:[%s22924_s17 + $0xf0] sm:$0xff]  }
 0x25f   :  { %20892 = vmatpush3.bf16.msra.mxu1 %v23270_v62  ;;  %18072 = vmatprep.mubr.f32.mxu1 %v23477_v51 }
 0x260   :  { %20894 = vmatprep.subr.bf16.mxu1 %v23276_v5 }
 0x262   :  { %18073 = vmatmul.mubr.f32.gmra.mrb[58].mxu1 %v23484_v1  ;;  %v16074_v1 = vld [vmem:[%s22924_s17 + $0xe8] sm:$0xff]  }
 0x263   :  { %20896 = vmatpush3.bf16.msra.mxu1 %v23276_v5  ;;  %18075 = vmatprep.mubr.f32.mxu1 %v23488_v8  ;;  %v23561_v30 = vunpack.c.h.bf16 %v16074_v1 }
 0x264   :  { %20898 = vmatprep.subr.bf16.mxu1 %v23282_v12 }
 0x265   :  { %26949 = vst [vmem:[#allocation87_spill] sm:$0xff] %v23561_v30 }
 0x266   :  { %18076 = vmatmul.mubr.f32.gmra.mrb[60].mxu1 %v23493_v15  ;;  %v16073_v15 = vld [vmem:[%s22924_s17 + $0xe0] sm:$0xff]  }
 0x267   :  { %20900 = vmatpush3.bf16.msra.mxu1 %v23282_v12  ;;  %18078 = vmatprep.mubr.f32.mxu1 %v23497_v22  ;;  %v23534_v22 = vunpack.c.h.bf16 %v16071_v40  ;;  %v23547_v40 = vunpack.c.l.bf16 %v16073_v15  ;;  %v23552_v51 = vunpack.c.h.bf16 %v16073_v15  ;;  %v23565_v15 = vunpack.c.l.bf16 %v16075_v44 }
 0x268   :  { %20902 = vmatprep.subr.bf16.mxu1 %v23287_v16 }
 0x269   :  { %26943 = vst [vmem:[#allocation81_spill] sm:$0xff] %v23534_v22  ;;  %26946 = vst [vmem:[#allocation84_spill] sm:$0xff] %v23547_v40 }
 0x26a   :  { %18079 = vmatmul.mubr.f32.gmra.mrb[62].mxu1 %v23502_v37  ;;  %v16072_v37 = vld [vmem:[%s22924_s17 + $0xd8] sm:$0xff]   ;;  %26947 = vst [vmem:[#allocation85_spill] sm:$0xff] %v23552_v51  ;;  %26950 = vst [vmem:[#allocation88_spill] sm:$0xff] %v23565_v15 }
 0x26b   :  { %20904 = vmatpush3.bf16.msra.mxu1 %v23287_v16  ;;  %18145 = vmatprep.mubr.f32.mxu1 %v23508_v54  ;;  %v23538_v61 = vunpack.c.l.bf16 %v16072_v37  ;;  %v23543_v8 = vunpack.c.h.bf16 %v16072_v37  ;;  %v23556_v37 = vunpack.c.l.bf16 %v16074_v1 }
 0x26c   :  { %20914 = vmatprep.subr.bf16.mxu1 %v23246_v34 }
 0x26d   :  { %26944 = vst [vmem:[#allocation82_spill] sm:$0xff] %v23538_v61  ;;  %26945 = vst [vmem:[#allocation83_spill] sm:$0xff] %v23543_v8 }
 0x26e   :  { %18146 = vmatmul.mubr.f32.vlgmr.msra.gmra.mrb[64].mxu1 %v23516_v4  ;;  %26948 = vst [vmem:[#allocation86_spill] sm:$0xff] %v23556_v37 }
 0x26f   :  { %20916 = vmatpush3.bf16.msra.mxu1 %v23246_v34  ;;  %18148 = vmatprep.mubr.f32.mxu1 %v23520_v11 }
 0x270   :  { %20918 = vmatprep.subr.bf16.mxu1 %v23252_v41 }
 0x272   :  { %18149 = vmatmul.mubr.f32.gmra.mrb[66].mxu1 %v23525_v47 }
 0x273   :  { %20920 = vmatpush3.bf16.msra.mxu1 %v23252_v41  ;;  %18151 = vmatprep.mubr.f32.mxu1 %v23529_v33 }
 0x274   :  { %20922 = vmatprep.subr.bf16.mxu1 %v23258_v48 }
 0x276   :  { %18152 = vmatmul.mubr.f32.gmra.mrb[68].mxu1 %v23534_v22  ;;  %v15006_v22 = vld [vmem:[%s22929_s21 + $0x48] sm:$0xff] }
 0x277   :  { %20924 = vmatpush3.bf16.msra.mxu1 %v23258_v48  ;;  %18154 = vmatprep.mubr.f32.mxu1 %v23538_v61 }
 0x278   :  { %20926 = vmatprep.subr.bf16.mxu1 %v23264_v55 }
 0x27a   :  { %18155 = vmatmul.mubr.f32.gmra.mrb[70].mxu1 %v23543_v8  ;;  %v23570_v8 = vunpack.c.h.bf16 %v16075_v44 }
 0x27b   :  { %20928 = vmatpush3.bf16.msra.mxu1 %v23264_v55  ;;  %18157 = vmatprep.mubr.f32.mxu1 %v23547_v40  ;;  %v16076_v40 = vld [vmem:[%s22924_s17 + $0xf8] sm:$0xff]  }
 0x27c   :  { %20930 = vmatprep.subr.bf16.mxu1 %v23270_v62  ;;  %26951 = vst [vmem:[#allocation89_spill] sm:$0xff] %v23570_v8  ;;  %v23574_v1 = vunpack.c.l.bf16 %v16076_v40 }
 0x27e   :  { %18158 = vmatmul.mubr.f32.gmra.mrb[72].mxu1 %v23552_v51  ;;  %26952 = vst [vmem:[#allocation90_spill] sm:$0xff] %v23574_v1  ;;  %v23579_v51 = vunpack.c.h.bf16 %v16076_v40 }
 0x27f   :  { %20932 = vmatpush3.bf16.msra.mxu1 %v23270_v62  ;;  %18160 = vmatprep.mubr.f32.mxu1 %v23556_v37  ;;  %v16077_v37 = vld [vmem:[%s22924_s17 + $0x100] sm:$0xff]  }
 0x280   :  { %20934 = vmatprep.subr.bf16.mxu1 %v23276_v5  ;;  %26953 = vst [vmem:[#allocation91_spill] sm:$0xff] %v23579_v51  ;;  %v23583_v44 = vunpack.c.l.bf16 %v16077_v37 }
 0x282   :  { %18161 = vmatmul.mubr.f32.gmra.mrb[74].mxu1 %v23561_v30  ;;  %26954 = vst [vmem:[#allocation92_spill] sm:$0xff] %v23583_v44  ;;  %v23588_v30 = vunpack.c.h.bf16 %v16077_v37 }
 0x283   :  { %20936 = vmatpush3.bf16.msra.mxu1 %v23276_v5  ;;  %18163 = vmatprep.mubr.f32.mxu1 %v23565_v15  ;;  %v16078_v15 = vld [vmem:[%s22924_s17 + $0x108] sm:$0xff]  }
 0x284   :  { %20938 = vmatprep.subr.bf16.mxu1 %v23282_v12  ;;  %26955 = vst [vmem:[#allocation93_spill] sm:$0xff] %v23588_v30  ;;  %v23592_v40 = vunpack.c.l.bf16 %v16078_v15 }
 0x286   :  { %18164 = vmatmul.mubr.f32.gmra.mrb[76].mxu1 %v23570_v8  ;;  %26956 = vst [vmem:[#allocation94_spill] sm:$0xff] %v23592_v40  ;;  %v23597_v8 = vunpack.c.h.bf16 %v16078_v15 }
 0x287   :  { %20940 = vmatpush3.bf16.msra.mxu1 %v23282_v12  ;;  %18166 = vmatprep.mubr.f32.mxu1 %v23574_v1  ;;  %v16079_v1 = vld [vmem:[%s22924_s17 + $0x110] sm:$0xff]  }
 0x288   :  { %20942 = vmatprep.subr.bf16.mxu1 %v23287_v16  ;;  %26957 = vst [vmem:[#allocation95_spill] sm:$0xff] %v23597_v8  ;;  %v23601_v37 = vunpack.c.l.bf16 %v16079_v1 }
 0x28a   :  { %18167 = vmatmul.mubr.f32.gmra.mrb[78].mxu1 %v23579_v51  ;;  %26958 = vst [vmem:[#allocation96_spill] sm:$0xff] %v23601_v37  ;;  %v23606_v51 = vunpack.c.h.bf16 %v16079_v1 }
 0x28b   :  { %20944 = vmatpush3.bf16.msra.mxu1 %v23287_v16  ;;  %18233 = vmatprep.mubr.f32.mxu1 %v23583_v44  ;;  %v16080_v44 = vld [vmem:[%s22924_s17 + $0x118] sm:$0xff]  }
 0x28c   :  { %20954 = vmatprep.subr.bf16.mxu1 %v23246_v34  ;;  %26959 = vst [vmem:[#allocation97_spill] sm:$0xff] %v23606_v51  ;;  %v23610_v15 = vunpack.c.l.bf16 %v16080_v44 }
 0x28e   :  { %18234 = vmatmul.mubr.f32.vlgmr.msra.gmra.mrb[80].mxu1 %v23588_v30  ;;  %26960 = vst [vmem:[#allocation98_spill] sm:$0xff] %v23610_v15  ;;  %v23615_v30 = vunpack.c.h.bf16 %v16080_v44 }
 0x28f   :  { %20956 = vmatpush3.bf16.msra.mxu1 %v23246_v34  ;;  %18236 = vmatprep.mubr.f32.mxu1 %v23592_v40  ;;  %v16081_v40 = vld [vmem:[%s22924_s17 + $0x120] sm:$0xff]  }
 0x290   :  { %20958 = vmatprep.subr.bf16.mxu1 %v23252_v41  ;;  %26961 = vst [vmem:[#allocation99_spill] sm:$0xff] %v23615_v30  ;;  %v23619_v1 = vunpack.c.l.bf16 %v16081_v40 }
 0x292   :  { %18237 = vmatmul.mubr.f32.gmra.mrb[82].mxu1 %v23597_v8  ;;  %26962 = vst [vmem:[#allocation100_spill] sm:$0xff] %v23619_v1  ;;  %v23624_v8 = vunpack.c.h.bf16 %v16081_v40 }
 0x293   :  { %20960 = vmatpush3.bf16.msra.mxu1 %v23252_v41  ;;  %18239 = vmatprep.mubr.f32.mxu1 %v23601_v37  ;;  %v16082_v37 = vld [vmem:[%s22924_s17 + $0x128] sm:$0xff]  }
 0x294   :  { %20962 = vmatprep.subr.bf16.mxu1 %v23258_v48  ;;  %26963 = vst [vmem:[#allocation101_spill] sm:$0xff] %v23624_v8  ;;  %v23628_v44 = vunpack.c.l.bf16 %v16082_v37 }
 0x296   :  { %18240 = vmatmul.mubr.f32.gmra.mrb[84].mxu1 %v23606_v51  ;;  %26964 = vst [vmem:[#allocation102_spill] sm:$0xff] %v23628_v44  ;;  %v23633_v51 = vunpack.c.h.bf16 %v16082_v37 }
 0x297   :  { %20964 = vmatpush3.bf16.msra.mxu1 %v23258_v48  ;;  %18242 = vmatprep.mubr.f32.mxu1 %v23610_v15  ;;  %v16083_v15 = vld [vmem:[%s22924_s17 + $0x130] sm:$0xff]  }
 0x298   :  { %20966 = vmatprep.subr.bf16.mxu1 %v23264_v55  ;;  %26965 = vst [vmem:[#allocation103_spill] sm:$0xff] %v23633_v51  ;;  %v23637_v40 = vunpack.c.l.bf16 %v16083_v15 }
 0x29a   :  { %18243 = vmatmul.mubr.f32.gmra.mrb[86].mxu1 %v23615_v30  ;;  %26966 = vst [vmem:[#allocation104_spill] sm:$0xff] %v23637_v40  ;;  %v23642_v30 = vunpack.c.h.bf16 %v16083_v15 }
 0x29b   :  { %20968 = vmatpush3.bf16.msra.mxu1 %v23264_v55  ;;  %18245 = vmatprep.mubr.f32.mxu1 %v23619_v1  ;;  %v16084_v1 = vld [vmem:[%s22924_s17 + $0x138] sm:$0xff]  }
 0x29c   :  { %20970 = vmatprep.subr.bf16.mxu1 %v23270_v62  ;;  %26967 = vst [vmem:[#allocation105_spill] sm:$0xff] %v23642_v30  ;;  %v23646_v37 = vunpack.c.l.bf16 %v16084_v1 }
 0x29e   :  { %18246 = vmatmul.mubr.f32.gmra.mrb[88].mxu1 %v23624_v8  ;;  %26968 = vst [vmem:[#allocation106_spill] sm:$0xff] %v23646_v37  ;;  %v23651_v8 = vunpack.c.h.bf16 %v16084_v1 }
 0x29f   :  { %20972 = vmatpush3.bf16.msra.mxu1 %v23270_v62  ;;  %18248 = vmatprep.mubr.f32.mxu1 %v23628_v44  ;;  %v16085_v44 = vld [vmem:[%s22924_s17 + $0x140] sm:$0xff]  }
 0x2a0   :  { %20974 = vmatprep.subr.bf16.mxu1 %v23276_v5  ;;  %26969 = vst [vmem:[#allocation107_spill] sm:$0xff] %v23651_v8  ;;  %v23655_v15 = vunpack.c.l.bf16 %v16085_v44 }
 0x2a2   :  { %18249 = vmatmul.mubr.f32.gmra.mrb[90].mxu1 %v23633_v51  ;;  %26970 = vst [vmem:[#allocation108_spill] sm:$0xff] %v23655_v15  ;;  %v23660_v51 = vunpack.c.h.bf16 %v16085_v44 }
 0x2a3   :  { %20976 = vmatpush3.bf16.msra.mxu1 %v23276_v5  ;;  %18251 = vmatprep.mubr.f32.mxu1 %v23637_v40  ;;  %v16086_v40 = vld [vmem:[%s22924_s17 + $0x148] sm:$0xff]  }
 0x2a4   :  { %20978 = vmatprep.subr.bf16.mxu1 %v23282_v12  ;;  %26971 = vst [vmem:[#allocation109_spill] sm:$0xff] %v23660_v51  ;;  %v23664_v1 = vunpack.c.l.bf16 %v16086_v40 }
 0x2a6   :  { %18252 = vmatmul.mubr.f32.gmra.mrb[92].mxu1 %v23642_v30  ;;  %26972 = vst [vmem:[#allocation110_spill] sm:$0xff] %v23664_v1  ;;  %v23669_v30 = vunpack.c.h.bf16 %v16086_v40 }
 0x2a7   :  { %20980 = vmatpush3.bf16.msra.mxu1 %v23282_v12  ;;  %18254 = vmatprep.mubr.f32.mxu1 %v23646_v37  ;;  %v16087_v37 = vld [vmem:[%s22924_s17 + $0x150] sm:$0xff]  }
 0x2a8   :  { %20982 = vmatprep.subr.bf16.mxu1 %v23287_v16  ;;  %26973 = vst [vmem:[#allocation111_spill] sm:$0xff] %v23669_v30  ;;  %v23673_v44 = vunpack.c.l.bf16 %v16087_v37 }
 0x2aa   :  { %18255 = vmatmul.mubr.f32.gmra.mrb[94].mxu1 %v23651_v8  ;;  %26974 = vst [vmem:[#allocation112_spill] sm:$0xff] %v23673_v44  ;;  %v16088_v8 = vld [vmem:[%s22924_s17 + $0x158] sm:$0xff]  }
 0x2ab   :  { %20984 = vmatpush3.bf16.msra.mxu1 %v23287_v16  ;;  %18321 = vmatprep.mubr.f32.mxu1 %v23655_v15  ;;  %v23678_v15 = vunpack.c.h.bf16 %v16087_v37  ;;  %v23682_v40 = vunpack.c.l.bf16 %v16088_v8 }
 0x2ac   :  { %20994 = vmatprep.subr.bf16.mxu1 %v23246_v34 }
 0x2ad   :  { %26975 = vst [vmem:[#allocation113_spill] sm:$0xff] %v23678_v15  ;;  %26976 = vst [vmem:[#allocation114_spill] sm:$0xff] %v23682_v40 }
 0x2ae   :  { %18322 = vmatmul.mubr.f32.vlgmr.msra.gmra.mrb[96].mxu1 %v23660_v51  ;;  %v23687_v51 = vunpack.c.h.bf16 %v16088_v8 }
 0x2af   :  { %20996 = vmatpush3.bf16.msra.mxu1 %v23246_v34  ;;  %18324 = vmatprep.mubr.f32.mxu1 %v23664_v1  ;;  %v16089_v1 = vld [vmem:[%s22924_s17 + $0x160] sm:$0xff]  }
 0x2b0   :  { %20998 = vmatprep.subr.bf16.mxu1 %v23252_v41  ;;  %26977 = vst [vmem:[#allocation115_spill] sm:$0xff] %v23687_v51  ;;  %v23691_v37 = vunpack.c.l.bf16 %v16089_v1 }
 0x2b2   :  { %18325 = vmatmul.mubr.f32.gmra.mrb[98].mxu1 %v23669_v30  ;;  %26978 = vst [vmem:[#allocation116_spill] sm:$0xff] %v23691_v37  ;;  %v23696_v30 = vunpack.c.h.bf16 %v16089_v1 }
 0x2b3   :  { %21000 = vmatpush3.bf16.msra.mxu1 %v23252_v41  ;;  %18327 = vmatprep.mubr.f32.mxu1 %v23673_v44  ;;  %v16090_v44 = vld [vmem:[%s22924_s17 + $0x168] sm:$0xff]  }
 0x2b4   :  { %21002 = vmatprep.subr.bf16.mxu1 %v23258_v48  ;;  %26979 = vst [vmem:[#allocation117_spill] sm:$0xff] %v23696_v30  ;;  %v23700_v8 = vunpack.c.l.bf16 %v16090_v44 }
 0x2b6   :  { %18328 = vmatmul.mubr.f32.gmra.mrb[100].mxu1 %v23678_v15  ;;  %26980 = vst [vmem:[#allocation118_spill] sm:$0xff] %v23700_v8  ;;  %v23705_v15 = vunpack.c.h.bf16 %v16090_v44 }
 0x2b7   :  { %21004 = vmatpush3.bf16.msra.mxu1 %v23258_v48  ;;  %18330 = vmatprep.mubr.f32.mxu1 %v23682_v40  ;;  %v16091_v40 = vld [vmem:[%s22924_s17 + $0x170] sm:$0xff]  }
 0x2b8   :  { %21006 = vmatprep.subr.bf16.mxu1 %v23264_v55  ;;  %26981 = vst [vmem:[#allocation119_spill] sm:$0xff] %v23705_v15  ;;  %v23709_v1 = vunpack.c.l.bf16 %v16091_v40 }
 0x2ba   :  { %18331 = vmatmul.mubr.f32.gmra.mrb[102].mxu1 %v23687_v51  ;;  %26982 = vst [vmem:[#allocation120_spill] sm:$0xff] %v23709_v1  ;;  %v23714_v51 = vunpack.c.h.bf16 %v16091_v40 }
 0x2bb   :  { %21008 = vmatpush3.bf16.msra.mxu1 %v23264_v55  ;;  %18333 = vmatprep.mubr.f32.mxu1 %v23691_v37  ;;  %v16092_v37 = vld [vmem:[%s22924_s17 + $0x178] sm:$0xff]  }
 0x2bc   :  { %21010 = vmatprep.subr.bf16.mxu1 %v23270_v62  ;;  %26983 = vst [vmem:[#allocation121_spill] sm:$0xff] %v23714_v51  ;;  %v23718_v44 = vunpack.c.l.bf16 %v16092_v37 }
 0x2be   :  { %18334 = vmatmul.mubr.f32.gmra.mrb[104].mxu1 %v23696_v30  ;;  %26984 = vst [vmem:[#allocation122_spill] sm:$0xff] %v23718_v44  ;;  %v23723_v30 = vunpack.c.h.bf16 %v16092_v37 }
 0x2bf   :  { %21012 = vmatpush3.bf16.msra.mxu1 %v23270_v62  ;;  %18336 = vmatprep.mubr.f32.mxu1 %v23700_v8  ;;  %v16093_v8 = vld [vmem:[%s22924_s17 + $0x180] sm:$0xff]  }
 0x2c0   :  { %21014 = vmatprep.subr.bf16.mxu1 %v23276_v5  ;;  %26985 = vst [vmem:[#allocation123_spill] sm:$0xff] %v23723_v30  ;;  %v23727_v40 = vunpack.c.l.bf16 %v16093_v8 }
 0x2c2   :  { %18337 = vmatmul.mubr.f32.gmra.mrb[106].mxu1 %v23705_v15  ;;  %26986 = vst [vmem:[#allocation124_spill] sm:$0xff] %v23727_v40  ;;  %v23732_v15 = vunpack.c.h.bf16 %v16093_v8 }
 0x2c3   :  { %21016 = vmatpush3.bf16.msra.mxu1 %v23276_v5  ;;  %18339 = vmatprep.mubr.f32.mxu1 %v23709_v1  ;;  %v16094_v1 = vld [vmem:[%s22924_s17 + $0x188] sm:$0xff]  }
 0x2c4   :  { %21018 = vmatprep.subr.bf16.mxu1 %v23282_v12  ;;  %26987 = vst [vmem:[#allocation125_spill] sm:$0xff] %v23732_v15  ;;  %v23736_v37 = vunpack.c.l.bf16 %v16094_v1 }
 0x2c6   :  { %18340 = vmatmul.mubr.f32.gmra.mrb[108].mxu1 %v23714_v51  ;;  %26988 = vst [vmem:[#allocation126_spill] sm:$0xff] %v23736_v37  ;;  %v23741_v51 = vunpack.c.h.bf16 %v16094_v1 }
 0x2c7   :  { %21020 = vmatpush3.bf16.msra.mxu1 %v23282_v12  ;;  %18342 = vmatprep.mubr.f32.mxu1 %v23718_v44  ;;  %v16095_v44 = vld [vmem:[%s22924_s17 + $0x190] sm:$0xff]  }
 0x2c8   :  { %21022 = vmatprep.subr.bf16.mxu1 %v23287_v16  ;;  %26989 = vst [vmem:[#allocation127_spill] sm:$0xff] %v23741_v51  ;;  %v23745_v8 = vunpack.c.l.bf16 %v16095_v44 }
 0x2ca   :  { %18343 = vmatmul.mubr.f32.gmra.mrb[110].mxu1 %v23723_v30  ;;  %26990 = vst [vmem:[#allocation128_spill] sm:$0xff] %v23745_v8  ;;  %v23750_v30 = vunpack.c.h.bf16 %v16095_v44 }
 0x2cb   :  { %21024 = vmatpush3.bf16.msra.mxu1 %v23287_v16  ;;  %18409 = vmatprep.mubr.f32.mxu1 %v23727_v40  ;;  %v16096_v40 = vld [vmem:[%s22924_s17 + $0x198] sm:$0xff]  }
 0x2cc   :  { %21034 = vmatprep.subr.bf16.mxu1 %v23246_v34  ;;  %26991 = vst [vmem:[#allocation129_spill] sm:$0xff] %v23750_v30  ;;  %v23754_v1 = vunpack.c.l.bf16 %v16096_v40 }
 0x2ce   :  { %18410 = vmatmul.mubr.f32.vlgmr.msra.gmra.mrb[112].mxu1 %v23732_v15  ;;  %26992 = vst [vmem:[#allocation130_spill] sm:$0xff] %v23754_v1  ;;  %v16097_v15 = vld [vmem:[%s22924_s17 + $0x1a0] sm:$0xff]  }
 0x2cf   :  { %21036 = vmatpush3.bf16.msra.mxu1 %v23246_v34  ;;  %18412 = vmatprep.mubr.f32.mxu1 %v23736_v37  ;;  %v23759_v37 = vunpack.c.h.bf16 %v16096_v40  ;;  %v23763_v44 = vunpack.c.l.bf16 %v16097_v15 }
 0x2d0   :  { %21038 = vmatprep.subr.bf16.mxu1 %v23252_v41 }
 0x2d1   :  { %26993 = vst [vmem:[#allocation131_spill] sm:$0xff] %v23759_v37  ;;  %26994 = vst [vmem:[#allocation132_spill] sm:$0xff] %v23763_v44 }
 0x2d2   :  { %18413 = vmatmul.mubr.f32.gmra.mrb[114].mxu1 %v23741_v51  ;;  %v23768_v51 = vunpack.c.h.bf16 %v16097_v15  ;;  %v14971_v15 = vld [vmem:[%s22929_s21 + $0x30] sm:$0xff] }
 0x2d3   :  { %21040 = vmatpush3.bf16.msra.mxu1 %v23252_v41  ;;  %18415 = vmatprep.mubr.f32.mxu1 %v23745_v8  ;;  %v16098_v8 = vld [vmem:[%s22924_s17 + $0x1a8] sm:$0xff]  }
 0x2d4   :  { %21042 = vmatprep.subr.bf16.mxu1 %v23258_v48  ;;  %26995 = vst [vmem:[#allocation133_spill] sm:$0xff] %v23768_v51  ;;  %v23772_v40 = vunpack.c.l.bf16 %v16098_v8 }
 0x2d6   :  { %18416 = vmatmul.mubr.f32.gmra.mrb[116].mxu1 %v23750_v30  ;;  %26996 = vst [vmem:[#allocation134_spill] sm:$0xff] %v23772_v40  ;;  %v16099_v30 = vld [vmem:[%s22924_s17 + $0x1b0] sm:$0xff]  }
 0x2d7   :  { %21044 = vmatpush3.bf16.msra.mxu1 %v23258_v48  ;;  %18418 = vmatprep.mubr.f32.mxu1 %v23754_v1  ;;  %v23776_v1 = vunpack.c.h.bf16 %v16098_v8  ;;  %v23784_v27 = vunpack.c.l.bf16 %v16099_v30  ;;  %v16100_v8 = vld [vmem:[%s22924_s17 + $0x1b8] sm:$0xff]  }
 0x2d8   :  { %21046 = vmatprep.subr.bf16.mxu1 %v23264_v55 }
 0x2d9   :  { %26997 = vst [vmem:[#allocation135_spill] sm:$0xff] %v23776_v1  ;;  %26998 = vst [vmem:[#allocation136_spill] sm:$0xff] %v23784_v27 }
 0x2da   :  { %18419 = vmatmul.mubr.f32.gmra.mrb[118].mxu1 %v23759_v37  ;;  %v14972_v37 = vld [vmem:[%s22929_s21 + $0x38] sm:$0xff] }
 0x2db   :  { %21048 = vmatpush3.bf16.msra.mxu1 %v23264_v55  ;;  %18421 = vmatprep.mubr.f32.mxu1 %v23763_v44  ;;  %v20829_v20 = vpack.c.bf16 %v14972_v37, %v14971_v15  ;;  %v16101_v37 = vld [vmem:[%s22924_s17 + $0x1c0] sm:$0xff]  }
 0x2dc   :  { %21050 = vmatprep.subr.bf16.mxu1 %v23270_v62 }
 0x2de   :  { %18422 = vmatmul.mubr.f32.gmra.mrb[120].mxu1 %v23768_v51  ;;  %v23787_v51 = vunpack.c.h.bf16 %v16099_v30  ;;  %v23798_v30 = vunpack.c.l.bf16 %v16100_v8 }
 0x2df   :  { %21052 = vmatpush3.bf16.msra.mxu1 %v23270_v62  ;;  %18424 = vmatprep.mubr.f32.mxu1 %v23772_v40  ;;  %v15005_v40 = vld [vmem:[%s22929_s21 + $0x40] sm:$0xff] }
 0x2e0   :  { %21054 = vmatprep.subr.bf16.mxu1 %v23276_v5  ;;  %26999 = vst [vmem:[#allocation137_spill] sm:$0xff] %v23787_v51  ;;  %27000 = vst [vmem:[#allocation138_spill] sm:$0xff] %v23798_v30  ;;  %v23804_v15 = vpack.c.bf16 %v15006_v22, %v15005_v40  ;;  %v23814_v22 = vunpack.c.h.bf16 %v16101_v37  ;;  %v16102_v40 = vld [vmem:[%s22924_s17 + $0x1c8] sm:$0xff]  }
 0x2e1   :  { %v17883_v44 = vpop.f32.mrb[16].mxu1 }
 0x2e2   :  { %v647_v61 = vpop.f32.mrb[17].mxu1  ;;  %18425 = vmatmul.mubr.f32.gmra.mrb[122].mxu1 %v23776_v1  ;;  %27003 = vst [vmem:[#allocation141_spill] sm:$0xff] %v23814_v22 }
 0x2e3   :  { %17913 = vmatprep.mubr.msk.f32.mxu0 %vm338_vm0, %v647_v61  ;;  %21056 = vmatpush3.bf16.msra.mxu1 %v23276_v5  ;;  %v23801_v61 = vunpack.c.h.bf16 %v16100_v8 }
 0x2e4   :  { %17914 = vmatmul.mubr.msk.f32.vlgmr.msra.gmra.mrb[0].mxu0 %vm338_vm0, %v17883_v44  ;;  %21058 = vmatprep.subr.bf16.mxu1 %v23282_v12  ;;  %v23811_v44 = vunpack.c.l.bf16 %v16101_v37  ;;  %v23826_v37 = vunpack.c.h.bf16 %v16102_v40 }
 0x2e5   :  { %v17886_v17 = vpop.f32.mrb[18].mxu1  ;;  %18427 = vmatprep.mubr.f32.mxu1 %v23784_v27  ;;  %20828 = vmatpush3.bf16.msra.mxu0 %v23510_v58  ;;  %27001 = vst [vmem:[#allocation139_spill] sm:$0xff] %v23801_v61  ;;  %v16105_v27 = vld [vmem:[%s22924_s17 + $0x1e0] sm:$0xff]  }
 0x2e6   :  { %v657_v1 = vpop.f32.mrb[19].mxu1  ;;  %18428 = vmatmul.mubr.f32.gmra.mrb[124].mxu1 %v23787_v51  ;;  %20830 = vmatprep.subr.bf16.mxu0 %v20829_v20  ;;  %27002 = vst [vmem:[#allocation140_spill] sm:$0xff] %v23811_v44  ;;  %27005 = vst [vmem:[#allocation143_spill] sm:$0xff] %v23826_v37  ;;  %v16104_v51 = vld [vmem:[%s22924_s17 + $0x1d8] sm:$0xff]  }
 0x2e7   :  { %17916 = vmatprep.mubr.msk.f32.mxu0 %vm338_vm0, %v657_v1  ;;  %21060 = vmatpush3.bf16.msra.mxu1 %v23282_v12 }
 0x2e8   :  { %17917 = vmatmul.mubr.msk.f32.gmra.mrb[2].mxu0 %vm338_vm0, %v17886_v17  ;;  %21062 = vmatprep.subr.bf16.mxu1 %v23287_v16 }
 0x2e9   :  { %v17889_v58 = vpop.f32.mrb[20].mxu1  ;;  %18430 = vmatprep.mubr.f32.mxu1 %v23798_v30  ;;  %20832 = vmatpush3.bf16.msra.mxu0 %v20829_v20  ;;  %v23823_v20 = vunpack.c.l.bf16 %v16102_v40 }
 0x2ea   :  { %v667_v8 = vpop.f32.mrb[21].mxu1  ;;  %18431 = vmatmul.mubr.f32.gmra.mrb[126].mxu1 %v23801_v61  ;;  %20866 = vmatprep.subr.bf16.mxu0 %v23804_v15  ;;  %v16103_v61 = vld [vmem:[%s22924_s17 + $0x1d0] sm:$0xff]  }
 0x2eb   :  { %17919 = vmatprep.mubr.msk.f32.mxu0 %vm338_vm0, %v667_v8  ;;  %21064 = vmatpush3.bf16.msra.mxu1 %v23287_v16  ;;  %27004 = vst [vmem:[#allocation142_spill] sm:$0xff] %v23823_v20  ;;  %v23834_v8 = vunpack.c.l.bf16 %v16103_v61  ;;  %v23837_v40 = vunpack.c.h.bf16 %v16103_v61  ;;  %v23848_v61 = vunpack.c.h.bf16 %v16104_v51 }
 0x2ec   :  { %17920 = vmatmul.mubr.msk.f32.gmra.mrb[4].mxu0 %vm338_vm0, %v17889_v58  ;;  %21074 = vmatprep.subr.bf16.mxu1 %v23246_v34 }
 0x2ed   :  { %v17892_v17 = vpop.f32.mrb[22].mxu1  ;;  %18497 = vmatprep.mubr.f32.mxu1 %v23811_v44  ;;  %27006 = vst [vmem:[#allocation144_spill] sm:$0xff] %v23834_v8  ;;  %27007 = vst [vmem:[#allocation145_spill] sm:$0xff] %v23837_v40 }
 0x2ee   :  { %v677_v1 = vpop.f32.mrb[23].mxu1  ;;  %18498 = vmatmul.mubr.f32.vlgmr.msra.gmra.mrb[128].mxu1 %v23814_v22  ;;  %27009 = vst [vmem:[#allocation147_spill] sm:$0xff] %v23848_v61 }
 0x2ef   :  { %17922 = vmatprep.mubr.msk.f32.mxu0 %vm338_vm0, %v677_v1  ;;  %21076 = vmatpush3.bf16.msra.mxu1 %v23246_v34 }
 0x2f0   :  { %17923 = vmatmul.mubr.msk.f32.gmra.mrb[6].mxu0 %vm338_vm0, %v17892_v17  ;;  %21078 = vmatprep.subr.bf16.mxu1 %v23252_v41  ;;  %v23845_v17 = vunpack.c.l.bf16 %v16104_v51  ;;  %v23859_v51 = vunpack.c.h.bf16 %v16105_v27 }
 0x2f1   :  { %v17895_v58 = vpop.f32.mrb[24].mxu1  ;;  %18500 = vmatprep.mubr.f32.mxu1 %v23823_v20 }
 0x2f2   :  { %v687_v30 = vpop.f32.mrb[25].mxu1  ;;  %18501 = vmatmul.mubr.f32.gmra.mrb[130].mxu1 %v23826_v37  ;;  %27008 = vst [vmem:[#allocation146_spill] sm:$0xff] %v23845_v17  ;;  %27011 = vst [vmem:[#allocation149_spill] sm:$0xff] %v23859_v51 }
 0x2f3   :  { %17925 = vmatprep.mubr.msk.f32.mxu0 %vm338_vm0, %v687_v30  ;;  %21080 = vmatpush3.bf16.msra.mxu1 %v23252_v41  ;;  %v23856_v30 = vunpack.c.l.bf16 %v16105_v27 }
 0x2f4   :  { %17926 = vmatmul.mubr.msk.f32.gmra.mrb[8].mxu0 %vm338_vm0, %v17895_v58  ;;  %21082 = vmatprep.subr.bf16.mxu1 %v23258_v48 }
 0x2f5   :  { %v17898_v34 = vpop.f32.mrb[26].mxu1  ;;  %18503 = vmatprep.mubr.f32.mxu1 %v23834_v8  ;;  %27010 = vst [vmem:[#allocation148_spill] sm:$0xff] %v23856_v30 }
 0x2f6   :  { %v697_v1 = vpop.f32.mrb[27].mxu1  ;;  %18504 = vmatmul.mubr.f32.gmra.mrb[132].mxu1 %v23837_v40  ;;  %v15042_v40 = vld [vmem:[%s22929_s21 + $0x68] sm:$0xff] }
 0x2f7   :  { %17928 = vmatprep.mubr.msk.f32.mxu0 %vm338_vm0, %v697_v1  ;;  %21084 = vmatpush3.bf16.msra.mxu1 %v23258_v48  ;;  %v16106_v1 = vld [vmem:[%s22924_s17 + $0x1e8] sm:$0xff]  }
 0x2f8   :  { %17929 = vmatmul.mubr.msk.f32.gmra.mrb[10].mxu0 %vm338_vm0, %v17898_v34  ;;  %21086 = vmatprep.subr.bf16.mxu1 %v23264_v55  ;;  %v23867_v34 = vunpack.c.l.bf16 %v16106_v1  ;;  %v23870_v27 = vunpack.c.h.bf16 %v16106_v1 }
 0x2f9   :  { %v17901_v41 = vpop.f32.mrb[28].mxu1  ;;  %18506 = vmatprep.mubr.f32.mxu1 %v23845_v17 }
 0x2fa   :  { %v707_v58 = vpop.f32.mrb[29].mxu1  ;;  %18507 = vmatmul.mubr.f32.gmra.mrb[134].mxu1 %v23848_v61  ;;  %27012 = vst [vmem:[#allocation150_spill] sm:$0xff] %v23867_v34  ;;  %27013 = vst [vmem:[#allocation151_spill] sm:$0xff] %v23870_v27  ;;  %v16107_v61 = vld [vmem:[%s22924_s17 + $0x1f0] sm:$0xff]  }
 0x2fb   :  { %17931 = vmatprep.mubr.msk.f32.mxu0 %vm338_vm0, %v707_v58  ;;  %21088 = vmatpush3.bf16.msra.mxu1 %v23264_v55  ;;  %v15007_v55 = vld [vmem:[%s22929_s21 + $0x50] sm:$0xff] }
 0x2fc   :  { %17932 = vmatmul.mubr.msk.f32.gmra.mrb[12].mxu0 %vm338_vm0, %v17901_v41  ;;  %21090 = vmatprep.subr.bf16.mxu1 %v23270_v62  ;;  %v15008_v41 = vld [vmem:[%s22929_s21 + $0x58] sm:$0xff] }
 0x2fd   :  { %v17904_v48 = vpop.f32.mrb[30].mxu1  ;;  %18509 = vmatprep.mubr.f32.mxu1 %v23856_v30  ;;  %v23880_v30 = vunpack.c.l.bf16 %v16107_v61 }
 0x2fe   :  { %v717_v17 = vpop.f32.mrb[31].mxu1  ;;  %18510 = vmatmul.mubr.f32.gmra.mrb[136].mxu1 %v23859_v51  ;;  %v16108_v51 = vld [vmem:[%s22924_s17 + $0x1f8] sm:$0xff]  }
 0x2ff   :  { %17934 = vmatprep.mubr.msk.f32.mxu0 %vm338_vm0, %v717_v17  ;;  %21092 = vmatpush3.bf16.msra.mxu1 %v23270_v62  ;;  %27014 = vst [vmem:[#allocation152_spill] sm:$0xff] %v23880_v30  ;;  %v23883_v17 = vunpack.c.h.bf16 %v16107_v61  ;;  %v20869_v62 = vpack.c.bf16 %v15008_v41, %v15007_v55  ;;  %v23894_v61 = vunpack.c.l.bf16 %v16108_v51  ;;  %v23898_v41 = vunpack.c.h.bf16 %v16108_v51 }
 0x300   :  { %17935 = vmatmul.mubr.msk.f32.gmra.mrb[14].mxu0 %vm338_vm0, %v17904_v48  ;;  %21094 = vmatprep.subr.bf16.mxu1 %v23276_v5  ;;  %v15041_v48 = vld [vmem:[%s22929_s21 + $0x60] sm:$0xff] }
 0x301   :  { %v17971_v58 = vpop.f32.mrb[32].mxu1  ;;  %18512 = vmatprep.mubr.f32.mxu1 %v23867_v34  ;;  %27015 = vst [vmem:[#allocation153_spill] sm:$0xff] %v23883_v17  ;;  %27016 = vst [vmem:[#allocation154_spill] sm:$0xff] %v23894_v61 }
 0x302   :  { %v1044_v1 = vpop.f32.mrb[33].mxu1  ;;  %18513 = vmatmul.mubr.f32.gmra.mrb[138].mxu1 %v23870_v27  ;;  %v16109_v27 = vld [vmem:[%s22924_s17 + $0x200] sm:$0xff]   ;;  %27017 = vst [vmem:[#allocation155_spill] sm:$0xff] %v23898_v41 }
 0x303   :  { %18001 = vmatprep.mubr.msk.f32.mxu0 %vm338_vm0, %v1044_v1  ;;  %21096 = vmatpush3.bf16.msra.mxu1 %v23276_v5  ;;  %v23900_v5 = vpack.c.bf16 %v15042_v40, %v15041_v48  ;;  %v23911_v40 = vunpack.c.h.bf16 %v16109_v27 }
 0x304   :  { %18002 = vmatmul.mubr.msk.f32.vlgmr.msra.gmra.mrb[0].mxu0 %vm338_vm0, %v17971_v58  ;;  %21098 = vmatprep.subr.bf16.mxu1 %v23282_v12  ;;  %v16110_v58 = vld [vmem:[%s22924_s17 + $0x208] sm:$0xff]  }
 0x305   :  { %v17974_v34 = vpop.f32.mrb[34].mxu1  ;;  %18515 = vmatprep.mubr.f32.mxu1 %v23880_v30  ;;  %20868 = vmatpush3.bf16.msra.mxu0 %v23804_v15  ;;  %v23906_v15 = vunpack.c.l.bf16 %v16109_v27  ;;  %27019 = vst [vmem:[#allocation157_spill] sm:$0xff] %v23911_v40  ;;  %v23922_v27 = vunpack.c.h.bf16 %v16110_v58 }
 0x306   :  { %v1054_v55 = vpop.f32.mrb[35].mxu1  ;;  %18516 = vmatmul.mubr.f32.gmra.mrb[140].mxu1 %v23883_v17  ;;  %20870 = vmatprep.subr.bf16.mxu0 %v20869_v62 }
 0x307   :  { %18004 = vmatprep.mubr.msk.f32.mxu0 %vm338_vm0, %v1054_v55  ;;  %21100 = vmatpush3.bf16.msra.mxu1 %v23282_v12  ;;  %27018 = vst [vmem:[#allocation156_spill] sm:$0xff] %v23906_v15  ;;  %v23916_v12 = vunpack.c.l.bf16 %v16110_v58  ;;  %27021 = vst [vmem:[#allocation159_spill] sm:$0xff] %v23922_v27 }
 0x308   :  { %18005 = vmatmul.mubr.msk.f32.gmra.mrb[2].mxu0 %vm338_vm0, %v17974_v34  ;;  %21102 = vmatprep.subr.bf16.mxu1 %v23287_v16  ;;  %v16111_v34 = vld [vmem:[%s22924_s17 + $0x210] sm:$0xff]  }
 0x309   :  { %v17977_v1 = vpop.f32.mrb[36].mxu1  ;;  %18518 = vmatprep.mubr.f32.mxu1 %v23894_v61  ;;  %20872 = vmatpush3.bf16.msra.mxu0 %v20869_v62  ;;  %27020 = vst [vmem:[#allocation158_spill] sm:$0xff] %v23916_v12  ;;  %v23926_v55 = vunpack.c.l.bf16 %v16111_v34  ;;  %v15078_v61 = vld [vmem:[%s22929_s21 + $0x88] sm:$0xff] }
 0x30a   :  { %v1064_v51 = vpop.f32.mrb[37].mxu1  ;;  %18519 = vmatmul.mubr.f32.gmra.mrb[142].mxu1 %v23898_v41  ;;  %20906 = vmatprep.subr.bf16.mxu0 %v23900_v5 }
 0x30b   :  { %18007 = vmatprep.mubr.msk.f32.mxu0 %vm338_vm0, %v1064_v51  ;;  %21104 = vmatpush3.bf16.msra.mxu1 %v23287_v16  ;;  %27022 = vst [vmem:[#allocation160_spill] sm:$0xff] %v23926_v55  ;;  %v16112_v16 = vld [vmem:[%s22924_s17 + $0x218] sm:$0xff]  }
 0x30c   :  { %18008 = vmatmul.mubr.msk.f32.gmra.mrb[4].mxu0 %vm338_vm0, %v17977_v1  ;;  %18585 = vmatprep.mubr.f32.mxu1 %v23906_v15  ;;  %v23931_v15 = vunpack.c.h.bf16 %v16111_v34  ;;  %v23935_v58 = vunpack.c.l.bf16 %v16112_v16 }
 0x30d   :  { %v17980_v62 = vpop.f32.mrb[38].mxu1 }
 0x30e   :  { %v1074_v48 = vpop.f32.mrb[39].mxu1  ;;  %18586 = vmatmul.mubr.f32.vlgmr.msra.gmra.mrb[144].mxu1 %v23911_v40  ;;  %27023 = vst [vmem:[#allocation161_spill] sm:$0xff] %v23931_v15  ;;  %27024 = vst [vmem:[#allocation162_spill] sm:$0xff] %v23935_v58 }
 0x30f   :  { %18010 = vmatprep.mubr.msk.f32.mxu0 %vm338_vm0, %v1074_v48  ;;  %18588 = vmatprep.mubr.f32.mxu1 %v23916_v12  ;;  %v16113_v48 = vld [vmem:[%s22924_s17 + $0x220] sm:$0xff]  }
 0x310   :  { %18011 = vmatmul.mubr.msk.f32.gmra.mrb[6].mxu0 %vm338_vm0, %v17980_v62  ;;  %v23940_v62 = vunpack.c.h.bf16 %v16112_v16  ;;  %v23944_v34 = vunpack.c.l.bf16 %v16113_v48  ;;  %v16115_v16 = vld [vmem:[%s22924_s17 + $0x230] sm:$0xff]  }
 0x311   :  { %v17983_v1 = vpop.f32.mrb[40].mxu1 }
 0x312   :  { %v1084_v51 = vpop.f32.mrb[41].mxu1  ;;  %18589 = vmatmul.mubr.f32.gmra.mrb[146].mxu1 %v23922_v27  ;;  %27025 = vst [vmem:[#allocation163_spill] sm:$0xff] %v23940_v62  ;;  %27026 = vst [vmem:[#allocation164_spill] sm:$0xff] %v23944_v34  ;;  %v23949_v27 = vunpack.c.h.bf16 %v16113_v48  ;;  %v23962_v48 = vunpack.c.l.bf16 %v16115_v16 }
 0x313   :  { %18013 = vmatprep.mubr.msk.f32.mxu0 %vm338_vm0, %v1084_v51  ;;  %18591 = vmatprep.mubr.f32.mxu1 %v23926_v55  ;;  %v16114_v51 = vld [vmem:[%s22924_s17 + $0x228] sm:$0xff]  }
 0x314   :  { %18014 = vmatmul.mubr.msk.f32.gmra.mrb[8].mxu0 %vm338_vm0, %v17983_v1  ;;  %27027 = vst [vmem:[#allocation165_spill] sm:$0xff] %v23949_v27  ;;  %27030 = vst [vmem:[#allocation168_spill] sm:$0xff] %v23962_v48 }
 0x315   :  { %v17986_v12 = vpop.f32.mrb[42].mxu1 }
 0x316   :  { %v1094_v40 = vpop.f32.mrb[43].mxu1  ;;  %18592 = vmatmul.mubr.f32.gmra.mrb[148].mxu1 %v23931_v15  ;;  %v23958_v15 = vunpack.c.h.bf16 %v16114_v51 }
 0x317   :  { %18016 = vmatprep.mubr.msk.f32.mxu0 %vm338_vm0, %v1094_v40  ;;  %18594 = vmatprep.mubr.f32.mxu1 %v23935_v58  ;;  %v23953_v40 = vunpack.c.l.bf16 %v16114_v51 }
 0x318   :  { %18017 = vmatmul.mubr.msk.f32.gmra.mrb[10].mxu0 %vm338_vm0, %v17986_v12  ;;  %27029 = vst [vmem:[#allocation167_spill] sm:$0xff] %v23958_v15 }
 0x319   :  { %v17989_v55 = vpop.f32.mrb[44].mxu1  ;;  %27028 = vst [vmem:[#allocation166_spill] sm:$0xff] %v23953_v40 }
 0x31a   :  { %v1104_v1 = vpop.f32.mrb[45].mxu1  ;;  %18595 = vmatmul.mubr.f32.gmra.mrb[150].mxu1 %v23940_v62 }
 0x31b   :  { %18019 = vmatprep.mubr.msk.f32.mxu0 %vm338_vm0, %v1104_v1  ;;  %18597 = vmatprep.mubr.f32.mxu1 %v23944_v34  ;;  %v15043_v1 = vld [vmem:[%s22929_s21 + $0x70] sm:$0xff]  ;;  %v15044_v34 = vld [vmem:[%s22929_s21 + $0x78] sm:$0xff] }
 0x31c   :  { %18020 = vmatmul.mubr.msk.f32.gmra.mrb[12].mxu0 %vm338_vm0, %v17989_v55  ;;  %v16116_v55 = vld [vmem:[%s22924_s17 + $0x238] sm:$0xff]   ;;  %v20909_v51 = vpack.c.bf16 %v15044_v34, %v15043_v1  ;;  %s27142_s17 = sld [smem:[#allocation27_spill]] }
 0x31d   :  { %v17992_v12 = vpop.f32.mrb[46].mxu1 }
 0x31e   :  { %v1114_v58 = vpop.f32.mrb[47].mxu1  ;;  %18598 = vmatmul.mubr.f32.gmra.mrb[152].mxu1 %v23949_v27  ;;  %v23969_v27 = vunpack.c.h.bf16 %v16115_v16 }
 0x31f   :  { %18022 = vmatprep.mubr.msk.f32.mxu0 %vm338_vm0, %v1114_v58  ;;  %18600 = vmatprep.mubr.f32.mxu1 %v23953_v40  ;;  %v23973_v58 = vunpack.c.l.bf16 %v16116_v55  ;;  %v15077_v40 = vld [vmem:[%s22929_s21 + $0x80] sm:$0xff] }
 0x320   :  { %18023 = vmatmul.mubr.msk.f32.gmra.mrb[14].mxu0 %vm338_vm0, %v17992_v12  ;;  %27031 = vst [vmem:[#allocation169_spill] sm:$0xff] %v23969_v27  ;;  %v20945_v34 = vpack.c.bf16 %v15078_v61, %v15077_v40 }
 0x321   :  { %v18059_v62 = vpop.f32.mrb[48].mxu1  ;;  %27032 = vst [vmem:[#allocation170_spill] sm:$0xff] %v23973_v58 }
 0x322   :  { %v1436_v41 = vpop.f32.mrb[49].mxu1  ;;  %18601 = vmatmul.mubr.f32.gmra.mrb[154].mxu1 %v23958_v15  ;;  %v23980_v15 = vunpack.c.h.bf16 %v16116_v55 }
 0x323   :  { %18089 = vmatprep.mubr.msk.f32.mxu0 %vm338_vm0, %v1436_v41  ;;  %18603 = vmatprep.mubr.f32.mxu1 %v23962_v48 }
 0x324   :  { %18090 = vmatmul.mubr.msk.f32.vlgmr.msra.gmra.mrb[0].mxu0 %vm338_vm0, %v18059_v62  ;;  %27033 = vst [vmem:[#allocation171_spill] sm:$0xff] %v23980_v15 }
 0x325   :  { %v18062_v17 = vpop.f32.mrb[50].mxu1  ;;  %20908 = vmatpush3.bf16.msra.mxu0 %v23900_v5 }
 0x326   :  { %v1446_v12 = vpop.f32.mrb[51].mxu1  ;;  %18604 = vmatmul.mubr.f32.gmra.mrb[156].mxu1 %v23969_v27  ;;  %20910 = vmatprep.subr.bf16.mxu0 %v20909_v51 }
 0x327   :  { %18092 = vmatprep.mubr.msk.f32.mxu0 %vm338_vm0, %v1446_v12  ;;  %18606 = vmatprep.mubr.f32.mxu1 %v23973_v58 }
 0x328   :  { %18093 = vmatmul.mubr.msk.f32.gmra.mrb[2].mxu0 %vm338_vm0, %v18062_v17 }
 0x329   :  { %v18065_v41 = vpop.f32.mrb[52].mxu1  ;;  %20912 = vmatpush3.bf16.msra.mxu0 %v20909_v51 }
 0x32a   :  { %v1456_v16 = vpop.f32.mrb[53].mxu1  ;;  %18607 = vmatmul.mubr.f32.gmra.mrb[158].mxu1 %v23980_v15  ;;  %20946 = vmatprep.subr.bf16.mxu0 %v20945_v34 }
 0x32b   :  { %18095 = vmatprep.mubr.msk.f32.mxu0 %vm338_vm0, %v1456_v16  ;;  %18673 = vmatprep.mubr.f32.mxu1 %v23237_v23  ;;  %v15079_v16 = vld [vmem:[%s22929_s21 + $0x90] sm:$0xff] }
 0x32c   :  { %18096 = vmatmul.mubr.msk.f32.gmra.mrb[4].mxu0 %vm338_vm0, %v18065_v41 }
 0x32d   :  { %v18068_v5 = vpop.f32.mrb[54].mxu1 }
 0x32e   :  { %v1466_v61 = vpop.f32.mrb[55].mxu1 }
 0x32f   :  { %18098 = vmatprep.mubr.msk.f32.mxu0 %vm338_vm0, %v1466_v61 }
 0x330   :  { %18099 = vmatmul.mubr.msk.f32.gmra.mrb[6].mxu0 %vm338_vm0, %v18068_v5  ;;  %v15080_v5 = vld [vmem:[%s22929_s21 + $0x98] sm:$0xff] }
 0x331   :  { %v18071_v17 = vpop.f32.mrb[56].mxu1 }
 0x332   :  { %v1476_v62 = vpop.f32.mrb[57].mxu1 }
 0x333   :  { %18101 = vmatprep.mubr.msk.f32.mxu0 %vm338_vm0, %v1476_v62  ;;  %v20949_v62 = vpack.c.bf16 %v15080_v5, %v15079_v16 }
 0x334   :  { %18102 = vmatmul.mubr.msk.f32.gmra.mrb[8].mxu0 %vm338_vm0, %v18071_v17 }
 0x335   :  { %v18074_v40 = vpop.f32.mrb[58].mxu1 }
 0x336   :  { %v1486_v1 = vpop.f32.mrb[59].mxu1 }
 0x337   :  { %18104 = vmatprep.mubr.msk.f32.mxu0 %vm338_vm0, %v1486_v1  ;;  %v15114_v1 = vld [vmem:[%s22929_s21 + $0xa8] sm:$0xff] }
 0x338   :  { %18105 = vmatmul.mubr.msk.f32.gmra.mrb[10].mxu0 %vm338_vm0, %v18074_v40  ;;  %v15113_v40 = vld [vmem:[%s22929_s21 + $0xa0] sm:$0xff] }
 0x339   :  { %v18077_v55 = vpop.f32.mrb[60].mxu1  ;;  %v20985_v23 = vpack.c.bf16 %v15114_v1, %v15113_v40 }
 0x33a   :  { %v1496_v51 = vpop.f32.mrb[61].mxu1 }
 0x33b   :  { %18107 = vmatprep.mubr.msk.f32.mxu0 %vm338_vm0, %v1496_v51 }
 0x33c   :  { %18108 = vmatmul.mubr.msk.f32.gmra.mrb[12].mxu0 %vm338_vm0, %v18077_v55 }
 0x33d   :  { %v18080_v12 = vpop.f32.mrb[62].mxu1 }
 0x33e   :  { %v1506_v41 = vpop.f32.mrb[63].mxu1 }
 0x33f   :  { %18110 = vmatprep.mubr.msk.f32.mxu0 %vm338_vm0, %v1506_v41 }
 0x340   :  { %18111 = vmatmul.mubr.msk.f32.gmra.mrb[14].mxu0 %vm338_vm0, %v18080_v12 }
 0x341   :  { %v18147_v61 = vpop.f32.mrb[64].mxu1 }
 0x342   :  { %v1828_v17 = vpop.f32.mrb[65].mxu1 }
 0x343   :  { %18177 = vmatprep.mubr.msk.f32.mxu0 %vm338_vm0, %v1828_v17 }
 0x344   :  { %18178 = vmatmul.mubr.msk.f32.vlgmr.msra.gmra.mrb[0].mxu0 %vm338_vm0, %v18147_v61 }
 0x345   :  { %v18150_v51 = vpop.f32.mrb[66].mxu1  ;;  %20948 = vmatpush3.bf16.msra.mxu0 %v20945_v34 }
 0x346   :  { %v1838_v55 = vpop.f32.mrb[67].mxu1  ;;  %20950 = vmatprep.subr.bf16.mxu0 %v20949_v62 }
 0x347   :  { %18180 = vmatprep.mubr.msk.f32.mxu0 %vm338_vm0, %v1838_v55 }
 0x348   :  { %18181 = vmatmul.mubr.msk.f32.gmra.mrb[2].mxu0 %vm338_vm0, %v18150_v51 }
 0x349   :  { %v18153_v41 = vpop.f32.mrb[68].mxu1  ;;  %20952 = vmatpush3.bf16.msra.mxu0 %v20949_v62 }
 0x34a   :  { %v1848_v12 = vpop.f32.mrb[69].mxu1  ;;  %20986 = vmatprep.subr.bf16.mxu0 %v20985_v23 }
 0x34b   :  { %18183 = vmatprep.mubr.msk.f32.mxu0 %vm338_vm0, %v1848_v12  ;;  %v15116_v12 = vld [vmem:[%s22929_s21 + $0xb8] sm:$0xff] }
 0x34c   :  { %18184 = vmatmul.mubr.msk.f32.gmra.mrb[4].mxu0 %vm338_vm0, %v18153_v41  ;;  %v15115_v41 = vld [vmem:[%s22929_s21 + $0xb0] sm:$0xff] }
 0x34d   :  { %v18156_v16 = vpop.f32.mrb[70].mxu1 }
 0x34e   :  { %v1858_v5 = vpop.f32.mrb[71].mxu1 }
 0x34f   :  { %18186 = vmatprep.mubr.msk.f32.mxu0 %vm338_vm0, %v1858_v5 }
 0x350   :  { %18187 = vmatmul.mubr.msk.f32.gmra.mrb[6].mxu0 %vm338_vm0, %v18156_v16 }
 0x351   :  { %v18159_v34 = vpop.f32.mrb[72].mxu1 }
 0x352   :  { %v1868_v61 = vpop.f32.mrb[73].mxu1 }
 0x353   :  { %18189 = vmatprep.mubr.msk.f32.mxu0 %vm338_vm0, %v1868_v61  ;;  %v15149_v61 = vld [vmem:[%s22929_s21 + $0xc0] sm:$0xff] }
 0x354   :  { %18190 = vmatmul.mubr.msk.f32.gmra.mrb[8].mxu0 %vm338_vm0, %v18159_v34  ;;  %v20989_v34 = vpack.c.bf16 %v15116_v12, %v15115_v41 }
 0x355   :  { %v18162_v17 = vpop.f32.mrb[74].mxu1 }
 0x356   :  { %v1878_v62 = vpop.f32.mrb[75].mxu1 }
 0x357   :  { %18192 = vmatprep.mubr.msk.f32.mxu0 %vm338_vm0, %v1878_v62 }
 0x358   :  { %18193 = vmatmul.mubr.msk.f32.gmra.mrb[10].mxu0 %vm338_vm0, %v18162_v17  ;;  %v15150_v17 = vld [vmem:[%s22929_s21 + $0xc8] sm:$0xff] }
 0x359   :  { %v18165_v40 = vpop.f32.mrb[76].mxu1 }
 0x35a   :  { %v1888_v1 = vpop.f32.mrb[77].mxu1 }
 0x35b   :  { %18195 = vmatprep.mubr.msk.f32.mxu0 %vm338_vm0, %v1888_v1  ;;  %v21025_v1 = vpack.c.bf16 %v15150_v17, %v15149_v61 }
 0x35c   :  { %18196 = vmatmul.mubr.msk.f32.gmra.mrb[12].mxu0 %vm338_vm0, %v18165_v40 }
 0x35d   :  { %v18168_v51 = vpop.f32.mrb[78].mxu1 }
 0x35e   :  { %v1898_v55 = vpop.f32.mrb[79].mxu1 }
 0x35f   :  { %18198 = vmatprep.mubr.msk.f32.mxu0 %vm338_vm0, %v1898_v55 }
 0x360   :  { %18199 = vmatmul.mubr.msk.f32.gmra.mrb[14].mxu0 %vm338_vm0, %v18168_v51 }
 0x361   :  { %v18235_v16 = vpop.f32.mrb[80].mxu1 }
 0x362   :  { %v2220_v5 = vpop.f32.mrb[81].mxu1 }
 0x363   :  { %18265 = vmatprep.mubr.msk.f32.mxu0 %vm338_vm0, %v2220_v5 }
 0x364   :  { %18266 = vmatmul.mubr.msk.f32.vlgmr.msra.gmra.mrb[0].mxu0 %vm338_vm0, %v18235_v16 }
 0x365   :  { %v18238_v62 = vpop.f32.mrb[82].mxu1  ;;  %20988 = vmatpush3.bf16.msra.mxu0 %v20985_v23 }
 0x366   :  { %v2230_v40 = vpop.f32.mrb[83].mxu1  ;;  %20990 = vmatprep.subr.bf16.mxu0 %v20989_v34 }
 0x367   :  { %18268 = vmatprep.mubr.msk.f32.mxu0 %vm338_vm0, %v2230_v40 }
 0x368   :  { %18269 = vmatmul.mubr.msk.f32.gmra.mrb[2].mxu0 %vm338_vm0, %v18238_v62 }
 0x369   :  { %v18241_v55 = vpop.f32.mrb[84].mxu1  ;;  %20992 = vmatpush3.bf16.msra.mxu0 %v20989_v34 }
 0x36a   :  { %v2240_v51 = vpop.f32.mrb[85].mxu1  ;;  %21026 = vmatprep.subr.bf16.mxu0 %v21025_v1 }
 0x36b   :  { %18271 = vmatprep.mubr.msk.f32.mxu0 %vm338_vm0, %v2240_v51  ;;  %v15152_v51 = vld [vmem:[%s22929_s21 + $0xd8] sm:$0xff] }
 0x36c   :  { %18272 = vmatmul.mubr.msk.f32.gmra.mrb[4].mxu0 %vm338_vm0, %v18241_v55  ;;  %v15151_v55 = vld [vmem:[%s22929_s21 + $0xd0] sm:$0xff] }
 0x36d   :  { %v18244_v41 = vpop.f32.mrb[86].mxu1 }
 0x36e   :  { %v2250_v12 = vpop.f32.mrb[87].mxu1 }
 0x36f   :  { %18274 = vmatprep.mubr.msk.f32.mxu0 %vm338_vm0, %v2250_v12 }
 0x370   :  { %18275 = vmatmul.mubr.msk.f32.gmra.mrb[6].mxu0 %vm338_vm0, %v18244_v41 }
 0x371   :  { %v18247_v23 = vpop.f32.mrb[88].mxu1 }
 0x372   :  { %v2260_v16 = vpop.f32.mrb[89].mxu1 }
 0x373   :  { %18277 = vmatprep.mubr.msk.f32.mxu0 %vm338_vm0, %v2260_v16  ;;  %v15185_v16 = vld [vmem:[%s22929_s21 + $0xe0] sm:$0xff] }
 0x374   :  { %18278 = vmatmul.mubr.msk.f32.gmra.mrb[8].mxu0 %vm338_vm0, %v18247_v23  ;;  %v21029_v23 = vpack.c.bf16 %v15152_v51, %v15151_v55 }
 0x375   :  { %v18250_v5 = vpop.f32.mrb[90].mxu1 }
 0x376   :  { %v2270_v34 = vpop.f32.mrb[91].mxu1 }
 0x377   :  { %18280 = vmatprep.mubr.msk.f32.mxu0 %vm338_vm0, %v2270_v34 }
 0x378   :  { %18281 = vmatmul.mubr.msk.f32.gmra.mrb[10].mxu0 %vm338_vm0, %v18250_v5  ;;  %v15186_v5 = vld [vmem:[%s22929_s21 + $0xe8] sm:$0xff] }
 0x379   :  { %v18253_v61 = vpop.f32.mrb[92].mxu1 }
 0x37a   :  { %v2280_v17 = vpop.f32.mrb[93].mxu1 }
 0x37b   :  { %18283 = vmatprep.mubr.msk.f32.mxu0 %vm338_vm0, %v2280_v17  ;;  %v21065_v17 = vpack.c.bf16 %v15186_v5, %v15185_v16 }
 0x37c   :  { %18284 = vmatmul.mubr.msk.f32.gmra.mrb[12].mxu0 %vm338_vm0, %v18253_v61 }
 0x37d   :  { %v18256_v62 = vpop.f32.mrb[94].mxu1 }
 0x37e   :  { %v2290_v40 = vpop.f32.mrb[95].mxu1 }
 0x37f   :  { %18286 = vmatprep.mubr.msk.f32.mxu0 %vm338_vm0, %v2290_v40 }
 0x380   :  { %18287 = vmatmul.mubr.msk.f32.gmra.mrb[14].mxu0 %vm338_vm0, %v18256_v62 }
 0x381   :  { %v18323_v41 = vpop.f32.mrb[96].mxu1 }
 0x382   :  { %v2612_v12 = vpop.f32.mrb[97].mxu1 }
 0x383   :  { %18353 = vmatprep.mubr.msk.f32.mxu0 %vm338_vm0, %v2612_v12 }
 0x384   :  { %18354 = vmatmul.mubr.msk.f32.vlgmr.msra.gmra.mrb[0].mxu0 %vm338_vm0, %v18323_v41 }
 0x385   :  { %v18326_v34 = vpop.f32.mrb[98].mxu1  ;;  %21028 = vmatpush3.bf16.msra.mxu0 %v21025_v1 }
 0x386   :  { %v2622_v61 = vpop.f32.mrb[99].mxu1  ;;  %21030 = vmatprep.subr.bf16.mxu0 %v21029_v23 }
 0x387   :  { %18356 = vmatprep.mubr.msk.f32.mxu0 %vm338_vm0, %v2622_v61 }
 0x388   :  { %18357 = vmatmul.mubr.msk.f32.gmra.mrb[2].mxu0 %vm338_vm0, %v18326_v34 }
 0x389   :  { %v18329_v40 = vpop.f32.mrb[100].mxu1  ;;  %21032 = vmatpush3.bf16.msra.mxu0 %v21029_v23 }
 0x38a   :  { %v2632_v62 = vpop.f32.mrb[101].mxu1  ;;  %21066 = vmatprep.subr.bf16.mxu0 %v21065_v17 }
 0x38b   :  { %18359 = vmatprep.mubr.msk.f32.mxu0 %vm338_vm0, %v2632_v62  ;;  %v15188_v62 = vld [vmem:[%s22929_s21 + $0xf8] sm:$0xff] }
 0x38c   :  { %18360 = vmatmul.mubr.msk.f32.gmra.mrb[4].mxu0 %vm338_vm0, %v18329_v40  ;;  %v15187_v40 = vld [vmem:[%s22929_s21 + $0xf0] sm:$0xff] }
 0x38d   :  { %v18332_v55 = vpop.f32.mrb[102].mxu1 }
 0x38e   :  { %v2642_v51 = vpop.f32.mrb[103].mxu1 }
 0x38f   :  { %18362 = vmatprep.mubr.msk.f32.mxu0 %vm338_vm0, %v2642_v51 }
 0x390   :  { %18363 = vmatmul.mubr.msk.f32.gmra.mrb[6].mxu0 %vm338_vm0, %v18332_v55 }
 0x391   :  { %v18335_v1 = vpop.f32.mrb[104].mxu1 }
 0x392   :  { %v2652_v41 = vpop.f32.mrb[105].mxu1 }
 0x393   :  { %18365 = vmatprep.mubr.msk.f32.mxu0 %vm338_vm0, %v2652_v41  ;;  %v15221_v41 = vld [vmem:[%s22929_s21 + $0x100] sm:$0xff] }
 0x394   :  { %18366 = vmatmul.mubr.msk.f32.gmra.mrb[8].mxu0 %vm338_vm0, %v18335_v1  ;;  %v21069_v1 = vpack.c.bf16 %v15188_v62, %v15187_v40 }
 0x395   :  { %v18338_v12 = vpop.f32.mrb[106].mxu1 }
 0x396   :  { %v2662_v23 = vpop.f32.mrb[107].mxu1 }
 0x397   :  { %18368 = vmatprep.mubr.msk.f32.mxu0 %vm338_vm0, %v2662_v23 }
 0x398   :  { %18369 = vmatmul.mubr.msk.f32.gmra.mrb[10].mxu0 %vm338_vm0, %v18338_v12  ;;  %v15222_v12 = vld [vmem:[%s22929_s21 + $0x108] sm:$0xff] }
 0x399   :  { %v18341_v16 = vpop.f32.mrb[108].mxu1 }
 0x39a   :  { %v2672_v5 = vpop.f32.mrb[109].mxu1 }
 0x39b   :  { %18371 = vmatprep.mubr.msk.f32.mxu0 %vm338_vm0, %v2672_v5  ;;  %v21105_v5 = vpack.c.bf16 %v15222_v12, %v15221_v41 }
 0x39c   :  { %18372 = vmatmul.mubr.msk.f32.gmra.mrb[12].mxu0 %vm338_vm0, %v18341_v16 }
 0x39d   :  { %v18344_v34 = vpop.f32.mrb[110].mxu1 }
 0x39e   :  { %v2682_v61 = vpop.f32.mrb[111].mxu1 }
 0x39f   :  { %18374 = vmatprep.mubr.msk.f32.mxu0 %vm338_vm0, %v2682_v61 }
 0x3a0   :  { %18375 = vmatmul.mubr.msk.f32.gmra.mrb[14].mxu0 %vm338_vm0, %v18344_v34 }
 0x3a1   :  { %v18411_v55 = vpop.f32.mrb[112].mxu1 }
 0x3a2   :  { %v3004_v51 = vpop.f32.mrb[113].mxu1 }
 0x3a3   :  { %18441 = vmatprep.mubr.msk.f32.mxu0 %vm338_vm0, %v3004_v51 }
 0x3a4   :  { %18442 = vmatmul.mubr.msk.f32.vlgmr.msra.gmra.mrb[0].mxu0 %vm338_vm0, %v18411_v55 }
 0x3a5   :  { %v18414_v23 = vpop.f32.mrb[114].mxu1  ;;  %21068 = vmatpush3.bf16.msra.mxu0 %v21065_v17 }
 0x3a6   :  { %v3014_v16 = vpop.f32.mrb[115].mxu1  ;;  %21070 = vmatprep.subr.bf16.mxu0 %v21069_v1 }
 0x3a7   :  { %18444 = vmatprep.mubr.msk.f32.mxu0 %vm338_vm0, %v3014_v16 }
 0x3a8   :  { %18445 = vmatmul.mubr.msk.f32.gmra.mrb[2].mxu0 %vm338_vm0, %v18414_v23 }
 0x3a9   :  { %v18417_v61 = vpop.f32.mrb[116].mxu1  ;;  %21072 = vmatpush3.bf16.msra.mxu0 %v21069_v1 }
 0x3aa   :  { %v3024_v34 = vpop.f32.mrb[117].mxu1  ;;  %21106 = vmatprep.subr.bf16.mxu0 %v21105_v5 }
 0x3ab   :  { %18447 = vmatprep.mubr.msk.f32.mxu0 %vm338_vm0, %v3024_v34  ;;  %v15224_v34 = vld [vmem:[%s22929_s21 + $0x118] sm:$0xff] }
 0x3ac   :  { %18448 = vmatmul.mubr.msk.f32.gmra.mrb[4].mxu0 %vm338_vm0, %v18417_v61  ;;  %v15223_v61 = vld [vmem:[%s22929_s21 + $0x110] sm:$0xff]  ;;  %s27243_s21 = sld [smem:[#allocation30_spill]] }
 0x3ad   :  { %v18420_v40 = vpop.f32.mrb[118].mxu1 }
 0x3ae   :  { %v3034_v62 = vpop.f32.mrb[119].mxu1 }
 0x3af   :  { %18450 = vmatprep.mubr.msk.f32.mxu0 %vm338_vm0, %v3034_v62 }
 0x3b0   :  { %18451 = vmatmul.mubr.msk.f32.gmra.mrb[6].mxu0 %vm338_vm0, %v18420_v40 }
 0x3b1   :  { %v18423_v17 = vpop.f32.mrb[120].mxu1 }
 0x3b2   :  { %v3044_v55 = vpop.f32.mrb[121].mxu1 }
 0x3b3   :  { %18453 = vmatprep.mubr.msk.f32.mxu0 %vm338_vm0, %v3044_v55 }
 0x3b4   :  { %18454 = vmatmul.mubr.msk.f32.gmra.mrb[8].mxu0 %vm338_vm0, %v18423_v17  ;;  %v21109_v17 = vpack.c.bf16 %v15224_v34, %v15223_v61 }
 0x3b5   :  { %v18426_v51 = vpop.f32.mrb[122].mxu1 }
 0x3b6   :  { %v3054_v1 = vpop.f32.mrb[123].mxu1 }
 0x3b7   :  { %18456 = vmatprep.mubr.msk.f32.mxu0 %vm338_vm0, %v3054_v1 }
 0x3b8   :  { %18457 = vmatmul.mubr.msk.f32.gmra.mrb[10].mxu0 %vm338_vm0, %v18426_v51 }
 0x3b9   :  { %v18429_v41 = vpop.f32.mrb[124].mxu1 }
 0x3ba   :  { %v3064_v12 = vpop.f32.mrb[125].mxu1 }
 0x3bb   :  { %18459 = vmatprep.mubr.msk.f32.mxu0 %vm338_vm0, %v3064_v12 }
 0x3bc   :  { %18460 = vmatmul.mubr.msk.f32.gmra.mrb[12].mxu0 %vm338_vm0, %v18429_v41 }
 0x3bd   :  { %v18432_v23 = vpop.f32.mrb[126].mxu1 }
 0x3be   :  { %v3074_v16 = vpop.f32.mrb[127].mxu1 }
 0x3bf   :  { %18462 = vmatprep.mubr.msk.f32.mxu0 %vm338_vm0, %v3074_v16 }
 0x3c0   :  { %18463 = vmatmul.mubr.msk.f32.gmra.mrb[14].mxu0 %vm338_vm0, %v18432_v23 }
 0x3c1   :  { %v18499_v40 = vpop.f32.mrb[128].mxu1 }
 0x3c2   :  { %v3396_v62 = vpop.f32.mrb[129].mxu1 }
 0x3c3   :  { %18529 = vmatprep.mubr.msk.f32.mxu0 %vm338_vm0, %v3396_v62 }
 0x3c4   :  { %18530 = vmatmul.mubr.msk.f32.vlgmr.msra.gmra.mrb[0].mxu0 %vm338_vm0, %v18499_v40 }
 0x3c5   :  { %v18502_v55 = vpop.f32.mrb[130].mxu1  ;;  %21108 = vmatpush3.bf16.msra.mxu0 %v21105_v5 }
 0x3c6   :  { %v3406_v51 = vpop.f32.mrb[131].mxu1  ;;  %21110 = vmatprep.subr.bf16.mxu0 %v21109_v17 }
 0x3c7   :  { %18532 = vmatprep.mubr.msk.f32.mxu0 %vm338_vm0, %v3406_v51 }
 0x3c8   :  { %18533 = vmatmul.mubr.msk.f32.gmra.mrb[2].mxu0 %vm338_vm0, %v18502_v55 }
 0x3c9   :  { %v18505_v1 = vpop.f32.mrb[132].mxu1  ;;  %21112 = vmatpush3.bf16.msra.mxu0 %v21109_v17 }
 0x3ca   :  { %v3416_v41 = vpop.f32.mrb[133].mxu1 }
 0x3cb   :  { %18535 = vmatprep.mubr.msk.f32.mxu0 %vm338_vm0, %v3416_v41 }
 0x3cc   :  { %18536 = vmatmul.mubr.msk.f32.gmra.mrb[4].mxu0 %vm338_vm0, %v18505_v1 }
 0x3cd   :  { %v18508_v12 = vpop.f32.mrb[134].mxu1 }
 0x3ce   :  { %v3426_v23 = vpop.f32.mrb[135].mxu1 }
 0x3cf   :  { %18538 = vmatprep.mubr.msk.f32.mxu0 %vm338_vm0, %v3426_v23 }
 0x3d0   :  { %18539 = vmatmul.mubr.msk.f32.gmra.mrb[6].mxu0 %vm338_vm0, %v18508_v12 }
 0x3d1   :  { %v18511_v5 = vpop.f32.mrb[136].mxu1 }
 0x3d2   :  { %v3436_v16 = vpop.f32.mrb[137].mxu1 }
 0x3d3   :  { %18541 = vmatprep.mubr.msk.f32.mxu0 %vm338_vm0, %v3436_v16 }
 0x3d4   :  { %18542 = vmatmul.mubr.msk.f32.gmra.mrb[8].mxu0 %vm338_vm0, %v18511_v5 }
 0x3d5   :  { %v18514_v61 = vpop.f32.mrb[138].mxu1 }
 0x3d6   :  { %v3446_v34 = vpop.f32.mrb[139].mxu1 }
 0x3d7   :  { %18544 = vmatprep.mubr.msk.f32.mxu0 %vm338_vm0, %v3446_v34 }
 0x3d8   :  { %18545 = vmatmul.mubr.msk.f32.gmra.mrb[10].mxu0 %vm338_vm0, %v18514_v61 }
 0x3d9   :  { %v18517_v40 = vpop.f32.mrb[140].mxu1 }
 0x3da   :  { %v3456_v62 = vpop.f32.mrb[141].mxu1 }
 0x3db   :  { %18547 = vmatprep.mubr.msk.f32.mxu0 %vm338_vm0, %v3456_v62 }
 0x3dc   :  { %18548 = vmatmul.mubr.msk.f32.gmra.mrb[12].mxu0 %vm338_vm0, %v18517_v40 }
 0x3dd   :  { %v18520_v17 = vpop.f32.mrb[142].mxu1 }
 0x3de   :  { %v3466_v55 = vpop.f32.mrb[143].mxu1 }
 0x3df   :  { %18550 = vmatprep.mubr.msk.f32.mxu0 %vm338_vm0, %v3466_v55 }
 0x3e0   :  { %18551 = vmatmul.mubr.msk.f32.gmra.mrb[14].mxu0 %vm338_vm0, %v18520_v17 }
 0x3e1   :  { %v18587_v51 = vpop.f32.mrb[144].mxu1 }
 0x3e2   :  { %v3788_v1 = vpop.f32.mrb[145].mxu1 }
 0x3e3   :  { %18617 = vmatprep.mubr.msk.f32.mxu0 %vm338_vm0, %v3788_v1 }
 0x3e4   :  { %18618 = vmatmul.mubr.msk.f32.vlgmr.msra.gmra.mrb[0].mxu0 %vm338_vm0, %v18587_v51 }
 0x3e5   :  { %v18590_v41 = vpop.f32.mrb[146].mxu1 }
 0x3e6   :  { %v3798_v12 = vpop.f32.mrb[147].mxu1 }
 0x3e7   :  { %18620 = vmatprep.mubr.msk.f32.mxu0 %vm338_vm0, %v3798_v12  ;;  %v24115_v12 = vld [vmem:[%s22934_s25] ss:$0 sm:$0xff]  ;;  %s27252_s25 = sld [smem:[#allocation28_spill]] }
 0x3e8   :  { %18621 = vmatmul.mubr.msk.f32.gmra.mrb[2].mxu0 %vm338_vm0, %v18590_v41 }
 0x3e9   :  { %v18593_v23 = vpop.f32.mrb[148].mxu1 }
 0x3ea   :  { %v3808_v5 = vpop.f32.mrb[149].mxu1 }
 0x3eb   :  { %18623 = vmatprep.mubr.msk.f32.mxu0 %vm338_vm0, %v3808_v5 }
 0x3ec   :  { %18624 = vmatmul.mubr.msk.f32.gmra.mrb[4].mxu0 %vm338_vm0, %v18593_v23 }
 0x3ed   :  { %v18596_v16 = vpop.f32.mrb[150].mxu1 }
 0x3ee   :  { %v3818_v61 = vpop.f32.mrb[151].mxu1 }
 0x3ef   :  { %18626 = vmatprep.mubr.msk.f32.mxu0 %vm338_vm0, %v3818_v61 }
 0x3f0   :  { %18627 = vmatmul.mubr.msk.f32.gmra.mrb[6].mxu0 %vm338_vm0, %v18596_v16 }
 0x3f1   :  { %v18599_v34 = vpop.f32.mrb[152].mxu1 }
 0x3f2   :  { %v3828_v40 = vpop.f32.mrb[153].mxu1 }
 0x3f3   :  { %18629 = vmatprep.mubr.msk.f32.mxu0 %vm338_vm0, %v3828_v40 }
 0x3f4   :  { %18630 = vmatmul.mubr.msk.f32.gmra.mrb[8].mxu0 %vm338_vm0, %v18599_v34 }
 0x3f5   :  { %v18602_v62 = vpop.f32.mrb[154].mxu1 }
 0x3f6   :  { %v3838_v17 = vpop.f32.mrb[155].mxu1 }
 0x3f7   :  { %18632 = vmatprep.mubr.msk.f32.mxu0 %vm338_vm0, %v3838_v17 }
 0x3f8   :  { %18633 = vmatmul.mubr.msk.f32.gmra.mrb[10].mxu0 %vm338_vm0, %v18602_v62 }
 0x3f9   :  { %v18605_v55 = vpop.f32.mrb[156].mxu1 }
 0x3fa   :  { %v3848_v51 = vpop.f32.mrb[157].mxu1 }
 0x3fb   :  { %18635 = vmatprep.mubr.msk.f32.mxu0 %vm338_vm0, %v3848_v51 }
 0x3fc   :  { %18636 = vmatmul.mubr.msk.f32.gmra.mrb[12].mxu0 %vm338_vm0, %v18605_v55 }
 0x3fd   :  { %v18608_v1 = vpop.f32.mrb[158].mxu1 }
 0x3fe   :  { %v3858_v41 = vpop.f32.mrb[159].mxu1 }
 0x3ff   :  { %18638 = vmatprep.mubr.msk.f32.mxu0 %vm338_vm0, %v3858_v41 }
 0x400   :  { %18639 = vmatmul.mubr.msk.f32.gmra.mrb[14].mxu0 %vm338_vm0, %v18608_v1 }
 0x401   :  { %18729 = vmatprep.mubr.f32.mxu0 %v23358_v43 }
 0x4b7   :  { %v18619_v23 = vpop.f32.mrb[0].mxu0 }
 0x4b8   :  { %v22395_v5 = vadd.f32 %v18619_v23, %v24115_v12  ;;  %v3986_v16 = vpop.f32.mrb[1].mxu0 }
 0x4b9   :  { %v22396_v61 = vadd.f32 %v24115_v12, %v3986_v16 }
 0x4ba   :  { %v4082_v34 = vmax.f32 %v22395_v5, 0.0 }
 0x4bb   :  { %v4081_v40 = vmax.f32 %v22396_v61, 0.0  ;;  %v18622_v62 = vpop.f32.mrb[2].mxu0 }
 0x4bc   :  { %v22397_v17 = vadd.f32 %v18622_v62, %v24115_v12  ;;  %v3996_v55 = vpop.f32.mrb[3].mxu0 }
 0x4bd   :  { %v24120_v51 = vpack.c.bf16 %v4082_v34, %v4081_v40  ;;  %v22398_v1 = vadd.f32 %v24115_v12, %v3996_v55 }
 0x4be   :  { %v4084_v41 = vmax.f32 %v22397_v17, 0.0 }
 0x4bf   :  { %27034 = vst [vmem:[#allocation172_spill] sm:$0xff] %v24120_v51  ;;  %v4083_v43 = vmax.f32 %v22398_v1, 0.0  ;;  %v18625_v15 = vpop.f32.mrb[4].mxu0  ;;  %21114 = vmatprep.subr.bf16.mxu1 %v24120_v51  ;;  %21146 = vmatprep.subr.bf16.mxu0 %v24120_v51 }
 0x4c0   :  { %v22399_v23 = vadd.f32 %v18625_v15, %v24115_v12  ;;  %v4006_v16 = vpop.f32.mrb[5].mxu0  ;;  %21116 = vmatpush3.bf16.msra.mxu1 %v24120_v51  ;;  %21148 = vmatpush3.bf16.msra.mxu0 %v24120_v51 }
 0x4c1   :  { %v24128_v5 = vpack.c.bf16 %v4084_v41, %v4083_v43  ;;  %v22400_v61 = vadd.f32 %v24115_v12, %v4006_v16 }
 0x4c2   :  { %v4086_v34 = vmax.f32 %v22399_v23, 0.0 }
 0x4c3   :  { %27035 = vst [vmem:[#allocation173_spill] sm:$0xff] %v24128_v5  ;;  %v4085_v40 = vmax.f32 %v22400_v61, 0.0  ;;  %v18628_v62 = vpop.f32.mrb[6].mxu0  ;;  %21118 = vmatprep.subr.bf16.mxu1 %v24128_v5  ;;  %21150 = vmatprep.subr.bf16.mxu0 %v24128_v5 }
 0x4c4   :  { %v22401_v17 = vadd.f32 %v18628_v62, %v24115_v12  ;;  %v4016_v55 = vpop.f32.mrb[7].mxu0  ;;  %21120 = vmatpush3.bf16.msra.mxu1 %v24128_v5  ;;  %21152 = vmatpush3.bf16.msra.mxu0 %v24128_v5 }
 0x4c5   :  { %v24136_v15 = vpack.c.bf16 %v4086_v34, %v4085_v40  ;;  %v22402_v43 = vadd.f32 %v24115_v12, %v4016_v55 }
 0x4c6   :  { %v4088_v1 = vmax.f32 %v22401_v17, 0.0 }
 0x4c7   :  { %27036 = vst [vmem:[#allocation174_spill] sm:$0xff] %v24136_v15  ;;  %v4087_v41 = vmax.f32 %v22402_v43, 0.0  ;;  %v18631_v23 = vpop.f32.mrb[8].mxu0  ;;  %21122 = vmatprep.subr.bf16.mxu1 %v24136_v15  ;;  %21154 = vmatprep.subr.bf16.mxu0 %v24136_v15 }
 0x4c8   :  { %v22403_v16 = vadd.f32 %v18631_v23, %v24115_v12  ;;  %v4026_v61 = vpop.f32.mrb[9].mxu0  ;;  %21124 = vmatpush3.bf16.msra.mxu1 %v24136_v15  ;;  %21156 = vmatpush3.bf16.msra.mxu0 %v24136_v15 }
 0x4c9   :  { %v24144_v62 = vpack.c.bf16 %v4088_v1, %v4087_v41  ;;  %v22404_v34 = vadd.f32 %v24115_v12, %v4026_v61 }
 0x4ca   :  { %v4090_v40 = vmax.f32 %v22403_v16, 0.0 }
 0x4cb   :  { %27037 = vst [vmem:[#allocation175_spill] sm:$0xff] %v24144_v62  ;;  %v4089_v55 = vmax.f32 %v22404_v34, 0.0  ;;  %v18634_v17 = vpop.f32.mrb[10].mxu0  ;;  %21126 = vmatprep.subr.bf16.mxu1 %v24144_v62  ;;  %21158 = vmatprep.subr.bf16.mxu0 %v24144_v62 }
 0x4cc   :  { %v22405_v43 = vadd.f32 %v18634_v17, %v24115_v12  ;;  %v4036_v58 = vpop.f32.mrb[11].mxu0  ;;  %21128 = vmatpush3.bf16.msra.mxu1 %v24144_v62  ;;  %21160 = vmatpush3.bf16.msra.mxu0 %v24144_v62 }
 0x4cd   :  { %v24152_v23 = vpack.c.bf16 %v4090_v40, %v4089_v55  ;;  %v22406_v1 = vadd.f32 %v24115_v12, %v4036_v58 }
 0x4ce   :  { %v4092_v41 = vmax.f32 %v22405_v43, 0.0 }
 0x4cf   :  { %27038 = vst [vmem:[#allocation176_spill] sm:$0xff] %v24152_v23  ;;  %v4091_v61 = vmax.f32 %v22406_v1, 0.0  ;;  %v18637_v16 = vpop.f32.mrb[12].mxu0  ;;  %21130 = vmatprep.subr.bf16.mxu1 %v24152_v23  ;;  %21162 = vmatprep.subr.bf16.mxu0 %v24152_v23 }
 0x4d0   :  { %v22407_v34 = vadd.f32 %v18637_v16, %v24115_v12  ;;  %v4046_v27 = vpop.f32.mrb[13].mxu0  ;;  %21132 = vmatpush3.bf16.msra.mxu1 %v24152_v23  ;;  %21164 = vmatpush3.bf16.msra.mxu0 %v24152_v23 }
 0x4d1   :  { %v24160_v17 = vpack.c.bf16 %v4092_v41, %v4091_v61  ;;  %v22408_v40 = vadd.f32 %v24115_v12, %v4046_v27 }
 0x4d2   :  { %v4094_v55 = vmax.f32 %v22407_v34, 0.0 }
 0x4d3   :  { %27039 = vst [vmem:[#allocation177_spill] sm:$0xff] %v24160_v17  ;;  %v4093_v58 = vmax.f32 %v22408_v40, 0.0  ;;  %v18640_v43 = vpop.f32.mrb[14].mxu0  ;;  %21134 = vmatprep.subr.bf16.mxu1 %v24160_v17  ;;  %21166 = vmatprep.subr.bf16.mxu0 %v24160_v17  ;;  %v27044_v40 = vld [vmem:[#allocation66_spill] sm:$0xff] }
 0x4d4   :  { %v22409_v1 = vadd.f32 %v18640_v43, %v24115_v12  ;;  %v4056_v48 = vpop.f32.mrb[15].mxu0  ;;  %21136 = vmatpush3.bf16.msra.mxu1 %v24160_v17  ;;  %21168 = vmatpush3.bf16.msra.mxu0 %v24160_v17  ;;  %v27047_v43 = vld [vmem:[#allocation83_spill] sm:$0xff] }
 0x4d5   :  { %v24168_v16 = vpack.c.bf16 %v4094_v55, %v4093_v58  ;;  %v22410_v41 = vadd.f32 %v24115_v12, %v4056_v48  ;;  %v27042_v48 = vld [vmem:[#allocation65_spill] sm:$0xff]  ;;  %v27045_v55 = vld [vmem:[#allocation82_spill] sm:$0xff]  ;;  %v27046_v58 = vld [vmem:[#allocation67_spill] sm:$0xff] }
 0x4d6   :  { %v4096_v61 = vmax.f32 %v22409_v1, 0.0  ;;  %v27043_v12 = vld [vmem:[#allocation81_spill] sm:$0xff]  ;;  %v27048_v1 = vld [vmem:[#allocation68_spill] sm:$0xff] }
 0x4d7   :  { %27040 = vst [vmem:[#allocation178_spill] sm:$0xff] %v24168_v16  ;;  %v4095_v27 = vmax.f32 %v22410_v41, 0.0  ;;  %21138 = vmatprep.subr.bf16.mxu1 %v24168_v16  ;;  %21170 = vmatprep.subr.bf16.mxu0 %v24168_v16  ;;  %v27049_v41 = vld [vmem:[#allocation84_spill] sm:$0xff] }
 0x4d8   :  { %21140 = vmatpush3.bf16.msra.mxu1 %v24168_v16  ;;  %21172 = vmatpush3.bf16.msra.mxu0 %v24168_v16 }
 0x4d9   :  { %v24175_v34 = vpack.c.bf16 %v4096_v61, %v4095_v27  ;;  %v27050_v61 = vld [vmem:[#allocation69_spill] sm:$0xff] }
 0x4da   :  { %v27051_v27 = vld [vmem:[#allocation85_spill] sm:$0xff] }
 0x4db   :  { %27041 = vst [vmem:[#allocation179_spill] sm:$0xff] %v24175_v34  ;;  %21142 = vmatprep.subr.bf16.mxu1 %v24175_v34  ;;  %21174 = vmatprep.subr.bf16.mxu0 %v24175_v34 }
 0x4dc   :  { %21144 = vmatpush3.bf16.msra.mxu1 %v24175_v34  ;;  %21176 = vmatpush3.bf16.msra.mxu0 %v24175_v34 }
 0x4dd   :  { %21178 = vmatprep.subr.bf16.mxu1 %v24120_v51  ;;  %21210 = vmatprep.subr.bf16.mxu0 %v24120_v51 }
 0x4df   :  { %18674 = vmatmul.mubr.f32.vlgmr.msra.gmra.mrb[160].mxu1 %v23292_v18  ;;  %18730 = vmatmul.mubr.f32.vlgmr.msra.gmra.mrb[16].mxu0 %v23363_v45 }
 0x4e0   :  { %21180 = vmatpush3.bf16.msra.mxu1 %v24120_v51  ;;  %21212 = vmatpush3.bf16.msra.mxu0 %v24120_v51 }
 0x4e1   :  { %21182 = vmatprep.subr.bf16.mxu1 %v24128_v5  ;;  %21214 = vmatprep.subr.bf16.mxu0 %v24128_v5 }
 0x4e2   :  { %18676 = vmatprep.mubr.f32.mxu1 %v23295_v19  ;;  %18732 = vmatprep.mubr.f32.mxu0 %v23367_v46 }
 0x4e3   :  { %18677 = vmatmul.mubr.f32.gmra.mrb[162].mxu1 %v23300_v21  ;;  %18733 = vmatmul.mubr.f32.gmra.mrb[18].mxu0 %v23372_v49 }
 0x4e4   :  { %21184 = vmatpush3.bf16.msra.mxu1 %v24128_v5  ;;  %21216 = vmatpush3.bf16.msra.mxu0 %v24128_v5 }
 0x4e5   :  { %21186 = vmatprep.subr.bf16.mxu1 %v24136_v15  ;;  %21218 = vmatprep.subr.bf16.mxu0 %v24136_v15 }
 0x4e6   :  { %18679 = vmatprep.mubr.f32.mxu1 %v23304_v24  ;;  %18735 = vmatprep.mubr.f32.mxu0 %v23376_v50 }
 0x4e7   :  { %18680 = vmatmul.mubr.f32.gmra.mrb[164].mxu1 %v23309_v25  ;;  %18736 = vmatmul.mubr.f32.gmra.mrb[20].mxu0 %v23381_v52 }
 0x4e8   :  { %21188 = vmatpush3.bf16.msra.mxu1 %v24136_v15  ;;  %21220 = vmatpush3.bf16.msra.mxu0 %v24136_v15 }
 0x4e9   :  { %21190 = vmatprep.subr.bf16.mxu1 %v24144_v62  ;;  %21222 = vmatprep.subr.bf16.mxu0 %v24144_v62 }
 0x4ea   :  { %18682 = vmatprep.mubr.f32.mxu1 %v23313_v26  ;;  %18738 = vmatprep.mubr.f32.mxu0 %v23385_v53 }
 0x4eb   :  { %18683 = vmatmul.mubr.f32.gmra.mrb[166].mxu1 %v23318_v28  ;;  %18739 = vmatmul.mubr.f32.gmra.mrb[22].mxu0 %v23390_v56 }
 0x4ec   :  { %21192 = vmatpush3.bf16.msra.mxu1 %v24144_v62  ;;  %21224 = vmatpush3.bf16.msra.mxu0 %v24144_v62 }
 0x4ed   :  { %21194 = vmatprep.subr.bf16.mxu1 %v24152_v23  ;;  %21226 = vmatprep.subr.bf16.mxu0 %v24152_v23 }
 0x4ee   :  { %18685 = vmatprep.mubr.f32.mxu1 %v23322_v29  ;;  %18741 = vmatprep.mubr.f32.mxu0 %v23394_v57 }
 0x4ef   :  { %18686 = vmatmul.mubr.f32.gmra.mrb[168].mxu1 %v23327_v31  ;;  %18742 = vmatmul.mubr.f32.gmra.mrb[24].mxu0 %v23399_v59 }
 0x4f0   :  { %21196 = vmatpush3.bf16.msra.mxu1 %v24152_v23  ;;  %21228 = vmatpush3.bf16.msra.mxu0 %v24152_v23 }
 0x4f1   :  { %21198 = vmatprep.subr.bf16.mxu1 %v24160_v17  ;;  %21230 = vmatprep.subr.bf16.mxu0 %v24160_v17 }
 0x4f2   :  { %18688 = vmatprep.mubr.f32.mxu1 %v23331_v32  ;;  %18744 = vmatprep.mubr.f32.mxu0 %v23403_v60 }
 0x4f3   :  { %18689 = vmatmul.mubr.f32.gmra.mrb[170].mxu1 %v23336_v35  ;;  %18745 = vmatmul.mubr.f32.gmra.mrb[26].mxu0 %v23408_v63 }
 0x4f4   :  { %21200 = vmatpush3.bf16.msra.mxu1 %v24160_v17  ;;  %21232 = vmatpush3.bf16.msra.mxu0 %v24160_v17 }
 0x4f5   :  { %21202 = vmatprep.subr.bf16.mxu1 %v24168_v16  ;;  %21234 = vmatprep.subr.bf16.mxu0 %v24168_v16 }
 0x4f6   :  { %18691 = vmatprep.mubr.f32.mxu1 %v23340_v36  ;;  %18747 = vmatprep.mubr.f32.mxu0 %v23412_v0 }
 0x4f7   :  { %18692 = vmatmul.mubr.f32.gmra.mrb[172].mxu1 %v23345_v38  ;;  %18748 = vmatmul.mubr.f32.gmra.mrb[28].mxu0 %v23417_v2 }
 0x4f8   :  { %21204 = vmatpush3.bf16.msra.mxu1 %v24168_v16  ;;  %21236 = vmatpush3.bf16.msra.mxu0 %v24168_v16 }
 0x4f9   :  { %21206 = vmatprep.subr.bf16.mxu1 %v24175_v34  ;;  %21238 = vmatprep.subr.bf16.mxu0 %v24175_v34 }
 0x4fa   :  { %18694 = vmatprep.mubr.f32.mxu1 %v23349_v39  ;;  %18750 = vmatprep.mubr.f32.mxu0 %v23421_v3 }
 0x4fb   :  { %18695 = vmatmul.mubr.f32.gmra.mrb[174].mxu1 %v23354_v42  ;;  %18751 = vmatmul.mubr.f32.gmra.mrb[30].mxu0 %v23426_v6 }
 0x4fc   :  { %21208 = vmatpush3.bf16.msra.mxu1 %v24175_v34  ;;  %21240 = vmatpush3.bf16.msra.mxu0 %v24175_v34 }
 0x4fd   :  { %21242 = vmatprep.subr.bf16.mxu1 %v24120_v51  ;;  %21274 = vmatprep.subr.bf16.mxu0 %v24120_v51 }
 0x4fe   :  { %18785 = vmatprep.mubr.f32.mxu1 %v23430_v7  ;;  %18841 = vmatprep.mubr.f32.mxu0 %v23508_v54 }
 0x4ff   :  { %18786 = vmatmul.mubr.f32.vlgmr.msra.gmra.mrb[176].mxu1 %v23435_v9  ;;  %18842 = vmatmul.mubr.f32.vlgmr.msra.gmra.mrb[32].mxu0 %v23516_v4  ;;  %v24528_v9 = vld [vmem:[%s27139_s9 + $0x2] ss:$0 sm:$0xff] }
 0x500   :  { %21244 = vmatpush3.bf16.msra.mxu1 %v24120_v51  ;;  %21276 = vmatpush3.bf16.msra.mxu0 %v24120_v51 }
 0x501   :  { %21246 = vmatprep.subr.bf16.mxu1 %v24128_v5  ;;  %21278 = vmatprep.subr.bf16.mxu0 %v24128_v5 }
 0x502   :  { %18788 = vmatprep.mubr.f32.mxu1 %v23439_v10  ;;  %18844 = vmatprep.mubr.f32.mxu0 %v23520_v11 }
 0x503   :  { %18789 = vmatmul.mubr.f32.gmra.mrb[178].mxu1 %v23444_v13  ;;  %18845 = vmatmul.mubr.f32.gmra.mrb[34].mxu0 %v23525_v47 }
 0x504   :  { %21248 = vmatpush3.bf16.msra.mxu1 %v24128_v5  ;;  %21280 = vmatpush3.bf16.msra.mxu0 %v24128_v5 }
 0x505   :  { %21250 = vmatprep.subr.bf16.mxu1 %v24136_v15  ;;  %21282 = vmatprep.subr.bf16.mxu0 %v24136_v15 }
 0x506   :  { %18791 = vmatprep.mubr.f32.mxu1 %v23448_v14  ;;  %18847 = vmatprep.mubr.f32.mxu0 %v23529_v33 }
 0x507   :  { %18792 = vmatmul.mubr.f32.gmra.mrb[180].mxu1 %v27042_v48  ;;  %18848 = vmatmul.mubr.f32.gmra.mrb[36].mxu0 %v27043_v12 }
 0x508   :  { %21252 = vmatpush3.bf16.msra.mxu1 %v24136_v15  ;;  %21284 = vmatpush3.bf16.msra.mxu0 %v24136_v15 }
 0x509   :  { %21254 = vmatprep.subr.bf16.mxu1 %v24144_v62  ;;  %21286 = vmatprep.subr.bf16.mxu0 %v24144_v62 }
 0x50a   :  { %18794 = vmatprep.mubr.f32.mxu1 %v27044_v40  ;;  %18850 = vmatprep.mubr.f32.mxu0 %v27045_v55  ;;  %v27054_v55 = vld [vmem:[#allocation71_spill] sm:$0xff] }
 0x50b   :  { %18795 = vmatmul.mubr.f32.gmra.mrb[182].mxu1 %v27046_v58  ;;  %18851 = vmatmul.mubr.f32.gmra.mrb[38].mxu0 %v27047_v43  ;;  %v27052_v43 = vld [vmem:[#allocation70_spill] sm:$0xff] }
 0x50c   :  { %21256 = vmatpush3.bf16.msra.mxu1 %v24144_v62  ;;  %21288 = vmatpush3.bf16.msra.mxu0 %v24144_v62  ;;  %v27053_v58 = vld [vmem:[#allocation86_spill] sm:$0xff] }
 0x50d   :  { %21258 = vmatprep.subr.bf16.mxu1 %v24152_v23  ;;  %21290 = vmatprep.subr.bf16.mxu0 %v24152_v23 }
 0x50e   :  { %18797 = vmatprep.mubr.f32.mxu1 %v27048_v1  ;;  %18853 = vmatprep.mubr.f32.mxu0 %v27049_v41  ;;  %v27055_v1 = vld [vmem:[#allocation87_spill] sm:$0xff]  ;;  %v27058_v41 = vld [vmem:[#allocation73_spill] sm:$0xff] }
 0x50f   :  { %18798 = vmatmul.mubr.f32.gmra.mrb[184].mxu1 %v27050_v61  ;;  %18854 = vmatmul.mubr.f32.gmra.mrb[40].mxu0 %v27051_v27  ;;  %v27056_v27 = vld [vmem:[#allocation72_spill] sm:$0xff] }
 0x510   :  { %21260 = vmatpush3.bf16.msra.mxu1 %v24152_v23  ;;  %21292 = vmatpush3.bf16.msra.mxu0 %v24152_v23  ;;  %v27057_v61 = vld [vmem:[#allocation88_spill] sm:$0xff] }
 0x511   :  { %21262 = vmatprep.subr.bf16.mxu1 %v24160_v17  ;;  %21294 = vmatprep.subr.bf16.mxu0 %v24160_v17 }
 0x512   :  { %18800 = vmatprep.mubr.f32.mxu1 %v27052_v43  ;;  %18856 = vmatprep.mubr.f32.mxu0 %v27053_v58  ;;  %v27059_v43 = vld [vmem:[#allocation89_spill] sm:$0xff]  ;;  %v27062_v58 = vld [vmem:[#allocation75_spill] sm:$0xff] }
 0x513   :  { %18801 = vmatmul.mubr.f32.gmra.mrb[186].mxu1 %v27054_v55  ;;  %18857 = vmatmul.mubr.f32.gmra.mrb[42].mxu0 %v27055_v1  ;;  %v27060_v1 = vld [vmem:[#allocation74_spill] sm:$0xff] }
 0x514   :  { %21264 = vmatpush3.bf16.msra.mxu1 %v24160_v17  ;;  %21296 = vmatpush3.bf16.msra.mxu0 %v24160_v17  ;;  %v27061_v55 = vld [vmem:[#allocation90_spill] sm:$0xff] }
 0x515   :  { %21266 = vmatprep.subr.bf16.mxu1 %v24168_v16  ;;  %21298 = vmatprep.subr.bf16.mxu0 %v24168_v16 }
 0x516   :  { %18803 = vmatprep.mubr.f32.mxu1 %v27056_v27  ;;  %18859 = vmatprep.mubr.f32.mxu0 %v27057_v61  ;;  %v27063_v27 = vld [vmem:[#allocation91_spill] sm:$0xff]  ;;  %v27066_v61 = vld [vmem:[#allocation93_spill] sm:$0xff] }
 0x517   :  { %18804 = vmatmul.mubr.f32.gmra.mrb[188].mxu1 %v27058_v41  ;;  %18860 = vmatmul.mubr.f32.gmra.mrb[44].mxu0 %v27059_v43  ;;  %v27064_v43 = vld [vmem:[#allocation92_spill] sm:$0xff] }
 0x518   :  { %21268 = vmatpush3.bf16.msra.mxu1 %v24168_v16  ;;  %21300 = vmatpush3.bf16.msra.mxu0 %v24168_v16  ;;  %v27065_v41 = vld [vmem:[#allocation108_spill] sm:$0xff] }
 0x519   :  { %21270 = vmatprep.subr.bf16.mxu1 %v24175_v34  ;;  %21302 = vmatprep.subr.bf16.mxu0 %v24175_v34 }
 0x51a   :  { %18806 = vmatprep.mubr.f32.mxu1 %v27060_v1  ;;  %18862 = vmatprep.mubr.f32.mxu0 %v27061_v55  ;;  %v27067_v1 = vld [vmem:[#allocation109_spill] sm:$0xff]  ;;  %v27070_v55 = vld [vmem:[#allocation95_spill] sm:$0xff] }
 0x51b   :  { %18807 = vmatmul.mubr.f32.gmra.mrb[190].mxu1 %v27062_v58  ;;  %18863 = vmatmul.mubr.f32.gmra.mrb[46].mxu0 %v27063_v27  ;;  %v27068_v27 = vld [vmem:[#allocation94_spill] sm:$0xff] }
 0x51c   :  { %21272 = vmatpush3.bf16.msra.mxu1 %v24175_v34  ;;  %21304 = vmatpush3.bf16.msra.mxu0 %v24175_v34  ;;  %v27069_v58 = vld [vmem:[#allocation110_spill] sm:$0xff] }
 0x51d   :  { %21306 = vmatprep.subr.bf16.mxu1 %v24120_v51  ;;  %21338 = vmatprep.subr.bf16.mxu0 %v24120_v51 }
 0x51e   :  { %18897 = vmatprep.mubr.f32.mxu1 %v27064_v43  ;;  %18953 = vmatprep.mubr.f32.mxu0 %v27065_v41  ;;  %v27071_v43 = vld [vmem:[#allocation111_spill] sm:$0xff]  ;;  %v27074_v41 = vld [vmem:[#allocation97_spill] sm:$0xff] }
 0x51f   :  { %18898 = vmatmul.mubr.f32.vlgmr.msra.gmra.mrb[192].mxu1 %v27066_v61  ;;  %18954 = vmatmul.mubr.f32.vlgmr.msra.gmra.mrb[48].mxu0 %v27067_v1  ;;  %v27072_v1 = vld [vmem:[#allocation96_spill] sm:$0xff] }
 0x520   :  { %21308 = vmatpush3.bf16.msra.mxu1 %v24120_v51  ;;  %21340 = vmatpush3.bf16.msra.mxu0 %v24120_v51  ;;  %v27073_v61 = vld [vmem:[#allocation112_spill] sm:$0xff] }
 0x521   :  { %21310 = vmatprep.subr.bf16.mxu1 %v24128_v5  ;;  %21342 = vmatprep.subr.bf16.mxu0 %v24128_v5 }
 0x522   :  { %18900 = vmatprep.mubr.f32.mxu1 %v27068_v27  ;;  %18956 = vmatprep.mubr.f32.mxu0 %v27069_v58  ;;  %v27075_v27 = vld [vmem:[#allocation113_spill] sm:$0xff]  ;;  %v27078_v58 = vld [vmem:[#allocation99_spill] sm:$0xff] }
 0x523   :  { %18901 = vmatmul.mubr.f32.gmra.mrb[194].mxu1 %v27070_v55  ;;  %18957 = vmatmul.mubr.f32.gmra.mrb[50].mxu0 %v27071_v43  ;;  %v27076_v43 = vld [vmem:[#allocation98_spill] sm:$0xff] }
 0x524   :  { %21312 = vmatpush3.bf16.msra.mxu1 %v24128_v5  ;;  %21344 = vmatpush3.bf16.msra.mxu0 %v24128_v5  ;;  %v27077_v55 = vld [vmem:[#allocation114_spill] sm:$0xff] }
 0x525   :  { %21314 = vmatprep.subr.bf16.mxu1 %v24136_v15  ;;  %21346 = vmatprep.subr.bf16.mxu0 %v24136_v15 }
 0x526   :  { %18903 = vmatprep.mubr.f32.mxu1 %v27072_v1  ;;  %18959 = vmatprep.mubr.f32.mxu0 %v27073_v61  ;;  %v27079_v1 = vld [vmem:[#allocation115_spill] sm:$0xff]  ;;  %v27082_v61 = vld [vmem:[#allocation101_spill] sm:$0xff] }
 0x527   :  { %18904 = vmatmul.mubr.f32.gmra.mrb[196].mxu1 %v27074_v41  ;;  %18960 = vmatmul.mubr.f32.gmra.mrb[52].mxu0 %v27075_v27  ;;  %v27080_v27 = vld [vmem:[#allocation100_spill] sm:$0xff] }
 0x528   :  { %21316 = vmatpush3.bf16.msra.mxu1 %v24136_v15  ;;  %21348 = vmatpush3.bf16.msra.mxu0 %v24136_v15  ;;  %v27081_v41 = vld [vmem:[#allocation116_spill] sm:$0xff] }
 0x529   :  { %21318 = vmatprep.subr.bf16.mxu1 %v24144_v62  ;;  %21350 = vmatprep.subr.bf16.mxu0 %v24144_v62 }
 0x52a   :  { %18906 = vmatprep.mubr.f32.mxu1 %v27076_v43  ;;  %18962 = vmatprep.mubr.f32.mxu0 %v27077_v55  ;;  %v27083_v43 = vld [vmem:[#allocation117_spill] sm:$0xff]  ;;  %v27086_v55 = vld [vmem:[#allocation103_spill] sm:$0xff] }
 0x52b   :  { %18907 = vmatmul.mubr.f32.gmra.mrb[198].mxu1 %v27078_v58  ;;  %18963 = vmatmul.mubr.f32.gmra.mrb[54].mxu0 %v27079_v1  ;;  %v27084_v1 = vld [vmem:[#allocation102_spill] sm:$0xff] }
 0x52c   :  { %21320 = vmatpush3.bf16.msra.mxu1 %v24144_v62  ;;  %21352 = vmatpush3.bf16.msra.mxu0 %v24144_v62  ;;  %v27085_v58 = vld [vmem:[#allocation118_spill] sm:$0xff] }
 0x52d   :  { %21322 = vmatprep.subr.bf16.mxu1 %v24152_v23  ;;  %21354 = vmatprep.subr.bf16.mxu0 %v24152_v23 }
 0x52e   :  { %18909 = vmatprep.mubr.f32.mxu1 %v27080_v27  ;;  %18965 = vmatprep.mubr.f32.mxu0 %v27081_v41  ;;  %v27087_v27 = vld [vmem:[#allocation119_spill] sm:$0xff]  ;;  %v27090_v41 = vld [vmem:[#allocation105_spill] sm:$0xff] }
 0x52f   :  { %18910 = vmatmul.mubr.f32.gmra.mrb[200].mxu1 %v27082_v61  ;;  %18966 = vmatmul.mubr.f32.gmra.mrb[56].mxu0 %v27083_v43  ;;  %v27088_v43 = vld [vmem:[#allocation104_spill] sm:$0xff] }
 0x530   :  { %21324 = vmatpush3.bf16.msra.mxu1 %v24152_v23  ;;  %21356 = vmatpush3.bf16.msra.mxu0 %v24152_v23  ;;  %v27089_v61 = vld [vmem:[#allocation120_spill] sm:$0xff] }
 0x531   :  { %21326 = vmatprep.subr.bf16.mxu1 %v24160_v17  ;;  %21358 = vmatprep.subr.bf16.mxu0 %v24160_v17 }
 0x532   :  { %18912 = vmatprep.mubr.f32.mxu1 %v27084_v1  ;;  %18968 = vmatprep.mubr.f32.mxu0 %v27085_v58  ;;  %v27091_v1 = vld [vmem:[#allocation121_spill] sm:$0xff]  ;;  %v27094_v58 = vld [vmem:[#allocation107_spill] sm:$0xff] }
 0x533   :  { %18913 = vmatmul.mubr.f32.gmra.mrb[202].mxu1 %v27086_v55  ;;  %18969 = vmatmul.mubr.f32.gmra.mrb[58].mxu0 %v27087_v27  ;;  %v27092_v27 = vld [vmem:[#allocation106_spill] sm:$0xff] }
 0x534   :  { %21328 = vmatpush3.bf16.msra.mxu1 %v24160_v17  ;;  %21360 = vmatpush3.bf16.msra.mxu0 %v24160_v17  ;;  %v27093_v55 = vld [vmem:[#allocation122_spill] sm:$0xff] }
 0x535   :  { %21330 = vmatprep.subr.bf16.mxu1 %v24168_v16  ;;  %21362 = vmatprep.subr.bf16.mxu0 %v24168_v16 }
 0x536   :  { %18915 = vmatprep.mubr.f32.mxu1 %v27088_v43  ;;  %18971 = vmatprep.mubr.f32.mxu0 %v27089_v61  ;;  %v27095_v43 = vld [vmem:[#allocation123_spill] sm:$0xff] }
 0x537   :  { %18916 = vmatmul.mubr.f32.gmra.mrb[204].mxu1 %v27090_v41  ;;  %18972 = vmatmul.mubr.f32.gmra.mrb[60].mxu0 %v27091_v1  ;;  %v27096_v1 = vld [vmem:[#allocation124_spill] sm:$0xff]  ;;  %v27097_v41 = vld [vmem:[#allocation125_spill] sm:$0xff] }
 0x538   :  { %21332 = vmatpush3.bf16.msra.mxu1 %v24168_v16  ;;  %21364 = vmatpush3.bf16.msra.mxu0 %v24168_v16 }
 0x539   :  { %21334 = vmatprep.subr.bf16.mxu1 %v24175_v34  ;;  %21366 = vmatprep.subr.bf16.mxu0 %v24175_v34 }
 0x53a   :  { %18918 = vmatprep.mubr.f32.mxu1 %v27092_v27  ;;  %18974 = vmatprep.mubr.f32.mxu0 %v27093_v55  ;;  %v27098_v55 = vld [vmem:[#allocation126_spill] sm:$0xff] }
 0x53b   :  { %18919 = vmatmul.mubr.f32.gmra.mrb[206].mxu1 %v27094_v58  ;;  %18975 = vmatmul.mubr.f32.gmra.mrb[62].mxu0 %v27095_v43  ;;  %v27099_v43 = vld [vmem:[#allocation127_spill] sm:$0xff] }
 0x53c   :  { %21336 = vmatpush3.bf16.msra.mxu1 %v24175_v34  ;;  %21368 = vmatpush3.bf16.msra.mxu0 %v24175_v34 }
 0x53d   :  { %21370 = vmatprep.subr.bf16.mxu1 %v24120_v51  ;;  %19009 = vmatprep.mubr.f32.mxu1 %v27096_v1  ;;  %v27100_v1 = vld [vmem:[#allocation128_spill] sm:$0xff] }
 0x53e   :  { %19065 = vmatprep.mubr.f32.mxu0 %v23811_v44 }
 0x53f   :  { %19010 = vmatmul.mubr.f32.vlgmr.msra.gmra.mrb[208].mxu1 %v27097_v41  ;;  %19066 = vmatmul.mubr.f32.vlgmr.msra.gmra.mrb[64].mxu0 %v23814_v22  ;;  %v27101_v22 = vld [vmem:[#allocation129_spill] sm:$0xff] }
 0x540   :  { %21372 = vmatpush3.bf16.msra.mxu1 %v24120_v51  ;;  %19012 = vmatprep.mubr.f32.mxu1 %v27098_v55  ;;  %v27102_v51 = vld [vmem:[#allocation145_spill] sm:$0xff]  ;;  %v27103_v55 = vld [vmem:[#allocation130_spill] sm:$0xff] }
 0x541   :  { %21374 = vmatprep.subr.bf16.mxu1 %v24128_v5  ;;  %19068 = vmatprep.mubr.f32.mxu0 %v23823_v20 }
 0x543   :  { %19013 = vmatmul.mubr.f32.gmra.mrb[210].mxu1 %v27099_v43  ;;  %19069 = vmatmul.mubr.f32.gmra.mrb[66].mxu0 %v23826_v37  ;;  %v27104_v43 = vld [vmem:[#allocation146_spill] sm:$0xff]  ;;  %v27105_v37 = vld [vmem:[#allocation131_spill] sm:$0xff] }
 0x544   :  { %21376 = vmatpush3.bf16.msra.mxu1 %v24128_v5  ;;  %19015 = vmatprep.mubr.f32.mxu1 %v27100_v1  ;;  %v27106_v5 = vld [vmem:[#allocation147_spill] sm:$0xff]  ;;  %v27107_v1 = vld [vmem:[#allocation132_spill] sm:$0xff] }
 0x545   :  { %21378 = vmatprep.subr.bf16.mxu1 %v24136_v15  ;;  %19071 = vmatprep.mubr.f32.mxu0 %v23834_v8 }
 0x547   :  { %19016 = vmatmul.mubr.f32.gmra.mrb[212].mxu1 %v27101_v22  ;;  %19072 = vmatmul.mubr.f32.gmra.mrb[68].mxu0 %v27102_v51  ;;  %v27108_v22 = vld [vmem:[#allocation148_spill] sm:$0xff]  ;;  %v27109_v51 = vld [vmem:[#allocation133_spill] sm:$0xff] }
 0x548   :  { %21380 = vmatpush3.bf16.msra.mxu1 %v24136_v15  ;;  %19018 = vmatprep.mubr.f32.mxu1 %v27103_v55  ;;  %v27110_v15 = vld [vmem:[#allocation149_spill] sm:$0xff]  ;;  %v27111_v55 = vld [vmem:[#allocation134_spill] sm:$0xff] }
 0x549   :  { %21382 = vmatprep.subr.bf16.mxu1 %v24144_v62  ;;  %19074 = vmatprep.mubr.f32.mxu0 %v27104_v43 }
 0x54b   :  { %19019 = vmatmul.mubr.f32.gmra.mrb[214].mxu1 %v27105_v37  ;;  %19075 = vmatmul.mubr.f32.gmra.mrb[70].mxu0 %v27106_v5  ;;  %v27112_v37 = vld [vmem:[#allocation150_spill] sm:$0xff]  ;;  %v27113_v5 = vld [vmem:[#allocation135_spill] sm:$0xff] }
 0x54c   :  { %21384 = vmatpush3.bf16.msra.mxu1 %v24144_v62  ;;  %19021 = vmatprep.mubr.f32.mxu1 %v27107_v1  ;;  %v27114_v62 = vld [vmem:[#allocation151_spill] sm:$0xff]  ;;  %v27115_v1 = vld [vmem:[#allocation136_spill] sm:$0xff] }
 0x54d   :  { %21386 = vmatprep.subr.bf16.mxu1 %v24152_v23  ;;  %19077 = vmatprep.mubr.f32.mxu0 %v27108_v22  ;;  %v5775_v22 = vld [vmem:[%s27125_s5 + $0x38] sm:$0xff] }
 0x54f   :  { %19022 = vmatmul.mubr.f32.gmra.mrb[216].mxu1 %v27109_v51  ;;  %19078 = vmatmul.mubr.f32.gmra.mrb[72].mxu0 %v27110_v15  ;;  %v27116_v15 = vld [vmem:[#allocation137_spill] sm:$0xff]  ;;  %v24446_v51 = vld [vmem:[%s27139_s9 + $0x1] ss:$0 sm:$0xff] }
 0x550   :  { %21388 = vmatpush3.bf16.msra.mxu1 %v24152_v23  ;;  %19024 = vmatprep.mubr.f32.mxu1 %v27111_v55  ;;  %v27117_v23 = vld [vmem:[#allocation153_spill] sm:$0xff]  ;;  %v27118_v55 = vld [vmem:[#allocation138_spill] sm:$0xff] }
 0x551   :  { %21390 = vmatprep.subr.bf16.mxu1 %v24160_v17  ;;  %19080 = vmatprep.mubr.f32.mxu0 %v27112_v37 }
 0x553   :  { %19025 = vmatmul.mubr.f32.gmra.mrb[218].mxu1 %v27113_v5  ;;  %19081 = vmatmul.mubr.f32.gmra.mrb[74].mxu0 %v27114_v62  ;;  %v27119_v5 = vld [vmem:[#allocation154_spill] sm:$0xff]  ;;  %v27120_v62 = vld [vmem:[#allocation139_spill] sm:$0xff] }
 0x554   :  { %21392 = vmatpush3.bf16.msra.mxu1 %v24160_v17  ;;  %19027 = vmatprep.mubr.f32.mxu1 %v27115_v1  ;;  %v27121_v17 = vld [vmem:[#allocation155_spill] sm:$0xff]  ;;  %v27122_v1 = vld [vmem:[#allocation156_spill] sm:$0xff] }
 0x555   :  { %21394 = vmatprep.subr.bf16.mxu1 %v24168_v16  ;;  %19083 = vmatprep.mubr.f32.mxu0 %v23880_v30  ;;  %v27123_v30 = vld [vmem:[#allocation157_spill] sm:$0xff] }
 0x557   :  { %19028 = vmatmul.mubr.f32.gmra.mrb[220].mxu1 %v27116_v15  ;;  %19084 = vmatmul.mubr.f32.gmra.mrb[76].mxu0 %v27117_v23  ;;  %v27124_v15 = vld [vmem:[#allocation158_spill] sm:$0xff]  ;;  %v27128_v23 = vld [vmem:[#allocation161_spill] sm:$0xff] }
 0x558   :  { %21396 = vmatpush3.bf16.msra.mxu1 %v24168_v16  ;;  %19030 = vmatprep.mubr.f32.mxu1 %v27118_v55  ;;  %v27126_v16 = vld [vmem:[#allocation159_spill] sm:$0xff]  ;;  %v27127_v55 = vld [vmem:[#allocation160_spill] sm:$0xff] }
 0x559   :  { %21398 = vmatprep.subr.bf16.mxu1 %v24175_v34  ;;  %19086 = vmatprep.mubr.f32.mxu0 %v27119_v5  ;;  %v27129_v5 = vld [vmem:[#allocation162_spill] sm:$0xff] }
 0x55b   :  { %19031 = vmatmul.mubr.f32.gmra.mrb[222].mxu1 %v27120_v62  ;;  %19087 = vmatmul.mubr.f32.gmra.mrb[78].mxu0 %v27121_v17  ;;  %v27130_v62 = vld [vmem:[#allocation163_spill] sm:$0xff]  ;;  %v27135_v17 = vld [vmem:[#allocation168_spill] sm:$0xff] }
 0x55c   :  { %21400 = vmatpush3.bf16.msra.mxu1 %v24175_v34  ;;  %19121 = vmatprep.mubr.f32.mxu1 %v27122_v1  ;;  %v27131_v34 = vld [vmem:[#allocation164_spill] sm:$0xff]  ;;  %v27132_v1 = vld [vmem:[#allocation165_spill] sm:$0xff] }
 0x55f   :  { %19122 = vmatmul.mubr.f32.vlgmr.msra.gmra.mrb[224].mxu1 %v27123_v30  ;;  %v27133_v30 = vld [vmem:[#allocation166_spill] sm:$0xff] }
 0x560   :  { %19124 = vmatprep.mubr.f32.mxu1 %v27124_v15  ;;  %v27134_v15 = vld [vmem:[#allocation167_spill] sm:$0xff] }
 0x563   :  { %19125 = vmatmul.mubr.f32.gmra.mrb[226].mxu1 %v27126_v16 }
 0x564   :  { %19127 = vmatprep.mubr.f32.mxu1 %v27127_v55  ;;  %v27136_v55 = vld [vmem:[#allocation169_spill] sm:$0xff] }
 0x567   :  { %19128 = vmatmul.mubr.f32.gmra.mrb[228].mxu1 %v27128_v23  ;;  %v27137_v23 = vld [vmem:[#allocation170_spill] sm:$0xff] }
 0x568   :  { %19130 = vmatprep.mubr.f32.mxu1 %v27129_v5  ;;  %v27138_v5 = vld [vmem:[#allocation171_spill] sm:$0xff] }
 0x56b   :  { %19131 = vmatmul.mubr.f32.gmra.mrb[230].mxu1 %v27130_v62  ;;  %v27140_v62 = vld [vmem:[#allocation57_spill] sm:$0xff] }
 0x56c   :  { %19133 = vmatprep.mubr.f32.mxu1 %v27131_v34  ;;  %v5768_v34 = vld [vmem:[%s27125_s5] sm:$0xff] }
 0x56f   :  { %19134 = vmatmul.mubr.f32.gmra.mrb[232].mxu1 %v27132_v1  ;;  %v5769_v1 = vld [vmem:[%s27125_s5 + $0x8] sm:$0xff] }
 0x570   :  { %19136 = vmatprep.mubr.f32.mxu1 %v27133_v30  ;;  %v21401_v30 = vpack.c.bf16 %v5769_v1, %v5768_v34 }
 0x572   :  { %21402 = vmatprep.subr.bf16.mxu0 %v21401_v30 }
 0x573   :  { %19137 = vmatmul.mubr.f32.gmra.mrb[234].mxu1 %v27134_v15  ;;  %21404 = vmatpush3.bf16.msra.mxu0 %v21401_v30  ;;  %v5770_v15 = vld [vmem:[%s27125_s5 + $0x10] sm:$0xff] }
 0x574   :  { %19139 = vmatprep.mubr.f32.mxu1 %v27135_v17  ;;  %v5771_v17 = vld [vmem:[%s27125_s5 + $0x18] sm:$0xff]  ;;  %v5774_v30 = vld [vmem:[%s27125_s5 + $0x30] sm:$0xff] }
 0x575   :  { %v21405_v16 = vpack.c.bf16 %v5771_v17, %v5770_v15  ;;  %v21413_v8 = vpack.c.bf16 %v5775_v22, %v5774_v30 }
 0x577   :  { %19140 = vmatmul.mubr.f32.gmra.mrb[236].mxu1 %v27136_v55  ;;  %21406 = vmatprep.subr.bf16.mxu0 %v21405_v16  ;;  %v5773_v55 = vld [vmem:[%s27125_s5 + $0x28] sm:$0xff] }
 0x578   :  { %19142 = vmatprep.mubr.f32.mxu1 %v27137_v23  ;;  %21408 = vmatpush3.bf16.msra.mxu0 %v21405_v16  ;;  %v5772_v23 = vld [vmem:[%s27125_s5 + $0x20] sm:$0xff]  ;;  %s27319_s5 = sld [smem:[#allocation52_spill]] }
 0x579   :  { %v21409_v37 = vpack.c.bf16 %v5773_v55, %v5772_v23 }
 0x57b   :  { %19143 = vmatmul.mubr.f32.gmra.mrb[238].mxu1 %v27138_v5  ;;  %v24443_v5 = vld [vmem:[%s27139_s9] ss:$0 sm:$0xff]  ;;  %21410 = vmatprep.subr.bf16.mxu0 %v21409_v37 }
 0x57c   :  { %19217 = vmatprep.mubr.f32.mxu1 %v27140_v62  ;;  %v24449_v62 = vld [vmem:[%s27141_s13] ss:$0 sm:$0xff]  ;;  %21412 = vmatpush3.bf16.msra.mxu0 %v21409_v37  ;;  %s27321_s13 = sld [smem:[#allocation54_spill]] }
 0x57d   :  { %21414 = vmatprep.subr.bf16.mxu0 %v21413_v8 }
 0x580   :  { %21416 = vmatpush3.bf16.msra.mxu0 %v21413_v8 }
 0x5b2   :  { %v18675_v34 = vpop.f32.mrb[160].mxu1  ;;  %v18731_v1 = vpop.f32.mrb[16].mxu0 }
 0x5b3   :  { %v4251_v43 = vmul.f32 %v18675_v34, %v24443_v5  ;;  %v4164_v15 = vpop.f32.mrb[161].mxu1  ;;  %v4442_v17 = vmul.f32 %v18731_v1, %v24446_v51  ;;  %v4354_v16 = vpop.f32.mrb[17].mxu0 }
 0x5b4   :  { %v4250_v23 = vmul.f32 %v24443_v5, %v4164_v15  ;;  %v4441_v55 = vmul.f32 %v24446_v51, %v4354_v16 }
 0x5b5   :  { %v4273_v20 = vadd.f32 %v24449_v62, %v4251_v43 }
 0x5b6   :  { %v4272_v41 = vadd.f32 %v24449_v62, %v4250_v23  ;;  %v18678_v44 = vpop.f32.mrb[162].mxu1  ;;  %v18734_v37 = vpop.f32.mrb[18].mxu0 }
 0x5b7   :  { %v4253_v58 = vmul.f32 %v18678_v44, %v24443_v5  ;;  %v4174_v34 = vpop.f32.mrb[163].mxu1  ;;  %v4444_v27 = vmul.f32 %v18734_v37, %v24446_v51  ;;  %v4364_v1 = vpop.f32.mrb[19].mxu0  ;;  %v24461_v61 = vadd.f32 %v4442_v17, %v4273_v20 }
 0x5b8   :  { %v4252_v22 = vmul.f32 %v24443_v5, %v4174_v34  ;;  %v4443_v30 = vmul.f32 %v24446_v51, %v4364_v1  ;;  %v24465_v15 = vadd.f32 %v4441_v55, %v4272_v41 }
 0x5b9   :  { %v4275_v43 = vadd.f32 %v24449_v62, %v4253_v58 }
 0x5ba   :  { %v4274_v16 = vadd.f32 %v24449_v62, %v4252_v22  ;;  %v18681_v23 = vpop.f32.mrb[164].mxu1  ;;  %v18737_v8 = vpop.f32.mrb[20].mxu0 }
 0x5bb   :  { %v4255_v44 = vmul.f32 %v18681_v23, %v24443_v5  ;;  %v4184_v40 = vpop.f32.mrb[165].mxu1  ;;  %v4446_v37 = vmul.f32 %v18737_v8, %v24446_v51  ;;  %v4374_v12 = vpop.f32.mrb[21].mxu0  ;;  %v24471_v20 = vadd.f32 %v4444_v27, %v4275_v43 }
 0x5bc   :  { %v4254_v17 = vmul.f32 %v24443_v5, %v4184_v40  ;;  %v4445_v34 = vmul.f32 %v24446_v51, %v4374_v12  ;;  %v24475_v41 = vadd.f32 %v4443_v30, %v4274_v16 }
 0x5bd   :  { %v4277_v58 = vadd.f32 %v24449_v62, %v4255_v44 }
 0x5be   :  { %v4276_v55 = vadd.f32 %v24449_v62, %v4254_v17  ;;  %v18684_v1 = vpop.f32.mrb[166].mxu1  ;;  %v18740_v22 = vpop.f32.mrb[22].mxu0 }
 0x5bf   :  { %v4257_v23 = vmul.f32 %v18684_v1, %v24443_v5  ;;  %v4194_v48 = vpop.f32.mrb[167].mxu1  ;;  %v4448_v8 = vmul.f32 %v18740_v22, %v24446_v51  ;;  %v4384_v33 = vpop.f32.mrb[23].mxu0  ;;  %v24481_v27 = vadd.f32 %v4446_v37, %v4277_v58 }
 0x5c0   :  { %v4256_v40 = vmul.f32 %v24443_v5, %v4194_v48  ;;  %v4447_v12 = vmul.f32 %v24446_v51, %v4384_v33  ;;  %v24485_v30 = vadd.f32 %v4445_v34, %v4276_v55 }
 0x5c1   :  { %v4279_v43 = vadd.f32 %v24449_v62, %v4257_v23 }
 0x5c2   :  { %v4278_v16 = vadd.f32 %v24449_v62, %v4256_v40  ;;  %v18687_v44 = vpop.f32.mrb[168].mxu1  ;;  %v18743_v17 = vpop.f32.mrb[24].mxu0 }
 0x5c3   :  { %v4259_v1 = vmul.f32 %v18687_v44, %v24443_v5  ;;  %v4204_v14 = vpop.f32.mrb[169].mxu1  ;;  %v4450_v22 = vmul.f32 %v18743_v17, %v24446_v51  ;;  %v4394_v47 = vpop.f32.mrb[25].mxu0  ;;  %v24491_v37 = vadd.f32 %v4448_v8, %v4279_v43 }
 0x5c4   :  { %v4258_v48 = vmul.f32 %v24443_v5, %v4204_v14  ;;  %v4449_v33 = vmul.f32 %v24446_v51, %v4394_v47  ;;  %v24495_v34 = vadd.f32 %v4447_v12, %v4278_v16 }
 0x5c5   :  { %v4281_v58 = vadd.f32 %v24449_v62, %v4259_v1 }
 0x5c6   :  { %v4280_v55 = vadd.f32 %v24449_v62, %v4258_v48  ;;  %v18690_v23 = vpop.f32.mrb[170].mxu1  ;;  %v18746_v40 = vpop.f32.mrb[26].mxu0 }
 0x5c7   :  { %v24499_v13 = vadd.f32 %v4450_v22, %v4281_v58  ;;  %v4261_v44 = vmul.f32 %v18690_v23, %v24443_v5  ;;  %v4214_v17 = vpop.f32.mrb[171].mxu1  ;;  %v4452_v8 = vmul.f32 %v18746_v40, %v24446_v51  ;;  %v4404_v43 = vpop.f32.mrb[27].mxu0 }
 0x5c8   :  { %v24503_v11 = vadd.f32 %v4449_v33, %v4280_v55  ;;  %v4260_v14 = vmul.f32 %v24443_v5, %v4214_v17  ;;  %v4451_v47 = vmul.f32 %v24446_v51, %v4404_v43 }
 0x5c9   :  { %v4283_v12 = vadd.f32 %v24449_v62, %v4261_v44 }
 0x5ca   :  { %v4282_v16 = vadd.f32 %v24449_v62, %v4260_v14  ;;  %v18693_v1 = vpop.f32.mrb[172].mxu1  ;;  %v18749_v48 = vpop.f32.mrb[28].mxu0 }
 0x5cb   :  { %v24509_v22 = vadd.f32 %v4452_v8, %v4283_v12  ;;  %v4263_v58 = vmul.f32 %v18693_v1, %v24443_v5  ;;  %v4224_v23 = vpop.f32.mrb[173].mxu1  ;;  %v4454_v40 = vmul.f32 %v18749_v48, %v24446_v51  ;;  %v4414_v10 = vpop.f32.mrb[29].mxu0 }
 0x5cc   :  { %v24513_v33 = vadd.f32 %v4451_v47, %v4282_v16  ;;  %v4262_v55 = vmul.f32 %v24443_v5, %v4224_v23  ;;  %v4453_v44 = vmul.f32 %v24446_v51, %v4414_v10 }
 0x5cd   :  { %v4285_v17 = vadd.f32 %v24449_v62, %v4263_v58  ;;  %v24531_v58 = vld [vmem:[%s27139_s9 + $0x3] ss:$0 sm:$0xff] }
 0x5ce   :  { %v4284_v43 = vadd.f32 %v24449_v62, %v4262_v55  ;;  %v18696_v8 = vpop.f32.mrb[174].mxu1  ;;  %v18752_v14 = vpop.f32.mrb[30].mxu0 }
 0x5cf   :  { %v24519_v12 = vadd.f32 %v4454_v40, %v4285_v17  ;;  %v4265_v1 = vmul.f32 %v18696_v8, %v24443_v5  ;;  %v4234_v48 = vpop.f32.mrb[175].mxu1  ;;  %v4456_v4 = vmul.f32 %v18752_v14, %v24446_v51  ;;  %v4424_v47 = vpop.f32.mrb[31].mxu0 }
 0x5d0   :  { %v24523_v16 = vadd.f32 %v4453_v44, %v4284_v43  ;;  %v4264_v23 = vmul.f32 %v24443_v5, %v4234_v48  ;;  %v4455_v10 = vmul.f32 %v24446_v51, %v4424_v47 }
 0x5d1   :  { %v4287_v55 = vadd.f32 %v24449_v62, %v4265_v1 }
 0x5d2   :  { %v4286_v40 = vadd.f32 %v24449_v62, %v4264_v23  ;;  %v18787_v17 = vpop.f32.mrb[176].mxu1  ;;  %v18843_v8 = vpop.f32.mrb[32].mxu0 }
 0x5d3   :  { %v24535_v54 = vadd.f32 %v4456_v4, %v4287_v55  ;;  %v4627_v14 = vmul.f32 %v18787_v17, %v24528_v9  ;;  %v4539_v44 = vpop.f32.mrb[177].mxu1  ;;  %v4812_v43 = vmul.f32 %v18843_v8, %v24531_v58  ;;  %v4724_v5 = vpop.f32.mrb[33].mxu0 }
 0x5d4   :  { %v24539_v48 = vadd.f32 %v4455_v10, %v4286_v40  ;;  %v4626_v51 = vmul.f32 %v24528_v9, %v4539_v44  ;;  %v4811_v47 = vmul.f32 %v24531_v58, %v4724_v5 }
 0x5d5   :  { %v4643_v1 = vadd.f32 %v4627_v14, %v24461_v61 }
 0x5d6   :  { %v4642_v62 = vadd.f32 %v4626_v51, %v24465_v15  ;;  %v18790_v23 = vpop.f32.mrb[178].mxu1  ;;  %v18846_v7 = vpop.f32.mrb[34].mxu0 }
 0x5d7   :  { %v24545_v4 = vadd.f32 %v4812_v43, %v4643_v1  ;;  %v4629_v55 = vmul.f32 %v18790_v23, %v24528_v9  ;;  %v4549_v17 = vpop.f32.mrb[179].mxu1  ;;  %v4814_v8 = vmul.f32 %v18846_v7, %v24531_v58  ;;  %v4734_v6 = vpop.f32.mrb[35].mxu0 }
 0x5d8   :  { %v24549_v10 = vadd.f32 %v4811_v47, %v4642_v62  ;;  %v4628_v40 = vmul.f32 %v24528_v9, %v4549_v17  ;;  %v4813_v44 = vmul.f32 %v24531_v58, %v4734_v6 }
 0x5d9   :  { %v4645_v61 = vadd.f32 %v4629_v55, %v24471_v20 }
 0x5da   :  { %v4644_v15 = vadd.f32 %v4628_v40, %v24475_v41  ;;  %v18793_v14 = vpop.f32.mrb[180].mxu1  ;;  %v18849_v5 = vpop.f32.mrb[36].mxu0 }
 0x5db   :  { %v24555_v43 = vadd.f32 %v4814_v8, %v4645_v61  ;;  %v4631_v51 = vmul.f32 %v18793_v14, %v24528_v9  ;;  %v4559_v1 = vpop.f32.mrb[181].mxu1  ;;  %v4816_v7 = vmul.f32 %v18849_v5, %v24531_v58  ;;  %v4744_v23 = vpop.f32.mrb[37].mxu0 }
 0x5dc   :  { %v24559_v47 = vadd.f32 %v4813_v44, %v4644_v15  ;;  %v4630_v62 = vmul.f32 %v24528_v9, %v4559_v1  ;;  %v4815_v6 = vmul.f32 %v24531_v58, %v4744_v23 }
 0x5dd   :  { %v4647_v20 = vadd.f32 %v4631_v51, %v24481_v27 }
 0x5de   :  { %v4646_v41 = vadd.f32 %v4630_v62, %v24485_v30  ;;  %v18796_v55 = vpop.f32.mrb[182].mxu1  ;;  %v18852_v17 = vpop.f32.mrb[38].mxu0 }
 0x5df   :  { %v24565_v8 = vadd.f32 %v4816_v7, %v4647_v20  ;;  %v4633_v40 = vmul.f32 %v18796_v55, %v24528_v9  ;;  %v4569_v61 = vpop.f32.mrb[183].mxu1  ;;  %v4818_v14 = vmul.f32 %v18852_v17, %v24531_v58  ;;  %v4754_v5 = vpop.f32.mrb[39].mxu0 }
 0x5e0   :  { %v24569_v44 = vadd.f32 %v4815_v6, %v4646_v41  ;;  %v4632_v15 = vmul.f32 %v24528_v9, %v4569_v61  ;;  %v4817_v1 = vmul.f32 %v24531_v58, %v4754_v5 }
 0x5e1   :  { %v4649_v27 = vadd.f32 %v4633_v40, %v24491_v37 }
 0x5e2   :  { %v4648_v30 = vadd.f32 %v4632_v15, %v24495_v34  ;;  %v18799_v51 = vpop.f32.mrb[184].mxu1  ;;  %v18855_v23 = vpop.f32.mrb[40].mxu0 }
 0x5e3   :  { %v24575_v7 = vadd.f32 %v4818_v14, %v4649_v27  ;;  %v4635_v62 = vmul.f32 %v18799_v51, %v24528_v9  ;;  %v4579_v20 = vpop.f32.mrb[185].mxu1  ;;  %v4820_v55 = vmul.f32 %v18855_v23, %v24531_v58  ;;  %v4764_v17 = vpop.f32.mrb[41].mxu0 }
 0x5e4   :  { %v24579_v6 = vadd.f32 %v4817_v1, %v4648_v30  ;;  %v4634_v41 = vmul.f32 %v24528_v9, %v4579_v20  ;;  %v4819_v61 = vmul.f32 %v24531_v58, %v4764_v17 }
 0x5e5   :  { %v4651_v37 = vadd.f32 %v4635_v62, %v24499_v13 }
 0x5e6   :  { %v4650_v34 = vadd.f32 %v4634_v41, %v24503_v11  ;;  %v18802_v40 = vpop.f32.mrb[186].mxu1  ;;  %v18858_v5 = vpop.f32.mrb[42].mxu0 }
 0x5e7   :  { %v24585_v14 = vadd.f32 %v4820_v55, %v4651_v37  ;;  %v4637_v15 = vmul.f32 %v18802_v40, %v24528_v9  ;;  %v4589_v27 = vpop.f32.mrb[187].mxu1  ;;  %v4822_v51 = vmul.f32 %v18858_v5, %v24531_v58  ;;  %v4774_v23 = vpop.f32.mrb[43].mxu0 }
 0x5e8   :  { %v24589_v1 = vadd.f32 %v4819_v61, %v4650_v34  ;;  %v4636_v30 = vmul.f32 %v24528_v9, %v4589_v27  ;;  %v4821_v20 = vmul.f32 %v24531_v58, %v4774_v23 }
 0x5e9   :  { %v4653_v13 = vadd.f32 %v4637_v15, %v24509_v22 }
 0x5ea   :  { %v4652_v11 = vadd.f32 %v4636_v30, %v24513_v33  ;;  %v18805_v62 = vpop.f32.mrb[188].mxu1  ;;  %v18861_v17 = vpop.f32.mrb[44].mxu0 }
 0x5eb   :  { %v24595_v55 = vadd.f32 %v4822_v51, %v4653_v13  ;;  %v4639_v41 = vmul.f32 %v18805_v62, %v24528_v9  ;;  %v4599_v37 = vpop.f32.mrb[189].mxu1  ;;  %v4824_v40 = vmul.f32 %v18861_v17, %v24531_v58  ;;  %v4784_v5 = vpop.f32.mrb[45].mxu0 }
 0x5ec   :  { %v24599_v61 = vadd.f32 %v4821_v20, %v4652_v11  ;;  %v4638_v34 = vmul.f32 %v24528_v9, %v4599_v37  ;;  %v4823_v22 = vmul.f32 %v24531_v58, %v4784_v5  ;;  %v24614_v5 = vld [vmem:[%s27139_s9 + $0x4] ss:$0 sm:$0xff] }
 0x5ed   :  { %v4655_v33 = vadd.f32 %v4639_v41, %v24519_v12  ;;  %v24617_v12 = vld [vmem:[%s27139_s9 + $0x5] ss:$0 sm:$0xff] }
 0x5ee   :  { %v4654_v15 = vadd.f32 %v4638_v34, %v24523_v16  ;;  %v18808_v27 = vpop.f32.mrb[190].mxu1  ;;  %v18864_v51 = vpop.f32.mrb[46].mxu0 }
 0x5ef   :  { %v24605_v23 = vadd.f32 %v4824_v40, %v4655_v33  ;;  %v4641_v30 = vmul.f32 %v18808_v27, %v24528_v9  ;;  %v4609_v13 = vpop.f32.mrb[191].mxu1  ;;  %v4826_v62 = vmul.f32 %v18864_v51, %v24531_v58  ;;  %v4794_v20 = vpop.f32.mrb[47].mxu0 }
 0x5f0   :  { %v24609_v11 = vadd.f32 %v4823_v22, %v4654_v15  ;;  %v4640_v17 = vmul.f32 %v24528_v9, %v4609_v13  ;;  %v4825_v37 = vmul.f32 %v24531_v58, %v4794_v20 }
 0x5f1   :  { %v4657_v16 = vadd.f32 %v4641_v30, %v24535_v54 }
 0x5f2   :  { %v4656_v41 = vadd.f32 %v4640_v17, %v24539_v48  ;;  %v18899_v40 = vpop.f32.mrb[192].mxu1  ;;  %v18955_v34 = vpop.f32.mrb[48].mxu0 }
 0x5f3   :  { %v24621_v33 = vadd.f32 %v4826_v62, %v4657_v16  ;;  %v4997_v27 = vmul.f32 %v18899_v40, %v24614_v5  ;;  %v4909_v22 = vpop.f32.mrb[193].mxu1  ;;  %v5182_v15 = vmul.f32 %v18955_v34, %v24617_v12  ;;  %v5094_v9 = vpop.f32.mrb[49].mxu0 }
 0x5f4   :  { %v24625_v51 = vadd.f32 %v4825_v37, %v4656_v41  ;;  %v4996_v58 = vmul.f32 %v24614_v5, %v4909_v22  ;;  %v5181_v13 = vmul.f32 %v24617_v12, %v5094_v9 }
 0x5f5   :  { %v5013_v54 = vadd.f32 %v4997_v27, %v24545_v4 }
 0x5f6   :  { %v5012_v48 = vadd.f32 %v4996_v58, %v24549_v10  ;;  %v18902_v30 = vpop.f32.mrb[194].mxu1  ;;  %v18958_v20 = vpop.f32.mrb[50].mxu0 }
 0x5f7   :  { %v24631_v62 = vadd.f32 %v5182_v15, %v5013_v54  ;;  %v4999_v17 = vmul.f32 %v18902_v30, %v24614_v5  ;;  %v4919_v16 = vpop.f32.mrb[195].mxu1  ;;  %v5184_v40 = vmul.f32 %v18958_v20, %v24617_v12  ;;  %v5104_v34 = vpop.f32.mrb[51].mxu0 }
 0x5f8   :  { %v24635_v37 = vadd.f32 %v5181_v13, %v5012_v48  ;;  %v4998_v41 = vmul.f32 %v24614_v5, %v4919_v16  ;;  %v5183_v22 = vmul.f32 %v24617_v12, %v5104_v34 }
 0x5f9   :  { %v5015_v4 = vadd.f32 %v4999_v17, %v24555_v43 }
 0x5fa   :  { %v5014_v10 = vadd.f32 %v4998_v41, %v24559_v47  ;;  %v18905_v27 = vpop.f32.mrb[196].mxu1  ;;  %v18961_v9 = vpop.f32.mrb[52].mxu0 }
 0x5fb   :  { %v24641_v15 = vadd.f32 %v5184_v40, %v5015_v4  ;;  %v5001_v58 = vmul.f32 %v18905_v27, %v24614_v5  ;;  %v4929_v54 = vpop.f32.mrb[197].mxu1  ;;  %v5186_v30 = vmul.f32 %v18961_v9, %v24617_v12  ;;  %v5114_v20 = vpop.f32.mrb[53].mxu0 }
 0x5fc   :  { %v24645_v13 = vadd.f32 %v5183_v22, %v5014_v10  ;;  %v5000_v48 = vmul.f32 %v24614_v5, %v4929_v54  ;;  %v5185_v16 = vmul.f32 %v24617_v12, %v5114_v20 }
 0x5fd   :  { %v5017_v43 = vadd.f32 %v5001_v58, %v24565_v8 }
 0x5fe   :  { %v5016_v47 = vadd.f32 %v5000_v48, %v24569_v44  ;;  %v18908_v17 = vpop.f32.mrb[198].mxu1  ;;  %v18964_v34 = vpop.f32.mrb[54].mxu0 }
 0x5ff   :  { %v24651_v40 = vadd.f32 %v5186_v30, %v5017_v43  ;;  %v5003_v41 = vmul.f32 %v18908_v17, %v24614_v5  ;;  %v4939_v4 = vpop.f32.mrb[199].mxu1  ;;  %v5188_v27 = vmul.f32 %v18964_v34, %v24617_v12  ;;  %v5124_v9 = vpop.f32.mrb[55].mxu0 }
 0x600   :  { %v24655_v22 = vadd.f32 %v5185_v16, %v5016_v47  ;;  %v5002_v10 = vmul.f32 %v24614_v5, %v4939_v4  ;;  %v5187_v54 = vmul.f32 %v24617_v12, %v5124_v9 }
 0x601   :  { %v5019_v8 = vadd.f32 %v5003_v41, %v24575_v7 }
 0x602   :  { %v5018_v44 = vadd.f32 %v5002_v10, %v24579_v6  ;;  %v18911_v58 = vpop.f32.mrb[200].mxu1  ;;  %v18967_v20 = vpop.f32.mrb[56].mxu0 }
 0x603   :  { %v24661_v30 = vadd.f32 %v5188_v27, %v5019_v8  ;;  %v5005_v48 = vmul.f32 %v18911_v58, %v24614_v5  ;;  %v4949_v43 = vpop.f32.mrb[201].mxu1  ;;  %v5190_v17 = vmul.f32 %v18967_v20, %v24617_v12  ;;  %v5134_v34 = vpop.f32.mrb[57].mxu0 }
 0x604   :  { %v24665_v16 = vadd.f32 %v5187_v54, %v5018_v44  ;;  %v5004_v47 = vmul.f32 %v24614_v5, %v4949_v43  ;;  %v5189_v4 = vmul.f32 %v24617_v12, %v5134_v34 }
 0x605   :  { %v5021_v7 = vadd.f32 %v5005_v48, %v24585_v14 }
 0x606   :  { %v5020_v6 = vadd.f32 %v5004_v47, %v24589_v1  ;;  %v18914_v41 = vpop.f32.mrb[202].mxu1  ;;  %v18970_v9 = vpop.f32.mrb[58].mxu0 }
 0x607   :  { %v24671_v27 = vadd.f32 %v5190_v17, %v5021_v7  ;;  %v5007_v10 = vmul.f32 %v18914_v41, %v24614_v5  ;;  %v4959_v8 = vpop.f32.mrb[203].mxu1  ;;  %v5192_v58 = vmul.f32 %v18970_v9, %v24617_v12  ;;  %v5144_v20 = vpop.f32.mrb[59].mxu0 }
 0x608   :  { %v24675_v54 = vadd.f32 %v5189_v4, %v5020_v6  ;;  %v5006_v44 = vmul.f32 %v24614_v5, %v4959_v8  ;;  %v5191_v43 = vmul.f32 %v24617_v12, %v5144_v20 }
 0x609   :  { %v5023_v14 = vadd.f32 %v5007_v10, %v24595_v55 }
 0x60a   :  { %v5022_v1 = vadd.f32 %v5006_v44, %v24599_v61  ;;  %v18917_v48 = vpop.f32.mrb[204].mxu1  ;;  %v18973_v34 = vpop.f32.mrb[60].mxu0 }
 0x60b   :  { %v24681_v17 = vadd.f32 %v5192_v58, %v5023_v14  ;;  %v5009_v47 = vmul.f32 %v18917_v48, %v24614_v5  ;;  %v4969_v7 = vpop.f32.mrb[205].mxu1  ;;  %v5194_v41 = vmul.f32 %v18973_v34, %v24617_v12  ;;  %v5154_v9 = vpop.f32.mrb[61].mxu0 }
 0x60c   :  { %v24685_v4 = vadd.f32 %v5191_v43, %v5022_v1  ;;  %v5008_v6 = vmul.f32 %v24614_v5, %v4969_v7  ;;  %v5193_v55 = vmul.f32 %v24617_v12, %v5154_v9  ;;  %v24700_v9 = vld [vmem:[%s27139_s9 + $0x6] ss:$0 sm:$0xff] }
 0x60d   :  { %v5025_v61 = vadd.f32 %v5009_v47, %v24605_v23  ;;  %v24703_v23 = vld [vmem:[%s27139_s9 + $0x7] ss:$0 sm:$0xff] }
 0x60e   :  { %v5024_v10 = vadd.f32 %v5008_v6, %v24609_v11  ;;  %v18920_v8 = vpop.f32.mrb[206].mxu1  ;;  %v18976_v58 = vpop.f32.mrb[62].mxu0 }
 0x60f   :  { %v24691_v20 = vadd.f32 %v5194_v41, %v5025_v61  ;;  %v5011_v44 = vmul.f32 %v18920_v8, %v24614_v5  ;;  %v4979_v14 = vpop.f32.mrb[207].mxu1  ;;  %v5196_v48 = vmul.f32 %v18976_v58, %v24617_v12  ;;  %v5164_v43 = vpop.f32.mrb[63].mxu0 }
 0x610   :  { %v24695_v1 = vadd.f32 %v5193_v55, %v5024_v10  ;;  %v5010_v34 = vmul.f32 %v24614_v5, %v4979_v14  ;;  %v5195_v7 = vmul.f32 %v24617_v12, %v5164_v43 }
 0x611   :  { %v5027_v11 = vadd.f32 %v5011_v44, %v24621_v33 }
 0x612   :  { %v5026_v47 = vadd.f32 %v5010_v34, %v24625_v51  ;;  %v19011_v41 = vpop.f32.mrb[208].mxu1  ;;  %v19067_v6 = vpop.f32.mrb[64].mxu0 }
 0x613   :  { %v24707_v61 = vadd.f32 %v5196_v48, %v5027_v11  ;;  %v5367_v8 = vmul.f32 %v19011_v41, %v24700_v9  ;;  %v5279_v55 = vpop.f32.mrb[209].mxu1  ;;  %v5552_v10 = vmul.f32 %v19067_v6, %v24703_v23  ;;  %v5464_v5 = vpop.f32.mrb[65].mxu0 }
 0x614   :  { %v24711_v58 = vadd.f32 %v5195_v7, %v5026_v47  ;;  %v5366_v12 = vmul.f32 %v24700_v9, %v5279_v55  ;;  %v5551_v14 = vmul.f32 %v24703_v23, %v5464_v5 }
 0x615   :  { %v5383_v33 = vadd.f32 %v5367_v8, %v24631_v62 }
 0x616   :  { %v5382_v51 = vadd.f32 %v5366_v12, %v24635_v37  ;;  %v19014_v44 = vpop.f32.mrb[210].mxu1  ;;  %v19070_v43 = vpop.f32.mrb[66].mxu0 }
 0x617   :  { %v24717_v48 = vadd.f32 %v5552_v10, %v5383_v33  ;;  %v5369_v34 = vmul.f32 %v19014_v44, %v24700_v9  ;;  %v5289_v11 = vpop.f32.mrb[211].mxu1  ;;  %v5554_v41 = vmul.f32 %v19070_v43, %v24703_v23  ;;  %v5474_v6 = vpop.f32.mrb[67].mxu0 }
 0x618   :  { %v24721_v7 = vadd.f32 %v5551_v14, %v5382_v51  ;;  %v5368_v47 = vmul.f32 %v24700_v9, %v5289_v11  ;;  %v5553_v55 = vmul.f32 %v24703_v23, %v5474_v6 }
 0x619   :  { %v5385_v62 = vadd.f32 %v5369_v34, %v24641_v15 }
 0x61a   :  { %v5384_v37 = vadd.f32 %v5368_v47, %v24645_v13  ;;  %v19017_v8 = vpop.f32.mrb[212].mxu1  ;;  %v19073_v5 = vpop.f32.mrb[68].mxu0 }
 0x61b   :  { %v24727_v10 = vadd.f32 %v5554_v41, %v5385_v62  ;;  %v5371_v12 = vmul.f32 %v19017_v8, %v24700_v9  ;;  %v5299_v33 = vpop.f32.mrb[213].mxu1  ;;  %v5556_v44 = vmul.f32 %v19073_v5, %v24703_v23  ;;  %v5484_v43 = vpop.f32.mrb[69].mxu0 }
 0x61c   :  { %v24731_v14 = vadd.f32 %v5553_v55, %v5384_v37  ;;  %v5370_v51 = vmul.f32 %v24700_v9, %v5299_v33  ;;  %v5555_v11 = vmul.f32 %v24703_v23, %v5484_v43 }
 0x61d   :  { %v5387_v15 = vadd.f32 %v5371_v12, %v24651_v40 }
 0x61e   :  { %v5386_v13 = vadd.f32 %v5370_v51, %v24655_v22  ;;  %v19020_v34 = vpop.f32.mrb[214].mxu1  ;;  %v19076_v6 = vpop.f32.mrb[70].mxu0 }
 0x61f   :  { %v24737_v41 = vadd.f32 %v5556_v44, %v5387_v15  ;;  %v5373_v47 = vmul.f32 %v19020_v34, %v24700_v9  ;;  %v5309_v62 = vpop.f32.mrb[215].mxu1  ;;  %v5558_v8 = vmul.f32 %v19076_v6, %v24703_v23  ;;  %v5494_v5 = vpop.f32.mrb[71].mxu0 }
 0x620   :  { %v24741_v55 = vadd.f32 %v5555_v11, %v5386_v13  ;;  %v5372_v37 = vmul.f32 %v24700_v9, %v5309_v62  ;;  %v5557_v33 = vmul.f32 %v24703_v23, %v5494_v5 }
 0x621   :  { %v5389_v40 = vadd.f32 %v5373_v47, %v24661_v30 }
 0x622   :  { %v5388_v22 = vadd.f32 %v5372_v37, %v24665_v16  ;;  %v19023_v12 = vpop.f32.mrb[216].mxu1  ;;  %v19079_v43 = vpop.f32.mrb[72].mxu0 }
 0x623   :  { %v24747_v44 = vadd.f32 %v5558_v8, %v5389_v40  ;;  %v5375_v51 = vmul.f32 %v19023_v12, %v24700_v9  ;;  %v5319_v15 = vpop.f32.mrb[217].mxu1  ;;  %v5560_v34 = vmul.f32 %v19079_v43, %v24703_v23  ;;  %v5504_v6 = vpop.f32.mrb[73].mxu0 }
 0x624   :  { %v24751_v11 = vadd.f32 %v5557_v33, %v5388_v22  ;;  %v5374_v13 = vmul.f32 %v24700_v9, %v5319_v15  ;;  %v5559_v62 = vmul.f32 %v24703_v23, %v5504_v6 }
 0x625   :  { %v5391_v30 = vadd.f32 %v5375_v51, %v24671_v27 }
 0x626   :  { %v5390_v16 = vadd.f32 %v5374_v13, %v24675_v54  ;;  %v19026_v47 = vpop.f32.mrb[218].mxu1  ;;  %v19082_v5 = vpop.f32.mrb[74].mxu0 }
 0x627   :  { %v24757_v8 = vadd.f32 %v5560_v34, %v5391_v30  ;;  %v5377_v37 = vmul.f32 %v19026_v47, %v24700_v9  ;;  %v5329_v40 = vpop.f32.mrb[219].mxu1  ;;  %v5562_v12 = vmul.f32 %v19082_v5, %v24703_v23  ;;  %v5514_v43 = vpop.f32.mrb[75].mxu0 }
 0x628   :  { %v24761_v33 = vadd.f32 %v5559_v62, %v5390_v16  ;;  %v5376_v22 = vmul.f32 %v24700_v9, %v5329_v40  ;;  %v5561_v15 = vmul.f32 %v24703_v23, %v5514_v43 }
 0x629   :  { %v5393_v27 = vadd.f32 %v5377_v37, %v24681_v17 }
 0x62a   :  { %v5392_v54 = vadd.f32 %v5376_v22, %v24685_v4  ;;  %v19029_v51 = vpop.f32.mrb[220].mxu1  ;;  %v19085_v6 = vpop.f32.mrb[76].mxu0 }
 0x62b   :  { %v24767_v34 = vadd.f32 %v5562_v12, %v5393_v27  ;;  %v5379_v13 = vmul.f32 %v19029_v51, %v24700_v9  ;;  %v5339_v30 = vpop.f32.mrb[221].mxu1  ;;  %v5564_v47 = vmul.f32 %v19085_v6, %v24703_v23  ;;  %v5524_v5 = vpop.f32.mrb[77].mxu0 }
 0x62c   :  { %v24771_v62 = vadd.f32 %v5561_v15, %v5392_v54  ;;  %v5378_v16 = vmul.f32 %v24700_v9, %v5339_v30  ;;  %v5563_v40 = vmul.f32 %v24703_v23, %v5524_v5  ;;  %v24784_v5 = vld [vmem:[%s27139_s9 + $0x8] ss:$0 sm:$0xff]  ;;  %s27320_s9 = sld [smem:[#allocation53_spill]] }
 0x62d   :  { %v5395_v17 = vadd.f32 %v5379_v13, %v24691_v20 }
 0x62e   :  { %v5394_v4 = vadd.f32 %v5378_v16, %v24695_v1  ;;  %v19032_v37 = vpop.f32.mrb[222].mxu1  ;;  %v19088_v12 = vpop.f32.mrb[78].mxu0 }
 0x62f   :  { %v24777_v43 = vadd.f32 %v5564_v47, %v5395_v17  ;;  %v5381_v22 = vmul.f32 %v19032_v37, %v24700_v9  ;;  %v5349_v27 = vpop.f32.mrb[223].mxu1  ;;  %v5566_v51 = vmul.f32 %v19088_v12, %v24703_v23  ;;  %v5534_v6 = vpop.f32.mrb[79].mxu0 }
 0x630   :  { %v5579_v15 = vadd.f32 %v5563_v40, %v5394_v4  ;;  %v5380_v54 = vmul.f32 %v24700_v9, %v5349_v27  ;;  %v5565_v30 = vmul.f32 %v24703_v23, %v5534_v6 }
 0x631   :  { %v5397_v20 = vadd.f32 %v5381_v22, %v24707_v61 }
 0x632   :  { %v5396_v1 = vadd.f32 %v5380_v54, %v24711_v58  ;;  %v19123_v13 = vpop.f32.mrb[224].mxu1 }
 0x633   :  { %v5582_v47 = vadd.f32 %v5566_v51, %v5397_v20  ;;  %v5737_v16 = vmul.f32 %v19123_v13, %v24784_v5  ;;  %v5649_v17 = vpop.f32.mrb[225].mxu1 }
 0x634   :  { %v5581_v37 = vadd.f32 %v5565_v30, %v5396_v1  ;;  %v5736_v12 = vmul.f32 %v24784_v5, %v5649_v17 }
 0x635   :  { %v5753_v40 = vadd.f32 %v5737_v16, %v24717_v48 }
 0x636   :  { %v5752_v9 = vadd.f32 %v5736_v12, %v24721_v7  ;;  %v19126_v23 = vpop.f32.mrb[226].mxu1 }
 0x637   :  { %v5739_v4 = vmul.f32 %v19126_v23, %v24784_v5  ;;  %v5659_v27 = vpop.f32.mrb[227].mxu1 }
 0x638   :  { %v5738_v61 = vmul.f32 %v24784_v5, %v5659_v27  ;;  %19161 = vmatprep.mubr.msk.f32.mxu0 %vm5783_vm1, %v5752_v9 }
 0x639   :  { %v5755_v58 = vadd.f32 %v5739_v4, %v24727_v10  ;;  %19162 = vmatmul.mubr.msk.f32.vlgmr.msra.gmra.mrb[80].mxu0 %vm5783_vm1, %v5753_v40 }
 0x63a   :  { %v5754_v22 = vadd.f32 %v5738_v61, %v24731_v14  ;;  %v19129_v51 = vpop.f32.mrb[228].mxu1 }
 0x63b   :  { %v5741_v48 = vmul.f32 %v19129_v51, %v24784_v5  ;;  %v5669_v6 = vpop.f32.mrb[229].mxu1 }
 0x63c   :  { %v5740_v7 = vmul.f32 %v24784_v5, %v5669_v6  ;;  %19164 = vmatprep.mubr.msk.f32.mxu0 %vm5783_vm1, %v5754_v22 }
 0x63d   :  { %v5757_v54 = vadd.f32 %v5741_v48, %v24737_v41  ;;  %19165 = vmatmul.mubr.msk.f32.gmra.mrb[82].mxu0 %vm5783_vm1, %v5755_v58 }
 0x63e   :  { %v5756_v30 = vadd.f32 %v5740_v7, %v24741_v55  ;;  %v19132_v20 = vpop.f32.mrb[230].mxu1 }
 0x63f   :  { %v5743_v10 = vmul.f32 %v19132_v20, %v24784_v5  ;;  %v5679_v1 = vpop.f32.mrb[231].mxu1  ;;  %v24835_v20 = vld [vmem:[%s27142_s17] ss:$0 sm:$0xff]  ;;  %s27322_s17 = sld [smem:[#allocation56_spill]] }
 0x640   :  { %v5742_v14 = vmul.f32 %v24784_v5, %v5679_v1  ;;  %19167 = vmatprep.mubr.msk.f32.mxu0 %vm5783_vm1, %v5756_v30 }
 0x641   :  { %v5759_v13 = vadd.f32 %v5743_v10, %v24747_v44  ;;  %19168 = vmatmul.mubr.msk.f32.gmra.mrb[84].mxu0 %vm5783_vm1, %v5757_v54 }
 0x642   :  { %v5758_v16 = vadd.f32 %v5742_v14, %v24751_v11  ;;  %v19135_v17 = vpop.f32.mrb[232].mxu1 }
 0x643   :  { %v5745_v41 = vmul.f32 %v19135_v17, %v24784_v5  ;;  %v5689_v12 = vpop.f32.mrb[233].mxu1 }
 0x644   :  { %v5744_v55 = vmul.f32 %v24784_v5, %v5689_v12  ;;  %19170 = vmatprep.mubr.msk.f32.mxu0 %vm5783_vm1, %v5758_v16 }
 0x645   :  { %v5761_v40 = vadd.f32 %v5745_v41, %v24757_v8  ;;  %19171 = vmatmul.mubr.msk.f32.gmra.mrb[86].mxu0 %vm5783_vm1, %v5759_v13 }
 0x646   :  { %v5760_v9 = vadd.f32 %v5744_v55, %v24761_v33  ;;  %v19138_v23 = vpop.f32.mrb[234].mxu1 }
 0x647   :  { %v5747_v44 = vmul.f32 %v19138_v23, %v24784_v5  ;;  %v5699_v4 = vpop.f32.mrb[235].mxu1 }
 0x648   :  { %v5746_v11 = vmul.f32 %v24784_v5, %v5699_v4  ;;  %19173 = vmatprep.mubr.msk.f32.mxu0 %vm5783_vm1, %v5760_v9 }
 0x649   :  { %v5763_v27 = vadd.f32 %v5747_v44, %v24767_v34  ;;  %19174 = vmatmul.mubr.msk.f32.gmra.mrb[88].mxu0 %vm5783_vm1, %v5761_v40 }
 0x64a   :  { %v5762_v61 = vadd.f32 %v5746_v11, %v24771_v62  ;;  %v19141_v58 = vpop.f32.mrb[236].mxu1 }
 0x64b   :  { %v5749_v8 = vmul.f32 %v19141_v58, %v24784_v5  ;;  %v5709_v22 = vpop.f32.mrb[237].mxu1 }
 0x64c   :  { %v5748_v33 = vmul.f32 %v24784_v5, %v5709_v22  ;;  %19176 = vmatprep.mubr.msk.f32.mxu0 %vm5783_vm1, %v5762_v61 }
 0x64d   :  { %v5765_v51 = vadd.f32 %v5749_v8, %v24777_v43  ;;  %19177 = vmatmul.mubr.msk.f32.gmra.mrb[90].mxu0 %vm5783_vm1, %v5763_v27  ;;  %v27143_v43 = vld [vmem:[#allocation58_spill] sm:$0xff] }
 0x64e   :  { %v5764_v48 = vadd.f32 %v5748_v33, %v5579_v15  ;;  %v19144_v6 = vpop.f32.mrb[238].mxu1 }
 0x64f   :  { %v5751_v34 = vmul.f32 %v19144_v6, %v24784_v5  ;;  %v5719_v7 = vpop.f32.mrb[239].mxu1 }
 0x650   :  { %v5750_v62 = vmul.f32 %v24784_v5, %v5719_v7  ;;  %19179 = vmatprep.mubr.msk.f32.mxu0 %vm5783_vm1, %v5764_v48 }
 0x651   :  { %v5767_v54 = vadd.f32 %v5751_v34, %v5582_v47  ;;  %19180 = vmatmul.mubr.msk.f32.gmra.mrb[92].mxu0 %vm5783_vm1, %v5765_v51 }
 0x652   :  { %v5766_v30 = vadd.f32 %v5750_v62, %v5581_v37 }
 0x654   :  { %19182 = vmatprep.mubr.msk.f32.mxu0 %vm5783_vm1, %v5766_v30 }
 0x655   :  { %19183 = vmatmul.mubr.msk.f32.gmra.mrb[94].mxu0 %vm5783_vm1, %v5767_v54 }
 0x656   :  { %19273 = vmatprep.mubr.f32.mxu0 %v27143_v43 }
 0x70c   :  { %v19163_v15 = vpop.f32.mrb[80].mxu0 }
 0x70d   :  { %v5904_v10 = vadd.f32 %v19163_v15, %v24835_v20  ;;  %v5898_v1 = vpop.f32.mrb[81].mxu0 }
 0x70e   :  { %v5899_v5 = vadd.f32 %v24835_v20, %v5898_v1 }
 0x70f   :  { %v5978_v14 = vmax.f32 %v5904_v10, 0.0 }
 0x710   :  { %v5977_v13 = vmax.f32 %v5899_v5, 0.0  ;;  %v19166_v47 = vpop.f32.mrb[82].mxu0 }
 0x711   :  { %v5914_v16 = vadd.f32 %v19166_v47, %v24835_v20  ;;  %v5908_v37 = vpop.f32.mrb[83].mxu0 }
 0x712   :  { %v24840_v17 = vpack.c.bf16 %v5978_v14, %v5977_v13  ;;  %v5909_v41 = vadd.f32 %v24835_v20, %v5908_v37 }
 0x713   :  { %v5980_v12 = vmax.f32 %v5914_v16, 0.0 }
 0x714   :  { %v5979_v55 = vmax.f32 %v5909_v41, 0.0  ;;  %v19169_v40 = vpop.f32.mrb[84].mxu0  ;;  %21418 = vmatprep.subr.bf16.mxu1 %v24840_v17  ;;  %21450 = vmatprep.subr.bf16.mxu0 %v24840_v17 }
 0x715   :  { %v5924_v9 = vadd.f32 %v19169_v40, %v24835_v20  ;;  %v5918_v23 = vpop.f32.mrb[85].mxu0  ;;  %21420 = vmatpush3.bf16.msra.mxu1 %v24840_v17  ;;  %21452 = vmatpush3.bf16.msra.mxu0 %v24840_v17 }
 0x716   :  { %v24848_v44 = vpack.c.bf16 %v5980_v12, %v5979_v55  ;;  %v5919_v4 = vadd.f32 %v24835_v20, %v5918_v23 }
 0x717   :  { %v5982_v11 = vmax.f32 %v5924_v9, 0.0 }
 0x718   :  { %v5981_v27 = vmax.f32 %v5919_v4, 0.0  ;;  %v19172_v61 = vpop.f32.mrb[86].mxu0  ;;  %21422 = vmatprep.subr.bf16.mxu1 %v24848_v44  ;;  %21454 = vmatprep.subr.bf16.mxu0 %v24848_v44 }
 0x719   :  { %v5934_v58 = vadd.f32 %v19172_v61, %v24835_v20  ;;  %v5928_v8 = vpop.f32.mrb[87].mxu0  ;;  %21424 = vmatpush3.bf16.msra.mxu1 %v24848_v44  ;;  %21456 = vmatpush3.bf16.msra.mxu0 %v24848_v44 }
 0x71a   :  { %v24856_v22 = vpack.c.bf16 %v5982_v11, %v5981_v27  ;;  %v5929_v33 = vadd.f32 %v24835_v20, %v5928_v8 }
 0x71b   :  { %v5984_v51 = vmax.f32 %v5934_v58, 0.0 }
 0x71c   :  { %v5983_v48 = vmax.f32 %v5929_v33, 0.0  ;;  %v19175_v6 = vpop.f32.mrb[88].mxu0  ;;  %21426 = vmatprep.subr.bf16.mxu1 %v24856_v22  ;;  %21458 = vmatprep.subr.bf16.mxu0 %v24856_v22 }
 0x71d   :  { %v5944_v34 = vadd.f32 %v19175_v6, %v24835_v20  ;;  %v5938_v7 = vpop.f32.mrb[89].mxu0  ;;  %21428 = vmatpush3.bf16.msra.mxu1 %v24856_v22  ;;  %21460 = vmatpush3.bf16.msra.mxu0 %v24856_v22  ;;  %v27176_v6 = vld [vmem:[#allocation91_spill] sm:$0xff] }
 0x71e   :  { %v24864_v62 = vpack.c.bf16 %v5984_v51, %v5983_v48  ;;  %v5939_v54 = vadd.f32 %v24835_v20, %v5938_v7  ;;  %v27174_v51 = vld [vmem:[#allocation90_spill] sm:$0xff]  ;;  %v27175_v48 = vld [vmem:[#allocation75_spill] sm:$0xff]  ;;  %v27178_v7 = vld [vmem:[#allocation108_spill] sm:$0xff] }
 0x71f   :  { %v5986_v30 = vmax.f32 %v5944_v34, 0.0  ;;  %v27177_v34 = vld [vmem:[#allocation92_spill] sm:$0xff] }
 0x720   :  { %v5985_v43 = vmax.f32 %v5939_v54, 0.0  ;;  %v19178_v15 = vpop.f32.mrb[90].mxu0  ;;  %21430 = vmatprep.subr.bf16.mxu1 %v24864_v62  ;;  %21462 = vmatprep.subr.bf16.mxu0 %v24864_v62  ;;  %v27179_v54 = vld [vmem:[#allocation93_spill] sm:$0xff] }
 0x721   :  { %v5954_v10 = vadd.f32 %v19178_v15, %v24835_v20  ;;  %v5948_v1 = vpop.f32.mrb[91].mxu0  ;;  %21432 = vmatpush3.bf16.msra.mxu1 %v24864_v62  ;;  %21464 = vmatpush3.bf16.msra.mxu0 %v24864_v62  ;;  %v27182_v15 = vld [vmem:[#allocation110_spill] sm:$0xff] }
 0x722   :  { %v24872_v5 = vpack.c.bf16 %v5986_v30, %v5985_v43  ;;  %v5949_v14 = vadd.f32 %v24835_v20, %v5948_v1  ;;  %v27180_v30 = vld [vmem:[#allocation109_spill] sm:$0xff]  ;;  %v27181_v43 = vld [vmem:[#allocation94_spill] sm:$0xff]  ;;  %v27184_v1 = vld [vmem:[#allocation111_spill] sm:$0xff] }
 0x723   :  { %v5988_v13 = vmax.f32 %v5954_v10, 0.0  ;;  %v27183_v10 = vld [vmem:[#allocation95_spill] sm:$0xff] }
 0x724   :  { %v5987_v47 = vmax.f32 %v5949_v14, 0.0  ;;  %v19181_v16 = vpop.f32.mrb[92].mxu0  ;;  %21434 = vmatprep.subr.bf16.mxu1 %v24872_v5  ;;  %21466 = vmatprep.subr.bf16.mxu0 %v24872_v5  ;;  %v27185_v14 = vld [vmem:[#allocation96_spill] sm:$0xff] }
 0x725   :  { %v5964_v37 = vadd.f32 %v19181_v16, %v24835_v20  ;;  %v5958_v41 = vpop.f32.mrb[93].mxu0  ;;  %21436 = vmatpush3.bf16.msra.mxu1 %v24872_v5  ;;  %21468 = vmatpush3.bf16.msra.mxu0 %v24872_v5  ;;  %v27188_v16 = vld [vmem:[#allocation113_spill] sm:$0xff] }
 0x726   :  { %v24880_v12 = vpack.c.bf16 %v5988_v13, %v5987_v47  ;;  %v5959_v55 = vadd.f32 %v24835_v20, %v5958_v41  ;;  %v27186_v13 = vld [vmem:[#allocation112_spill] sm:$0xff]  ;;  %v27187_v47 = vld [vmem:[#allocation97_spill] sm:$0xff]  ;;  %v27190_v41 = vld [vmem:[#allocation114_spill] sm:$0xff] }
 0x727   :  { %v5990_v40 = vmax.f32 %v5964_v37, 0.0  ;;  %v27189_v37 = vld [vmem:[#allocation98_spill] sm:$0xff] }
 0x728   :  { %v5989_v9 = vmax.f32 %v5959_v55, 0.0  ;;  %v19184_v23 = vpop.f32.mrb[94].mxu0  ;;  %21438 = vmatprep.subr.bf16.mxu1 %v24880_v12  ;;  %21470 = vmatprep.subr.bf16.mxu0 %v24880_v12  ;;  %v27191_v55 = vld [vmem:[#allocation99_spill] sm:$0xff] }
 0x729   :  { %v5974_v4 = vadd.f32 %v19184_v23, %v24835_v20  ;;  %v5968_v11 = vpop.f32.mrb[95].mxu0  ;;  %21440 = vmatpush3.bf16.msra.mxu1 %v24880_v12  ;;  %21472 = vmatpush3.bf16.msra.mxu0 %v24880_v12  ;;  %v27194_v23 = vld [vmem:[#allocation116_spill] sm:$0xff] }
 0x72a   :  { %v24888_v27 = vpack.c.bf16 %v5990_v40, %v5989_v9  ;;  %v5969_v61 = vadd.f32 %v24835_v20, %v5968_v11  ;;  %v27173_v20 = vld [vmem:[#allocation74_spill] sm:$0xff]  ;;  %v27192_v40 = vld [vmem:[#allocation115_spill] sm:$0xff]  ;;  %v27193_v9 = vld [vmem:[#allocation100_spill] sm:$0xff] }
 0x72b   :  { %v5992_v58 = vmax.f32 %v5974_v4, 0.0  ;;  %v27195_v4 = vld [vmem:[#allocation101_spill] sm:$0xff] }
 0x72c   :  { %v5991_v8 = vmax.f32 %v5969_v61, 0.0  ;;  %21442 = vmatprep.subr.bf16.mxu1 %v24888_v27  ;;  %21474 = vmatprep.subr.bf16.mxu0 %v24888_v27  ;;  %v27196_v11 = vld [vmem:[#allocation117_spill] sm:$0xff]  ;;  %v27197_v61 = vld [vmem:[#allocation102_spill] sm:$0xff] }
 0x72d   :  { %21444 = vmatpush3.bf16.msra.mxu1 %v24888_v27  ;;  %21476 = vmatpush3.bf16.msra.mxu0 %v24888_v27 }
 0x72e   :  { %v24895_v33 = vpack.c.bf16 %v5992_v58, %v5991_v8  ;;  %v27198_v58 = vld [vmem:[#allocation118_spill] sm:$0xff]  ;;  %v27199_v8 = vld [vmem:[#allocation103_spill] sm:$0xff] }
 0x730   :  { %21446 = vmatprep.subr.bf16.mxu1 %v24895_v33  ;;  %21478 = vmatprep.subr.bf16.mxu0 %v24895_v33 }
 0x731   :  { %21448 = vmatpush3.bf16.msra.mxu1 %v24895_v33  ;;  %21480 = vmatpush3.bf16.msra.mxu0 %v24895_v33 }
 0x732   :  { %21482 = vmatprep.subr.bf16.mxu1 %v24840_v17  ;;  %21514 = vmatprep.subr.bf16.mxu0 %v24840_v17 }
 0x734   :  { %19218 = vmatmul.mubr.f32.vlgmr.msra.gmra.mrb[240].mxu1 %v23292_v18  ;;  %19274 = vmatmul.mubr.f32.vlgmr.msra.gmra.mrb[96].mxu0 %v23363_v45  ;;  %v27144_v18 = vld [vmem:[#allocation59_spill] sm:$0xff] }
 0x735   :  { %21484 = vmatpush3.bf16.msra.mxu1 %v24840_v17  ;;  %21516 = vmatpush3.bf16.msra.mxu0 %v24840_v17  ;;  %v27159_v45 = vld [vmem:[#allocation67_spill] sm:$0xff] }
 0x736   :  { %21486 = vmatprep.subr.bf16.mxu1 %v24848_v44  ;;  %21518 = vmatprep.subr.bf16.mxu0 %v24848_v44 }
 0x737   :  { %19220 = vmatprep.mubr.f32.mxu1 %v23295_v19  ;;  %19276 = vmatprep.mubr.f32.mxu0 %v23367_v46  ;;  %v27145_v19 = vld [vmem:[#allocation60_spill] sm:$0xff]  ;;  %v27160_v46 = vld [vmem:[#allocation83_spill] sm:$0xff] }
 0x738   :  { %19221 = vmatmul.mubr.f32.gmra.mrb[242].mxu1 %v23300_v21  ;;  %19277 = vmatmul.mubr.f32.gmra.mrb[98].mxu0 %v23372_v49  ;;  %v27146_v21 = vld [vmem:[#allocation76_spill] sm:$0xff] }
 0x739   :  { %21488 = vmatpush3.bf16.msra.mxu1 %v24848_v44  ;;  %21520 = vmatpush3.bf16.msra.mxu0 %v24848_v44  ;;  %v27161_v49 = vld [vmem:[#allocation68_spill] sm:$0xff] }
 0x73a   :  { %21490 = vmatprep.subr.bf16.mxu1 %v24856_v22  ;;  %21522 = vmatprep.subr.bf16.mxu0 %v24856_v22 }
 0x73b   :  { %19223 = vmatprep.mubr.f32.mxu1 %v23304_v24  ;;  %19279 = vmatprep.mubr.f32.mxu0 %v23376_v50  ;;  %v27147_v24 = vld [vmem:[#allocation61_spill] sm:$0xff]  ;;  %v27162_v50 = vld [vmem:[#allocation84_spill] sm:$0xff] }
 0x73c   :  { %19224 = vmatmul.mubr.f32.gmra.mrb[244].mxu1 %v23309_v25  ;;  %19280 = vmatmul.mubr.f32.gmra.mrb[100].mxu0 %v23381_v52  ;;  %v27148_v25 = vld [vmem:[#allocation77_spill] sm:$0xff] }
 0x73d   :  { %21492 = vmatpush3.bf16.msra.mxu1 %v24856_v22  ;;  %21524 = vmatpush3.bf16.msra.mxu0 %v24856_v22  ;;  %v27163_v52 = vld [vmem:[#allocation69_spill] sm:$0xff] }
 0x73e   :  { %21494 = vmatprep.subr.bf16.mxu1 %v24864_v62  ;;  %21526 = vmatprep.subr.bf16.mxu0 %v24864_v62 }
 0x73f   :  { %19226 = vmatprep.mubr.f32.mxu1 %v23313_v26  ;;  %19282 = vmatprep.mubr.f32.mxu0 %v23385_v53  ;;  %v27149_v26 = vld [vmem:[#allocation62_spill] sm:$0xff]  ;;  %v27164_v53 = vld [vmem:[#allocation85_spill] sm:$0xff] }
 0x740   :  { %19227 = vmatmul.mubr.f32.gmra.mrb[246].mxu1 %v23318_v28  ;;  %19283 = vmatmul.mubr.f32.gmra.mrb[102].mxu0 %v23390_v56  ;;  %v27150_v28 = vld [vmem:[#allocation78_spill] sm:$0xff] }
 0x741   :  { %21496 = vmatpush3.bf16.msra.mxu1 %v24864_v62  ;;  %21528 = vmatpush3.bf16.msra.mxu0 %v24864_v62  ;;  %v27165_v56 = vld [vmem:[#allocation70_spill] sm:$0xff] }
 0x742   :  { %21498 = vmatprep.subr.bf16.mxu1 %v24872_v5  ;;  %21530 = vmatprep.subr.bf16.mxu0 %v24872_v5 }
 0x743   :  { %19229 = vmatprep.mubr.f32.mxu1 %v23322_v29  ;;  %19285 = vmatprep.mubr.f32.mxu0 %v23394_v57  ;;  %v27151_v29 = vld [vmem:[#allocation63_spill] sm:$0xff]  ;;  %v27166_v57 = vld [vmem:[#allocation86_spill] sm:$0xff] }
 0x744   :  { %19230 = vmatmul.mubr.f32.gmra.mrb[248].mxu1 %v23327_v31  ;;  %19286 = vmatmul.mubr.f32.gmra.mrb[104].mxu0 %v23399_v59  ;;  %v27152_v31 = vld [vmem:[#allocation79_spill] sm:$0xff] }
 0x745   :  { %21500 = vmatpush3.bf16.msra.mxu1 %v24872_v5  ;;  %21532 = vmatpush3.bf16.msra.mxu0 %v24872_v5  ;;  %v27167_v59 = vld [vmem:[#allocation71_spill] sm:$0xff] }
 0x746   :  { %21502 = vmatprep.subr.bf16.mxu1 %v24880_v12  ;;  %21534 = vmatprep.subr.bf16.mxu0 %v24880_v12 }
 0x747   :  { %19232 = vmatprep.mubr.f32.mxu1 %v23331_v32  ;;  %19288 = vmatprep.mubr.f32.mxu0 %v23403_v60  ;;  %v27153_v32 = vld [vmem:[#allocation64_spill] sm:$0xff]  ;;  %v27168_v60 = vld [vmem:[#allocation87_spill] sm:$0xff] }
 0x748   :  { %19233 = vmatmul.mubr.f32.gmra.mrb[250].mxu1 %v23336_v35  ;;  %19289 = vmatmul.mubr.f32.gmra.mrb[106].mxu0 %v23408_v63  ;;  %v27154_v35 = vld [vmem:[#allocation80_spill] sm:$0xff] }
 0x749   :  { %21504 = vmatpush3.bf16.msra.mxu1 %v24880_v12  ;;  %21536 = vmatpush3.bf16.msra.mxu0 %v24880_v12  ;;  %v27169_v63 = vld [vmem:[#allocation72_spill] sm:$0xff] }
 0x74a   :  { %21506 = vmatprep.subr.bf16.mxu1 %v24888_v27  ;;  %21538 = vmatprep.subr.bf16.mxu0 %v24888_v27 }
 0x74b   :  { %19235 = vmatprep.mubr.f32.mxu1 %v23340_v36  ;;  %19291 = vmatprep.mubr.f32.mxu0 %v23412_v0  ;;  %v27155_v36 = vld [vmem:[#allocation65_spill] sm:$0xff]  ;;  %v27170_v0 = vld [vmem:[#allocation88_spill] sm:$0xff] }
 0x74c   :  { %19236 = vmatmul.mubr.f32.gmra.mrb[252].mxu1 %v23345_v38  ;;  %19292 = vmatmul.mubr.f32.gmra.mrb[108].mxu0 %v23417_v2  ;;  %v27156_v38 = vld [vmem:[#allocation81_spill] sm:$0xff] }
 0x74d   :  { %21508 = vmatpush3.bf16.msra.mxu1 %v24888_v27  ;;  %21540 = vmatpush3.bf16.msra.mxu0 %v24888_v27  ;;  %v27171_v2 = vld [vmem:[#allocation73_spill] sm:$0xff] }
 0x74e   :  { %21510 = vmatprep.subr.bf16.mxu1 %v24895_v33  ;;  %21542 = vmatprep.subr.bf16.mxu0 %v24895_v33 }
 0x74f   :  { %19238 = vmatprep.mubr.f32.mxu1 %v23349_v39  ;;  %19294 = vmatprep.mubr.f32.mxu0 %v23421_v3  ;;  %v27157_v39 = vld [vmem:[#allocation66_spill] sm:$0xff]  ;;  %v27172_v3 = vld [vmem:[#allocation89_spill] sm:$0xff] }
 0x750   :  { %19239 = vmatmul.mubr.f32.gmra.mrb[254].mxu1 %v23354_v42  ;;  %19295 = vmatmul.mubr.f32.gmra.mrb[110].mxu0 %v27144_v18  ;;  %v27158_v42 = vld [vmem:[#allocation82_spill] sm:$0xff]  ;;  %v27200_v18 = vld [vmem:[#allocation119_spill] sm:$0xff] }
 0x751   :  { %21512 = vmatpush3.bf16.msra.mxu1 %v24895_v33  ;;  %21544 = vmatpush3.bf16.msra.mxu0 %v24895_v33 }
 0x752   :  { %21546 = vmatprep.subr.bf16.mxu1 %v24840_v17  ;;  %21578 = vmatprep.subr.bf16.mxu0 %v24840_v17 }
 0x753   :  { %19329 = vmatprep.mubr.f32.mxu1 %v27145_v19  ;;  %19385 = vmatprep.mubr.f32.mxu0 %v27146_v21  ;;  %v27201_v19 = vld [vmem:[#allocation104_spill] sm:$0xff] }
 0x754   :  { %19330 = vmatmul.mubr.f32.vlgmr.msra.gmra.mrb[0].mxu1 %v27147_v24  ;;  %19386 = vmatmul.mubr.f32.vlgmr.msra.gmra.mrb[112].mxu0 %v27148_v25  ;;  %v27202_v21 = vld [vmem:[#allocation120_spill] sm:$0xff]  ;;  %v27203_v24 = vld [vmem:[#allocation105_spill] sm:$0xff] }
 0x755   :  { %21548 = vmatpush3.bf16.msra.mxu1 %v24840_v17  ;;  %21580 = vmatpush3.bf16.msra.mxu0 %v24840_v17  ;;  %v27204_v25 = vld [vmem:[#allocation121_spill] sm:$0xff] }
 0x756   :  { %21550 = vmatprep.subr.bf16.mxu1 %v24848_v44  ;;  %21582 = vmatprep.subr.bf16.mxu0 %v24848_v44 }
 0x757   :  { %19332 = vmatprep.mubr.f32.mxu1 %v27149_v26  ;;  %19388 = vmatprep.mubr.f32.mxu0 %v27150_v28  ;;  %v27205_v26 = vld [vmem:[#allocation106_spill] sm:$0xff] }
 0x758   :  { %19333 = vmatmul.mubr.f32.gmra.mrb[2].mxu1 %v27151_v29  ;;  %19389 = vmatmul.mubr.f32.gmra.mrb[114].mxu0 %v27152_v31  ;;  %v27206_v28 = vld [vmem:[#allocation122_spill] sm:$0xff]  ;;  %v27207_v29 = vld [vmem:[#allocation107_spill] sm:$0xff] }
 0x759   :  { %21552 = vmatpush3.bf16.msra.mxu1 %v24848_v44  ;;  %21584 = vmatpush3.bf16.msra.mxu0 %v24848_v44  ;;  %v27208_v31 = vld [vmem:[#allocation123_spill] sm:$0xff] }
 0x75a   :  { %21554 = vmatprep.subr.bf16.mxu1 %v24856_v22  ;;  %21586 = vmatprep.subr.bf16.mxu0 %v24856_v22 }
 0x75b   :  { %19335 = vmatprep.mubr.f32.mxu1 %v27153_v32  ;;  %19391 = vmatprep.mubr.f32.mxu0 %v27154_v35  ;;  %v27209_v32 = vld [vmem:[#allocation124_spill] sm:$0xff] }
 0x75c   :  { %19336 = vmatmul.mubr.f32.gmra.mrb[4].mxu1 %v27155_v36  ;;  %19392 = vmatmul.mubr.f32.gmra.mrb[116].mxu0 %v27156_v38  ;;  %v27210_v35 = vld [vmem:[#allocation140_spill] sm:$0xff]  ;;  %v27211_v36 = vld [vmem:[#allocation125_spill] sm:$0xff] }
 0x75d   :  { %21556 = vmatpush3.bf16.msra.mxu1 %v24856_v22  ;;  %21588 = vmatpush3.bf16.msra.mxu0 %v24856_v22  ;;  %v27212_v38 = vld [vmem:[#allocation141_spill] sm:$0xff] }
 0x75e   :  { %21558 = vmatprep.subr.bf16.mxu1 %v24864_v62  ;;  %21590 = vmatprep.subr.bf16.mxu0 %v24864_v62 }
 0x75f   :  { %19338 = vmatprep.mubr.f32.mxu1 %v27157_v39  ;;  %19394 = vmatprep.mubr.f32.mxu0 %v27158_v42  ;;  %v27213_v39 = vld [vmem:[#allocation126_spill] sm:$0xff] }
 0x760   :  { %19339 = vmatmul.mubr.f32.gmra.mrb[6].mxu1 %v27159_v45  ;;  %19395 = vmatmul.mubr.f32.gmra.mrb[118].mxu0 %v27160_v46  ;;  %v27214_v42 = vld [vmem:[#allocation142_spill] sm:$0xff]  ;;  %v27215_v45 = vld [vmem:[#allocation127_spill] sm:$0xff] }
 0x761   :  { %21560 = vmatpush3.bf16.msra.mxu1 %v24864_v62  ;;  %21592 = vmatpush3.bf16.msra.mxu0 %v24864_v62  ;;  %v27216_v46 = vld [vmem:[#allocation143_spill] sm:$0xff] }
 0x762   :  { %21562 = vmatprep.subr.bf16.mxu1 %v24872_v5  ;;  %21594 = vmatprep.subr.bf16.mxu0 %v24872_v5 }
 0x763   :  { %19341 = vmatprep.mubr.f32.mxu1 %v27161_v49  ;;  %19397 = vmatprep.mubr.f32.mxu0 %v27162_v50  ;;  %v27217_v49 = vld [vmem:[#allocation128_spill] sm:$0xff] }
 0x764   :  { %19342 = vmatmul.mubr.f32.gmra.mrb[8].mxu1 %v27163_v52  ;;  %19398 = vmatmul.mubr.f32.gmra.mrb[120].mxu0 %v27164_v53  ;;  %v27218_v50 = vld [vmem:[#allocation144_spill] sm:$0xff]  ;;  %v27219_v52 = vld [vmem:[#allocation129_spill] sm:$0xff]  ;;  %v27221_v53 = vld [vmem:[#allocation130_spill] sm:$0xff] }
 0x765   :  { %21564 = vmatpush3.bf16.msra.mxu1 %v24872_v5  ;;  %21596 = vmatpush3.bf16.msra.mxu0 %v24872_v5 }
 0x766   :  { %21566 = vmatprep.subr.bf16.mxu1 %v24880_v12  ;;  %21598 = vmatprep.subr.bf16.mxu0 %v24880_v12 }
 0x767   :  { %19344 = vmatprep.mubr.f32.mxu1 %v27165_v56  ;;  %19400 = vmatprep.mubr.f32.mxu0 %v27166_v57  ;;  %v27222_v56 = vld [vmem:[#allocation146_spill] sm:$0xff]  ;;  %v27223_v57 = vld [vmem:[#allocation131_spill] sm:$0xff] }
 0x768   :  { %19345 = vmatmul.mubr.f32.gmra.mrb[10].mxu1 %v27167_v59  ;;  %19401 = vmatmul.mubr.f32.gmra.mrb[122].mxu0 %v27168_v60  ;;  %v27225_v59 = vld [vmem:[#allocation132_spill] sm:$0xff] }
 0x769   :  { %21568 = vmatpush3.bf16.msra.mxu1 %v24880_v12  ;;  %21600 = vmatpush3.bf16.msra.mxu0 %v24880_v12  ;;  %v27226_v60 = vld [vmem:[#allocation148_spill] sm:$0xff] }
 0x76a   :  { %21570 = vmatprep.subr.bf16.mxu1 %v24888_v27  ;;  %21602 = vmatprep.subr.bf16.mxu0 %v24888_v27 }
 0x76b   :  { %19347 = vmatprep.mubr.f32.mxu1 %v27169_v63  ;;  %19403 = vmatprep.mubr.f32.mxu0 %v27170_v0  ;;  %v27227_v63 = vld [vmem:[#allocation133_spill] sm:$0xff]  ;;  %v27229_v0 = vld [vmem:[#allocation134_spill] sm:$0xff] }
 0x76c   :  { %19348 = vmatmul.mubr.f32.gmra.mrb[12].mxu1 %v27171_v2  ;;  %19404 = vmatmul.mubr.f32.gmra.mrb[124].mxu0 %v27172_v3  ;;  %v27230_v2 = vld [vmem:[#allocation150_spill] sm:$0xff]  ;;  %v27231_v3 = vld [vmem:[#allocation135_spill] sm:$0xff] }
 0x76d   :  { %21572 = vmatpush3.bf16.msra.mxu1 %v24888_v27  ;;  %21604 = vmatpush3.bf16.msra.mxu0 %v24888_v27 }
 0x76e   :  { %21574 = vmatprep.subr.bf16.mxu1 %v24895_v33  ;;  %21606 = vmatprep.subr.bf16.mxu0 %v24895_v33 }
 0x76f   :  { %19350 = vmatprep.mubr.f32.mxu1 %v27173_v20  ;;  %19406 = vmatprep.mubr.f32.mxu0 %v27174_v51  ;;  %v27233_v20 = vld [vmem:[#allocation136_spill] sm:$0xff] }
 0x770   :  { %19351 = vmatmul.mubr.f32.gmra.mrb[14].mxu1 %v27175_v48  ;;  %19407 = vmatmul.mubr.f32.gmra.mrb[126].mxu0 %v27176_v6  ;;  %v27234_v51 = vld [vmem:[#allocation152_spill] sm:$0xff]  ;;  %v27235_v48 = vld [vmem:[#allocation137_spill] sm:$0xff]  ;;  %v27237_v6 = vld [vmem:[#allocation138_spill] sm:$0xff] }
 0x771   :  { %21576 = vmatpush3.bf16.msra.mxu1 %v24895_v33  ;;  %21608 = vmatpush3.bf16.msra.mxu0 %v24895_v33 }
 0x772   :  { %21610 = vmatprep.subr.bf16.mxu1 %v24840_v17  ;;  %21642 = vmatprep.subr.bf16.mxu0 %v24840_v17 }
 0x773   :  { %19441 = vmatprep.mubr.f32.mxu1 %v27177_v34  ;;  %19497 = vmatprep.mubr.f32.mxu0 %v27178_v7  ;;  %v27238_v34 = vld [vmem:[#allocation154_spill] sm:$0xff]  ;;  %v27239_v7 = vld [vmem:[#allocation139_spill] sm:$0xff] }
 0x774   :  { %19442 = vmatmul.mubr.f32.vlgmr.msra.gmra.mrb[16].mxu1 %v27179_v54  ;;  %19498 = vmatmul.mubr.f32.vlgmr.msra.gmra.mrb[128].mxu0 %v27180_v30  ;;  %v27241_v54 = vld [vmem:[#allocation156_spill] sm:$0xff]  ;;  %v27242_v30 = vld [vmem:[#allocation157_spill] sm:$0xff] }
 0x775   :  { %21612 = vmatpush3.bf16.msra.mxu1 %v24840_v17  ;;  %21644 = vmatpush3.bf16.msra.mxu0 %v24840_v17 }
 0x776   :  { %21614 = vmatprep.subr.bf16.mxu1 %v24848_v44  ;;  %21646 = vmatprep.subr.bf16.mxu0 %v24848_v44 }
 0x777   :  { %19444 = vmatprep.mubr.f32.mxu1 %v27181_v43  ;;  %19500 = vmatprep.mubr.f32.mxu0 %v27182_v15  ;;  %v27244_v43 = vld [vmem:[#allocation158_spill] sm:$0xff]  ;;  %v27246_v15 = vld [vmem:[#allocation160_spill] sm:$0xff] }
 0x778   :  { %19445 = vmatmul.mubr.f32.gmra.mrb[18].mxu1 %v27183_v10  ;;  %19501 = vmatmul.mubr.f32.gmra.mrb[130].mxu0 %v27184_v1  ;;  %v27247_v10 = vld [vmem:[#allocation161_spill] sm:$0xff]  ;;  %v27248_v1 = vld [vmem:[#allocation162_spill] sm:$0xff] }
 0x779   :  { %21616 = vmatpush3.bf16.msra.mxu1 %v24848_v44  ;;  %21648 = vmatpush3.bf16.msra.mxu0 %v24848_v44 }
 0x77a   :  { %21618 = vmatprep.subr.bf16.mxu1 %v24856_v22  ;;  %21650 = vmatprep.subr.bf16.mxu0 %v24856_v22 }
 0x77b   :  { %19447 = vmatprep.mubr.f32.mxu1 %v27185_v14  ;;  %19503 = vmatprep.mubr.f32.mxu0 %v27186_v13  ;;  %v27249_v14 = vld [vmem:[#allocation163_spill] sm:$0xff]  ;;  %v27251_v13 = vld [vmem:[#allocation165_spill] sm:$0xff] }
 0x77c   :  { %19448 = vmatmul.mubr.f32.gmra.mrb[20].mxu1 %v27187_v47  ;;  %19504 = vmatmul.mubr.f32.gmra.mrb[132].mxu0 %v27188_v16  ;;  %v27253_v47 = vld [vmem:[#allocation166_spill] sm:$0xff]  ;;  %v27254_v16 = vld [vmem:[#allocation167_spill] sm:$0xff] }
 0x77d   :  { %21620 = vmatpush3.bf16.msra.mxu1 %v24856_v22  ;;  %21652 = vmatpush3.bf16.msra.mxu0 %v24856_v22 }
 0x77e   :  { %21622 = vmatprep.subr.bf16.mxu1 %v24864_v62  ;;  %21654 = vmatprep.subr.bf16.mxu0 %v24864_v62 }
 0x77f   :  { %19450 = vmatprep.mubr.f32.mxu1 %v27189_v37  ;;  %19506 = vmatprep.mubr.f32.mxu0 %v27190_v41  ;;  %v27255_v37 = vld [vmem:[#allocation168_spill] sm:$0xff]  ;;  %v27257_v41 = vld [vmem:[#allocation169_spill] sm:$0xff] }
 0x780   :  { %19451 = vmatmul.mubr.f32.gmra.mrb[22].mxu1 %v27191_v55  ;;  %19507 = vmatmul.mubr.f32.gmra.mrb[134].mxu0 %v27192_v40  ;;  %v27258_v55 = vld [vmem:[#allocation170_spill] sm:$0xff]  ;;  %v27259_v40 = vld [vmem:[#allocation171_spill] sm:$0xff] }
 0x781   :  { %21624 = vmatpush3.bf16.msra.mxu1 %v24864_v62  ;;  %21656 = vmatpush3.bf16.msra.mxu0 %v24864_v62 }
 0x782   :  { %21626 = vmatprep.subr.bf16.mxu1 %v24872_v5  ;;  %21658 = vmatprep.subr.bf16.mxu0 %v24872_v5 }
 0x783   :  { %19453 = vmatprep.mubr.f32.mxu1 %v27193_v9  ;;  %19509 = vmatprep.mubr.f32.mxu0 %v27194_v23  ;;  %v7664_v9 = vld [vmem:[%s27243_s21] sm:$0xff]  ;;  %v7665_v23 = vld [vmem:[%s27243_s21 + $0x8] sm:$0xff] }
 0x784   :  { %19454 = vmatmul.mubr.f32.gmra.mrb[24].mxu1 %v27195_v4  ;;  %19510 = vmatmul.mubr.f32.gmra.mrb[136].mxu0 %v27196_v11  ;;  %v21705_v4 = vpack.c.bf16 %v7665_v23, %v7664_v9  ;;  %v7666_v11 = vld [vmem:[%s27243_s21 + $0x10] sm:$0xff] }
 0x785   :  { %21628 = vmatpush3.bf16.msra.mxu1 %v24872_v5  ;;  %21660 = vmatpush3.bf16.msra.mxu0 %v24872_v5 }
 0x786   :  { %21630 = vmatprep.subr.bf16.mxu1 %v24880_v12  ;;  %21662 = vmatprep.subr.bf16.mxu0 %v24880_v12 }
 0x787   :  { %19456 = vmatprep.mubr.f32.mxu1 %v27197_v61  ;;  %19512 = vmatprep.mubr.f32.mxu0 %v27198_v58  ;;  %v7667_v61 = vld [vmem:[%s27243_s21 + $0x18] sm:$0xff]  ;;  %s27323_s21 = sld [smem:[#allocation55_spill]] }
 0x788   :  { %19457 = vmatmul.mubr.f32.gmra.mrb[26].mxu1 %v27199_v8  ;;  %19513 = vmatmul.mubr.f32.gmra.mrb[138].mxu0 %v27200_v18  ;;  %v21709_v58 = vpack.c.bf16 %v7667_v61, %v7666_v11  ;;  %v25160_v8 = vld [vmem:[%s27252_s25] ss:$0 sm:$0xff]  ;;  %v25163_v18 = vld [vmem:[%s27252_s25 + $0x1] ss:$0 sm:$0xff] }
 0x789   :  { %21632 = vmatpush3.bf16.msra.mxu1 %v24880_v12  ;;  %21664 = vmatpush3.bf16.msra.mxu0 %v24880_v12 }
 0x78a   :  { %21634 = vmatprep.subr.bf16.mxu1 %v24888_v27  ;;  %21666 = vmatprep.subr.bf16.mxu0 %v24888_v27 }
 0x78b   :  { %19459 = vmatprep.mubr.f32.mxu1 %v27201_v19  ;;  %19515 = vmatprep.mubr.f32.mxu0 %v27202_v21  ;;  %v25166_v19 = vld [vmem:[%s27256_s3] ss:$0 sm:$0xff] }
 0x78c   :  { %19460 = vmatmul.mubr.f32.gmra.mrb[28].mxu1 %v27203_v24  ;;  %19516 = vmatmul.mubr.f32.gmra.mrb[140].mxu0 %v27204_v25 }
 0x78d   :  { %21636 = vmatpush3.bf16.msra.mxu1 %v24888_v27  ;;  %21668 = vmatpush3.bf16.msra.mxu0 %v24888_v27 }
 0x78e   :  { %21638 = vmatprep.subr.bf16.mxu1 %v24895_v33  ;;  %21670 = vmatprep.subr.bf16.mxu0 %v24895_v33 }
 0x78f   :  { %19462 = vmatprep.mubr.f32.mxu1 %v27205_v26  ;;  %19518 = vmatprep.mubr.f32.mxu0 %v27206_v28 }
 0x790   :  { %19463 = vmatmul.mubr.f32.gmra.mrb[30].mxu1 %v27207_v29  ;;  %19519 = vmatmul.mubr.f32.gmra.mrb[142].mxu0 %v27208_v31 }
 0x791   :  { %21640 = vmatpush3.bf16.msra.mxu1 %v24895_v33  ;;  %21672 = vmatpush3.bf16.msra.mxu0 %v24895_v33 }
 0x792   :  { %21674 = vmatprep.subr.bf16.mxu1 %v24840_v17  ;;  %19553 = vmatprep.mubr.f32.mxu1 %v27209_v32 }
 0x793   :  { %19609 = vmatprep.mubr.f32.mxu0 %v27210_v35  ;;  %21706 = vmatprep.subr.bf16.mxu0 %v21705_v4 }
 0x794   :  { %19554 = vmatmul.mubr.f32.vlgmr.msra.gmra.mrb[32].mxu1 %v27211_v36  ;;  %19610 = vmatmul.mubr.f32.vlgmr.msra.gmra.mrb[144].mxu0 %v27212_v38 }
 0x795   :  { %21676 = vmatpush3.bf16.msra.mxu1 %v24840_v17  ;;  %19556 = vmatprep.mubr.f32.mxu1 %v27213_v39  ;;  %v27220_v17 = vld [vmem:[#allocation145_spill] sm:$0xff] }
 0x796   :  { %21678 = vmatprep.subr.bf16.mxu1 %v24848_v44  ;;  %19612 = vmatprep.mubr.f32.mxu0 %v27214_v42 }
 0x797   :  { %21708 = vmatpush3.bf16.msra.mxu0 %v21705_v4 }
 0x798   :  { %19557 = vmatmul.mubr.f32.gmra.mrb[34].mxu1 %v27215_v45  ;;  %19613 = vmatmul.mubr.f32.gmra.mrb[146].mxu0 %v27216_v46 }
 0x799   :  { %21680 = vmatpush3.bf16.msra.mxu1 %v24848_v44  ;;  %19559 = vmatprep.mubr.f32.mxu1 %v27217_v49  ;;  %v27224_v44 = vld [vmem:[#allocation147_spill] sm:$0xff] }
 0x79a   :  { %21682 = vmatprep.subr.bf16.mxu1 %v24856_v22  ;;  %19615 = vmatprep.mubr.f32.mxu0 %v27218_v50 }
 0x79b   :  { %21710 = vmatprep.subr.bf16.mxu0 %v21709_v58 }
 0x79c   :  { %19560 = vmatmul.mubr.f32.gmra.mrb[36].mxu1 %v27219_v52  ;;  %19616 = vmatmul.mubr.f32.gmra.mrb[148].mxu0 %v27220_v17 }
 0x79d   :  { %21684 = vmatpush3.bf16.msra.mxu1 %v24856_v22  ;;  %19562 = vmatprep.mubr.f32.mxu1 %v27221_v53  ;;  %v27228_v22 = vld [vmem:[#allocation149_spill] sm:$0xff] }
 0x79e   :  { %21686 = vmatprep.subr.bf16.mxu1 %v24864_v62  ;;  %19618 = vmatprep.mubr.f32.mxu0 %v27222_v56 }
 0x79f   :  { %21712 = vmatpush3.bf16.msra.mxu0 %v21709_v58 }
 0x7a0   :  { %19563 = vmatmul.mubr.f32.gmra.mrb[38].mxu1 %v27223_v57  ;;  %19619 = vmatmul.mubr.f32.gmra.mrb[150].mxu0 %v27224_v44 }
 0x7a1   :  { %21688 = vmatpush3.bf16.msra.mxu1 %v24864_v62  ;;  %19565 = vmatprep.mubr.f32.mxu1 %v27225_v59  ;;  %v27232_v62 = vld [vmem:[#allocation151_spill] sm:$0xff] }
 0x7a2   :  { %21690 = vmatprep.subr.bf16.mxu1 %v24872_v5  ;;  %19621 = vmatprep.mubr.f32.mxu0 %v27226_v60 }
 0x7a4   :  { %19566 = vmatmul.mubr.f32.gmra.mrb[40].mxu1 %v27227_v63  ;;  %19622 = vmatmul.mubr.f32.gmra.mrb[152].mxu0 %v27228_v22 }
 0x7a5   :  { %21692 = vmatpush3.bf16.msra.mxu1 %v24872_v5  ;;  %19568 = vmatprep.mubr.f32.mxu1 %v27229_v0  ;;  %v27236_v5 = vld [vmem:[#allocation153_spill] sm:$0xff] }
 0x7a6   :  { %21694 = vmatprep.subr.bf16.mxu1 %v24880_v12  ;;  %19624 = vmatprep.mubr.f32.mxu0 %v27230_v2 }
 0x7a8   :  { %19569 = vmatmul.mubr.f32.gmra.mrb[42].mxu1 %v27231_v3  ;;  %19625 = vmatmul.mubr.f32.gmra.mrb[154].mxu0 %v27232_v62 }
 0x7a9   :  { %21696 = vmatpush3.bf16.msra.mxu1 %v24880_v12  ;;  %19571 = vmatprep.mubr.f32.mxu1 %v27233_v20  ;;  %v27240_v12 = vld [vmem:[#allocation155_spill] sm:$0xff] }
 0x7aa   :  { %21698 = vmatprep.subr.bf16.mxu1 %v24888_v27  ;;  %19627 = vmatprep.mubr.f32.mxu0 %v27234_v51 }
 0x7ac   :  { %19572 = vmatmul.mubr.f32.gmra.mrb[44].mxu1 %v27235_v48  ;;  %19628 = vmatmul.mubr.f32.gmra.mrb[156].mxu0 %v27236_v5 }
 0x7ad   :  { %21700 = vmatpush3.bf16.msra.mxu1 %v24888_v27  ;;  %19574 = vmatprep.mubr.f32.mxu1 %v27237_v6  ;;  %v27245_v27 = vld [vmem:[#allocation159_spill] sm:$0xff] }
 0x7ae   :  { %21702 = vmatprep.subr.bf16.mxu1 %v24895_v33  ;;  %19630 = vmatprep.mubr.f32.mxu0 %v27238_v34 }
 0x7b0   :  { %19575 = vmatmul.mubr.f32.gmra.mrb[46].mxu1 %v27239_v7  ;;  %19631 = vmatmul.mubr.f32.gmra.mrb[158].mxu0 %v27240_v12 }
 0x7b1   :  { %21704 = vmatpush3.bf16.msra.mxu1 %v24895_v33  ;;  %19665 = vmatprep.mubr.f32.mxu1 %v27241_v54  ;;  %v27250_v33 = vld [vmem:[#allocation164_spill] sm:$0xff] }
 0x7b4   :  { %19666 = vmatmul.mubr.f32.vlgmr.msra.gmra.mrb[48].mxu1 %v27242_v30 }
 0x7b5   :  { %19668 = vmatprep.mubr.f32.mxu1 %v27244_v43 }
 0x7b8   :  { %19669 = vmatmul.mubr.f32.gmra.mrb[50].mxu1 %v27245_v27 }
 0x7b9   :  { %19671 = vmatprep.mubr.f32.mxu1 %v27246_v15 }
 0x7bc   :  { %19672 = vmatmul.mubr.f32.gmra.mrb[52].mxu1 %v27247_v10 }
 0x7bd   :  { %19674 = vmatprep.mubr.f32.mxu1 %v27248_v1 }
 0x7c0   :  { %19675 = vmatmul.mubr.f32.gmra.mrb[54].mxu1 %v27249_v14 }
 0x7c1   :  { %19677 = vmatprep.mubr.f32.mxu1 %v27250_v33 }
 0x7c4   :  { %19678 = vmatmul.mubr.f32.gmra.mrb[56].mxu1 %v27251_v13 }
 0x7c5   :  { %19680 = vmatprep.mubr.f32.mxu1 %v27253_v47 }
 0x7c8   :  { %19681 = vmatmul.mubr.f32.gmra.mrb[58].mxu1 %v27254_v16 }
 0x7c9   :  { %19683 = vmatprep.mubr.f32.mxu1 %v27255_v37 }
 0x7cc   :  { %19684 = vmatmul.mubr.f32.gmra.mrb[60].mxu1 %v27257_v41 }
 0x7cd   :  { %19686 = vmatprep.mubr.f32.mxu1 %v27258_v55 }
 0x7d0   :  { %19687 = vmatmul.mubr.f32.gmra.mrb[62].mxu1 %v27259_v40 }
 0x807   :  { %v19219_v21 = vpop.f32.mrb[240].mxu1  ;;  %v19275_v24 = vpop.f32.mrb[96].mxu0 }
 0x808   :  { %v6147_v25 = vmul.f32 %v19219_v21, %v25160_v8  ;;  %v6060_v26 = vpop.f32.mrb[241].mxu1  ;;  %v6338_v28 = vmul.f32 %v19275_v24, %v25163_v18  ;;  %v6250_v29 = vpop.f32.mrb[97].mxu0 }
 0x809   :  { %v6146_v31 = vmul.f32 %v25160_v8, %v6060_v26  ;;  %v6337_v32 = vmul.f32 %v25163_v18, %v6250_v29 }
 0x80a   :  { %v6169_v35 = vadd.f32 %v25166_v19, %v6147_v25 }
 0x80b   :  { %v6168_v36 = vadd.f32 %v25166_v19, %v6146_v31  ;;  %v19222_v38 = vpop.f32.mrb[242].mxu1  ;;  %v19278_v39 = vpop.f32.mrb[98].mxu0 }
 0x80c   :  { %v25174_v42 = vadd.f32 %v6338_v28, %v6169_v35  ;;  %v6149_v45 = vmul.f32 %v19222_v38, %v25160_v8  ;;  %v6070_v46 = vpop.f32.mrb[243].mxu1  ;;  %v6340_v49 = vmul.f32 %v19278_v39, %v25163_v18  ;;  %v6260_v50 = vpop.f32.mrb[99].mxu0 }
 0x80d   :  { %v25178_v52 = vadd.f32 %v6337_v32, %v6168_v36  ;;  %v6148_v17 = vmul.f32 %v25160_v8, %v6070_v46  ;;  %v6339_v53 = vmul.f32 %v25163_v18, %v6260_v50 }
 0x80e   :  { %v6171_v56 = vadd.f32 %v25166_v19, %v6149_v45 }
 0x80f   :  { %v6170_v57 = vadd.f32 %v25166_v19, %v6148_v17  ;;  %v19225_v44 = vpop.f32.mrb[244].mxu1  ;;  %v19281_v59 = vpop.f32.mrb[100].mxu0 }
 0x810   :  { %v25184_v60 = vadd.f32 %v6340_v49, %v6171_v56  ;;  %v6151_v63 = vmul.f32 %v19225_v44, %v25160_v8  ;;  %v6080_v22 = vpop.f32.mrb[245].mxu1  ;;  %v6342_v0 = vmul.f32 %v19281_v59, %v25163_v18  ;;  %v6270_v2 = vpop.f32.mrb[101].mxu0 }
 0x811   :  { %v25188_v3 = vadd.f32 %v6339_v53, %v6170_v57  ;;  %v6150_v62 = vmul.f32 %v25160_v8, %v6080_v22  ;;  %v6341_v20 = vmul.f32 %v25163_v18, %v6270_v2 }
 0x812   :  { %v6173_v51 = vadd.f32 %v25166_v19, %v6151_v63 }
 0x813   :  { %v6172_v48 = vadd.f32 %v25166_v19, %v6150_v62  ;;  %v19228_v5 = vpop.f32.mrb[246].mxu1  ;;  %v19284_v6 = vpop.f32.mrb[102].mxu0 }
 0x814   :  { %v25194_v34 = vadd.f32 %v6342_v0, %v6173_v51  ;;  %v6153_v7 = vmul.f32 %v19228_v5, %v25160_v8  ;;  %v6090_v12 = vpop.f32.mrb[247].mxu1  ;;  %v6344_v54 = vmul.f32 %v19284_v6, %v25163_v18  ;;  %v6280_v30 = vpop.f32.mrb[103].mxu0  ;;  %v25243_v6 = vld [vmem:[%s27252_s25 + $0x2] ss:$0 sm:$0xff] }
 0x815   :  { %v25198_v43 = vadd.f32 %v6341_v20, %v6172_v48  ;;  %v6152_v27 = vmul.f32 %v25160_v8, %v6090_v12  ;;  %v6343_v15 = vmul.f32 %v25163_v18, %v6280_v30 }
 0x816   :  { %v6175_v10 = vadd.f32 %v25166_v19, %v6153_v7  ;;  %v25246_v7 = vld [vmem:[%s27252_s25 + $0x3] ss:$0 sm:$0xff] }
 0x817   :  { %v6174_v1 = vadd.f32 %v25166_v19, %v6152_v27  ;;  %v19231_v14 = vpop.f32.mrb[248].mxu1  ;;  %v19287_v33 = vpop.f32.mrb[104].mxu0 }
 0x818   :  { %v25204_v13 = vadd.f32 %v6344_v54, %v6175_v10  ;;  %v6155_v47 = vmul.f32 %v19231_v14, %v25160_v8  ;;  %v6100_v16 = vpop.f32.mrb[249].mxu1  ;;  %v6346_v37 = vmul.f32 %v19287_v33, %v25163_v18  ;;  %v6290_v41 = vpop.f32.mrb[105].mxu0 }
 0x819   :  { %v25208_v55 = vadd.f32 %v6343_v15, %v6174_v1  ;;  %v6154_v40 = vmul.f32 %v25160_v8, %v6100_v16  ;;  %v6345_v9 = vmul.f32 %v25163_v18, %v6290_v41 }
 0x81a   :  { %v6177_v23 = vadd.f32 %v25166_v19, %v6155_v47 }
 0x81b   :  { %v6176_v4 = vadd.f32 %v25166_v19, %v6154_v40  ;;  %v19234_v11 = vpop.f32.mrb[250].mxu1  ;;  %v19290_v61 = vpop.f32.mrb[106].mxu0 }
 0x81c   :  { %v25214_v58 = vadd.f32 %v6346_v37, %v6177_v23  ;;  %v6157_v21 = vmul.f32 %v19234_v11, %v25160_v8  ;;  %v6110_v24 = vpop.f32.mrb[251].mxu1  ;;  %v6348_v25 = vmul.f32 %v19290_v61, %v25163_v18  ;;  %v6300_v26 = vpop.f32.mrb[107].mxu0 }
 0x81d   :  { %v25218_v28 = vadd.f32 %v6345_v9, %v6176_v4  ;;  %v6156_v29 = vmul.f32 %v25160_v8, %v6110_v24  ;;  %v6347_v31 = vmul.f32 %v25163_v18, %v6300_v26 }
 0x81e   :  { %v6179_v32 = vadd.f32 %v25166_v19, %v6157_v21 }
 0x81f   :  { %v6178_v35 = vadd.f32 %v25166_v19, %v6156_v29  ;;  %v19237_v36 = vpop.f32.mrb[252].mxu1  ;;  %v19293_v38 = vpop.f32.mrb[108].mxu0 }
 0x820   :  { %v25224_v39 = vadd.f32 %v6348_v25, %v6179_v32  ;;  %v6159_v45 = vmul.f32 %v19237_v36, %v25160_v8  ;;  %v6120_v46 = vpop.f32.mrb[253].mxu1  ;;  %v6350_v49 = vmul.f32 %v19293_v38, %v25163_v18  ;;  %v6310_v50 = vpop.f32.mrb[109].mxu0 }
 0x821   :  { %v25228_v17 = vadd.f32 %v6347_v31, %v6178_v35  ;;  %v6158_v53 = vmul.f32 %v25160_v8, %v6120_v46  ;;  %v6349_v56 = vmul.f32 %v25163_v18, %v6310_v50 }
 0x822   :  { %v6181_v57 = vadd.f32 %v25166_v19, %v6159_v45 }
 0x823   :  { %v6180_v44 = vadd.f32 %v25166_v19, %v6158_v53  ;;  %v19240_v59 = vpop.f32.mrb[254].mxu1  ;;  %v19296_v63 = vpop.f32.mrb[110].mxu0 }
 0x824   :  { %v25234_v22 = vadd.f32 %v6350_v49, %v6181_v57  ;;  %v6161_v0 = vmul.f32 %v19240_v59, %v25160_v8  ;;  %v6130_v2 = vpop.f32.mrb[255].mxu1  ;;  %v6352_v62 = vmul.f32 %v19296_v63, %v25163_v18  ;;  %v6320_v20 = vpop.f32.mrb[111].mxu0 }
 0x825   :  { %v25238_v51 = vadd.f32 %v6349_v56, %v6180_v44  ;;  %v6160_v48 = vmul.f32 %v25160_v8, %v6130_v2  ;;  %v6351_v5 = vmul.f32 %v25163_v18, %v6320_v20 }
 0x826   :  { %v6183_v12 = vadd.f32 %v25166_v19, %v6161_v0 }
 0x827   :  { %v6182_v54 = vadd.f32 %v25166_v19, %v6160_v48  ;;  %v19331_v30 = vpop.f32.mrb[0].mxu1  ;;  %v19387_v27 = vpop.f32.mrb[112].mxu0 }
 0x828   :  { %v25250_v15 = vadd.f32 %v6352_v62, %v6183_v12  ;;  %v6523_v10 = vmul.f32 %v19331_v30, %v25243_v6  ;;  %v6435_v1 = vpop.f32.mrb[1].mxu1  ;;  %v6708_v14 = vmul.f32 %v19387_v27, %v25246_v7  ;;  %v6620_v8 = vpop.f32.mrb[113].mxu0 }
 0x829   :  { %v25254_v33 = vadd.f32 %v6351_v5, %v6182_v54  ;;  %v6522_v18 = vmul.f32 %v25243_v6, %v6435_v1  ;;  %v6707_v47 = vmul.f32 %v25246_v7, %v6620_v8 }
 0x82a   :  { %v6539_v16 = vadd.f32 %v6523_v10, %v25174_v42 }
 0x82b   :  { %v6538_v19 = vadd.f32 %v6522_v18, %v25178_v52  ;;  %v19334_v37 = vpop.f32.mrb[2].mxu1  ;;  %v19390_v41 = vpop.f32.mrb[114].mxu0 }
 0x82c   :  { %v25260_v40 = vadd.f32 %v6708_v14, %v6539_v16  ;;  %v6525_v9 = vmul.f32 %v19334_v37, %v25243_v6  ;;  %v6445_v23 = vpop.f32.mrb[3].mxu1  ;;  %v6710_v4 = vmul.f32 %v19390_v41, %v25246_v7  ;;  %v6630_v11 = vpop.f32.mrb[115].mxu0 }
 0x82d   :  { %v25264_v61 = vadd.f32 %v6707_v47, %v6538_v19  ;;  %v6524_v21 = vmul.f32 %v25243_v6, %v6445_v23  ;;  %v6709_v24 = vmul.f32 %v25246_v7, %v6630_v11 }
 0x82e   :  { %v6541_v42 = vadd.f32 %v6525_v9, %v25184_v60 }
 0x82f   :  { %v6540_v52 = vadd.f32 %v6524_v21, %v25188_v3  ;;  %v19337_v25 = vpop.f32.mrb[4].mxu1  ;;  %v19393_v26 = vpop.f32.mrb[116].mxu0 }
 0x830   :  { %v25270_v29 = vadd.f32 %v6710_v4, %v6541_v42  ;;  %v6527_v31 = vmul.f32 %v19337_v25, %v25243_v6  ;;  %v6455_v32 = vpop.f32.mrb[5].mxu1  ;;  %v6712_v35 = vmul.f32 %v19393_v26, %v25246_v7  ;;  %v6640_v36 = vpop.f32.mrb[117].mxu0 }
 0x831   :  { %v25274_v38 = vadd.f32 %v6709_v24, %v6540_v52  ;;  %v6526_v45 = vmul.f32 %v25243_v6, %v6455_v32  ;;  %v6711_v46 = vmul.f32 %v25246_v7, %v6640_v36 }
 0x832   :  { %v6543_v60 = vadd.f32 %v6527_v31, %v25194_v34 }
 0x833   :  { %v6542_v3 = vadd.f32 %v6526_v45, %v25198_v43  ;;  %v19340_v49 = vpop.f32.mrb[6].mxu1  ;;  %v19396_v50 = vpop.f32.mrb[118].mxu0 }
 0x834   :  { %v25280_v53 = vadd.f32 %v6712_v35, %v6543_v60  ;;  %v6529_v56 = vmul.f32 %v19340_v49, %v25243_v6  ;;  %v6465_v57 = vpop.f32.mrb[7].mxu1  ;;  %v6714_v44 = vmul.f32 %v19396_v50, %v25246_v7  ;;  %v6650_v59 = vpop.f32.mrb[119].mxu0 }
 0x835   :  { %v25284_v63 = vadd.f32 %v6711_v46, %v6542_v3  ;;  %v6528_v0 = vmul.f32 %v25243_v6, %v6465_v57  ;;  %v6713_v2 = vmul.f32 %v25246_v7, %v6650_v59 }
 0x836   :  { %v6545_v34 = vadd.f32 %v6529_v56, %v25204_v13 }
 0x837   :  { %v6544_v43 = vadd.f32 %v6528_v0, %v25208_v55  ;;  %v19343_v62 = vpop.f32.mrb[8].mxu1  ;;  %v19399_v20 = vpop.f32.mrb[120].mxu0 }
 0x838   :  { %v25290_v48 = vadd.f32 %v6714_v44, %v6545_v34  ;;  %v6531_v5 = vmul.f32 %v19343_v62, %v25243_v6  ;;  %v6475_v12 = vpop.f32.mrb[9].mxu1  ;;  %v6716_v54 = vmul.f32 %v19399_v20, %v25246_v7  ;;  %v6660_v30 = vpop.f32.mrb[121].mxu0  ;;  %v25329_v44 = vld [vmem:[%s27252_s25 + $0x4] ss:$0 sm:$0xff] }
 0x839   :  { %v25294_v27 = vadd.f32 %v6713_v2, %v6544_v43  ;;  %v6530_v10 = vmul.f32 %v25243_v6, %v6475_v12  ;;  %v6715_v1 = vmul.f32 %v25246_v7, %v6660_v30 }
 0x83a   :  { %v6547_v13 = vadd.f32 %v6531_v5, %v25214_v58 }
 0x83b   :  { %v6546_v55 = vadd.f32 %v6530_v10, %v25218_v28  ;;  %v19346_v14 = vpop.f32.mrb[10].mxu1  ;;  %v19402_v8 = vpop.f32.mrb[122].mxu0 }
 0x83c   :  { %v25300_v18 = vadd.f32 %v6716_v54, %v6547_v13  ;;  %v6533_v47 = vmul.f32 %v19346_v14, %v25243_v6  ;;  %v6485_v16 = vpop.f32.mrb[11].mxu1  ;;  %v6718_v19 = vmul.f32 %v19402_v8, %v25246_v7  ;;  %v6670_v37 = vpop.f32.mrb[123].mxu0 }
 0x83d   :  { %v25304_v41 = vadd.f32 %v6715_v1, %v6546_v55  ;;  %v6532_v9 = vmul.f32 %v25243_v6, %v6485_v16  ;;  %v6717_v23 = vmul.f32 %v25246_v7, %v6670_v37 }
 0x83e   :  { %v6549_v58 = vadd.f32 %v6533_v47, %v25224_v39 }
 0x83f   :  { %v6548_v28 = vadd.f32 %v6532_v9, %v25228_v17  ;;  %v19349_v4 = vpop.f32.mrb[12].mxu1  ;;  %v19405_v11 = vpop.f32.mrb[124].mxu0 }
 0x840   :  { %v25310_v21 = vadd.f32 %v6718_v19, %v6549_v58  ;;  %v6535_v24 = vmul.f32 %v19349_v4, %v25243_v6  ;;  %v6495_v42 = vpop.f32.mrb[13].mxu1  ;;  %v6720_v52 = vmul.f32 %v19405_v11, %v25246_v7  ;;  %v6680_v25 = vpop.f32.mrb[125].mxu0 }
 0x841   :  { %v25314_v26 = vadd.f32 %v6717_v23, %v6548_v28  ;;  %v6534_v31 = vmul.f32 %v25243_v6, %v6495_v42  ;;  %v6719_v39 = vmul.f32 %v25246_v7, %v6680_v25 }
 0x842   :  { %v6551_v17 = vadd.f32 %v6535_v24, %v25234_v22  ;;  %v25332_v22 = vld [vmem:[%s27252_s25 + $0x5] ss:$0 sm:$0xff] }
 0x843   :  { %v6550_v32 = vadd.f32 %v6534_v31, %v25238_v51  ;;  %v19352_v35 = vpop.f32.mrb[14].mxu1  ;;  %v19408_v36 = vpop.f32.mrb[126].mxu0 }
 0x844   :  { %v25320_v45 = vadd.f32 %v6720_v52, %v6551_v17  ;;  %v6537_v46 = vmul.f32 %v19352_v35, %v25243_v6  ;;  %v6505_v60 = vpop.f32.mrb[15].mxu1  ;;  %v6722_v3 = vmul.f32 %v19408_v36, %v25246_v7  ;;  %v6690_v49 = vpop.f32.mrb[127].mxu0 }
 0x845   :  { %v25324_v50 = vadd.f32 %v6719_v39, %v6550_v32  ;;  %v6536_v56 = vmul.f32 %v25243_v6, %v6505_v60  ;;  %v6721_v57 = vmul.f32 %v25246_v7, %v6690_v49 }
 0x846   :  { %v6553_v51 = vadd.f32 %v6537_v46, %v25250_v15 }
 0x847   :  { %v6552_v59 = vadd.f32 %v6536_v56, %v25254_v33  ;;  %v19443_v0 = vpop.f32.mrb[16].mxu1  ;;  %v19499_v2 = vpop.f32.mrb[128].mxu0 }
 0x848   :  { %v25336_v34 = vadd.f32 %v6722_v3, %v6553_v51  ;;  %v6893_v43 = vmul.f32 %v19443_v0, %v25329_v44  ;;  %v6805_v62 = vpop.f32.mrb[17].mxu1  ;;  %v7078_v20 = vmul.f32 %v19499_v2, %v25332_v22  ;;  %v6990_v6 = vpop.f32.mrb[129].mxu0 }
 0x849   :  { %v25340_v5 = vadd.f32 %v6721_v57, %v6552_v59  ;;  %v6892_v7 = vmul.f32 %v25329_v44, %v6805_v62  ;;  %v7077_v12 = vmul.f32 %v25332_v22, %v6990_v6 }
 0x84a   :  { %v6909_v15 = vadd.f32 %v6893_v43, %v25260_v40 }
 0x84b   :  { %v6908_v33 = vadd.f32 %v6892_v7, %v25264_v61  ;;  %v19446_v54 = vpop.f32.mrb[18].mxu1  ;;  %v19502_v30 = vpop.f32.mrb[130].mxu0 }
 0x84c   :  { %v25346_v10 = vadd.f32 %v7078_v20, %v6909_v15  ;;  %v6895_v1 = vmul.f32 %v19446_v54, %v25329_v44  ;;  %v6815_v13 = vpop.f32.mrb[19].mxu1  ;;  %v7080_v55 = vmul.f32 %v19502_v30, %v25332_v22  ;;  %v7000_v14 = vpop.f32.mrb[131].mxu0 }
 0x84d   :  { %v25350_v8 = vadd.f32 %v7077_v12, %v6908_v33  ;;  %v6894_v47 = vmul.f32 %v25329_v44, %v6815_v13  ;;  %v7079_v16 = vmul.f32 %v25332_v22, %v7000_v14 }
 0x84e   :  { %v6911_v40 = vadd.f32 %v6895_v1, %v25270_v29 }
 0x84f   :  { %v6910_v61 = vadd.f32 %v6894_v47, %v25274_v38  ;;  %v19449_v19 = vpop.f32.mrb[20].mxu1  ;;  %v19505_v37 = vpop.f32.mrb[132].mxu0 }
 0x850   :  { %v25356_v9 = vadd.f32 %v7080_v55, %v6911_v40  ;;  %v6897_v23 = vmul.f32 %v19449_v19, %v25329_v44  ;;  %v6825_v58 = vpop.f32.mrb[21].mxu1  ;;  %v7082_v28 = vmul.f32 %v19505_v37, %v25332_v22  ;;  %v7010_v4 = vpop.f32.mrb[133].mxu0 }
 0x851   :  { %v25360_v11 = vadd.f32 %v7079_v16, %v6910_v61  ;;  %v6896_v24 = vmul.f32 %v25329_v44, %v6825_v58  ;;  %v7081_v42 = vmul.f32 %v25332_v22, %v7010_v4 }
 0x852   :  { %v6913_v29 = vadd.f32 %v6897_v23, %v25280_v53 }
 0x853   :  { %v6912_v38 = vadd.f32 %v6896_v24, %v25284_v63  ;;  %v19452_v52 = vpop.f32.mrb[22].mxu1  ;;  %v19508_v25 = vpop.f32.mrb[134].mxu0 }
 0x854   :  { %v25366_v31 = vadd.f32 %v7082_v28, %v6913_v29  ;;  %v6899_v39 = vmul.f32 %v19452_v52, %v25329_v44  ;;  %v6835_v17 = vpop.f32.mrb[23].mxu1  ;;  %v7084_v32 = vmul.f32 %v19508_v25, %v25332_v22  ;;  %v7020_v35 = vpop.f32.mrb[135].mxu0 }
 0x855   :  { %v25370_v36 = vadd.f32 %v7081_v42, %v6912_v38  ;;  %v6898_v46 = vmul.f32 %v25329_v44, %v6835_v17  ;;  %v7083_v60 = vmul.f32 %v25332_v22, %v7020_v35 }
 0x856   :  { %v6915_v53 = vadd.f32 %v6899_v39, %v25290_v48 }
 0x857   :  { %v6914_v63 = vadd.f32 %v6898_v46, %v25294_v27  ;;  %v19455_v3 = vpop.f32.mrb[24].mxu1  ;;  %v19511_v49 = vpop.f32.mrb[136].mxu0 }
 0x858   :  { %v25376_v56 = vadd.f32 %v7084_v32, %v6915_v53  ;;  %v6901_v57 = vmul.f32 %v19455_v3, %v25329_v44  ;;  %v6845_v51 = vpop.f32.mrb[25].mxu1  ;;  %v7086_v59 = vmul.f32 %v19511_v49, %v25332_v22  ;;  %v7030_v0 = vpop.f32.mrb[137].mxu0  ;;  %v25415_v32 = vld [vmem:[%s27252_s25 + $0x6] ss:$0 sm:$0xff] }
 0x859   :  { %v25380_v2 = vadd.f32 %v7083_v60, %v6914_v63  ;;  %v6900_v43 = vmul.f32 %v25329_v44, %v6845_v51  ;;  %v7085_v62 = vmul.f32 %v25332_v22, %v7030_v0 }
 0x85a   :  { %v6917_v48 = vadd.f32 %v6901_v57, %v25300_v18 }
 0x85b   :  { %v6916_v27 = vadd.f32 %v6900_v43, %v25304_v41  ;;  %v19458_v20 = vpop.f32.mrb[26].mxu1  ;;  %v19514_v6 = vpop.f32.mrb[138].mxu0 }
 0x85c   :  { %v25386_v7 = vadd.f32 %v7086_v59, %v6917_v48  ;;  %v6903_v12 = vmul.f32 %v19458_v20, %v25329_v44  ;;  %v6855_v15 = vpop.f32.mrb[27].mxu1  ;;  %v7088_v33 = vmul.f32 %v19514_v6, %v25332_v22  ;;  %v7040_v54 = vpop.f32.mrb[139].mxu0 }
 0x85d   :  { %v25390_v30 = vadd.f32 %v7085_v62, %v6916_v27  ;;  %v6902_v1 = vmul.f32 %v25329_v44, %v6855_v15  ;;  %v7087_v13 = vmul.f32 %v25332_v22, %v7040_v54 }
 0x85e   :  { %v6919_v18 = vadd.f32 %v6903_v12, %v25310_v21 }
 0x85f   :  { %v6918_v41 = vadd.f32 %v6902_v1, %v25314_v26  ;;  %v19461_v55 = vpop.f32.mrb[28].mxu1  ;;  %v19517_v14 = vpop.f32.mrb[140].mxu0 }
 0x860   :  { %v25396_v47 = vadd.f32 %v7088_v33, %v6919_v18  ;;  %v6905_v16 = vmul.f32 %v19461_v55, %v25329_v44  ;;  %v6865_v40 = vpop.f32.mrb[29].mxu1  ;;  %v7090_v61 = vmul.f32 %v19517_v14, %v25332_v22  ;;  %v7050_v19 = vpop.f32.mrb[141].mxu0 }
 0x861   :  { %v25400_v37 = vadd.f32 %v7087_v13, %v6918_v41  ;;  %v6904_v23 = vmul.f32 %v25329_v44, %v6865_v40  ;;  %v7089_v21 = vmul.f32 %v25332_v22, %v7050_v19 }
 0x862   :  { %v6921_v26 = vadd.f32 %v6905_v16, %v25320_v45  ;;  %v25418_v45 = vld [vmem:[%s27252_s25 + $0x7] ss:$0 sm:$0xff] }
 0x863   :  { %v6920_v58 = vadd.f32 %v6904_v23, %v25324_v50  ;;  %v19464_v28 = vpop.f32.mrb[30].mxu1  ;;  %v19520_v4 = vpop.f32.mrb[142].mxu0 }
 0x864   :  { %v25406_v24 = vadd.f32 %v7090_v61, %v6921_v26  ;;  %v6907_v42 = vmul.f32 %v19464_v28, %v25329_v44  ;;  %v6875_v29 = vpop.f32.mrb[31].mxu1  ;;  %v7092_v38 = vmul.f32 %v19520_v4, %v25332_v22  ;;  %v7060_v52 = vpop.f32.mrb[143].mxu0 }
 0x865   :  { %v25410_v25 = vadd.f32 %v7089_v21, %v6920_v58  ;;  %v6906_v39 = vmul.f32 %v25329_v44, %v6875_v29  ;;  %v7091_v17 = vmul.f32 %v25332_v22, %v7060_v52 }
 0x866   :  { %v6923_v50 = vadd.f32 %v6907_v42, %v25336_v34 }
 0x867   :  { %v6922_v35 = vadd.f32 %v6906_v39, %v25340_v5  ;;  %v19555_v46 = vpop.f32.mrb[32].mxu1  ;;  %v19611_v60 = vpop.f32.mrb[144].mxu0 }
 0x868   :  { %v25422_v53 = vadd.f32 %v7092_v38, %v6923_v50  ;;  %v7263_v63 = vmul.f32 %v19555_v46, %v25415_v32  ;;  %v7175_v3 = vpop.f32.mrb[33].mxu1  ;;  %v7448_v49 = vmul.f32 %v19611_v60, %v25418_v45  ;;  %v7360_v44 = vpop.f32.mrb[145].mxu0 }
 0x869   :  { %v25426_v57 = vadd.f32 %v7091_v17, %v6922_v35  ;;  %v7262_v22 = vmul.f32 %v25415_v32, %v7175_v3  ;;  %v7447_v51 = vmul.f32 %v25418_v45, %v7360_v44 }
 0x86a   :  { %v7279_v34 = vadd.f32 %v7263_v63, %v25346_v10 }
 0x86b   :  { %v7278_v5 = vadd.f32 %v7262_v22, %v25350_v8  ;;  %v19558_v59 = vpop.f32.mrb[34].mxu1  ;;  %v19614_v0 = vpop.f32.mrb[146].mxu0 }
 0x86c   :  { %v25432_v43 = vadd.f32 %v7448_v49, %v7279_v34  ;;  %v7265_v62 = vmul.f32 %v19558_v59, %v25415_v32  ;;  %v7185_v48 = vpop.f32.mrb[35].mxu1  ;;  %v7450_v27 = vmul.f32 %v19614_v0, %v25418_v45  ;;  %v7370_v20 = vpop.f32.mrb[147].mxu0 }
 0x86d   :  { %v25436_v6 = vadd.f32 %v7447_v51, %v7278_v5  ;;  %v7264_v12 = vmul.f32 %v25415_v32, %v7185_v48  ;;  %v7449_v15 = vmul.f32 %v25418_v45, %v7370_v20 }
 0x86e   :  { %v7281_v10 = vadd.f32 %v7265_v62, %v25356_v9 }
 0x86f   :  { %v7280_v8 = vadd.f32 %v7264_v12, %v25360_v11  ;;  %v19561_v33 = vpop.f32.mrb[36].mxu1  ;;  %v19617_v54 = vpop.f32.mrb[148].mxu0 }
 0x870   :  { %v25442_v1 = vadd.f32 %v7450_v27, %v7281_v10  ;;  %v7267_v13 = vmul.f32 %v19561_v33, %v25415_v32  ;;  %v7195_v18 = vpop.f32.mrb[37].mxu1  ;;  %v7452_v41 = vmul.f32 %v19617_v54, %v25418_v45  ;;  %v7380_v55 = vpop.f32.mrb[149].mxu0 }
 0x871   :  { %v25446_v14 = vadd.f32 %v7449_v15, %v7280_v8  ;;  %v7266_v16 = vmul.f32 %v25415_v32, %v7195_v18  ;;  %v7451_v40 = vmul.f32 %v25418_v45, %v7380_v55 }
 0x872   :  { %v7283_v9 = vadd.f32 %v7267_v13, %v25366_v31 }
 0x873   :  { %v7282_v11 = vadd.f32 %v7266_v16, %v25370_v36  ;;  %v19564_v61 = vpop.f32.mrb[38].mxu1  ;;  %v19620_v19 = vpop.f32.mrb[150].mxu0 }
 0x874   :  { %v25452_v23 = vadd.f32 %v7452_v41, %v7283_v9  ;;  %v7269_v21 = vmul.f32 %v19564_v61, %v25415_v32  ;;  %v7205_v26 = vpop.f32.mrb[39].mxu1  ;;  %v7454_v58 = vmul.f32 %v19620_v19, %v25418_v45  ;;  %v7390_v28 = vpop.f32.mrb[151].mxu0 }
 0x875   :  { %v25456_v4 = vadd.f32 %v7451_v40, %v7282_v11  ;;  %v7268_v42 = vmul.f32 %v25415_v32, %v7205_v26  ;;  %v7453_v29 = vmul.f32 %v25418_v45, %v7390_v28 }
 0x876   :  { %v7285_v31 = vadd.f32 %v7269_v21, %v25376_v56 }
 0x877   :  { %v7284_v36 = vadd.f32 %v7268_v42, %v25380_v2  ;;  %v19567_v38 = vpop.f32.mrb[40].mxu1  ;;  %v19623_v52 = vpop.f32.mrb[152].mxu0 }
 0x878   :  { %v25462_v39 = vadd.f32 %v7454_v58, %v7285_v31  ;;  %v7271_v17 = vmul.f32 %v19567_v38, %v25415_v32  ;;  %v7215_v50 = vpop.f32.mrb[41].mxu1  ;;  %v7456_v35 = vmul.f32 %v19623_v52, %v25418_v45  ;;  %v7400_v46 = vpop.f32.mrb[153].mxu0  ;;  %v15293_v58 = vld [vmem:[%s27252_s25 + $0x8] ss:$0 sm:$0xff] }
 0x879   :  { %v25466_v60 = vadd.f32 %v7453_v29, %v7284_v36  ;;  %v7270_v63 = vmul.f32 %v25415_v32, %v7215_v50  ;;  %v7455_v3 = vmul.f32 %v25418_v45, %v7400_v46 }
 0x87a   :  { %v7287_v56 = vadd.f32 %v7271_v17, %v25386_v7 }
 0x87b   :  { %v7286_v2 = vadd.f32 %v7270_v63, %v25390_v30  ;;  %v19570_v49 = vpop.f32.mrb[42].mxu1  ;;  %v19626_v44 = vpop.f32.mrb[154].mxu0 }
 0x87c   :  { %v25472_v22 = vadd.f32 %v7456_v35, %v7287_v56  ;;  %v7273_v51 = vmul.f32 %v19570_v49, %v25415_v32  ;;  %v7225_v34 = vpop.f32.mrb[43].mxu1  ;;  %v7458_v5 = vmul.f32 %v19626_v44, %v25418_v45  ;;  %v7410_v59 = vpop.f32.mrb[155].mxu0 }
 0x87d   :  { %v25476_v0 = vadd.f32 %v7455_v3, %v7286_v2  ;;  %v7272_v62 = vmul.f32 %v25415_v32, %v7225_v34  ;;  %v7457_v48 = vmul.f32 %v25418_v45, %v7410_v59 }
 0x87e   :  { %v7289_v7 = vadd.f32 %v7273_v51, %v25396_v47 }
 0x87f   :  { %v7288_v30 = vadd.f32 %v7272_v62, %v25400_v37  ;;  %v19573_v27 = vpop.f32.mrb[44].mxu1  ;;  %v19629_v20 = vpop.f32.mrb[156].mxu0 }
 0x880   :  { %v25482_v12 = vadd.f32 %v7458_v5, %v7289_v7  ;;  %v7275_v15 = vmul.f32 %v19573_v27, %v25415_v32  ;;  %v7235_v10 = vpop.f32.mrb[45].mxu1  ;;  %v7460_v8 = vmul.f32 %v19629_v20, %v25418_v45  ;;  %v7420_v33 = vpop.f32.mrb[157].mxu0 }
 0x881   :  { %v25486_v54 = vadd.f32 %v7457_v48, %v7288_v30  ;;  %v7274_v13 = vmul.f32 %v25415_v32, %v7235_v10  ;;  %v7459_v18 = vmul.f32 %v25418_v45, %v7420_v33 }
 0x882   :  { %v7291_v47 = vadd.f32 %v7275_v15, %v25406_v24 }
 0x883   :  { %v7290_v37 = vadd.f32 %v7274_v13, %v25410_v25  ;;  %v19576_v41 = vpop.f32.mrb[46].mxu1  ;;  %v19632_v55 = vpop.f32.mrb[158].mxu0 }
 0x884   :  { %v25492_v16 = vadd.f32 %v7460_v8, %v7291_v47  ;;  %v7277_v40 = vmul.f32 %v19576_v41, %v25415_v32  ;;  %v7245_v9 = vpop.f32.mrb[47].mxu1  ;;  %v7462_v11 = vmul.f32 %v19632_v55, %v25418_v45  ;;  %v7430_v61 = vpop.f32.mrb[159].mxu0  ;;  %v25534_v41 = vld [vmem:[%s27260_s8 + $0x10] sm:$0xff]  }
 0x885   :  { %v7475_v19 = vadd.f32 %v7459_v18, %v7290_v37  ;;  %v7276_v21 = vmul.f32 %v25415_v32, %v7245_v9  ;;  %v7461_v26 = vmul.f32 %v25418_v45, %v7430_v61  ;;  %v25531_v37 = vld [vmem:[%s27260_s8] sm:$0xff]  }
 0x886   :  { %v7293_v24 = vadd.f32 %v7277_v40, %v25422_v53  ;;  %v15896_v55 = vunpack.c.l.bf16 %v25531_v37  ;;  %v25539_v40 = vld [vmem:[%s27261_s2] ss:$0 sm:$0xff] }
 0x887   :  { %v7292_v25 = vadd.f32 %v7276_v21, %v25426_v57  ;;  %v19667_v28 = vpop.f32.mrb[48].mxu1 }
 0x888   :  { %v7478_v42 = vadd.f32 %v7462_v11, %v7293_v24  ;;  %v7633_v29 = vmul.f32 %v19667_v28, %v15293_v58  ;;  %v7545_v31 = vpop.f32.mrb[49].mxu1  ;;  %19753 = vmatprep.mubr.f32.mxu1 %v15896_v55  ;;  %v16126_v55 = vld [vmem:[%s27260_s8 + $0x50] sm:$0xff]  }
 0x889   :  { %v7477_v36 = vadd.f32 %v7461_v26, %v7292_v25  ;;  %v7632_v38 = vmul.f32 %v15293_v58, %v7545_v31 }
 0x88a   :  { %v7649_v52 = vadd.f32 %v7633_v29, %v25432_v43 }
 0x88b   :  { %v7648_v17 = vadd.f32 %v7632_v38, %v25436_v6  ;;  %v19670_v50 = vpop.f32.mrb[50].mxu1 }
 0x88c   :  { %v7635_v35 = vmul.f32 %v19670_v50, %v15293_v58  ;;  %v7555_v32 = vpop.f32.mrb[51].mxu1 }
 0x88d   :  { %v7634_v46 = vmul.f32 %v15293_v58, %v7555_v32  ;;  %19697 = vmatprep.mubr.msk.f32.mxu0 %vm338_vm0, %v7648_v17 }
 0x88e   :  { %v7651_v45 = vadd.f32 %v7635_v35, %v25442_v1  ;;  %19698 = vmatmul.mubr.msk.f32.vlgmr.msra.gmra.mrb[160].mxu0 %vm338_vm0, %v7649_v52 }
 0x88f   :  { %v7650_v53 = vadd.f32 %v7634_v46, %v25446_v14  ;;  %v19673_v57 = vpop.f32.mrb[52].mxu1 }
 0x890   :  { %v7637_v63 = vmul.f32 %v19673_v57, %v15293_v58  ;;  %v7565_v3 = vpop.f32.mrb[53].mxu1 }
 0x891   :  { %v7636_v56 = vmul.f32 %v15293_v58, %v7565_v3  ;;  %19700 = vmatprep.mubr.msk.f32.mxu0 %vm338_vm0, %v7650_v53 }
 0x892   :  { %v7653_v43 = vadd.f32 %v7637_v63, %v25452_v23  ;;  %19701 = vmatmul.mubr.msk.f32.gmra.mrb[162].mxu0 %vm338_vm0, %v7651_v45 }
 0x893   :  { %v7652_v6 = vadd.f32 %v7636_v56, %v25456_v4  ;;  %v19676_v2 = vpop.f32.mrb[54].mxu1 }
 0x894   :  { %v7639_v49 = vmul.f32 %v19676_v2, %v15293_v58  ;;  %v7575_v44 = vpop.f32.mrb[55].mxu1 }
 0x895   :  { %v7638_v1 = vmul.f32 %v15293_v58, %v7575_v44  ;;  %19703 = vmatprep.mubr.msk.f32.mxu0 %vm338_vm0, %v7652_v6 }
 0x896   :  { %v7655_v14 = vadd.f32 %v7639_v49, %v25462_v39  ;;  %19704 = vmatmul.mubr.msk.f32.gmra.mrb[164].mxu0 %vm338_vm0, %v7653_v43 }
 0x897   :  { %v7654_v51 = vadd.f32 %v7638_v1, %v25466_v60  ;;  %v19679_v34 = vpop.f32.mrb[56].mxu1 }
 0x898   :  { %v7641_v5 = vmul.f32 %v19679_v34, %v15293_v58  ;;  %v7585_v59 = vpop.f32.mrb[57].mxu1 }
 0x899   :  { %v7640_v23 = vmul.f32 %v15293_v58, %v7585_v59  ;;  %19706 = vmatprep.mubr.msk.f32.mxu0 %vm338_vm0, %v7654_v51 }
 0x89a   :  { %v7657_v4 = vadd.f32 %v7641_v5, %v25472_v22  ;;  %19707 = vmatmul.mubr.msk.f32.gmra.mrb[166].mxu0 %vm338_vm0, %v7655_v14 }
 0x89b   :  { %v7656_v62 = vadd.f32 %v7640_v23, %v25476_v0  ;;  %v19682_v48 = vpop.f32.mrb[58].mxu1 }
 0x89c   :  { %v7643_v7 = vmul.f32 %v19682_v48, %v15293_v58  ;;  %v7595_v30 = vpop.f32.mrb[59].mxu1  ;;  %v15905_v48 = vunpack.c.h.bf16 %v25534_v41 }
 0x89d   :  { %v7642_v39 = vmul.f32 %v15293_v58, %v7595_v30  ;;  %19709 = vmatprep.mubr.msk.f32.mxu0 %vm338_vm0, %v7656_v62  ;;  %v15897_v62 = vunpack.c.h.bf16 %v25531_v37  ;;  %v16119_v30 = vld [vmem:[%s27260_s8 + $0x18] sm:$0xff]  }
 0x89e   :  { %v7659_v60 = vadd.f32 %v7643_v7, %v25482_v12  ;;  %19710 = vmatmul.mubr.msk.f32.gmra.mrb[168].mxu0 %vm338_vm0, %v7657_v4  ;;  %v16117_v7 = vld [vmem:[%s27260_s8 + $0x8] sm:$0xff]  }
 0x89f   :  { %v7658_v27 = vadd.f32 %v7642_v39, %v25486_v54  ;;  %v19685_v20 = vpop.f32.mrb[60].mxu1  ;;  %v15900_v39 = vunpack.c.l.bf16 %v16117_v7 }
 0x8a0   :  { %v7645_v15 = vmul.f32 %v19685_v20, %v15293_v58  ;;  %v7605_v10 = vpop.f32.mrb[61].mxu1  ;;  %v15909_v20 = vunpack.c.h.bf16 %v16119_v30 }
 0x8a1   :  { %v7644_v22 = vmul.f32 %v15293_v58, %v7605_v10  ;;  %19712 = vmatprep.mubr.msk.f32.mxu0 %vm338_vm0, %v7658_v27  ;;  %v15901_v27 = vunpack.c.h.bf16 %v16117_v7  ;;  %v16122_v10 = vld [vmem:[%s27260_s8 + $0x30] sm:$0xff]   ;;  %v8839_v7 = vld [vmem:[%s27271_s14 + $0x8] sm:$0xff] }
 0x8a2   :  { %v7661_v0 = vadd.f32 %v7645_v15, %v25492_v16  ;;  %19713 = vmatmul.mubr.msk.f32.gmra.mrb[170].mxu0 %vm338_vm0, %v7659_v60  ;;  %v15904_v16 = vunpack.c.l.bf16 %v25534_v41  ;;  %v15908_v60 = vunpack.c.l.bf16 %v16119_v30  ;;  %v16120_v15 = vld [vmem:[%s27260_s8 + $0x20] sm:$0xff]  }
 0x8a3   :  { %v7660_v8 = vadd.f32 %v7644_v22, %v7475_v19  ;;  %v19688_v33 = vpop.f32.mrb[62].mxu1  ;;  %v15912_v22 = vunpack.c.l.bf16 %v16120_v15  ;;  %v16124_v41 = vld [vmem:[%s27260_s8 + $0x40] sm:$0xff]  }
 0x8a4   :  { %v7647_v12 = vmul.f32 %v19688_v33, %v15293_v58  ;;  %v7615_v13 = vpop.f32.mrb[63].mxu1  ;;  %v15921_v33 = vunpack.c.h.bf16 %v16122_v10 }
 0x8a5   :  { %v7646_v18 = vmul.f32 %v15293_v58, %v7615_v13  ;;  %19715 = vmatprep.mubr.msk.f32.mxu0 %vm338_vm0, %v7660_v8  ;;  %v15913_v8 = vunpack.c.h.bf16 %v16120_v15  ;;  %v16123_v13 = vld [vmem:[%s27260_s8 + $0x38] sm:$0xff]  }
 0x8a6   :  { %v7663_v54 = vadd.f32 %v7647_v12, %v7478_v42  ;;  %19716 = vmatmul.mubr.msk.f32.gmra.mrb[172].mxu0 %vm338_vm0, %v7661_v0  ;;  %v15920_v0 = vunpack.c.l.bf16 %v16122_v10  ;;  %v16121_v12 = vld [vmem:[%s27260_s8 + $0x28] sm:$0xff]   ;;  %v15925_v37 = vunpack.c.h.bf16 %v16123_v13  ;;  %v8844_v10 = vld [vmem:[%s27271_s14 + $0x30] sm:$0xff] }
 0x8a7   :  { %v7662_v47 = vadd.f32 %v7646_v18, %v7477_v36  ;;  %v15916_v18 = vunpack.c.l.bf16 %v16121_v12 }
 0x8a9   :  { %19718 = vmatprep.mubr.msk.f32.mxu0 %vm338_vm0, %v7662_v47  ;;  %v15917_v47 = vunpack.c.h.bf16 %v16121_v12 }
 0x8aa   :  { %19719 = vmatmul.mubr.msk.f32.gmra.mrb[174].mxu0 %vm338_vm0, %v7663_v54  ;;  %v15924_v54 = vunpack.c.l.bf16 %v16123_v13 }
 0x8ab   :  { %19791 = vmatprep.mubr.f32.mxu0 %v15904_v16  ;;  %v15928_v16 = vunpack.c.l.bf16 %v16124_v41 }
 0x961   :  { %v19699_v9 = vpop.f32.mrb[160].mxu0 }
 0x962   :  { %v7795_v11 = vadd.f32 %v19699_v9, %v25539_v40  ;;  %v7789_v61 = vpop.f32.mrb[161].mxu0  ;;  %v15929_v9 = vunpack.c.h.bf16 %v16124_v41 }
 0x963   :  { %v7790_v19 = vadd.f32 %v25539_v40, %v7789_v61  ;;  %v16125_v61 = vld [vmem:[%s27260_s8 + $0x48] sm:$0xff]  }
 0x965   :  { %v25543_v21 = vpack.c.bf16 %v7795_v11, %v7790_v19  ;;  %v19702_v26 = vpop.f32.mrb[162].mxu0  ;;  %v15937_v11 = vunpack.c.h.bf16 %v16126_v55  ;;  %v16127_v19 = vld [vmem:[%s27260_s8 + $0x58] sm:$0xff]  }
 0x966   :  { %v7805_v58 = vadd.f32 %v19702_v26, %v25539_v40  ;;  %v7799_v24 = vpop.f32.mrb[163].mxu0  ;;  %v15932_v26 = vunpack.c.l.bf16 %v16125_v61 }
 0x967   :  { %v7800_v25 = vadd.f32 %v25539_v40, %v7799_v24  ;;  %21714 = vmatprep.subr.bf16.mxu1 %v25543_v21  ;;  %21746 = vmatprep.subr.bf16.mxu0 %v25543_v21  ;;  %v15933_v24 = vunpack.c.h.bf16 %v16125_v61 }
 0x968   :  { %21716 = vmatpush3.bf16.msra.mxu1 %v25543_v21  ;;  %21748 = vmatpush3.bf16.msra.mxu0 %v25543_v21 }
 0x969   :  { %v25551_v28 = vpack.c.bf16 %v7805_v58, %v7800_v25  ;;  %v19705_v42 = vpop.f32.mrb[164].mxu0  ;;  %v15940_v58 = vunpack.c.l.bf16 %v16127_v19  ;;  %v15941_v25 = vunpack.c.h.bf16 %v16127_v19 }
 0x96a   :  { %v7815_v29 = vadd.f32 %v19705_v42, %v25539_v40  ;;  %v7809_v31 = vpop.f32.mrb[165].mxu0  ;;  %v16128_v42 = vld [vmem:[%s27260_s8 + $0x60] sm:$0xff]  }
 0x96b   :  { %v7810_v36 = vadd.f32 %v25539_v40, %v7809_v31  ;;  %21718 = vmatprep.subr.bf16.mxu1 %v25551_v28  ;;  %21750 = vmatprep.subr.bf16.mxu0 %v25551_v28  ;;  %v15944_v31 = vunpack.c.l.bf16 %v16128_v42 }
 0x96c   :  { %21720 = vmatpush3.bf16.msra.mxu1 %v25551_v28  ;;  %21752 = vmatpush3.bf16.msra.mxu0 %v25551_v28 }
 0x96d   :  { %v25559_v38 = vpack.c.bf16 %v7815_v29, %v7810_v36  ;;  %v19708_v52 = vpop.f32.mrb[166].mxu0  ;;  %v16130_v29 = vld [vmem:[%s27260_s8 + $0x70] sm:$0xff]  }
 0x96e   :  { %v7825_v17 = vadd.f32 %v19708_v52, %v25539_v40  ;;  %v7819_v50 = vpop.f32.mrb[167].mxu0  ;;  %v15952_v36 = vunpack.c.l.bf16 %v16130_v29  ;;  %v15945_v52 = vunpack.c.h.bf16 %v16128_v42 }
 0x96f   :  { %v7820_v35 = vadd.f32 %v25539_v40, %v7819_v50  ;;  %21722 = vmatprep.subr.bf16.mxu1 %v25559_v38  ;;  %21754 = vmatprep.subr.bf16.mxu0 %v25559_v38  ;;  %v16129_v50 = vld [vmem:[%s27260_s8 + $0x68] sm:$0xff]  }
 0x970   :  { %21724 = vmatpush3.bf16.msra.mxu1 %v25559_v38  ;;  %21756 = vmatpush3.bf16.msra.mxu0 %v25559_v38 }
 0x971   :  { %v25567_v32 = vpack.c.bf16 %v7825_v17, %v7820_v35  ;;  %v19711_v46 = vpop.f32.mrb[168].mxu0  ;;  %v15953_v17 = vunpack.c.h.bf16 %v16130_v29  ;;  %v16131_v35 = vld [vmem:[%s27260_s8 + $0x78] sm:$0xff]  }
 0x972   :  { %v7835_v45 = vadd.f32 %v19711_v46, %v25539_v40  ;;  %v7829_v53 = vpop.f32.mrb[169].mxu0  ;;  %v27263_v46 = vld [vmem:[#allocation172_spill] sm:$0xff] }
 0x973   :  { %v7830_v57 = vadd.f32 %v25539_v40, %v7829_v53  ;;  %21726 = vmatprep.subr.bf16.mxu1 %v25567_v32  ;;  %21758 = vmatprep.subr.bf16.mxu0 %v25567_v32  ;;  %v15956_v53 = vunpack.c.l.bf16 %v16131_v35 }
 0x974   :  { %21728 = vmatpush3.bf16.msra.mxu1 %v25567_v32  ;;  %21760 = vmatpush3.bf16.msra.mxu0 %v25567_v32 }
 0x975   :  { %v25575_v63 = vpack.c.bf16 %v7835_v45, %v7830_v57  ;;  %v19714_v3 = vpop.f32.mrb[170].mxu0  ;;  %v15948_v45 = vunpack.c.l.bf16 %v16129_v50  ;;  %v15949_v57 = vunpack.c.h.bf16 %v16129_v50 }
 0x976   :  { %v7845_v56 = vadd.f32 %v19714_v3, %v25539_v40  ;;  %v7839_v43 = vpop.f32.mrb[171].mxu0  ;;  %v15957_v3 = vunpack.c.h.bf16 %v16131_v35 }
 0x977   :  { %v7840_v6 = vadd.f32 %v25539_v40, %v7839_v43  ;;  %21730 = vmatprep.subr.bf16.mxu1 %v25575_v63  ;;  %21762 = vmatprep.subr.bf16.mxu0 %v25575_v63  ;;  %v15967_v43 = vld [vmem:[%s27262_s7] sm:$0xff]  }
 0x978   :  { %21732 = vmatpush3.bf16.msra.mxu1 %v25575_v63  ;;  %21764 = vmatpush3.bf16.msra.mxu0 %v25575_v63 }
 0x979   :  { %v25583_v2 = vpack.c.bf16 %v7845_v56, %v7840_v6  ;;  %v19717_v49 = vpop.f32.mrb[172].mxu0  ;;  %v16132_v56 = vld [vmem:[%s27260_s8 + $0x80] sm:$0xff]   ;;  %v27264_v6 = vld [vmem:[#allocation173_spill] sm:$0xff] }
 0x97a   :  { %v7855_v44 = vadd.f32 %v19717_v49, %v25539_v40  ;;  %v7849_v1 = vpop.f32.mrb[173].mxu0  ;;  %v15960_v49 = vunpack.c.l.bf16 %v16132_v56 }
 0x97b   :  { %v7850_v14 = vadd.f32 %v25539_v40, %v7849_v1  ;;  %21734 = vmatprep.subr.bf16.mxu1 %v25583_v2  ;;  %21766 = vmatprep.subr.bf16.mxu0 %v25583_v2  ;;  %v27265_v1 = vld [vmem:[#allocation174_spill] sm:$0xff] }
 0x97c   :  { %21736 = vmatpush3.bf16.msra.mxu1 %v25583_v2  ;;  %21768 = vmatpush3.bf16.msra.mxu0 %v25583_v2 }
 0x97d   :  { %v25591_v51 = vpack.c.bf16 %v7855_v44, %v7850_v14  ;;  %v19720_v34 = vpop.f32.mrb[174].mxu0  ;;  %v15968_v44 = vunpack.c.l.bf16 %v15967_v43  ;;  %v16133_v14 = vld [vmem:[%s27260_s8 + $0x88] sm:$0xff]  }
 0x97e   :  { %v7865_v5 = vadd.f32 %v19720_v34, %v25539_v40  ;;  %v7859_v59 = vpop.f32.mrb[175].mxu0  ;;  %v16134_v34 = vld [vmem:[%s27262_s7 + $0x8] sm:$0xff]  }
 0x97f   :  { %v7860_v23 = vadd.f32 %v25539_v40, %v7859_v59  ;;  %21738 = vmatprep.subr.bf16.mxu1 %v25591_v51  ;;  %21770 = vmatprep.subr.bf16.mxu0 %v25591_v51  ;;  %v15936_v40 = vunpack.c.l.bf16 %v16126_v55  ;;  %v15964_v59 = vunpack.c.l.bf16 %v16133_v14 }
 0x980   :  { %21740 = vmatpush3.bf16.msra.mxu1 %v25591_v51  ;;  %21772 = vmatpush3.bf16.msra.mxu0 %v25591_v51 }
 0x981   :  { %v25599_v4 = vpack.c.bf16 %v7865_v5, %v7860_v23  ;;  %v15961_v5 = vunpack.c.h.bf16 %v16132_v56  ;;  %v15965_v23 = vunpack.c.h.bf16 %v16133_v14 }
 0x983   :  { %21742 = vmatprep.subr.bf16.mxu1 %v25599_v4  ;;  %21774 = vmatprep.subr.bf16.mxu0 %v25599_v4 }
 0x984   :  { %21744 = vmatpush3.bf16.msra.mxu1 %v25599_v4  ;;  %21776 = vmatpush3.bf16.msra.mxu0 %v25599_v4 }
 0x985   :  { %21778 = vmatprep.subr.bf16.mxu1 %v25543_v21  ;;  %21810 = vmatprep.subr.bf16.mxu0 %v25543_v21 }
 0x987   :  { %19754 = vmatmul.mubr.f32.vlgmr.msra.gmra.mrb[64].mxu1 %v15897_v62  ;;  %19792 = vmatmul.mubr.f32.vlgmr.msra.gmra.mrb[176].mxu0 %v15905_v48  ;;  %v15973_v62 = vunpack.c.h.bf16 %v16134_v34  ;;  %v8838_v48 = vld [vmem:[%s27271_s14] sm:$0xff] }
 0x988   :  { %21780 = vmatpush3.bf16.msra.mxu1 %v25543_v21  ;;  %21812 = vmatpush3.bf16.msra.mxu0 %v25543_v21  ;;  %v22033_v30 = vpack.c.bf16 %v8839_v7, %v8838_v48 }
 0x989   :  { %21782 = vmatprep.subr.bf16.mxu1 %v25551_v28  ;;  %21814 = vmatprep.subr.bf16.mxu0 %v25551_v28 }
 0x98a   :  { %19756 = vmatprep.mubr.f32.mxu1 %v15900_v39  ;;  %19794 = vmatprep.mubr.f32.mxu0 %v15908_v60  ;;  %v8841_v39 = vld [vmem:[%s27271_s14 + $0x18] sm:$0xff] }
 0x98b   :  { %19757 = vmatmul.mubr.f32.gmra.mrb[66].mxu1 %v15901_v27  ;;  %19795 = vmatmul.mubr.f32.gmra.mrb[178].mxu0 %v15909_v20  ;;  %v8842_v27 = vld [vmem:[%s27271_s14 + $0x20] sm:$0xff]  ;;  %v8843_v20 = vld [vmem:[%s27271_s14 + $0x28] sm:$0xff] }
 0x98c   :  { %21784 = vmatpush3.bf16.msra.mxu1 %v25551_v28  ;;  %21816 = vmatpush3.bf16.msra.mxu0 %v25551_v28  ;;  %v22041_v15 = vpack.c.bf16 %v8843_v20, %v8842_v27 }
 0x98d   :  { %21786 = vmatprep.subr.bf16.mxu1 %v25559_v38  ;;  %21818 = vmatprep.subr.bf16.mxu0 %v25559_v38 }
 0x98e   :  { %19829 = vmatprep.mubr.f32.mxu1 %v15912_v22  ;;  %19867 = vmatprep.mubr.f32.mxu0 %v15920_v0  ;;  %v8845_v22 = vld [vmem:[%s27271_s14 + $0x38] sm:$0xff] }
 0x98f   :  { %v22045_v0 = vpack.c.bf16 %v8845_v22, %v8844_v10 }
 0x990   :  { %21788 = vmatpush3.bf16.msra.mxu1 %v25559_v38  ;;  %21820 = vmatpush3.bf16.msra.mxu0 %v25559_v38 }
 0x991   :  { %21790 = vmatprep.subr.bf16.mxu1 %v25567_v32  ;;  %21822 = vmatprep.subr.bf16.mxu0 %v25567_v32 }
 0x994   :  { %21792 = vmatpush3.bf16.msra.mxu1 %v25567_v32  ;;  %21824 = vmatpush3.bf16.msra.mxu0 %v25567_v32 }
 0x995   :  { %21794 = vmatprep.subr.bf16.mxu1 %v25575_v63  ;;  %21826 = vmatprep.subr.bf16.mxu0 %v25575_v63 }
 0x998   :  { %21796 = vmatpush3.bf16.msra.mxu1 %v25575_v63  ;;  %21828 = vmatpush3.bf16.msra.mxu0 %v25575_v63 }
 0x999   :  { %21798 = vmatprep.subr.bf16.mxu1 %v25583_v2  ;;  %21830 = vmatprep.subr.bf16.mxu0 %v25583_v2 }
 0x99c   :  { %21800 = vmatpush3.bf16.msra.mxu1 %v25583_v2  ;;  %21832 = vmatpush3.bf16.msra.mxu0 %v25583_v2 }
 0x99d   :  { %21802 = vmatprep.subr.bf16.mxu1 %v25591_v51  ;;  %21834 = vmatprep.subr.bf16.mxu0 %v25591_v51 }
 0x9a0   :  { %21804 = vmatpush3.bf16.msra.mxu1 %v25591_v51  ;;  %21836 = vmatpush3.bf16.msra.mxu0 %v25591_v51 }
 0x9a1   :  { %21806 = vmatprep.subr.bf16.mxu1 %v25599_v4  ;;  %21838 = vmatprep.subr.bf16.mxu0 %v25599_v4 }
 0x9a4   :  { %21808 = vmatpush3.bf16.msra.mxu1 %v25599_v4  ;;  %21840 = vmatpush3.bf16.msra.mxu0 %v25599_v4 }
 0x9a5   :  { %21842 = vmatprep.subr.bf16.mxu1 %v25543_v21  ;;  %21874 = vmatprep.subr.bf16.mxu0 %v25543_v21 }
 0x9a7   :  { %19830 = vmatmul.mubr.f32.vlgmr.msra.gmra.mrb[68].mxu1 %v15913_v8  ;;  %19868 = vmatmul.mubr.f32.vlgmr.msra.gmra.mrb[180].mxu0 %v15921_v33 }
 0x9a8   :  { %21844 = vmatpush3.bf16.msra.mxu1 %v25543_v21  ;;  %21876 = vmatpush3.bf16.msra.mxu0 %v25543_v21 }
 0x9a9   :  { %21846 = vmatprep.subr.bf16.mxu1 %v25551_v28  ;;  %21878 = vmatprep.subr.bf16.mxu0 %v25551_v28 }
 0x9aa   :  { %19832 = vmatprep.mubr.f32.mxu1 %v15916_v18  ;;  %19870 = vmatprep.mubr.f32.mxu0 %v15924_v54 }
 0x9ab   :  { %19833 = vmatmul.mubr.f32.gmra.mrb[70].mxu1 %v15917_v47  ;;  %19871 = vmatmul.mubr.f32.gmra.mrb[182].mxu0 %v15925_v37 }
 0x9ac   :  { %21848 = vmatpush3.bf16.msra.mxu1 %v25551_v28  ;;  %21880 = vmatpush3.bf16.msra.mxu0 %v25551_v28 }
 0x9ad   :  { %21850 = vmatprep.subr.bf16.mxu1 %v25559_v38  ;;  %21882 = vmatprep.subr.bf16.mxu0 %v25559_v38 }
 0x9ae   :  { %19905 = vmatprep.mubr.f32.mxu1 %v15928_v16  ;;  %19943 = vmatprep.mubr.f32.mxu0 %v15936_v40 }
 0x9b0   :  { %21852 = vmatpush3.bf16.msra.mxu1 %v25559_v38  ;;  %21884 = vmatpush3.bf16.msra.mxu0 %v25559_v38 }
 0x9b1   :  { %21854 = vmatprep.subr.bf16.mxu1 %v25567_v32  ;;  %21886 = vmatprep.subr.bf16.mxu0 %v25567_v32 }
 0x9b4   :  { %21856 = vmatpush3.bf16.msra.mxu1 %v25567_v32  ;;  %21888 = vmatpush3.bf16.msra.mxu0 %v25567_v32 }
 0x9b5   :  { %21858 = vmatprep.subr.bf16.mxu1 %v25575_v63  ;;  %21890 = vmatprep.subr.bf16.mxu0 %v25575_v63 }
 0x9b8   :  { %21860 = vmatpush3.bf16.msra.mxu1 %v25575_v63  ;;  %21892 = vmatpush3.bf16.msra.mxu0 %v25575_v63 }
 0x9b9   :  { %21862 = vmatprep.subr.bf16.mxu1 %v25583_v2  ;;  %21894 = vmatprep.subr.bf16.mxu0 %v25583_v2 }
 0x9bc   :  { %21864 = vmatpush3.bf16.msra.mxu1 %v25583_v2  ;;  %21896 = vmatpush3.bf16.msra.mxu0 %v25583_v2 }
 0x9bd   :  { %21866 = vmatprep.subr.bf16.mxu1 %v25591_v51  ;;  %21898 = vmatprep.subr.bf16.mxu0 %v25591_v51 }
 0x9c0   :  { %21868 = vmatpush3.bf16.msra.mxu1 %v25591_v51  ;;  %21900 = vmatpush3.bf16.msra.mxu0 %v25591_v51 }
 0x9c1   :  { %21870 = vmatprep.subr.bf16.mxu1 %v25599_v4  ;;  %21902 = vmatprep.subr.bf16.mxu0 %v25599_v4 }
 0x9c4   :  { %21872 = vmatpush3.bf16.msra.mxu1 %v25599_v4  ;;  %21904 = vmatpush3.bf16.msra.mxu0 %v25599_v4 }
 0x9c5   :  { %21906 = vmatprep.subr.bf16.mxu1 %v25543_v21  ;;  %21938 = vmatprep.subr.bf16.mxu0 %v25543_v21 }
 0x9c7   :  { %19906 = vmatmul.mubr.f32.vlgmr.msra.gmra.mrb[72].mxu1 %v15929_v9  ;;  %19944 = vmatmul.mubr.f32.vlgmr.msra.gmra.mrb[184].mxu0 %v15937_v11 }
 0x9c8   :  { %21908 = vmatpush3.bf16.msra.mxu1 %v25543_v21  ;;  %21940 = vmatpush3.bf16.msra.mxu0 %v25543_v21 }
 0x9c9   :  { %21910 = vmatprep.subr.bf16.mxu1 %v25551_v28  ;;  %21942 = vmatprep.subr.bf16.mxu0 %v25551_v28 }
 0x9ca   :  { %19908 = vmatprep.mubr.f32.mxu1 %v15932_v26  ;;  %19946 = vmatprep.mubr.f32.mxu0 %v15940_v58 }
 0x9cb   :  { %19909 = vmatmul.mubr.f32.gmra.mrb[74].mxu1 %v15933_v24  ;;  %19947 = vmatmul.mubr.f32.gmra.mrb[186].mxu0 %v15941_v25 }
 0x9cc   :  { %21912 = vmatpush3.bf16.msra.mxu1 %v25551_v28  ;;  %21944 = vmatpush3.bf16.msra.mxu0 %v25551_v28 }
 0x9cd   :  { %21914 = vmatprep.subr.bf16.mxu1 %v25559_v38  ;;  %21946 = vmatprep.subr.bf16.mxu0 %v25559_v38 }
 0x9ce   :  { %19981 = vmatprep.mubr.f32.mxu1 %v15944_v31  ;;  %20019 = vmatprep.mubr.f32.mxu0 %v15952_v36 }
 0x9d0   :  { %21916 = vmatpush3.bf16.msra.mxu1 %v25559_v38  ;;  %21948 = vmatpush3.bf16.msra.mxu0 %v25559_v38 }
 0x9d1   :  { %21918 = vmatprep.subr.bf16.mxu1 %v25567_v32  ;;  %21950 = vmatprep.subr.bf16.mxu0 %v25567_v32 }
 0x9d4   :  { %21920 = vmatpush3.bf16.msra.mxu1 %v25567_v32  ;;  %21952 = vmatpush3.bf16.msra.mxu0 %v25567_v32 }
 0x9d5   :  { %21922 = vmatprep.subr.bf16.mxu1 %v25575_v63  ;;  %21954 = vmatprep.subr.bf16.mxu0 %v25575_v63 }
 0x9d8   :  { %21924 = vmatpush3.bf16.msra.mxu1 %v25575_v63  ;;  %21956 = vmatpush3.bf16.msra.mxu0 %v25575_v63 }
 0x9d9   :  { %21926 = vmatprep.subr.bf16.mxu1 %v25583_v2  ;;  %21958 = vmatprep.subr.bf16.mxu0 %v25583_v2 }
 0x9dc   :  { %21928 = vmatpush3.bf16.msra.mxu1 %v25583_v2  ;;  %21960 = vmatpush3.bf16.msra.mxu0 %v25583_v2 }
 0x9dd   :  { %21930 = vmatprep.subr.bf16.mxu1 %v25591_v51  ;;  %21962 = vmatprep.subr.bf16.mxu0 %v25591_v51 }
 0x9e0   :  { %21932 = vmatpush3.bf16.msra.mxu1 %v25591_v51  ;;  %21964 = vmatpush3.bf16.msra.mxu0 %v25591_v51 }
 0x9e1   :  { %21934 = vmatprep.subr.bf16.mxu1 %v25599_v4  ;;  %21966 = vmatprep.subr.bf16.mxu0 %v25599_v4 }
 0x9e4   :  { %21936 = vmatpush3.bf16.msra.mxu1 %v25599_v4  ;;  %21968 = vmatpush3.bf16.msra.mxu0 %v25599_v4 }
 0x9e5   :  { %21970 = vmatprep.subr.bf16.mxu1 %v25543_v21  ;;  %22002 = vmatprep.subr.bf16.mxu0 %v27263_v46 }
 0x9e7   :  { %19982 = vmatmul.mubr.f32.vlgmr.msra.gmra.mrb[76].mxu1 %v15945_v52  ;;  %20020 = vmatmul.mubr.f32.vlgmr.msra.gmra.mrb[188].mxu0 %v15953_v17 }
 0x9e8   :  { %21972 = vmatpush3.bf16.msra.mxu1 %v25543_v21  ;;  %22004 = vmatpush3.bf16.msra.mxu0 %v27263_v46  ;;  %v27266_v21 = vld [vmem:[#allocation175_spill] sm:$0xff] }
 0x9e9   :  { %21974 = vmatprep.subr.bf16.mxu1 %v25551_v28  ;;  %22006 = vmatprep.subr.bf16.mxu0 %v27264_v6 }
 0x9ea   :  { %19984 = vmatprep.mubr.f32.mxu1 %v15948_v45  ;;  %20022 = vmatprep.mubr.f32.mxu0 %v15956_v53 }
 0x9eb   :  { %19985 = vmatmul.mubr.f32.gmra.mrb[78].mxu1 %v15949_v57  ;;  %20023 = vmatmul.mubr.f32.gmra.mrb[190].mxu0 %v15957_v3 }
 0x9ec   :  { %21976 = vmatpush3.bf16.msra.mxu1 %v25551_v28  ;;  %22008 = vmatpush3.bf16.msra.mxu0 %v27264_v6  ;;  %v27267_v28 = vld [vmem:[#allocation176_spill] sm:$0xff] }
 0x9ed   :  { %21978 = vmatprep.subr.bf16.mxu1 %v25559_v38  ;;  %22010 = vmatprep.subr.bf16.mxu0 %v27265_v1 }
 0x9ee   :  { %20057 = vmatprep.mubr.f32.mxu1 %v15960_v49  ;;  %20095 = vmatprep.mubr.f32.mxu0 %v15968_v44 }
 0x9f0   :  { %21980 = vmatpush3.bf16.msra.mxu1 %v25559_v38  ;;  %22012 = vmatpush3.bf16.msra.mxu0 %v27265_v1  ;;  %v27268_v38 = vld [vmem:[#allocation177_spill] sm:$0xff] }
 0x9f1   :  { %21982 = vmatprep.subr.bf16.mxu1 %v25567_v32  ;;  %22014 = vmatprep.subr.bf16.mxu0 %v27266_v21 }
 0x9f4   :  { %21984 = vmatpush3.bf16.msra.mxu1 %v25567_v32  ;;  %22016 = vmatpush3.bf16.msra.mxu0 %v27266_v21  ;;  %v27269_v32 = vld [vmem:[#allocation178_spill] sm:$0xff] }
 0x9f5   :  { %21986 = vmatprep.subr.bf16.mxu1 %v25575_v63  ;;  %22018 = vmatprep.subr.bf16.mxu0 %v27267_v28 }
 0x9f8   :  { %21988 = vmatpush3.bf16.msra.mxu1 %v25575_v63  ;;  %22020 = vmatpush3.bf16.msra.mxu0 %v27267_v28  ;;  %v27270_v63 = vld [vmem:[#allocation179_spill] sm:$0xff] }
 0x9f9   :  { %21990 = vmatprep.subr.bf16.mxu1 %v25583_v2  ;;  %22022 = vmatprep.subr.bf16.mxu0 %v27268_v38 }
 0x9fc   :  { %21992 = vmatpush3.bf16.msra.mxu1 %v25583_v2  ;;  %22024 = vmatpush3.bf16.msra.mxu0 %v27268_v38  ;;  %v15969_v2 = vunpack.c.h.bf16 %v15967_v43 }
 0x9fd   :  { %21994 = vmatprep.subr.bf16.mxu1 %v25591_v51  ;;  %22026 = vmatprep.subr.bf16.mxu0 %v27269_v32 }
 0xa00   :  { %21996 = vmatpush3.bf16.msra.mxu1 %v25591_v51  ;;  %22028 = vmatpush3.bf16.msra.mxu0 %v27269_v32  ;;  %v15972_v51 = vunpack.c.l.bf16 %v16134_v34 }
 0xa01   :  { %21998 = vmatprep.subr.bf16.mxu1 %v25599_v4  ;;  %22030 = vmatprep.subr.bf16.mxu0 %v27270_v63 }
 0xa04   :  { %22000 = vmatpush3.bf16.msra.mxu1 %v25599_v4  ;;  %22032 = vmatpush3.bf16.msra.mxu0 %v27270_v63  ;;  %v8840_v4 = vld [vmem:[%s27271_s14 + $0x10] sm:$0xff] }
 0xa05   :  { %v22037_v60 = vpack.c.bf16 %v8841_v39, %v8840_v4  ;;  %22034 = vmatprep.subr.bf16.mxu0 %v22033_v30 }
 0xa07   :  { %20058 = vmatmul.mubr.f32.vlgmr.msra.gmra.mrb[80].mxu1 %v15961_v5  ;;  %20096 = vmatmul.mubr.f32.vlgmr.msra.gmra.mrb[192].mxu0 %v15969_v2 }
 0xa08   :  { %20060 = vmatprep.mubr.f32.mxu1 %v15964_v59  ;;  %20098 = vmatprep.mubr.f32.mxu0 %v15972_v51 }
 0xa09   :  { %22036 = vmatpush3.bf16.msra.mxu0 %v22033_v30 }
 0xa0a   :  { %22038 = vmatprep.subr.bf16.mxu0 %v22037_v60 }
 0xa0b   :  { %20061 = vmatmul.mubr.f32.gmra.mrb[82].mxu1 %v15965_v23  ;;  %20099 = vmatmul.mubr.f32.gmra.mrb[194].mxu0 %v15973_v62 }
 0xa0d   :  { %22040 = vmatpush3.bf16.msra.mxu0 %v22037_v60 }
 0xa0e   :  { %22042 = vmatprep.subr.bf16.mxu0 %v22041_v15 }
 0xa11   :  { %22044 = vmatpush3.bf16.msra.mxu0 %v22041_v15 }
 0xa12   :  { %22046 = vmatprep.subr.bf16.mxu0 %v22045_v0 }
 0xa15   :  { %22048 = vmatpush3.bf16.msra.mxu0 %v22045_v0 }
 0xa5a   :  { %v19755_v8 = vpop.f32.mrb[64].mxu1  ;;  %v19793_v33 = vpop.f32.mrb[176].mxu0 }
 0xa5b   :  { %v8056_v12 = vmax.f32 %v19755_v8, %v19793_v33  ;;  %v7942_v13 = vpop.f32.mrb[65].mxu1  ;;  %v8036_v18 = vpop.f32.mrb[177].mxu0 }
 0xa5c   :  { %v8055_v54 = vmax.f32 %v7942_v13, %v8036_v18 }
 0xa5e   :  { %v19758_v47 = vpop.f32.mrb[66].mxu1  ;;  %v19796_v37 = vpop.f32.mrb[178].mxu0 }
 0xa5f   :  { %v8058_v41 = vmax.f32 %v19758_v47, %v19796_v37  ;;  %v7952_v55 = vpop.f32.mrb[67].mxu1  ;;  %v8046_v16 = vpop.f32.mrb[179].mxu0 }
 0xa60   :  { %v8057_v40 = vmax.f32 %v7952_v55, %v8046_v16  ;;  %v25770_v16 = vld [vmem:[%s27272_s6 + $0x20] sm:$0xff]  }
 0xa7a   :  { %v19831_v9 = vpop.f32.mrb[68].mxu1  ;;  %v19869_v11 = vpop.f32.mrb[180].mxu0 }
 0xa7b   :  { %v8154_v61 = vmax.f32 %v8056_v12, %v19831_v9  ;;  %v8134_v19 = vpop.f32.mrb[69].mxu1  ;;  %v8232_v26 = vpop.f32.mrb[181].mxu0  ;;  %v15343_v9 = vld [vmem:[#allocation2] ss:$0 sm:$0xff] }
 0xa7c   :  { %v8153_v58 = vmax.f32 %v8055_v54, %v8134_v19 }
 0xa7d   :  { %v8252_v24 = vmax.f32 %v8154_v61, %v19869_v11 }
 0xa7e   :  { %v8251_v25 = vmax.f32 %v8153_v58, %v8232_v26  ;;  %v19834_v42 = vpop.f32.mrb[70].mxu1  ;;  %v19872_v29 = vpop.f32.mrb[182].mxu0 }
 0xa7f   :  { %v8156_v31 = vmax.f32 %v8058_v41, %v19834_v42  ;;  %v8144_v36 = vpop.f32.mrb[71].mxu1  ;;  %v8242_v52 = vpop.f32.mrb[183].mxu0  ;;  %v25766_v41 = vld [vmem:[%s27272_s6] sm:$0xff]  }
 0xa80   :  { %v8155_v17 = vmax.f32 %v8057_v40, %v8144_v36  ;;  %v15976_v55 = vunpack.c.l.bf16 %v25766_v41  ;;  %v26885_v40 = vunpack.c.l.bf16 %v25770_v16 }
 0xa81   :  { %v8254_v50 = vmax.f32 %v8156_v31, %v19872_v29 }
 0xa82   :  { %v8253_v35 = vmax.f32 %v8155_v17, %v8242_v52  ;;  %20159 = vmatprep.mubr.msk.f32.mxu1 %vm338_vm0, %v26885_v40 }
 0xa9a   :  { %v19907_v46 = vpop.f32.mrb[72].mxu1  ;;  %v19945_v45 = vpop.f32.mrb[184].mxu0 }
 0xa9b   :  { %v8350_v53 = vmax.f32 %v8252_v24, %v19907_v46  ;;  %v8330_v57 = vpop.f32.mrb[73].mxu1  ;;  %v8428_v3 = vpop.f32.mrb[185].mxu0 }
 0xa9c   :  { %v8349_v56 = vmax.f32 %v8251_v25, %v8330_v57 }
 0xa9d   :  { %v8448_v43 = vmax.f32 %v8350_v53, %v19945_v45 }
 0xa9e   :  { %v8447_v6 = vmax.f32 %v8349_v56, %v8428_v3  ;;  %v19910_v49 = vpop.f32.mrb[74].mxu1  ;;  %v19948_v44 = vpop.f32.mrb[186].mxu0  ;;  %v15977_v56 = vunpack.c.h.bf16 %v25766_v41  ;;  %v27277_v41 = vunpack.c.l.bf16 %v25770_v16 }
 0xa9f   :  { %v8352_v1 = vmax.f32 %v8254_v50, %v19910_v49  ;;  %v8340_v21 = vpop.f32.mrb[75].mxu1  ;;  %v8438_v28 = vpop.f32.mrb[187].mxu0  ;;  %v25811_v49 = vld [vmem:[%s27272_s6 + $0x28] sm:$0xff]  }
 0xaa0   :  { %v8351_v38 = vmax.f32 %v8253_v35, %v8340_v21 }
 0xaa1   :  { %v8450_v32 = vmax.f32 %v8352_v1, %v19948_v44  ;;  %v26881_v1 = vunpack.c.l.bf16 %v25811_v49 }
 0xaa2   :  { %v8449_v63 = vmax.f32 %v8351_v38, %v8438_v28  ;;  %v26879_v28 = vunpack.c.h.bf16 %v25811_v49  ;;  %v25828_v38 = vld [vmem:[%s27272_s6 + $0x10] sm:$0xff]  }
 0xaba   :  { %v19983_v14 = vpop.f32.mrb[76].mxu1  ;;  %v20021_v34 = vpop.f32.mrb[188].mxu0 }
 0xabb   :  { %v8546_v5 = vmax.f32 %v8448_v43, %v19983_v14  ;;  %v8526_v2 = vpop.f32.mrb[77].mxu1  ;;  %v8624_v59 = vpop.f32.mrb[189].mxu0  ;;  %v26883_v43 = vunpack.c.h.bf16 %v25770_v16 }
 0xabc   :  { %v8545_v51 = vmax.f32 %v8447_v6, %v8526_v2  ;;  %v25808_v6 = vld [vmem:[%s27272_s6 + $0x8] sm:$0xff]   ;;  %v25854_v2 = vld [vmem:[%s27272_s6 + $0x18] sm:$0xff]  }
 0xabd   :  { %v8644_v23 = vmax.f32 %v8546_v5, %v20021_v34  ;;  %v15980_v44 = vunpack.c.l.bf16 %v25808_v6  ;;  %v15981_v21 = vunpack.c.h.bf16 %v25808_v6  ;;  %v15985_v34 = vunpack.c.h.bf16 %v25828_v38 }
 0xabe   :  { %v8643_v62 = vmax.f32 %v8545_v51, %v8624_v59  ;;  %v19986_v48 = vpop.f32.mrb[78].mxu1  ;;  %v20024_v7 = vpop.f32.mrb[190].mxu0  ;;  %v25857_v59 = vld [vmem:[%s27272_s6 + $0x48] sm:$0xff]   ;;  %v15988_v51 = vunpack.c.l.bf16 %v25854_v2  ;;  %v27279_v6 = vunpack.c.h.bf16 %v25770_v16  ;;  %v27283_v16 = vunpack.c.h.bf16 %v25811_v49 }
 0xabf   :  { %v8548_v4 = vmax.f32 %v8450_v32, %v19986_v48  ;;  %v8536_v30 = vpop.f32.mrb[79].mxu1  ;;  %v8634_v39 = vpop.f32.mrb[191].mxu0  ;;  %v25831_v32 = vld [vmem:[%s27272_s6 + $0x40] sm:$0xff]   ;;  %v26871_v48 = vunpack.c.h.bf16 %v25857_v59 }
 0xac0   :  { %v8547_v60 = vmax.f32 %v8449_v63, %v8536_v30  ;;  %v15984_v63 = vunpack.c.l.bf16 %v25828_v38  ;;  %v26877_v14 = vunpack.c.l.bf16 %v25831_v32  ;;  %v26875_v5 = vunpack.c.h.bf16 %v25831_v32 }
 0xac1   :  { %v8646_v27 = vmax.f32 %v8548_v4, %v20024_v7  ;;  %v25880_v7 = vld [vmem:[%s27272_s6 + $0x30] sm:$0xff]   ;;  %v25883_v4 = vld [vmem:[%s27272_s6 + $0x60] sm:$0xff]  }
 0xac2   :  { %v8645_v20 = vmax.f32 %v8547_v60, %v8634_v39  ;;  %v26884_v30 = vunpack.c.l.bf16 %v25880_v7  ;;  %v26869_v39 = vunpack.c.l.bf16 %v25883_v4  ;;  %v26882_v60 = vunpack.c.h.bf16 %v25880_v7 }
 0xada   :  { %v20059_v15 = vpop.f32.mrb[80].mxu1  ;;  %v20097_v10 = vpop.f32.mrb[192].mxu0 }
 0xadb   :  { %v8742_v22 = vmax.f32 %v8644_v23, %v20059_v15  ;;  %v8722_v0 = vpop.f32.mrb[81].mxu1  ;;  %v8819_v8 = vpop.f32.mrb[193].mxu0  ;;  %v26873_v23 = vunpack.c.l.bf16 %v25857_v59  ;;  %v25909_v15 = vld [vmem:[%s27272_s6 + $0x68] sm:$0xff]  }
 0xadc   :  { %v8741_v33 = vmax.f32 %v8643_v62, %v8722_v0  ;;  %20117 = vmatprep.mubr.msk.f32.mxu0 %vm5783_vm1, %v8819_v8  ;;  %v15989_v62 = vunpack.c.h.bf16 %v25854_v2  ;;  %v26865_v0 = vunpack.c.l.bf16 %v25909_v15  ;;  %v27285_v2 = vunpack.c.l.bf16 %v25831_v32 }
 0xadd   :  { %20118 = vmatmul.mubr.msk.f32.vlgmr.msra.gmra.mrb[196].mxu0 %vm5783_vm1, %v20097_v10 }
 0xade   :  { %v20062_v12 = vpop.f32.mrb[82].mxu1  ;;  %v20100_v13 = vpop.f32.mrb[194].mxu0 }
 0xadf   :  { %v8744_v18 = vmax.f32 %v8646_v27, %v20062_v12  ;;  %v8732_v54 = vpop.f32.mrb[83].mxu1  ;;  %v8829_v47 = vpop.f32.mrb[195].mxu0  ;;  %v26867_v27 = vunpack.c.h.bf16 %v25883_v4  ;;  %v25935_v12 = vld [vmem:[%s27272_s6 + $0x80] sm:$0xff]  }
 0xae0   :  { %v8743_v37 = vmax.f32 %v8645_v20, %v8732_v54  ;;  %20120 = vmatprep.mubr.msk.f32.mxu0 %vm5783_vm1, %v8829_v47  ;;  %v25906_v20 = vld [vmem:[%s27272_s6 + $0x38] sm:$0xff]   ;;  %v26861_v54 = vunpack.c.l.bf16 %v25935_v12  ;;  %v25953_v47 = vld [vmem:[%s27272_s6 + $0x88] sm:$0xff]  }
 0xae1   :  { %20121 = vmatmul.mubr.msk.f32.gmra.mrb[198].mxu0 %vm5783_vm1, %v20100_v13  ;;  %v26880_v10 = vunpack.c.l.bf16 %v25906_v20  ;;  %v26878_v8 = vunpack.c.h.bf16 %v25906_v20  ;;  %v27282_v38 = vunpack.c.l.bf16 %v25906_v20 }
 0xae2   :  { %20131 = vmatprep.mubr.msk.f32.mxu0 %vm338_vm0, %v15976_v55 }
 0xbb0   :  { %v20119_v11 = vpop.f32.mrb[196].mxu0 }
 0xbb1   :  { %v8937_v61 = vadd.f32 %v20119_v11, %v15343_v9  ;;  %v8931_v19 = vpop.f32.mrb[197].mxu0 }
 0xbb2   :  { %v8932_v26 = vadd.f32 %v15343_v9, %v8931_v19  ;;  %v26859_v19 = vunpack.c.l.bf16 %v25953_v47 }
 0xbb3   :  { %v25779_v58 = vadd.f32 %v8937_v61, %v8742_v22  ;;  %v25923_v22 = vld [vmem:[%s27272_s6 + $0x50] sm:$0xff]  }
 0xbb4   :  { %v25781_v24 = vadd.f32 %v8932_v26, %v8741_v33  ;;  %v20122_v25 = vpop.f32.mrb[198].mxu0  ;;  %v26862_v33 = vunpack.c.h.bf16 %v25909_v15  ;;  %v26876_v13 = vunpack.c.l.bf16 %v25923_v22  ;;  %v25971_v61 = vld [vmem:[%s27272_s6 + $0x70] sm:$0xff]  }
 0xbb5   :  { %v8955_v42 = vmax.f32 %v25779_v58, 0.0  ;;  %v8947_v29 = vadd.f32 %v20122_v25, %v15343_v9  ;;  %v8941_v31 = vpop.f32.mrb[199].mxu0  ;;  %v26858_v25 = vunpack.c.h.bf16 %v25953_v47 }
 0xbb6   :  { %v8954_v36 = vmax.f32 %v25781_v24, 0.0  ;;  %v8942_v17 = vadd.f32 %v15343_v9, %v8941_v31  ;;  %v26860_v9 = vunpack.c.h.bf16 %v25935_v12  ;;  %v26866_v31 = vunpack.c.h.bf16 %v25971_v61 }
 0xbb7   :  { %v25787_v50 = vadd.f32 %v8947_v29, %v8744_v18  ;;  %v25943_v18 = vld [vmem:[%s27272_s6 + $0x58] sm:$0xff]  }
 0xbb8   :  { %v25789_v35 = vpack.c.bf16 %v8955_v42, %v8954_v36  ;;  %v25791_v46 = vadd.f32 %v8942_v17, %v8743_v37  ;;  %v26874_v37 = vunpack.c.h.bf16 %v25923_v22  ;;  %v26872_v11 = vunpack.c.l.bf16 %v25943_v18  ;;  %v25992_v29 = vld [vmem:[%s27272_s6 + $0x78] sm:$0xff]  }
 0xbb9   :  { %v8957_v45 = vmax.f32 %v25787_v50, 0.0  ;;  %v26870_v26 = vunpack.c.h.bf16 %v25943_v18  ;;  %v26868_v42 = vunpack.c.l.bf16 %v25971_v61  ;;  %v26864_v36 = vunpack.c.l.bf16 %v25992_v29 }
 0xbba   :  { %v8956_v53 = vmax.f32 %v25791_v46, 0.0  ;;  %22050 = vmatprep.subr.bf16.mxu0 %v25789_v35  ;;  %22066 = vmatprep.subr.bf16.mxu1 %v25789_v35  ;;  %v26863_v17 = vunpack.c.h.bf16 %v25992_v29 }
 0xbbb   :  { %22052 = vmatpush3.bf16.msra.mxu0 %v25789_v35  ;;  %22068 = vmatpush3.bf16.msra.mxu1 %v25789_v35 }
 0xbbc   :  { %v25801_v3 = vpack.c.bf16 %v8957_v45, %v8956_v53  ;;  %v10062_v45 = vld [vmem:[%s27273_s10 + $0x8] sm:$0xff] }
 0xbbe   :  { %22054 = vmatprep.subr.bf16.mxu0 %v25801_v3  ;;  %22070 = vmatprep.subr.bf16.mxu1 %v25801_v3 }
 0xbbf   :  { %22056 = vmatpush3.bf16.msra.mxu0 %v25801_v3  ;;  %22072 = vmatpush3.bf16.msra.mxu1 %v25801_v3 }
 0xbc0   :  { %22058 = vmatprep.subr.bf16.mxu0 %v25789_v35  ;;  %22082 = vmatprep.subr.bf16.mxu1 %v25789_v35 }
 0xbc2   :  { %20132 = vmatmul.mubr.msk.f32.vlgmr.msra.gmra.mrb[200].mxu0 %vm338_vm0, %v15977_v56  ;;  %20160 = vmatmul.mubr.msk.f32.vlgmr.msra.gmra.mrb[84].mxu1 %vm338_vm0, %v26883_v43 }
 0xbc3   :  { %22060 = vmatpush3.bf16.msra.mxu0 %v25789_v35  ;;  %22084 = vmatpush3.bf16.msra.mxu1 %v25789_v35 }
 0xbc4   :  { %22062 = vmatprep.subr.bf16.mxu0 %v25801_v3  ;;  %22086 = vmatprep.subr.bf16.mxu1 %v25801_v3 }
 0xbc5   :  { %20134 = vmatprep.mubr.msk.f32.mxu0 %vm338_vm0, %v15980_v44  ;;  %20162 = vmatprep.mubr.msk.f32.mxu1 %vm338_vm0, %v26881_v1 }
 0xbc6   :  { %20135 = vmatmul.mubr.msk.f32.gmra.mrb[202].mxu0 %vm338_vm0, %v15981_v21  ;;  %20163 = vmatmul.mubr.msk.f32.gmra.mrb[86].mxu1 %vm338_vm0, %v26879_v28 }
 0xbc7   :  { %22064 = vmatpush3.bf16.msra.mxu0 %v25801_v3  ;;  %22088 = vmatpush3.bf16.msra.mxu1 %v25801_v3 }
 0xbc8   :  { %22074 = vmatprep.subr.bf16.mxu0 %v25789_v35  ;;  %22098 = vmatprep.subr.bf16.mxu1 %v25789_v35 }
 0xbc9   :  { %20145 = vmatprep.mubr.msk.f32.mxu0 %vm338_vm0, %v15984_v63  ;;  %20187 = vmatprep.mubr.msk.f32.mxu1 %vm338_vm0, %v26877_v14 }
 0xbca   :  { %20146 = vmatmul.mubr.msk.f32.vlgmr.msra.gmra.mrb[204].mxu0 %vm338_vm0, %v15985_v34  ;;  %20188 = vmatmul.mubr.msk.f32.vlgmr.msra.gmra.mrb[88].mxu1 %vm338_vm0, %v26875_v5 }
 0xbcb   :  { %22076 = vmatpush3.bf16.msra.mxu0 %v25789_v35  ;;  %22100 = vmatpush3.bf16.msra.mxu1 %v25789_v35 }
 0xbcc   :  { %22078 = vmatprep.subr.bf16.mxu0 %v25801_v3  ;;  %22102 = vmatprep.subr.bf16.mxu1 %v25801_v3 }
 0xbcd   :  { %20148 = vmatprep.mubr.msk.f32.mxu0 %vm338_vm0, %v15988_v51  ;;  %20190 = vmatprep.mubr.msk.f32.mxu1 %vm338_vm0, %v26873_v23 }
 0xbce   :  { %20149 = vmatmul.mubr.msk.f32.gmra.mrb[206].mxu0 %vm338_vm0, %v15989_v62  ;;  %20191 = vmatmul.mubr.msk.f32.gmra.mrb[90].mxu1 %vm338_vm0, %v26871_v48 }
 0xbcf   :  { %22080 = vmatpush3.bf16.msra.mxu0 %v25801_v3  ;;  %22104 = vmatpush3.bf16.msra.mxu1 %v25801_v3 }
 0xbd0   :  { %22090 = vmatprep.subr.bf16.mxu0 %v25789_v35  ;;  %22114 = vmatprep.subr.bf16.mxu1 %v25789_v35 }
 0xbd1   :  { %20173 = vmatprep.mubr.msk.f32.mxu0 %vm338_vm0, %v26884_v30  ;;  %20215 = vmatprep.mubr.msk.f32.mxu1 %vm338_vm0, %v26869_v39 }
 0xbd2   :  { %20174 = vmatmul.mubr.msk.f32.vlgmr.msra.gmra.mrb[208].mxu0 %vm338_vm0, %v26882_v60  ;;  %20216 = vmatmul.mubr.msk.f32.vlgmr.msra.gmra.mrb[92].mxu1 %vm338_vm0, %v26867_v27  ;;  %v15373_v27 = vld [vmem:[%s27274_s11 + $0x2] ss:$0 sm:$0xff] }
 0xbd3   :  { %22092 = vmatpush3.bf16.msra.mxu0 %v25789_v35  ;;  %22116 = vmatpush3.bf16.msra.mxu1 %v25789_v35 }
 0xbd4   :  { %22094 = vmatprep.subr.bf16.mxu0 %v25801_v3  ;;  %22118 = vmatprep.subr.bf16.mxu1 %v25801_v3 }
 0xbd5   :  { %20176 = vmatprep.mubr.msk.f32.mxu0 %vm338_vm0, %v26880_v10  ;;  %20218 = vmatprep.mubr.msk.f32.mxu1 %vm338_vm0, %v26865_v0 }
 0xbd6   :  { %20177 = vmatmul.mubr.msk.f32.gmra.mrb[210].mxu0 %vm338_vm0, %v26878_v8  ;;  %20219 = vmatmul.mubr.msk.f32.gmra.mrb[94].mxu1 %vm338_vm0, %v26862_v33 }
 0xbd7   :  { %22096 = vmatpush3.bf16.msra.mxu0 %v25801_v3  ;;  %22120 = vmatpush3.bf16.msra.mxu1 %v25801_v3 }
 0xbd8   :  { %22106 = vmatprep.subr.bf16.mxu0 %v25789_v35  ;;  %20201 = vmatprep.mubr.msk.f32.mxu0 %vm338_vm0, %v26876_v13 }
 0xbd9   :  { %20243 = vmatprep.mubr.msk.f32.mxu1 %vm338_vm0, %v26861_v54  ;;  %v15352_v54 = vld [vmem:[%s27274_s11] ss:$0 sm:$0xff] }
 0xbda   :  { %20202 = vmatmul.mubr.msk.f32.vlgmr.msra.gmra.mrb[212].mxu0 %vm338_vm0, %v26874_v37  ;;  %20244 = vmatmul.mubr.msk.f32.vlgmr.msra.gmra.mrb[96].mxu1 %vm338_vm0, %v26860_v9 }
 0xbdb   :  { %22108 = vmatpush3.bf16.msra.mxu0 %v25789_v35  ;;  %20204 = vmatprep.mubr.msk.f32.mxu0 %vm338_vm0, %v26872_v11  ;;  %v10061_v35 = vld [vmem:[%s27273_s10] sm:$0xff] }
 0xbdc   :  { %22110 = vmatprep.subr.bf16.mxu0 %v25801_v3  ;;  %20246 = vmatprep.mubr.msk.f32.mxu1 %vm338_vm0, %v26859_v19  ;;  %v22121_v53 = vpack.c.bf16 %v10062_v45, %v10061_v35  ;;  %v15353_v45 = vld [vmem:[%s27275_s4] ss:$0 sm:$0xff] }
 0xbde   :  { %20205 = vmatmul.mubr.msk.f32.gmra.mrb[214].mxu0 %vm338_vm0, %v26870_v26  ;;  %20247 = vmatmul.mubr.msk.f32.gmra.mrb[98].mxu1 %vm338_vm0, %v26858_v25 }
 0xbdf   :  { %22112 = vmatpush3.bf16.msra.mxu0 %v25801_v3  ;;  %20229 = vmatprep.mubr.msk.f32.mxu0 %vm338_vm0, %v26868_v42  ;;  %v10064_v3 = vld [vmem:[%s27273_s10 + $0x18] sm:$0xff] }
 0xbe0   :  { %20271 = vmatprep.mubr.msk.f32.mxu1 %vm338_vm0, %v15976_v55  ;;  %22122 = vmatprep.subr.bf16.mxu0 %v22121_v53  ;;  %v10063_v55 = vld [vmem:[%s27273_s10 + $0x10] sm:$0xff] }
 0xbe1   :  { %v22125_v57 = vpack.c.bf16 %v10064_v3, %v10063_v55 }
 0xbe2   :  { %20230 = vmatmul.mubr.msk.f32.vlgmr.msra.gmra.mrb[216].mxu0 %vm338_vm0, %v26866_v31  ;;  %v15363_v31 = vld [vmem:[%s27274_s11 + $0x1] ss:$0 sm:$0xff] }
 0xbe3   :  { %20232 = vmatprep.mubr.msk.f32.mxu0 %vm338_vm0, %v26864_v36  ;;  %22124 = vmatpush3.bf16.msra.mxu0 %v22121_v53 }
 0xbe4   :  { %22126 = vmatprep.subr.bf16.mxu0 %v22125_v57 }
 0xbe6   :  { %20233 = vmatmul.mubr.msk.f32.gmra.mrb[218].mxu0 %vm338_vm0, %v26863_v17 }
 0xbe7   :  { %22128 = vmatpush3.bf16.msra.mxu0 %v22125_v57 }
 0xc95   :  { %v20133_v52 = vpop.f32.mrb[200].mxu0  ;;  %v20161_v25 = vpop.f32.mrb[84].mxu1 }
 0xc96   :  { %v9045_v19 = vpop.f32.mrb[201].mxu0  ;;  %v9294_v9 = vpop.f32.mrb[85].mxu1  ;;  %v9072_v36 = vmul.f32 %v20133_v52, %v15352_v54  ;;  %v9322_v48 = vmul.f32 %v20161_v25, %v15373_v27 }
 0xc97   :  { %v9071_v53 = vmul.f32 %v15352_v54, %v9045_v19  ;;  %v9321_v13 = vmul.f32 %v15373_v27, %v9294_v9 }
 0xc98   :  { %v9082_v55 = vadd.f32 %v15353_v45, %v9072_v36 }
 0xc99   :  { %v20136_v33 = vpop.f32.mrb[202].mxu0  ;;  %v20164_v17 = vpop.f32.mrb[86].mxu1  ;;  %v9081_v23 = vadd.f32 %v15353_v45, %v9071_v53  ;;  %v15383_v53 = vld [vmem:[%s27274_s11 + $0x3] ss:$0 sm:$0xff] }
 0xc9a   :  { %v9055_v0 = vpop.f32.mrb[203].mxu0  ;;  %v9304_v35 = vpop.f32.mrb[87].mxu1  ;;  %v9074_v3 = vmul.f32 %v20136_v33, %v15352_v54  ;;  %v9324_v36 = vmul.f32 %v20164_v17, %v15373_v27 }
 0xc9b   :  { %v9073_v37 = vmul.f32 %v15352_v54, %v9055_v0  ;;  %v9323_v30 = vmul.f32 %v15373_v27, %v9304_v35  ;;  %v15393_v0 = vld [vmem:[%s27274_s11 + $0x4] ss:$0 sm:$0xff] }
 0xc9c   :  { %v9084_v28 = vadd.f32 %v15353_v45, %v9074_v3 }
 0xc9d   :  { %v20147_v42 = vpop.f32.mrb[204].mxu0  ;;  %v20189_v39 = vpop.f32.mrb[88].mxu1 }
 0xc9e   :  { %v9200_v26 = vmul.f32 %v20147_v42, %v15363_v31  ;;  %v9172_v57 = vpop.f32.mrb[205].mxu0  ;;  %v9538_v11 = vpop.f32.mrb[89].mxu1  ;;  %v9083_v42 = vadd.f32 %v15353_v45, %v9073_v37 }
 0xc9f   :  { %v9199_v5 = vmul.f32 %v15363_v31, %v9172_v57  ;;  %v9565_v17 = vmul.f32 %v15393_v0, %v9538_v11 }
 0xca0   :  { %v9204_v52 = vadd.f32 %v9200_v26, %v9082_v55  ;;  %v9566_v55 = vmul.f32 %v20189_v39, %v15393_v0  ;;  %v15413_v39 = vld [vmem:[%s27274_s11 + $0x6] ss:$0 sm:$0xff] }
 0xca1   :  { %v9203_v14 = vadd.f32 %v9199_v5, %v9081_v23  ;;  %v20150_v8 = vpop.f32.mrb[206].mxu0  ;;  %v20192_v19 = vpop.f32.mrb[90].mxu1 }
 0xca2   :  { %v9326_v10 = vadd.f32 %v9322_v48, %v9204_v52  ;;  %v9202_v1 = vmul.f32 %v20150_v8, %v15363_v31  ;;  %v9182_v60 = vpop.f32.mrb[207].mxu0  ;;  %v9548_v33 = vpop.f32.mrb[91].mxu1 }
 0xca3   :  { %v9325_v43 = vadd.f32 %v9321_v13, %v9203_v14  ;;  %v9201_v25 = vmul.f32 %v15363_v31, %v9182_v60 }
 0xca4   :  { %v9206_v54 = vadd.f32 %v9202_v1, %v9084_v28  ;;  %v9568_v28 = vmul.f32 %v20192_v19, %v15393_v0 }
 0xca5   :  { %v9205_v57 = vadd.f32 %v9201_v25, %v9083_v42  ;;  %v20175_v9 = vpop.f32.mrb[208].mxu0  ;;  %v20217_v40 = vpop.f32.mrb[92].mxu1  ;;  %v15403_v42 = vld [vmem:[%s27274_s11 + $0x5] ss:$0 sm:$0xff] }
 0xca6   :  { %v9328_v26 = vadd.f32 %v9324_v36, %v9206_v54  ;;  %v9444_v5 = vmul.f32 %v20175_v9, %v15383_v53  ;;  %v9416_v23 = vpop.f32.mrb[209].mxu0  ;;  %v9782_v3 = vpop.f32.mrb[93].mxu1  ;;  %v9567_v36 = vmul.f32 %v15393_v0, %v9548_v33 }
 0xca7   :  { %v9327_v48 = vadd.f32 %v9323_v30, %v9205_v57  ;;  %v9443_v8 = vmul.f32 %v15383_v53, %v9416_v23  ;;  %v9809_v19 = vmul.f32 %v15413_v39, %v9782_v3 }
 0xca8   :  { %v9448_v37 = vadd.f32 %v9444_v5, %v9326_v10 }
 0xca9   :  { %v9447_v14 = vadd.f32 %v9443_v8, %v9325_v43  ;;  %v20178_v60 = vpop.f32.mrb[210].mxu0  ;;  %v20220_v27 = vpop.f32.mrb[94].mxu1  ;;  %v9810_v43 = vmul.f32 %v20217_v40, %v15413_v39  ;;  %v15433_v40 = vld [vmem:[%s27274_s11 + $0x8] ss:$0 sm:$0xff] }
 0xcaa   :  { %v9570_v13 = vadd.f32 %v9566_v55, %v9448_v37  ;;  %v9446_v31 = vmul.f32 %v20178_v60, %v15383_v53  ;;  %v9426_v1 = vpop.f32.mrb[211].mxu0  ;;  %v9792_v35 = vpop.f32.mrb[95].mxu1 }
 0xcab   :  { %v9569_v45 = vadd.f32 %v9565_v17, %v9447_v14  ;;  %v9445_v52 = vmul.f32 %v15383_v53, %v9426_v1  ;;  %v9811_v1 = vmul.f32 %v15413_v39, %v9792_v35 }
 0xcac   :  { %v9450_v25 = vadd.f32 %v9446_v31, %v9328_v26 }
 0xcad   :  { %v9449_v54 = vadd.f32 %v9445_v52, %v9327_v48  ;;  %v20203_v30 = vpop.f32.mrb[212].mxu0  ;;  %v20245_v57 = vpop.f32.mrb[96].mxu1  ;;  %v9812_v48 = vmul.f32 %v20220_v27, %v15413_v39 }
 0xcae   :  { %v9572_v9 = vadd.f32 %v9568_v28, %v9450_v25  ;;  %v9688_v11 = vmul.f32 %v20203_v30, %v15403_v42  ;;  %v9660_v10 = vpop.f32.mrb[213].mxu0  ;;  %v10026_v5 = vpop.f32.mrb[97].mxu1  ;;  %v15423_v28 = vld [vmem:[%s27274_s11 + $0x7] ss:$0 sm:$0xff] }
 0xcaf   :  { %v9571_v23 = vadd.f32 %v9567_v36, %v9449_v54  ;;  %v9687_v55 = vmul.f32 %v15403_v42, %v9660_v10  ;;  %v10053_v10 = vmul.f32 %v15433_v40, %v10026_v5  ;;  %v15434_v5 = vld [vmem:[%s27276_s15] ss:$0 sm:$0xff] }
 0xcb0   :  { %v9692_v8 = vadd.f32 %v9688_v11, %v9570_v13  ;;  %v10054_v13 = vmul.f32 %v20245_v57, %v15433_v40 }
 0xcb1   :  { %v9691_v17 = vadd.f32 %v9687_v55, %v9569_v45  ;;  %v20206_v53 = vpop.f32.mrb[214].mxu0  ;;  %v20248_v33 = vpop.f32.mrb[98].mxu1 }
 0xcb2   :  { %v9814_v0 = vadd.f32 %v9810_v43, %v9692_v8  ;;  %v9690_v37 = vmul.f32 %v20206_v53, %v15403_v42  ;;  %v9670_v26 = vpop.f32.mrb[215].mxu0  ;;  %v10036_v14 = vpop.f32.mrb[99].mxu1  ;;  %v10056_v35 = vmul.f32 %v20248_v33, %v15433_v40 }
 0xcb3   :  { %v9813_v60 = vadd.f32 %v9809_v19, %v9691_v17  ;;  %v9689_v31 = vmul.f32 %v15403_v42, %v9670_v26 }
 0xcb4   :  { %v9694_v52 = vadd.f32 %v9690_v37, %v9572_v9  ;;  %v10055_v9 = vmul.f32 %v15433_v40, %v10036_v14 }
 0xcb5   :  { %v9693_v25 = vadd.f32 %v9689_v31, %v9571_v23  ;;  %v20231_v36 = vpop.f32.mrb[216].mxu0 }
 0xcb6   :  { %v9816_v54 = vadd.f32 %v9812_v48, %v9694_v52  ;;  %v9932_v30 = vmul.f32 %v20231_v36, %v15423_v28  ;;  %v9904_v3 = vpop.f32.mrb[217].mxu0 }
 0xcb7   :  { %v9815_v45 = vadd.f32 %v9811_v1, %v9693_v25  ;;  %v9931_v11 = vmul.f32 %v15423_v28, %v9904_v3  ;;  %v27298_v3 = vunpack.c.l.bf16 %v25909_v15 }
 0xcb8   :  { %v9936_v43 = vadd.f32 %v9932_v30, %v9814_v0  ;;  %v27295_v30 = vunpack.c.l.bf16 %v25971_v61 }
 0xcb9   :  { %v9935_v55 = vadd.f32 %v9931_v11, %v9813_v60  ;;  %v20234_v8 = vpop.f32.mrb[218].mxu0  ;;  %v27303_v11 = vunpack.c.h.bf16 %v25935_v12 }
 0xcba   :  { %v10058_v27 = vadd.f32 %v10054_v13, %v9936_v43  ;;  %v9934_v19 = vmul.f32 %v20234_v8, %v15423_v28  ;;  %v9914_v42 = vpop.f32.mrb[219].mxu0  ;;  %v27299_v13 = vunpack.c.l.bf16 %v25992_v29  ;;  %v11089_v43 = vld [vmem:[%s27294_s16 + $0x8] sm:$0xff]  ;;  %v11090_v8 = vld [vmem:[%s27294_s16 + $0x10] sm:$0xff] }
 0xcbb   :  { %v10057_v39 = vadd.f32 %v10053_v10, %v9935_v55  ;;  %v9933_v17 = vmul.f32 %v15423_v28, %v9914_v42  ;;  %v27304_v10 = vunpack.c.l.bf16 %v25953_v47  ;;  %v11093_v42 = vld [vmem:[%s27294_s16 + $0x28] sm:$0xff] }
 0xcbc   :  { %v9938_v23 = vadd.f32 %v9934_v19, %v9816_v54  ;;  %v27293_v54 = vunpack.c.l.bf16 %v25883_v4  ;;  %v11092_v19 = vld [vmem:[%s27294_s16 + $0x20] sm:$0xff] }
 0xcbd   :  { %v9937_v53 = vadd.f32 %v9933_v17, %v9815_v45  ;;  %20257 = vmatprep.mubr.msk.f32.mxu0 %vm338_vm0, %v10057_v39  ;;  %v27302_v45 = vunpack.c.l.bf16 %v25935_v12  ;;  %v11091_v12 = vld [vmem:[%s27294_s16 + $0x18] sm:$0xff] }
 0xcbe   :  { %v10060_v37 = vadd.f32 %v10056_v35, %v9938_v23  ;;  %20258 = vmatmul.mubr.msk.f32.vlgmr.msra.gmra.mrb[220].mxu0 %vm338_vm0, %v10058_v27  ;;  %v22205_v27 = vpack.c.bf16 %v11091_v12, %v11090_v8  ;;  %v11094_v35 = vld [vmem:[%s27294_s16 + $0x30] sm:$0xff]  ;;  %v11095_v39 = vld [vmem:[%s27294_s16 + $0x38] sm:$0xff]  ;;  %v15450_v23 = vld [vmem:[%s27306_s18 + $0x1] ss:$0 sm:$0xff] }
 0xcbf   :  { %v10059_v57 = vadd.f32 %v10055_v9, %v9937_v53  ;;  %v22213_v17 = vpack.c.bf16 %v11095_v39, %v11094_v35  ;;  %v15443_v9 = vld [vmem:[%s27306_s18] ss:$0 sm:$0xff] }
 0xcc0   :  { %v15444_v53 = vld [vmem:[%s27307_s20] ss:$0 sm:$0xff] }
 0xcc1   :  { %20260 = vmatprep.mubr.msk.f32.mxu0 %vm338_vm0, %v10059_v57 }
 0xcc2   :  { %20261 = vmatmul.mubr.msk.f32.gmra.mrb[222].mxu0 %vm338_vm0, %v10060_v37 }
 0xcc3   :  { %20285 = vmatprep.mubr.msk.f32.mxu0 %vm338_vm0, %v15984_v63 }
 0xd91   :  { %v20259_v33 = vpop.f32.mrb[220].mxu0 }
 0xd92   :  { %v10156_v0 = vadd.f32 %v20259_v33, %v15434_v5  ;;  %v10150_v26 = vpop.f32.mrb[221].mxu0 }
 0xd93   :  { %v10151_v48 = vadd.f32 %v15434_v5, %v10150_v26 }
 0xd94   :  { %v10170_v14 = vmax.f32 %v10156_v0, 0.0 }
 0xd95   :  { %v10169_v60 = vmax.f32 %v10151_v48, 0.0  ;;  %v20262_v31 = vpop.f32.mrb[222].mxu0 }
 0xd96   :  { %v10166_v1 = vadd.f32 %v20262_v31, %v15434_v5  ;;  %v10160_v28 = vpop.f32.mrb[223].mxu0 }
 0xd97   :  { %v26044_v40 = vpack.c.bf16 %v10170_v14, %v10169_v60  ;;  %v10161_v52 = vadd.f32 %v15434_v5, %v10160_v28 }
 0xd98   :  { %v10172_v25 = vmax.f32 %v10166_v1, 0.0 }
 0xd99   :  { %v10171_v36 = vmax.f32 %v10161_v52, 0.0  ;;  %22130 = vmatprep.subr.bf16.mxu1 %v26044_v40  ;;  %22138 = vmatprep.subr.bf16.mxu0 %v26044_v40 }
 0xd9a   :  { %22132 = vmatpush3.bf16.msra.mxu1 %v26044_v40  ;;  %22140 = vmatpush3.bf16.msra.mxu0 %v26044_v40 }
 0xd9b   :  { %v22133_v63 = vpack.c.bf16 %v10172_v25, %v10171_v36 }
 0xd9d   :  { %22134 = vmatprep.subr.bf16.mxu1 %v22133_v63  ;;  %22142 = vmatprep.subr.bf16.mxu0 %v22133_v63 }
 0xd9e   :  { %22136 = vmatpush3.bf16.msra.mxu1 %v22133_v63  ;;  %22144 = vmatpush3.bf16.msra.mxu0 %v22133_v63 }
 0xd9f   :  { %22146 = vmatprep.subr.bf16.mxu1 %v26044_v40  ;;  %22154 = vmatprep.subr.bf16.mxu0 %v26044_v40 }
 0xda1   :  { %20272 = vmatmul.mubr.msk.f32.vlgmr.msra.gmra.mrb[100].mxu1 %vm338_vm0, %v15977_v56  ;;  %20286 = vmatmul.mubr.msk.f32.vlgmr.msra.gmra.mrb[224].mxu0 %vm338_vm0, %v15985_v34  ;;  %v27278_v56 = vunpack.c.l.bf16 %v25880_v7  ;;  %v27284_v34 = vunpack.c.h.bf16 %v25906_v20  ;;  %v27290_v20 = vunpack.c.l.bf16 %v25943_v18 }
 0xda2   :  { %22148 = vmatpush3.bf16.msra.mxu1 %v26044_v40  ;;  %22156 = vmatpush3.bf16.msra.mxu0 %v26044_v40 }
 0xda3   :  { %22150 = vmatprep.subr.bf16.mxu1 %v22133_v63  ;;  %22158 = vmatprep.subr.bf16.mxu0 %v22133_v63 }
 0xda4   :  { %20274 = vmatprep.mubr.msk.f32.mxu1 %vm338_vm0, %v15980_v44  ;;  %20288 = vmatprep.mubr.msk.f32.mxu0 %vm338_vm0, %v15988_v51  ;;  %v27280_v44 = vunpack.c.h.bf16 %v25880_v7  ;;  %v27286_v51 = vunpack.c.l.bf16 %v25923_v22  ;;  %v27289_v7 = vunpack.c.l.bf16 %v25857_v59 }
 0xda5   :  { %20275 = vmatmul.mubr.msk.f32.gmra.mrb[102].mxu1 %vm338_vm0, %v15981_v21  ;;  %20289 = vmatmul.mubr.msk.f32.gmra.mrb[226].mxu0 %vm338_vm0, %v15989_v62  ;;  %v27281_v21 = vunpack.c.l.bf16 %v25811_v49  ;;  %v27287_v49 = vunpack.c.h.bf16 %v25831_v32  ;;  %v27288_v62 = vunpack.c.h.bf16 %v25923_v22  ;;  %v27291_v32 = vunpack.c.h.bf16 %v25857_v59 }
 0xda6   :  { %22152 = vmatpush3.bf16.msra.mxu1 %v22133_v63  ;;  %22160 = vmatpush3.bf16.msra.mxu0 %v22133_v63  ;;  %v27292_v22 = vunpack.c.h.bf16 %v25943_v18  ;;  %v27296_v59 = vunpack.c.h.bf16 %v25883_v4  ;;  %v27297_v18 = vunpack.c.h.bf16 %v25971_v61  ;;  %v27300_v4 = vunpack.c.h.bf16 %v25909_v15 }
 0xda7   :  { %22162 = vmatprep.subr.bf16.mxu1 %v26044_v40  ;;  %22170 = vmatprep.subr.bf16.mxu0 %v26044_v40  ;;  %v27301_v61 = vunpack.c.h.bf16 %v25992_v29  ;;  %v27305_v15 = vunpack.c.h.bf16 %v25953_v47  ;;  %v11088_v29 = vld [vmem:[%s27294_s16] sm:$0xff]  ;;  %v22209_v47 = vpack.c.bf16 %v11093_v42, %v11092_v19 }
 0xda8   :  { %20299 = vmatprep.mubr.msk.f32.mxu1 %vm338_vm0, %v27277_v41  ;;  %20313 = vmatprep.mubr.msk.f32.mxu0 %vm338_vm0, %v27278_v56  ;;  %v22201_v55 = vpack.c.bf16 %v11089_v43, %v11088_v29  ;;  %v15468_v43 = vld [vmem:[%s27306_s18 + $0x4] ss:$0 sm:$0xff] }
 0xda9   :  { %20300 = vmatmul.mubr.msk.f32.vlgmr.msra.gmra.mrb[104].mxu1 %vm338_vm0, %v27279_v6  ;;  %20314 = vmatmul.mubr.msk.f32.vlgmr.msra.gmra.mrb[228].mxu0 %vm338_vm0, %v27280_v44  ;;  %v15456_v44 = vld [vmem:[%s27306_s18 + $0x2] ss:$0 sm:$0xff] }
 0xdaa   :  { %22164 = vmatpush3.bf16.msra.mxu1 %v26044_v40  ;;  %22172 = vmatpush3.bf16.msra.mxu0 %v26044_v40 }
 0xdab   :  { %22166 = vmatprep.subr.bf16.mxu1 %v22133_v63  ;;  %22174 = vmatprep.subr.bf16.mxu0 %v22133_v63 }
 0xdac   :  { %20302 = vmatprep.mubr.msk.f32.mxu1 %vm338_vm0, %v27281_v21  ;;  %20316 = vmatprep.mubr.msk.f32.mxu0 %vm338_vm0, %v27282_v38  ;;  %v15462_v21 = vld [vmem:[%s27306_s18 + $0x3] ss:$0 sm:$0xff] }
 0xdad   :  { %20303 = vmatmul.mubr.msk.f32.gmra.mrb[106].mxu1 %vm338_vm0, %v27283_v16  ;;  %20317 = vmatmul.mubr.msk.f32.gmra.mrb[230].mxu0 %vm338_vm0, %v27284_v34 }
 0xdae   :  { %22168 = vmatpush3.bf16.msra.mxu1 %v22133_v63  ;;  %22176 = vmatpush3.bf16.msra.mxu0 %v22133_v63 }
 0xdaf   :  { %22178 = vmatprep.subr.bf16.mxu1 %v26044_v40  ;;  %22186 = vmatprep.subr.bf16.mxu0 %v26044_v40 }
 0xdb0   :  { %20327 = vmatprep.mubr.msk.f32.mxu1 %vm338_vm0, %v27285_v2  ;;  %20341 = vmatprep.mubr.msk.f32.mxu0 %vm338_vm0, %v27286_v51 }
 0xdb1   :  { %20328 = vmatmul.mubr.msk.f32.vlgmr.msra.gmra.mrb[108].mxu1 %vm338_vm0, %v27287_v49  ;;  %20342 = vmatmul.mubr.msk.f32.vlgmr.msra.gmra.mrb[232].mxu0 %vm338_vm0, %v27288_v62 }
 0xdb2   :  { %22180 = vmatpush3.bf16.msra.mxu1 %v26044_v40  ;;  %22188 = vmatpush3.bf16.msra.mxu0 %v26044_v40 }
 0xdb3   :  { %22182 = vmatprep.subr.bf16.mxu1 %v22133_v63  ;;  %22190 = vmatprep.subr.bf16.mxu0 %v22133_v63 }
 0xdb4   :  { %20330 = vmatprep.mubr.msk.f32.mxu1 %vm338_vm0, %v27289_v7  ;;  %20344 = vmatprep.mubr.msk.f32.mxu0 %vm338_vm0, %v27290_v20 }
 0xdb5   :  { %20331 = vmatmul.mubr.msk.f32.gmra.mrb[110].mxu1 %vm338_vm0, %v27291_v32  ;;  %20345 = vmatmul.mubr.msk.f32.gmra.mrb[234].mxu0 %vm338_vm0, %v27292_v22 }
 0xdb6   :  { %22184 = vmatpush3.bf16.msra.mxu1 %v22133_v63  ;;  %22192 = vmatpush3.bf16.msra.mxu0 %v22133_v63 }
 0xdb7   :  { %22194 = vmatprep.subr.bf16.mxu1 %v26044_v40  ;;  %20355 = vmatprep.mubr.msk.f32.mxu1 %vm338_vm0, %v27293_v54 }
 0xdb8   :  { %20369 = vmatprep.mubr.msk.f32.mxu0 %vm338_vm0, %v27295_v30  ;;  %22202 = vmatprep.subr.bf16.mxu0 %v22201_v55 }
 0xdb9   :  { %20356 = vmatmul.mubr.msk.f32.vlgmr.msra.gmra.mrb[112].mxu1 %vm338_vm0, %v27296_v59  ;;  %20370 = vmatmul.mubr.msk.f32.vlgmr.msra.gmra.mrb[236].mxu0 %vm338_vm0, %v27297_v18 }
 0xdba   :  { %22196 = vmatpush3.bf16.msra.mxu1 %v26044_v40  ;;  %20358 = vmatprep.mubr.msk.f32.mxu1 %vm338_vm0, %v27298_v3 }
 0xdbb   :  { %22198 = vmatprep.subr.bf16.mxu1 %v22133_v63  ;;  %20372 = vmatprep.mubr.msk.f32.mxu0 %vm338_vm0, %v27299_v13 }
 0xdbc   :  { %22204 = vmatpush3.bf16.msra.mxu0 %v22201_v55  ;;  %v15474_v55 = vld [vmem:[%s27306_s18 + $0x5] ss:$0 sm:$0xff] }
 0xdbd   :  { %20359 = vmatmul.mubr.msk.f32.gmra.mrb[114].mxu1 %vm338_vm0, %v27300_v4  ;;  %20373 = vmatmul.mubr.msk.f32.gmra.mrb[238].mxu0 %vm338_vm0, %v27301_v61 }
 0xdbe   :  { %22200 = vmatpush3.bf16.msra.mxu1 %v22133_v63  ;;  %20383 = vmatprep.mubr.msk.f32.mxu1 %vm338_vm0, %v27302_v45 }
 0xdbf   :  { %22206 = vmatprep.subr.bf16.mxu0 %v22205_v27 }
 0xdc0   :  { %22208 = vmatpush3.bf16.msra.mxu0 %v22205_v27 }
 0xdc1   :  { %20384 = vmatmul.mubr.msk.f32.vlgmr.msra.gmra.mrb[116].mxu1 %vm338_vm0, %v27303_v11  ;;  %22210 = vmatprep.subr.bf16.mxu0 %v22209_v47 }
 0xdc2   :  { %20386 = vmatprep.mubr.msk.f32.mxu1 %vm338_vm0, %v27304_v10 }
 0xdc4   :  { %22212 = vmatpush3.bf16.msra.mxu0 %v22209_v47 }
 0xdc5   :  { %20387 = vmatmul.mubr.msk.f32.gmra.mrb[118].mxu1 %vm338_vm0, %v27305_v15  ;;  %22214 = vmatprep.subr.bf16.mxu0 %v22213_v17 }
 0xdc8   :  { %22216 = vmatpush3.bf16.msra.mxu0 %v22213_v17 }
 0xe74   :  { %v20273_v37 = vpop.f32.mrb[100].mxu1  ;;  %v20287_v57 = vpop.f32.mrb[224].mxu0 }
 0xe75   :  { %v10267_v5 = vmul.f32 %v20273_v37, %v15443_v9  ;;  %v10240_v33 = vpop.f32.mrb[101].mxu1  ;;  %v10374_v0 = vmul.f32 %v20287_v57, %v15450_v23  ;;  %v10346_v26 = vpop.f32.mrb[225].mxu0 }
 0xe76   :  { %v10266_v48 = vmul.f32 %v15443_v9, %v10240_v33  ;;  %v10373_v14 = vmul.f32 %v15450_v23, %v10346_v26 }
 0xe77   :  { %v10277_v60 = vadd.f32 %v15444_v53, %v10267_v5 }
 0xe78   :  { %v10276_v31 = vadd.f32 %v15444_v53, %v10266_v48  ;;  %v20276_v1 = vpop.f32.mrb[102].mxu1  ;;  %v20290_v28 = vpop.f32.mrb[226].mxu0 }
 0xe79   :  { %v10378_v40 = vadd.f32 %v10374_v0, %v10277_v60  ;;  %v10269_v52 = vmul.f32 %v20276_v1, %v15443_v9  ;;  %v10250_v25 = vpop.f32.mrb[103].mxu1  ;;  %v10376_v36 = vmul.f32 %v20290_v28, %v15450_v23  ;;  %v10356_v63 = vpop.f32.mrb[227].mxu0 }
 0xe7a   :  { %v10377_v41 = vadd.f32 %v10373_v14, %v10276_v31  ;;  %v10268_v56 = vmul.f32 %v15443_v9, %v10250_v25  ;;  %v10375_v6 = vmul.f32 %v15450_v23, %v10356_v63 }
 0xe7b   :  { %v10279_v38 = vadd.f32 %v15444_v53, %v10269_v52  ;;  %v15486_v52 = vld [vmem:[%s27306_s18 + $0x7] ss:$0 sm:$0xff] }
 0xe7c   :  { %v10278_v16 = vadd.f32 %v15444_v53, %v10268_v56  ;;  %v20301_v34 = vpop.f32.mrb[104].mxu1  ;;  %v20315_v2 = vpop.f32.mrb[228].mxu0 }
 0xe7d   :  { %v10380_v51 = vadd.f32 %v10376_v36, %v10279_v38  ;;  %v10475_v49 = vmul.f32 %v20301_v34, %v15456_v44  ;;  %v10447_v62 = vpop.f32.mrb[105].mxu1  ;;  %v10576_v7 = vmul.f32 %v20315_v2, %v15462_v21  ;;  %v10548_v20 = vpop.f32.mrb[229].mxu0 }
 0xe7e   :  { %v10379_v32 = vadd.f32 %v10375_v6, %v10278_v16  ;;  %v10474_v22 = vmul.f32 %v15456_v44, %v10447_v62  ;;  %v10575_v54 = vmul.f32 %v15462_v21, %v10548_v20 }
 0xe7f   :  { %v10479_v30 = vadd.f32 %v10475_v49, %v10378_v40  ;;  %v15480_v40 = vld [vmem:[%s27306_s18 + $0x6] ss:$0 sm:$0xff] }
 0xe80   :  { %v10478_v59 = vadd.f32 %v10474_v22, %v10377_v41  ;;  %v20304_v18 = vpop.f32.mrb[106].mxu1  ;;  %v20318_v3 = vpop.f32.mrb[230].mxu0 }
 0xe81   :  { %v10580_v13 = vadd.f32 %v10576_v7, %v10479_v30  ;;  %v10477_v4 = vmul.f32 %v20304_v18, %v15456_v44  ;;  %v10457_v61 = vpop.f32.mrb[107].mxu1  ;;  %v10578_v45 = vmul.f32 %v20318_v3, %v15462_v21  ;;  %v10558_v11 = vpop.f32.mrb[231].mxu0 }
 0xe82   :  { %v10579_v10 = vadd.f32 %v10575_v54, %v10478_v59  ;;  %v10476_v15 = vmul.f32 %v15456_v44, %v10457_v61  ;;  %v10577_v29 = vmul.f32 %v15462_v21, %v10558_v11 }
 0xe83   :  { %v10481_v8 = vadd.f32 %v10477_v4, %v10380_v51 }
 0xe84   :  { %v10480_v12 = vadd.f32 %v10476_v15, %v10379_v32  ;;  %v20329_v27 = vpop.f32.mrb[108].mxu1  ;;  %v20343_v19 = vpop.f32.mrb[232].mxu0 }
 0xe85   :  { %v10582_v42 = vadd.f32 %v10578_v45, %v10481_v8  ;;  %v10677_v47 = vmul.f32 %v20329_v27, %v15468_v43  ;;  %v10649_v35 = vpop.f32.mrb[109].mxu1  ;;  %v10778_v39 = vmul.f32 %v20343_v19, %v15474_v55  ;;  %v10750_v17 = vpop.f32.mrb[233].mxu0 }
 0xe86   :  { %v10581_v9 = vadd.f32 %v10577_v29, %v10480_v12  ;;  %v10676_v23 = vmul.f32 %v15468_v43, %v10649_v35  ;;  %v10777_v53 = vmul.f32 %v15474_v55, %v10750_v17  ;;  %v22899_v17 = vmov 0.0  }
 0xe87   :  { %v10681_v37 = vadd.f32 %v10677_v47, %v10580_v13  ;;  %v15492_v13 = vld [vmem:[%s27306_s18 + $0x8] ss:$0 sm:$0xff]  ;;  %20419 = vmatprep.mubr.msk.f32.mxu1 %vm22898_vm2, %v22899_v17 }
 0xe88   :  { %v10680_v57 = vadd.f32 %v10676_v23, %v10579_v10  ;;  %v20332_v5 = vpop.f32.mrb[110].mxu1  ;;  %v20346_v33 = vpop.f32.mrb[234].mxu0 }
 0xe89   :  { %v10782_v0 = vadd.f32 %v10778_v39, %v10681_v37  ;;  %v10679_v26 = vmul.f32 %v20332_v5, %v15468_v43  ;;  %v10659_v48 = vpop.f32.mrb[111].mxu1  ;;  %v10780_v14 = vmul.f32 %v20346_v33, %v15474_v55  ;;  %v10760_v60 = vpop.f32.mrb[235].mxu0  ;;  %v22897_v39 = vmov 0.0|0.0  }
 0xe8a   :  { %v10781_v31 = vadd.f32 %v10777_v53, %v10680_v57  ;;  %v10678_v1 = vmul.f32 %v15468_v43, %v10659_v48  ;;  %v10779_v28 = vmul.f32 %v15474_v55, %v10760_v60  ;;  %22217 = vmatprep.subr.bf16.mxu1 %v22897_v39  ;;  %22229 = vmatprep.subr.bf16.mxu0 %v22897_v39  ;;  %v15501_v60 = vld [vmem:[%s27309_s12 + $0x8] sm:$0xff]  }
 0xe8b   :  { %v10683_v25 = vadd.f32 %v10679_v26, %v10582_v42 }
 0xe8c   :  { %v10682_v36 = vadd.f32 %v10678_v1, %v10581_v9  ;;  %v20357_v63 = vpop.f32.mrb[112].mxu1  ;;  %v20371_v41 = vpop.f32.mrb[236].mxu0  ;;  %v15493_v9 = vld [vmem:[%s27308_s22] ss:$0 sm:$0xff] }
 0xe8d   :  { %v10784_v56 = vadd.f32 %v10780_v14, %v10683_v25  ;;  %v10879_v6 = vmul.f32 %v20357_v63, %v15480_v40  ;;  %v10851_v44 = vpop.f32.mrb[113].mxu1  ;;  %v10980_v21 = vmul.f32 %v20371_v41, %v15486_v52  ;;  %v10952_v38 = vpop.f32.mrb[237].mxu0  ;;  %v11200_v14 = vld [vmem:[%s27309_s12] sm:$0xff]   ;;  %v11431_v63 = vunpack.c.h.bf16 %v15501_v60 }
 0xe8e   :  { %v10783_v16 = vadd.f32 %v10779_v28, %v10682_v36  ;;  %v10878_v34 = vmul.f32 %v15480_v40, %v10851_v44  ;;  %v10979_v2 = vmul.f32 %v15486_v52, %v10952_v38  ;;  %v11201_v1 = vunpack.c.l.bf16 %v11200_v14  ;;  %v15509_v36 = vld [vmem:[%s27309_s12 + $0x18] sm:$0xff]  }
 0xe8f   :  { %v10883_v51 = vadd.f32 %v10879_v6, %v10782_v0  ;;  %v11354_v28 = vunpack.c.l.bf16 %v15501_v60  ;;  %v11662_v41 = vunpack.c.l.bf16 %v15509_v36  ;;  %v27312_v38 = vpack.c.bf16 %v25779_v58, %v25781_v24  ;;  %v11966_v58 = vld [vmem:[%s27311_s0] sm:$0xff]  ;;  %v11967_v24 = vld [vmem:[%s27311_s0 + $0x8] sm:$0xff]  ;;  %v26289_v60 = vld [vmem:[%s27314_s30 + $0x18] sm:$0xff]  }
 0xe90   :  { %v10882_v49 = vadd.f32 %v10878_v34, %v10781_v31  ;;  %v20360_v62 = vpop.f32.mrb[114].mxu1  ;;  %v20374_v7 = vpop.f32.mrb[238].mxu0 }
 0xe91   :  { %v10984_v20 = vadd.f32 %v10980_v21, %v10883_v51  ;;  %v10881_v32 = vmul.f32 %v20360_v62, %v15480_v40  ;;  %v10861_v22 = vpop.f32.mrb[115].mxu1  ;;  %v10982_v54 = vmul.f32 %v20374_v7, %v15486_v52  ;;  %v10962_v30 = vpop.f32.mrb[239].mxu0  ;;  %v11739_v21 = vunpack.c.h.bf16 %v15509_v36  ;;  %v11969_v62 = vld [vmem:[%s27311_s0 + $0x18] sm:$0xff] }
 0xe92   :  { %v10983_v59 = vadd.f32 %v10979_v2, %v10882_v49  ;;  %v10880_v18 = vmul.f32 %v15480_v40, %v10861_v22  ;;  %v10981_v3 = vmul.f32 %v15486_v52, %v10962_v30  ;;  %v15505_v40 = vld [vmem:[%s27309_s12 + $0x10] sm:$0xff]   ;;  %v11277_v52 = vunpack.c.h.bf16 %v11200_v14 }
 0xe93   :  { %v10885_v4 = vadd.f32 %v10881_v32, %v10784_v56  ;;  %v11508_v25 = vunpack.c.l.bf16 %v15505_v40  ;;  %v15513_v56 = vld [vmem:[%s27309_s12 + $0x20] sm:$0xf]  ;;  %v11585_v6 = vunpack.c.h.bf16 %v15505_v40  ;;  %v27313_v2 = vpack.c.bf16 %v25787_v50, %v25791_v46  ;;  %v11968_v49 = vld [vmem:[%s27311_s0 + $0x10] sm:$0xff] }
 0xe94   :  { %v10884_v61 = vadd.f32 %v10880_v18, %v10783_v16  ;;  %v20385_v45 = vpop.f32.mrb[116].mxu1  ;;  %v11816_v44 = vunpack.c.l.bf16 %v15513_v56  ;;  %v11891_v16 = vld [vmem:[%s27310_s23] sm:$0xf]  ;;  %v22278_v51 = vpack.c.bf16 %v11967_v24, %v11966_v58  ;;  %v22281_v7 = vpack.c.bf16 %v11969_v62, %v11968_v49  ;;  %v12838_v24 = vld [vmem:[%s27315_s19 + $0x30] sm:$0xff] }
 0xe95   :  { %v10986_v11 = vadd.f32 %v10982_v54, %v10885_v4  ;;  %v11081_v10 = vmul.f32 %v20385_v45, %v15492_v13  ;;  %v11053_v15 = vpop.f32.mrb[117].mxu1  ;;  %v11892_v34 = vunpack.c.l.bf16 %v11891_v16  ;;  %v26305_v40 = vld [vmem:[%s27314_s30 + $0x20] sm:$0xf] }
 0xe96   :  { %v10985_v29 = vadd.f32 %v10981_v3, %v10884_v61  ;;  %v11080_v43 = vmul.f32 %v15492_v13, %v11053_v15  ;;  %v12832_v56 = vld [vmem:[%s27315_s19] sm:$0xff] }
 0xe97   :  { %v11085_v55 = vadd.f32 %v11081_v10, %v10984_v20  ;;  %v15519_v62 = vld [vmem:[%s27316_s26] ss:$0 sm:$0xff] }
 0xe98   :  { %v11084_v8 = vadd.f32 %v11080_v43, %v10983_v59  ;;  %v20388_v12 = vpop.f32.mrb[118].mxu1 }
 0xe99   :  { %v11083_v27 = vmul.f32 %v20388_v12, %v15492_v13  ;;  %v11063_v19 = vpop.f32.mrb[119].mxu1 }
 0xe9a   :  { %v11082_v42 = vmul.f32 %v15492_v13, %v11063_v19  ;;  %20405 = vmatprep.mubr.msk.f32.mxu0 %vm5783_vm1, %v11084_v8 }
 0xe9b   :  { %v11087_v47 = vadd.f32 %v11083_v27, %v10986_v11  ;;  %20406 = vmatmul.mubr.msk.f32.vlgmr.msra.gmra.mrb[240].mxu0 %vm5783_vm1, %v11085_v55 }
 0xe9c   :  { %v11086_v35 = vadd.f32 %v11082_v42, %v10985_v29 }
 0xe9e   :  { %20408 = vmatprep.mubr.msk.f32.mxu0 %vm5783_vm1, %v11086_v35 }
 0xe9f   :  { %20409 = vmatmul.mubr.msk.f32.gmra.mrb[242].mxu0 %vm5783_vm1, %v11087_v47 }
 0xea0   :  { %20441 = vmatprep.mubr.msk.f32.mxu0 %vm22898_vm2, %v22899_v17 }
 0xf6e   :  { %v20407_v23 = vpop.f32.mrb[240].mxu0 }
 0xf6f   :  { %v11187_v53 = vadd.f32 %v20407_v23, %v15493_v9  ;;  %v11181_v37 = vpop.f32.mrb[241].mxu0  ;;  %v15516_v23 = vld [vmem:[#allocation5] ss:$0 sm:$0xff] }
 0xf70   :  { %v11182_v57 = vadd.f32 %v15493_v9, %v11181_v37 }
 0xf72   :  { %v26195_v5 = vpack.c.bf16 %v11187_v53, %v11182_v57  ;;  %v20410_v33 = vpop.f32.mrb[242].mxu0 }
 0xf73   :  { %v11197_v0 = vadd.f32 %v20410_v33, %v15493_v9  ;;  %v11191_v26 = vpop.f32.mrb[243].mxu0  ;;  %v26281_v33 = vld [vmem:[%s27314_s30 + $0x10] sm:$0xff]  }
 0xf74   :  { %v11192_v48 = vadd.f32 %v15493_v9, %v11191_v26  ;;  %22219 = vmatpush3.bf16.msra.mxu1 %v26195_v5  ;;  %22231 = vmatpush3.bf16.msra.mxu0 %v26195_v5  ;;  %v12404_v14 = vunpack.c.l.bf16 %v26281_v33 }
 0xf75   :  { %22220 = vmatprep.subr.bf16.mxu1 %v22897_v39  ;;  %22232 = vmatprep.subr.bf16.mxu0 %v22897_v39 }
 0xf76   :  { %v22221_v31 = vpack.c.bf16 %v11197_v0, %v11192_v48 }
 0xf78   :  { %22222 = vmatpush3.bf16.msra.mxu1 %v22221_v31  ;;  %22234 = vmatpush3.bf16.msra.mxu0 %v22221_v31 }
 0xf79   :  { %22223 = vmatprep.subr.bf16.mxu1 %v22897_v39  ;;  %22241 = vmatprep.subr.bf16.mxu0 %v22897_v39 }
 0xf7b   :  { %20420 = vmatmul.mubr.msk.f32.vlgmr.msra.gmra.mrb[120].mxu1 %vm338_vm0, %v11201_v1  ;;  %20442 = vmatmul.mubr.msk.f32.vlgmr.msra.gmra.mrb[244].mxu0 %vm338_vm0, %v11354_v28  ;;  %v12576_v1 = vunpack.c.l.bf16 %v26289_v60  ;;  %v26302_v28 = vld [vmem:[%s27314_s30 + $0x8] sm:$0xff]  }
 0xf7c   :  { %22225 = vmatpush3.bf16.msra.mxu1 %v26195_v5  ;;  %22243 = vmatpush3.bf16.msra.mxu0 %v26195_v5  ;;  %v12318_v36 = vunpack.c.h.bf16 %v26302_v28 }
 0xf7d   :  { %22226 = vmatprep.subr.bf16.mxu1 %v22897_v39  ;;  %22244 = vmatprep.subr.bf16.mxu0 %v22897_v39 }
 0xf7e   :  { %20430 = vmatprep.mubr.msk.f32.mxu1 %vm22898_vm2, %v22899_v17  ;;  %20463 = vmatprep.mubr.msk.f32.mxu0 %vm22898_vm2, %v22899_v17 }
 0xf80   :  { %22228 = vmatpush3.bf16.msra.mxu1 %v22221_v31  ;;  %22246 = vmatpush3.bf16.msra.mxu0 %v22221_v31 }
 0xf81   :  { %22235 = vmatprep.subr.bf16.mxu1 %v22897_v39  ;;  %22253 = vmatprep.subr.bf16.mxu0 %v22897_v39 }
 0xf83   :  { %20431 = vmatmul.mubr.msk.f32.vlgmr.msra.gmra.mrb[122].mxu1 %vm338_vm0, %v11277_v52  ;;  %20464 = vmatmul.mubr.msk.f32.vlgmr.msra.gmra.mrb[246].mxu0 %vm338_vm0, %v11508_v25  ;;  %v12232_v52 = vunpack.c.l.bf16 %v26302_v28  ;;  %v12748_v25 = vunpack.c.l.bf16 %v26305_v40  ;;  %v13651_v28 = vld [vmem:[%s27317_s28 + $0x20] sm:$0xff] }
 0xf84   :  { %22237 = vmatpush3.bf16.msra.mxu1 %v26195_v5  ;;  %22255 = vmatpush3.bf16.msra.mxu0 %v26195_v5 }
 0xf85   :  { %22238 = vmatprep.subr.bf16.mxu1 %v22897_v39  ;;  %22256 = vmatprep.subr.bf16.mxu0 %v22897_v39 }
 0xf86   :  { %20452 = vmatprep.mubr.msk.f32.mxu1 %vm22898_vm2, %v22899_v17  ;;  %20485 = vmatprep.mubr.msk.f32.mxu0 %vm22898_vm2, %v22899_v17 }
 0xf88   :  { %22240 = vmatpush3.bf16.msra.mxu1 %v22221_v31  ;;  %22258 = vmatpush3.bf16.msra.mxu0 %v22221_v31 }
 0xf89   :  { %22247 = vmatprep.subr.bf16.mxu1 %v22897_v39  ;;  %22265 = vmatprep.subr.bf16.mxu0 %v22897_v39 }
 0xf8b   :  { %20453 = vmatmul.mubr.msk.f32.vlgmr.msra.gmra.mrb[124].mxu1 %vm338_vm0, %v11431_v63  ;;  %20486 = vmatmul.mubr.msk.f32.vlgmr.msra.gmra.mrb[248].mxu0 %vm338_vm0, %v11662_v41  ;;  %v12490_v63 = vunpack.c.h.bf16 %v26281_v33  ;;  %v12662_v41 = vunpack.c.h.bf16 %v26289_v60  ;;  %v13649_v33 = vld [vmem:[%s27317_s28 + $0x10] sm:$0xff]  ;;  %v13652_v60 = vld [vmem:[%s27317_s28 + $0x28] sm:$0xff] }
 0xf8c   :  { %22249 = vmatpush3.bf16.msra.mxu1 %v26195_v5  ;;  %22267 = vmatpush3.bf16.msra.mxu0 %v26195_v5  ;;  %v22302_v40 = vpack.c.bf16 %v13652_v60, %v13651_v28 }
 0xf8d   :  { %22250 = vmatprep.subr.bf16.mxu1 %v22897_v39  ;;  %22268 = vmatprep.subr.bf16.mxu0 %v22897_v39 }
 0xf8e   :  { %20474 = vmatprep.mubr.msk.f32.mxu1 %vm22898_vm2, %v22899_v17  ;;  %20507 = vmatprep.mubr.msk.f32.mxu0 %vm22898_vm2, %v22899_v17 }
 0xf90   :  { %22252 = vmatpush3.bf16.msra.mxu1 %v22221_v31  ;;  %22270 = vmatpush3.bf16.msra.mxu0 %v22221_v31 }
 0xf91   :  { %22259 = vmatprep.subr.bf16.mxu1 %v22897_v39  ;;  %22277 = vmatprep.subr.bf16.mxu0 %v22897_v39 }
 0xf93   :  { %20475 = vmatmul.mubr.msk.f32.vlgmr.msra.gmra.mrb[126].mxu1 %vm338_vm0, %v11585_v6  ;;  %20508 = vmatmul.mubr.msk.f32.vlgmr.msra.gmra.mrb[250].mxu0 %vm338_vm0, %v11816_v44  ;;  %v12833_v6 = vld [vmem:[%s27315_s19 + $0x8] sm:$0xff] }
 0xf94   :  { %22261 = vmatpush3.bf16.msra.mxu1 %v26195_v5  ;;  %20496 = vmatprep.mubr.msk.f32.mxu1 %vm22898_vm2, %v22899_v17  ;;  %v26278_v5 = vld [vmem:[%s27314_s30] sm:$0xff]   ;;  %v22284_v44 = vpack.c.bf16 %v12833_v6, %v12832_v56 }
 0xf95   :  { %22262 = vmatprep.subr.bf16.mxu1 %v22897_v39  ;;  %20529 = vmatprep.mubr.msk.f32.mxu0 %vm22898_vm2, %v22899_v17  ;;  %v12054_v26 = vunpack.c.l.bf16 %v26278_v5  ;;  %v15548_v6 = vld [vmem:[%s27316_s26 + $0x7] ss:$0 sm:$0xff] }
 0xf96   :  { %22279 = vmatpush3.bf16.msra.mxu0 %v22278_v51  ;;  %v12839_v51 = vld [vmem:[%s27315_s19 + $0x38] sm:$0xff] }
 0xf97   :  { %22280 = vmatprep.subr.bf16.mxu0 %v22897_v39  ;;  %v22293_v49 = vpack.c.bf16 %v12839_v51, %v12838_v24 }
 0xf98   :  { %22264 = vmatpush3.bf16.msra.mxu1 %v22221_v31  ;;  %v12146_v31 = vunpack.c.h.bf16 %v26278_v5  ;;  %v13647_v5 = vld [vmem:[%s27317_s28] sm:$0xff] }
 0xf99   :  { %22271 = vmatprep.subr.bf16.mxu1 %v22897_v39 }
 0xf9a   :  { %22282 = vmatpush3.bf16.msra.mxu0 %v22281_v7 }
 0xf9b   :  { %20497 = vmatmul.mubr.msk.f32.vlgmr.msra.gmra.mrb[128].mxu1 %vm338_vm0, %v11739_v21  ;;  %20552 = vmatprep.subr.mxu0 %v22899_v17  ;;  %v12834_v21 = vld [vmem:[%s27315_s19 + $0x10] sm:$0xff] }
 0xf9c   :  { %22273 = vmatpush3.bf16.msra.mxu1 %v27312_v38  ;;  %20518 = vmatprep.mubr.msk.f32.mxu1 %vm22898_vm2, %v22899_v17  ;;  %v12835_v38 = vld [vmem:[%s27315_s19 + $0x18] sm:$0xff] }
 0xf9d   :  { %22274 = vmatprep.subr.bf16.mxu1 %v22897_v39  ;;  %v22287_v16 = vpack.c.bf16 %v12835_v38, %v12834_v21 }
 0xfa0   :  { %22276 = vmatpush3.bf16.msra.mxu1 %v27313_v2  ;;  %v12837_v2 = vld [vmem:[%s27315_s19 + $0x28] sm:$0xff] }
 0xfa1   :  { %20532 = vmatprep.subr.mxu1 %v22899_v17 }
 0xfa3   :  { %20519 = vmatmul.mubr.msk.f32.vlgmr.msra.gmra.mrb[130].mxu1 %vm338_vm0, %v11892_v34  ;;  %v12836_v34 = vld [vmem:[%s27315_s19 + $0x20] sm:$0xff] }
 0xfa4   :  { %20534 = vmatprep.mubr.msk.f32.mxu1 %vm22898_vm2, %v22899_v17  ;;  %v22290_v58 = vpack.c.bf16 %v12837_v2, %v12836_v34 }
0x104e   :  { %v11271_v50 = vpop.f32.mrb[120].mxu1  ;;  %v11424_v46 = vpop.f32.mrb[244].mxu0 }
0x104f   :  { %v20421_v20 = vpop.f32.mrb[121].mxu1  ;;  %v20443_v32 = vpop.f32.mrb[245].mxu0 }
0x1056   :  { %v11347_v22 = vpop.f32.mrb[122].mxu1  ;;  %v11578_v54 = vpop.f32.mrb[246].mxu0 }
0x1057   :  { %v11351_v30 = vmax.f32 %v11271_v50, %v11347_v22  ;;  %v20432_v59 = vpop.f32.mrb[123].mxu1  ;;  %v20465_v18 = vpop.f32.mrb[247].mxu0  ;;  %v15520_v22 = vld [vmem:[#allocation7] ss:$0 sm:$0xff] }
0x1059   :  { %v11428_v3 = vmax.f32 %v11351_v30, %v11424_v46 }
0x105e   :  { %v11501_v13 = vpop.f32.mrb[124].mxu1  ;;  %v11732_v4 = vpop.f32.mrb[248].mxu0 }
0x105f   :  { %v11505_v61 = vmax.f32 %v11428_v3, %v11501_v13  ;;  %v20454_v45 = vpop.f32.mrb[125].mxu1  ;;  %v20487_v11 = vpop.f32.mrb[249].mxu0 }
0x1061   :  { %v11582_v10 = vmax.f32 %v11505_v61, %v11578_v54  ;;  %v15524_v54 = vld [vmem:[%s27316_s26 + $0x1] ss:$0 sm:$0xff]  ;;  %v15528_v61 = vld [vmem:[%s27316_s26 + $0x2] ss:$0 sm:$0xff] }
0x1066   :  { %v11655_v15 = vpop.f32.mrb[126].mxu1  ;;  %v11886_v29 = vpop.f32.mrb[250].mxu0 }
0x1067   :  { %v11659_v43 = vmax.f32 %v11582_v10, %v11655_v15  ;;  %v20476_v55 = vpop.f32.mrb[127].mxu1  ;;  %v20509_v8 = vpop.f32.mrb[251].mxu0 }
0x1068   :  { %v15532_v55 = vld [vmem:[%s27316_s26 + $0x3] ss:$0 sm:$0xff]  ;;  %v15536_v8 = vld [vmem:[%s27316_s26 + $0x4] ss:$0 sm:$0xff] }
0x1069   :  { %v11736_v12 = vmax.f32 %v11659_v43, %v11732_v4 }
0x106e   :  { %v11809_v27 = vpop.f32.mrb[128].mxu1 }
0x106f   :  { %v11813_v19 = vmax.f32 %v11736_v12, %v11809_v27  ;;  %v20498_v42 = vpop.f32.mrb[129].mxu1 }
0x1071   :  { %v11890_v47 = vmax.f32 %v11813_v19, %v11886_v29 }
0x1076   :  { %v11962_v35 = vpop.f32.mrb[130].mxu1 }
0x1077   :  { %v20520_v9 = vpop.f32.mrb[131].mxu1  ;;  %20530 = vmatmul.mubr.msk.f32.vlgmr.msra.gmra.mrb[252].mxu0 %vm338_vm0, %v11962_v35  ;;  %v15540_v35 = vld [vmem:[%s27316_s26 + $0x5] ss:$0 sm:$0xff] }
0x1078   :  { %20554 = vmatprep.mubr.msk.f32.mxu0 %vm22898_vm2, %v22899_v17  ;;  %v15544_v9 = vld [vmem:[%s27316_s26 + $0x6] ss:$0 sm:$0xff] }
0x114a   :  { %v12046_v53 = vpop.f32.mrb[252].mxu0 }
0x114b   :  { %v12047_v37 = vadd.f32 %v15516_v23, %v12046_v53  ;;  %v20531_v57 = vpop.f32.mrb[253].mxu0 }
0x114d   :  { %v26283_v0 = vadd.f32 %v12047_v37, %v11890_v47 }
0x114f   :  { %v12051_v48 = vmax.f32 %v26283_v0, 0.0 }
0x1151   :  { %20533 = vmatpush3.msra.mxu1 %v12051_v48  ;;  %20553 = vmatpush3.msra.mxu0 %v12051_v48 }
0x1152   :  { %20535 = vmatmul.mubr.msk.f32.vlgmr.msra.gmra.mrb[132].mxu1 %vm12055_vm3, %v12054_v26  ;;  %20537 = vmatprep.subr.mxu1 %v22899_v17 }
0x1153   :  { %20555 = vmatmul.mubr.msk.f32.vlgmr.msra.gmra.mrb[254].mxu0 %vm12055_vm3, %v12404_v14  ;;  %20562 = vmatprep.subr.mxu0 %v22899_v17 }
0x1154   :  { %20538 = vmatpush3.msra.mxu1 %v12051_v48  ;;  %20563 = vmatpush3.msra.mxu0 %v12051_v48 }
0x1155   :  { %20539 = vmatprep.mubr.msk.f32.mxu1 %vm22898_vm2, %v22899_v17  ;;  %20542 = vmatprep.subr.mxu1 %v22899_v17 }
0x1156   :  { %20564 = vmatprep.mubr.msk.f32.mxu0 %vm22898_vm2, %v22899_v17  ;;  %20572 = vmatprep.subr.mxu0 %v22899_v17 }
0x1157   :  { %20540 = vmatmul.mubr.msk.f32.vlgmr.msra.gmra.mrb[134].mxu1 %vm12055_vm3, %v12146_v31  ;;  %20565 = vmatmul.mubr.msk.f32.vlgmr.msra.gmra.mrb[0].mxu0 %vm12055_vm3, %v12576_v1 }
0x1158   :  { %20543 = vmatpush3.msra.mxu1 %v12051_v48  ;;  %20573 = vmatpush3.msra.mxu0 %v12051_v48 }
0x1159   :  { %20544 = vmatprep.mubr.msk.f32.mxu1 %vm22898_vm2, %v22899_v17  ;;  %20547 = vmatprep.subr.mxu1 %v22899_v17 }
0x115a   :  { %20574 = vmatprep.mubr.msk.f32.mxu0 %vm22898_vm2, %v22899_v17  ;;  %20596 = vmatprep.subr.mxu0 %v22899_v17 }
0x115b   :  { %20545 = vmatmul.mubr.msk.f32.vlgmr.msra.gmra.mrb[136].mxu1 %vm12055_vm3, %v12232_v52  ;;  %20575 = vmatmul.mubr.msk.f32.vlgmr.msra.gmra.mrb[2].mxu0 %vm12055_vm3, %v12748_v25 }
0x115c   :  { %20548 = vmatpush3.msra.mxu1 %v12051_v48  ;;  %20549 = vmatprep.mubr.msk.f32.mxu1 %vm22898_vm2, %v22899_v17 }
0x115d   :  { %20557 = vmatprep.subr.mxu1 %v22899_v17  ;;  %20598 = vmatprep.mubr.msk.f32.mxu0 %vm22898_vm2, %v22899_v17 }
0x115f   :  { %20550 = vmatmul.mubr.msk.f32.vlgmr.msra.gmra.mrb[138].mxu1 %vm12055_vm3, %v12318_v36 }
0x1160   :  { %20558 = vmatpush3.msra.mxu1 %v12051_v48  ;;  %20559 = vmatprep.mubr.msk.f32.mxu1 %vm22898_vm2, %v22899_v17 }
0x1161   :  { %20567 = vmatprep.subr.mxu1 %v22899_v17 }
0x1163   :  { %20560 = vmatmul.mubr.msk.f32.vlgmr.msra.gmra.mrb[140].mxu1 %vm12055_vm3, %v12490_v63 }
0x1164   :  { %20568 = vmatpush3.msra.mxu1 %v12051_v48  ;;  %20569 = vmatprep.mubr.msk.f32.mxu1 %vm22898_vm2, %v22899_v17 }
0x1165   :  { %22283 = vmatprep.subr.bf16.mxu1 %v22897_v39 }
0x1167   :  { %20570 = vmatmul.mubr.msk.f32.vlgmr.msra.gmra.mrb[142].mxu1 %vm12055_vm3, %v12662_v41 }
0x1168   :  { %20593 = vmatprep.mubr.msk.f32.mxu1 %vm22898_vm2, %v22899_v17  ;;  %22285 = vmatpush3.bf16.msra.mxu1 %v22284_v44  ;;  %v15552_v44 = vld [vmem:[%s27316_s26 + $0x8] ss:$0 sm:$0xff] }
0x1169   :  { %22286 = vmatprep.subr.bf16.mxu1 %v22897_v39 }
0x116c   :  { %22288 = vmatpush3.bf16.msra.mxu1 %v22287_v16 }
0x116d   :  { %22289 = vmatprep.subr.bf16.mxu1 %v22897_v39 }
0x1170   :  { %22291 = vmatpush3.bf16.msra.mxu1 %v22290_v58 }
0x1171   :  { %22292 = vmatprep.subr.bf16.mxu1 %v22897_v39 }
0x1174   :  { %22294 = vmatpush3.bf16.msra.mxu1 %v22293_v49  ;;  %v15553_v49 = vld [vmem:[#allocation8] ss:$0 sm:$0xff] }
0x1175   :  { %20616 = vmatprep.subr.mxu1 %v22899_v17 }
0x1225   :  { %v12125_v7 = vpop.f32.mrb[132].mxu1 }
0x1226   :  { %v20536_v50 = vpop.f32.mrb[133].mxu1  ;;  %v12474_v46 = vpop.f32.mrb[254].mxu0  ;;  %v12136_v20 = vmul.f32 %v15519_v62, %v12125_v7 }
0x1227   :  { %v20556_v32 = vpop.f32.mrb[255].mxu0  ;;  %v12486_v47 = vmul.f32 %v15536_v8, %v12474_v46 }
0x1228   :  { %v12143_v18 = vadd.f32 %v15520_v22, %v12136_v20  ;;  %v13657_v32 = vld [vmem:[%s27317_s28 + $0x50] sm:$0xff]  ;;  %v13658_v22 = vld [vmem:[%s27317_s28 + $0x58] sm:$0xff] }
0x122a   :  { %v12216_v30 = vpop.f32.mrb[134].mxu1  ;;  %v12646_v59 = vpop.f32.mrb[0].mxu0 }
0x122b   :  { %v12228_v3 = vmul.f32 %v15524_v54, %v12216_v30  ;;  %v20541_v13 = vpop.f32.mrb[135].mxu1  ;;  %v20566_v4 = vpop.f32.mrb[1].mxu0  ;;  %v12658_v56 = vmul.f32 %v15544_v9, %v12646_v59  ;;  %v22311_v54 = vpack.c.bf16 %v13658_v22, %v13657_v32  ;;  %v13659_v30 = vld [vmem:[%s27317_s28 + $0x60] sm:$0xff]  ;;  %v13660_v59 = vld [vmem:[%s27317_s28 + $0x68] sm:$0xff] }
0x122c   :  { %v13662_v13 = vld [vmem:[%s27317_s28 + $0x78] sm:$0xff]  ;;  %v15584_v22 = vld [vmem:[%s27319_s5 + $0x1] sm:$0x1] }
0x122d   :  { %v12229_v45 = vadd.f32 %v12228_v3, %v12143_v18  ;;  %v22314_v18 = vpack.c.bf16 %v13660_v59, %v13659_v30  ;;  %v13661_v3 = vld [vmem:[%s27317_s28 + $0x70] sm:$0xff]  ;;  %v13817_v30 = vunpack.c.l.bf16 %v15584_v22  ;;  %v15586_v59 = vld [vmem:[%s27319_s5 + $0x2] sm:$0x1] }
0x122e   :  { %v12302_v11 = vpop.f32.mrb[136].mxu1  ;;  %v12818_v10 = vpop.f32.mrb[2].mxu0  ;;  %v22317_v4 = vpack.c.bf16 %v13662_v13, %v13661_v3  ;;  %v15588_v3 = vld [vmem:[%s27319_s5 + $0x3] sm:$0x1] }
0x122f   :  { %v12314_v15 = vmul.f32 %v15528_v61, %v12302_v11  ;;  %v20546_v29 = vpop.f32.mrb[137].mxu1  ;;  %v20576_v43 = vpop.f32.mrb[3].mxu0  ;;  %v12830_v58 = vmul.f32 %v15552_v44, %v12818_v10  ;;  %v15556_v61 = vld [vmem:[%s27318_s1] ss:$0 sm:$0xff]  ;;  %v13971_v13 = vunpack.c.l.bf16 %v15588_v3 }
0x1230   :  { %v15557_v43 = vld [vmem:[#allocation10] ss:$0 sm:$0xff] }
0x1231   :  { %v12315_v12 = vadd.f32 %v12314_v15, %v12229_v45 }
0x1232   :  { %v12388_v27 = vpop.f32.mrb[138].mxu1 }
0x1233   :  { %v12400_v19 = vmul.f32 %v15532_v55, %v12388_v27  ;;  %v20551_v42 = vpop.f32.mrb[139].mxu1  ;;  %v15560_v55 = vld [vmem:[%s27318_s1 + $0x1] ss:$0 sm:$0xff] }
0x1235   :  { %v12401_v23 = vadd.f32 %v12400_v19, %v12315_v12 }
0x1236   :  { %v12560_v53 = vpop.f32.mrb[140].mxu1 }
0x1237   :  { %v12487_v37 = vadd.f32 %v12486_v47, %v12401_v23  ;;  %v12572_v57 = vmul.f32 %v15540_v35, %v12560_v53  ;;  %v20561_v48 = vpop.f32.mrb[141].mxu1  ;;  %v15563_v35 = vld [vmem:[%s27318_s1 + $0x2] ss:$0 sm:$0xff] }
0x1239   :  { %v12573_v21 = vadd.f32 %v12572_v57, %v12487_v37 }
0x123a   :  { %v12732_v38 = vpop.f32.mrb[142].mxu1 }
0x123b   :  { %v12659_v16 = vadd.f32 %v12658_v56, %v12573_v21  ;;  %v12744_v34 = vmul.f32 %v15548_v6, %v12732_v38  ;;  %v20571_v2 = vpop.f32.mrb[143].mxu1  ;;  %v15566_v56 = vld [vmem:[%s27318_s1 + $0x3] ss:$0 sm:$0xff]  ;;  %v15569_v6 = vld [vmem:[%s27318_s1 + $0x4] ss:$0 sm:$0xff] }
0x123c   :  { %v15572_v2 = vld [vmem:[%s27318_s1 + $0x5] ss:$0 sm:$0xff] }
0x123d   :  { %v12745_v24 = vadd.f32 %v12744_v34, %v12659_v16 }
0x123f   :  { %v12831_v51 = vadd.f32 %v12830_v58, %v12745_v24  ;;  %v15575_v58 = vld [vmem:[%s27318_s1 + $0x6] ss:$0 sm:$0xff] }
0x1241   :  { %20594 = vmatmul.mubr.msk.f32.vlgmr.msra.gmra.mrb[144].mxu1 %vm5783_vm1, %v12831_v51 }
0x1242   :  { %20618 = vmatprep.mubr.msk.f32.mxu1 %vm22898_vm2, %v22899_v17 }
0x1314   :  { %v12916_v62 = vpop.f32.mrb[144].mxu1 }
0x1315   :  { %v12917_v7 = vadd.f32 %v15553_v49, %v12916_v62  ;;  %v20595_v50 = vpop.f32.mrb[145].mxu1 }
0x1317   :  { %v12920_v46 = vmax.f32 %v12917_v7, 0.0 }
0x1319   :  { %20597 = vmatpush3.msra.mxu0 %v12920_v46  ;;  %20617 = vmatpush3.msra.mxu1 %v12920_v46 }
0x131a   :  { %20599 = vmatmul.mubr.msk.f32.vlgmr.msra.gmra.mrb[4].mxu0 %vm12055_vm3, %v12054_v26  ;;  %20601 = vmatprep.subr.mxu0 %v22899_v17  ;;  %v13648_v26 = vld [vmem:[%s27317_s28 + $0x8] sm:$0xff] }
0x131b   :  { %20619 = vmatmul.mubr.msk.f32.vlgmr.msra.gmra.mrb[146].mxu1 %vm12055_vm3, %v12404_v14  ;;  %20626 = vmatprep.subr.mxu1 %v22899_v17  ;;  %v22296_v14 = vpack.c.bf16 %v13648_v26, %v13647_v5  ;;  %v15581_v5 = vld [vmem:[%s27318_s1 + $0x8] ss:$0 sm:$0xff] }
0x131c   :  { %20602 = vmatpush3.msra.mxu0 %v12920_v46  ;;  %20627 = vmatpush3.msra.mxu1 %v12920_v46 }
0x131d   :  { %20603 = vmatprep.mubr.msk.f32.mxu0 %vm22898_vm2, %v22899_v17  ;;  %20606 = vmatprep.subr.mxu0 %v22899_v17 }
0x131e   :  { %20628 = vmatprep.mubr.msk.f32.mxu1 %vm22898_vm2, %v22899_v17  ;;  %20636 = vmatprep.subr.mxu1 %v22899_v17 }
0x131f   :  { %20604 = vmatmul.mubr.msk.f32.vlgmr.msra.gmra.mrb[6].mxu0 %vm12055_vm3, %v12146_v31  ;;  %20629 = vmatmul.mubr.msk.f32.vlgmr.msra.gmra.mrb[148].mxu1 %vm12055_vm3, %v12576_v1  ;;  %v13650_v31 = vld [vmem:[%s27317_s28 + $0x18] sm:$0xff] }
0x1320   :  { %20607 = vmatpush3.msra.mxu0 %v12920_v46  ;;  %20637 = vmatpush3.msra.mxu1 %v12920_v46  ;;  %v22299_v1 = vpack.c.bf16 %v13650_v31, %v13649_v33 }
0x1321   :  { %20608 = vmatprep.mubr.msk.f32.mxu0 %vm22898_vm2, %v22899_v17  ;;  %20611 = vmatprep.subr.mxu0 %v22899_v17 }
0x1322   :  { %20638 = vmatprep.mubr.msk.f32.mxu1 %vm22898_vm2, %v22899_v17  ;;  %20676 = vmatprep.subr.mxu1 %v22899_v17 }
0x1323   :  { %20609 = vmatmul.mubr.msk.f32.vlgmr.msra.gmra.mrb[8].mxu0 %vm12055_vm3, %v12232_v52  ;;  %20639 = vmatmul.mubr.msk.f32.vlgmr.msra.gmra.mrb[150].mxu1 %vm12055_vm3, %v12748_v25  ;;  %v13653_v52 = vld [vmem:[%s27317_s28 + $0x30] sm:$0xff]  ;;  %v13654_v25 = vld [vmem:[%s27317_s28 + $0x38] sm:$0xff] }
0x1324   :  { %20612 = vmatpush3.msra.mxu0 %v12920_v46  ;;  %20613 = vmatprep.mubr.msk.f32.mxu0 %vm22898_vm2, %v22899_v17 }
0x1325   :  { %20621 = vmatprep.subr.mxu0 %v22899_v17  ;;  %20678 = vmatprep.mubr.msk.f32.mxu1 %vm22898_vm2, %v22899_v17 }
0x1327   :  { %20614 = vmatmul.mubr.msk.f32.vlgmr.msra.gmra.mrb[10].mxu0 %vm12055_vm3, %v12318_v36  ;;  %v22305_v36 = vpack.c.bf16 %v13654_v25, %v13653_v52  ;;  %v13740_v52 = vld [vmem:[%s27319_s5] sm:$0x1]  ;;  %v15582_v25 = vld [vmem:[#allocation11] ss:$0 sm:$0xff] }
0x1328   :  { %20622 = vmatpush3.msra.mxu0 %v12920_v46  ;;  %20623 = vmatprep.mubr.msk.f32.mxu0 %vm22898_vm2, %v22899_v17 }
0x1329   :  { %20631 = vmatprep.subr.mxu0 %v22899_v17 }
0x132b   :  { %20624 = vmatmul.mubr.msk.f32.vlgmr.msra.gmra.mrb[12].mxu0 %vm12055_vm3, %v12490_v63  ;;  %v13655_v63 = vld [vmem:[%s27317_s28 + $0x40] sm:$0xff] }
0x132c   :  { %20632 = vmatpush3.msra.mxu0 %v12920_v46  ;;  %20633 = vmatprep.mubr.msk.f32.mxu0 %vm22898_vm2, %v22899_v17  ;;  %v15578_v46 = vld [vmem:[%s27318_s1 + $0x7] ss:$0 sm:$0xff] }
0x132d   :  { %22295 = vmatprep.subr.bf16.mxu0 %v22897_v39 }
0x132f   :  { %20634 = vmatmul.mubr.msk.f32.vlgmr.msra.gmra.mrb[14].mxu0 %vm12055_vm3, %v12662_v41  ;;  %v13656_v41 = vld [vmem:[%s27317_s28 + $0x48] sm:$0xff] }
0x1330   :  { %22297 = vmatpush3.bf16.msra.mxu0 %v22296_v14  ;;  %20673 = vmatprep.mubr.msk.f32.mxu0 %vm22898_vm2, %v22899_v17  ;;  %v22308_v20 = vpack.c.bf16 %v13656_v41, %v13655_v63  ;;  %v13741_v41 = vunpack.c.l.bf16 %v13740_v52  ;;  %v14629_v52 = vld [vmem:[%s27322_s17 + $0x90] sm:$0xff] }
0x1331   :  { %22298 = vmatprep.subr.bf16.mxu0 %v22897_v39 }
0x1334   :  { %22300 = vmatpush3.bf16.msra.mxu0 %v22299_v1 }
0x1335   :  { %22301 = vmatprep.subr.bf16.mxu0 %v22897_v39 }
0x1338   :  { %22303 = vmatpush3.bf16.msra.mxu0 %v22302_v40 }
0x1339   :  { %22304 = vmatprep.subr.bf16.mxu0 %v22897_v39 }
0x133c   :  { %22306 = vmatpush3.bf16.msra.mxu0 %v22305_v36  ;;  %v15598_v36 = vld [vmem:[%s27319_s5 + $0x8] sm:$0x1] }
0x133d   :  { %22307 = vmatprep.subr.bf16.mxu0 %v22897_v39 }
0x1340   :  { %22309 = vmatpush3.bf16.msra.mxu0 %v22308_v20 }
0x1341   :  { %22310 = vmatprep.subr.bf16.mxu0 %v22897_v39 }
0x1344   :  { %22312 = vmatpush3.bf16.msra.mxu0 %v22311_v54  ;;  %v14356_v54 = vunpack.c.l.bf16 %v15598_v36  ;;  %v14634_v36 = vld [vmem:[%s27322_s17 + $0xb8] sm:$0xff] }
0x1345   :  { %22313 = vmatprep.subr.bf16.mxu0 %v22897_v39 }
0x1348   :  { %22315 = vmatpush3.bf16.msra.mxu0 %v22314_v18  ;;  %v13894_v18 = vunpack.c.l.bf16 %v15586_v59 }
0x1349   :  { %22316 = vmatprep.subr.bf16.mxu0 %v22897_v39 }
0x134c   :  { %22318 = vmatpush3.bf16.msra.mxu0 %v22317_v4  ;;  %v15590_v4 = vld [vmem:[%s27319_s5 + $0x4] sm:$0x1] }
0x134d   :  { %20716 = vmatprep.subr.mxu0 %v22899_v17 }
0x13ed   :  { %v12988_v45 = vpop.f32.mrb[4].mxu0 }
0x13ee   :  { %v20600_v11 = vpop.f32.mrb[5].mxu0  ;;  %v13313_v10 = vpop.f32.mrb[146].mxu1  ;;  %v12999_v15 = vmul.f32 %v15556_v61, %v12988_v45  ;;  %v14048_v61 = vunpack.c.l.bf16 %v15590_v4  ;;  %v15592_v45 = vld [vmem:[%s27319_s5 + $0x5] sm:$0x1] }
0x13ef   :  { %v20620_v29 = vpop.f32.mrb[147].mxu1  ;;  %v13325_v34 = vmul.f32 %v15569_v6, %v13313_v10  ;;  %v14125_v11 = vunpack.c.l.bf16 %v15592_v45  ;;  %v15594_v10 = vld [vmem:[%s27319_s5 + $0x6] sm:$0x1] }
0x13f0   :  { %v13006_v27 = vadd.f32 %v15557_v43, %v12999_v15  ;;  %v14202_v15 = vunpack.c.l.bf16 %v15594_v10  ;;  %v15596_v29 = vld [vmem:[%s27319_s5 + $0x7] sm:$0x1] }
0x13f1   :  { %v14279_v43 = vunpack.c.l.bf16 %v15596_v29 }
0x13f2   :  { %v13073_v8 = vpop.f32.mrb[6].mxu0  ;;  %v13473_v12 = vpop.f32.mrb[148].mxu1 }
0x13f3   :  { %v13085_v19 = vmul.f32 %v15560_v55, %v13073_v8  ;;  %v20605_v42 = vpop.f32.mrb[7].mxu0  ;;  %v20630_v47 = vpop.f32.mrb[149].mxu1  ;;  %v13485_v50 = vmul.f32 %v15575_v58, %v13473_v12  ;;  %v14431_v55 = vld [vmem:[%s27320_s9] sm:$0x1]  ;;  %v14620_v58 = vld [vmem:[%s27322_s17 + $0x48] sm:$0xff] }
0x13f4   :  { %v14432_v8 = vunpack.c.l.bf16 %v14431_v55  ;;  %v14506_v12 = vld [vmem:[%s27321_s13] sm:$0xff]  ;;  %v14508_v42 = vld [vmem:[%s27321_s13 + $0x10] sm:$0xff] }
0x13f5   :  { %v13086_v9 = vadd.f32 %v13085_v19, %v13006_v27  ;;  %v14507_v27 = vld [vmem:[%s27321_s13 + $0x8] sm:$0xff] }
0x13f6   :  { %v13153_v23 = vpop.f32.mrb[8].mxu0  ;;  %v13633_v53 = vpop.f32.mrb[150].mxu1  ;;  %v22320_v19 = vpack.c.bf16 %v14507_v27, %v14506_v12 }
0x13f7   :  { %v13165_v37 = vmul.f32 %v15563_v35, %v13153_v23  ;;  %v20610_v57 = vpop.f32.mrb[9].mxu0  ;;  %v20640_v48 = vpop.f32.mrb[151].mxu1  ;;  %v13645_v28 = vmul.f32 %v15581_v5, %v13633_v53  ;;  %v14511_v35 = vld [vmem:[%s27321_s13 + $0x28] sm:$0xff]  ;;  %v14512_v23 = vld [vmem:[%s27321_s13 + $0x30] sm:$0xff]  ;;  %v14513_v53 = vld [vmem:[%s27321_s13 + $0x38] sm:$0xff] }
0x13f8   :  { %v14612_v57 = vld [vmem:[%s27322_s17 + $0x8] sm:$0xff]  ;;  %v14614_v48 = vld [vmem:[%s27322_s17 + $0x18] sm:$0xff] }
0x13f9   :  { %v13166_v44 = vadd.f32 %v13165_v37, %v13086_v9  ;;  %v22329_v37 = vpack.c.bf16 %v14513_v53, %v14512_v23  ;;  %v22331_v6 = vpack.c.bf16 %v14614_v48, %v14612_v57  ;;  %v14636_v57 = vld [vmem:[%s27322_s17 + $0xc8] sm:$0xff]  ;;  %v14638_v48 = vld [vmem:[%s27322_s17 + $0xd8] sm:$0xff] }
0x13fa   :  { %v13233_v21 = vpop.f32.mrb[10].mxu0 }
0x13fb   :  { %v13245_v38 = vmul.f32 %v15566_v56, %v13233_v21  ;;  %v20615_v16 = vpop.f32.mrb[11].mxu0  ;;  %v14611_v56 = vld [vmem:[%s27322_s17] sm:$0xff]  ;;  %v14616_v21 = vld [vmem:[%s27322_s17 + $0x28] sm:$0xff] }
0x13fd   :  { %v13246_v24 = vadd.f32 %v13245_v38, %v13166_v44  ;;  %v14613_v44 = vld [vmem:[%s27322_s17 + $0x10] sm:$0xff]  ;;  %v14618_v38 = vld [vmem:[%s27322_s17 + $0x38] sm:$0xff] }
0x13fe   :  { %v13393_v51 = vpop.f32.mrb[12].mxu0  ;;  %v22333_v16 = vpack.c.bf16 %v14613_v44, %v14611_v56  ;;  %v22355_v56 = vpack.c.bf16 %v14638_v48, %v14636_v57  ;;  %v14637_v44 = vld [vmem:[%s27322_s17 + $0xd0] sm:$0xff]  ;;  %v14759_v48 = vld [vmem:[%s23149_s27 + $0xf8] sm:$0xff] }
0x13ff   :  { %v13326_v49 = vadd.f32 %v13325_v34, %v13246_v24  ;;  %v13405_v62 = vmul.f32 %v15572_v2, %v13393_v51  ;;  %v20625_v7 = vpop.f32.mrb[13].mxu0  ;;  %v22335_v34 = vpack.c.bf16 %v14618_v38, %v14616_v21  ;;  %v14617_v2 = vld [vmem:[%s27322_s17 + $0x30] sm:$0xff]  ;;  %v14622_v24 = vld [vmem:[%s27322_s17 + $0x58] sm:$0xff]  ;;  %v14640_v38 = vld [vmem:[%s27322_s17 + $0xe8] sm:$0xff] }
0x1400   :  { %v14621_v7 = vld [vmem:[%s27322_s17 + $0x50] sm:$0xff] }
0x1401   :  { %v13406_v26 = vadd.f32 %v13405_v62, %v13326_v49  ;;  %v22339_v49 = vpack.c.bf16 %v14622_v24, %v14620_v58  ;;  %v14619_v62 = vld [vmem:[%s27322_s17 + $0x40] sm:$0xff]  ;;  %v14758_v57 = vld [vmem:[%s23149_s27 + $0xf0] sm:$0xff] }
0x1402   :  { %v13553_v14 = vpop.f32.mrb[14].mxu0  ;;  %v22341_v5 = vpack.c.bf16 %v14621_v7, %v14619_v62  ;;  %v14744_v24 = vld [vmem:[%s23149_s27 + $0x80] sm:$0xff]  ;;  %v14729_v7 = vld [vmem:[%s23149_s27 + $0x8] sm:$0xff] }
0x1403   :  { %v13486_v33 = vadd.f32 %v13485_v50, %v13406_v26  ;;  %v13565_v31 = vmul.f32 %v15578_v46, %v13553_v14  ;;  %v20635_v1 = vpop.f32.mrb[15].mxu0  ;;  %v14624_v50 = vld [vmem:[%s27322_s17 + $0x68] sm:$0xff]  ;;  %v14626_v46 = vld [vmem:[%s27322_s17 + $0x78] sm:$0xff]  ;;  %v14623_v14 = vld [vmem:[%s27322_s17 + $0x60] sm:$0xff] }
0x1404   :  { %v22343_v26 = vpack.c.bf16 %v14626_v46, %v14624_v50  ;;  %v14630_v1 = vld [vmem:[%s27322_s17 + $0x98] sm:$0xff]  ;;  %v14746_v50 = vld [vmem:[%s23149_s27 + $0x90] sm:$0xff] }
0x1405   :  { %v13566_v60 = vadd.f32 %v13565_v31, %v13486_v33  ;;  %v14625_v33 = vld [vmem:[%s27322_s17 + $0x70] sm:$0xff]  ;;  %v14628_v31 = vld [vmem:[%s27322_s17 + $0x88] sm:$0xff]  ;;  %v14747_v46 = vld [vmem:[%s23149_s27 + $0x98] sm:$0xff] }
0x1407   :  { %v13646_v40 = vadd.f32 %v13645_v28, %v13566_v60  ;;  %v22345_v28 = vpack.c.bf16 %v14625_v33, %v14623_v14  ;;  %v22347_v60 = vpack.c.bf16 %v14630_v1, %v14628_v31  ;;  %v14730_v14 = vld [vmem:[%s23149_s27 + $0x10] sm:$0xff]  ;;  %v14731_v33 = vld [vmem:[%s23149_s27 + $0x18] sm:$0xff]  ;;  %v14748_v31 = vld [vmem:[%s23149_s27 + $0xa0] sm:$0xff] }
0x1408   :  { %v14749_v1 = vld [vmem:[%s23149_s27 + $0xa8] sm:$0xff] }
0x1409   :  { %20674 = vmatmul.mubr.f32.vlgmr.msra.gmra.mrb[16].mxu0 %v13646_v40  ;;  %v14627_v40 = vld [vmem:[%s27322_s17 + $0x80] sm:$0xff] }
0x140a   :  { %20718 = vmatprep.mubr.msk.f32.mxu0 %vm22898_vm2, %v22899_v17 }
0x14dc   :  { %v13736_v63 = vpop.f32.mrb[16].mxu0 }
0x14dd   :  { %v13737_v20 = vadd.f32 %v15582_v25, %v13736_v63  ;;  %v20675_v32 = vpop.f32.mrb[17].mxu0  ;;  %v14632_v25 = vld [vmem:[%s27322_s17 + $0xa8] sm:$0xff]  ;;  %v22349_v63 = vpack.c.bf16 %v14629_v52, %v14627_v40  ;;  %v14732_v40 = vld [vmem:[%s23149_s27 + $0x20] sm:$0xff] }
0x14de   :  { %v14633_v32 = vld [vmem:[%s27322_s17 + $0xb0] sm:$0xff]  ;;  %v14733_v52 = vld [vmem:[%s23149_s27 + $0x28] sm:$0xff] }
0x14df   :  { %20677 = vmatpush3.msra.mxu1 %v13737_v20  ;;  %20717 = vmatpush3.msra.mxu0 %v13737_v20 }
0x14e0   :  { %20679 = vmatmul.mubr.msk.f32.vlgmr.msra.gmra.mrb[152].mxu1 %vm12055_vm3, %v13741_v41  ;;  %20681 = vmatprep.subr.mxu1 %v22899_v17  ;;  %v22351_v41 = vpack.c.bf16 %v14634_v36, %v14632_v25  ;;  %v14750_v25 = vld [vmem:[%s23149_s27 + $0xb0] sm:$0xff]  ;;  %v14751_v36 = vld [vmem:[%s23149_s27 + $0xb8] sm:$0xff] }
0x14e1   :  { %20682 = vmatpush3.msra.mxu1 %v13737_v20  ;;  %20683 = vmatprep.mubr.msk.f32.mxu1 %vm22898_vm2, %v22899_v17 }
0x14e2   :  { %20686 = vmatprep.subr.mxu1 %v22899_v17  ;;  %20719 = vmatmul.mubr.msk.f32.vlgmr.msra.gmra.mrb[18].mxu0 %vm12055_vm3, %v14356_v54 }
0x14e3   :  { %22319 = vmatprep.subr.bf16.mxu0 %v22897_v39  ;;  %20742 = vmatprep.mubr.msk.f32.mxu0 %vm22898_vm2, %v22899_v17 }
0x14e4   :  { %20684 = vmatmul.mubr.msk.f32.vlgmr.msra.gmra.mrb[154].mxu1 %vm12055_vm3, %v13817_v30  ;;  %22321 = vmatpush3.bf16.msra.mxu0 %v22320_v19 }
0x14e5   :  { %20687 = vmatpush3.msra.mxu1 %v13737_v20  ;;  %20688 = vmatprep.mubr.msk.f32.mxu1 %vm22898_vm2, %v22899_v17 }
0x14e6   :  { %20691 = vmatprep.subr.mxu1 %v22899_v17  ;;  %22322 = vmatprep.subr.bf16.mxu0 %v22897_v39 }
0x14e8   :  { %20689 = vmatmul.mubr.msk.f32.vlgmr.msra.gmra.mrb[156].mxu1 %vm12055_vm3, %v13894_v18 }
0x14e9   :  { %20692 = vmatpush3.msra.mxu1 %v13737_v20  ;;  %20693 = vmatprep.mubr.msk.f32.mxu1 %vm22898_vm2, %v22899_v17 }
0x14ea   :  { %20696 = vmatprep.subr.mxu1 %v22899_v17 }
0x14ec   :  { %20694 = vmatmul.mubr.msk.f32.vlgmr.msra.gmra.mrb[158].mxu1 %vm12055_vm3, %v13971_v13 }
0x14ed   :  { %20697 = vmatpush3.msra.mxu1 %v13737_v20  ;;  %20698 = vmatprep.mubr.msk.f32.mxu1 %vm22898_vm2, %v22899_v17 }
0x14ee   :  { %20701 = vmatprep.subr.mxu1 %v22899_v17 }
0x14f0   :  { %20699 = vmatmul.mubr.msk.f32.vlgmr.msra.gmra.mrb[160].mxu1 %vm12055_vm3, %v14048_v61 }
0x14f1   :  { %20702 = vmatpush3.msra.mxu1 %v13737_v20  ;;  %20703 = vmatprep.mubr.msk.f32.mxu1 %vm22898_vm2, %v22899_v17 }
0x14f2   :  { %20706 = vmatprep.subr.mxu1 %v22899_v17 }
0x14f4   :  { %20704 = vmatmul.mubr.msk.f32.vlgmr.msra.gmra.mrb[162].mxu1 %vm12055_vm3, %v14125_v11 }
0x14f5   :  { %20707 = vmatpush3.msra.mxu1 %v13737_v20  ;;  %20708 = vmatprep.mubr.msk.f32.mxu1 %vm22898_vm2, %v22899_v17 }
0x14f6   :  { %20711 = vmatprep.subr.mxu1 %v22899_v17 }
0x14f8   :  { %20709 = vmatmul.mubr.msk.f32.vlgmr.msra.gmra.mrb[164].mxu1 %vm12055_vm3, %v14202_v15 }
0x14f9   :  { %20712 = vmatpush3.msra.mxu1 %v13737_v20  ;;  %20713 = vmatprep.mubr.msk.f32.mxu1 %vm22898_vm2, %v22899_v17  ;;  %v14631_v20 = vld [vmem:[%s27322_s17 + $0xa0] sm:$0xff] }
0x14fa   :  { %20721 = vmatprep.subr.mxu1 %v22899_v17  ;;  %v22353_v22 = vpack.c.bf16 %v14633_v32, %v14631_v20  ;;  %v14734_v20 = vld [vmem:[%s23149_s27 + $0x30] sm:$0xff]  ;;  %v14735_v32 = vld [vmem:[%s23149_s27 + $0x38] sm:$0xff] }
0x14fc   :  { %20714 = vmatmul.mubr.msk.f32.vlgmr.msra.gmra.mrb[166].mxu1 %vm12055_vm3, %v14279_v43 }
0x14fd   :  { %20722 = vmatpush3.msra.mxu1 %v26283_v0  ;;  %20723 = vmatprep.mubr.msk.f32.mxu1 %vm22898_vm2, %v22899_v17  ;;  %v14509_v0 = vld [vmem:[%s27321_s13 + $0x18] sm:$0xff] }
0x14fe   :  { %v22323_v47 = vpack.c.bf16 %v14509_v0, %v14508_v42  ;;  %22332 = vmatprep.subr.bf16.mxu1 %v22331_v6  ;;  %v14635_v6 = vld [vmem:[%s27322_s17 + $0xc0] sm:$0xff] }
0x14ff   :  { %v22357_v21 = vpack.c.bf16 %v14637_v44, %v14635_v6  ;;  %v14742_v6 = vld [vmem:[%s23149_s27 + $0x70] sm:$0xff]  ;;  %v14743_v44 = vld [vmem:[%s23149_s27 + $0x78] sm:$0xff] }
0x1500   :  { %20724 = vmatmul.mubr.msk.f32.vlgmr.msra.gmra.mrb[168].mxu1 %vm12055_vm3, %v14432_v8  ;;  %22324 = vmatpush3.bf16.msra.mxu0 %v22323_v47 }
0x1501   :  { %14719 = vmatprep.mubr.f32.mxu1 %v22899_v17  ;;  %22325 = vmatprep.subr.bf16.mxu0 %v22897_v39  ;;  %v14510_v17 = vld [vmem:[%s27321_s13 + $0x20] sm:$0xff] }
0x1502   :  { %v22326_v9 = vpack.c.bf16 %v14511_v35, %v14510_v17  ;;  %22334 = vmatpush1.bf16.msra.mxu1 %v22333_v16  ;;  %v14642_v16 = vld [vmem:[%s27322_s17 + $0xf8] sm:$0xff] }
0x1503   :  { %22336 = vmatprep.subr.bf16.mxu1 %v22335_v34  ;;  %v22359_v34 = vpack.c.bf16 %v14642_v16, %v14640_v38  ;;  %v14645_v38 = vlaneseq }
0x1504   :  { %22327 = vmatpush3.bf16.msra.mxu0 %v22326_v9 }
0x1505   :  { %22328 = vmatprep.subr.bf16.mxu0 %v22897_v39  ;;  %v14615_v39 = vld [vmem:[%s27322_s17 + $0x20] sm:$0xff]  ;;  %v14646_v16 = vshrl.u32 %v14645_v38, 7 }
0x1506   :  { %v22337_v51 = vpack.c.bf16 %v14617_v2, %v14615_v39  ;;  %v14639_v39 = vld [vmem:[%s27322_s17 + $0xe0] sm:$0xff]  ;;  %v14641_v2 = vld [vmem:[%s27322_s17 + $0xf0] sm:$0xff] }
0x1507   :  { %v22361_v58 = vpack.c.bf16 %v14641_v2, %v14639_v39  ;;  %v14651_v39 = vsub.s32 1, %v14646_v16 }
0x1508   :  { %22330 = vmatpush3.bf16.msra.mxu0 %v22329_v37  ;;  %22338 = vmatpush1.bf16.msra.mxu1 %v22337_v51  ;;  %v14745_v51 = vld [vmem:[%s23149_s27 + $0x88] sm:$0xff] }
0x1509   :  { %22340 = vmatprep.subr.bf16.mxu1 %v22339_v49  ;;  %v14728_v49 = vld [vmem:[%s23149_s27] sm:$0xff]  ;;  %v22363_v62 = vpack.c.bf16 %v14745_v51, %v14744_v24 }
0x150b   :  { %22364 = vmatprep.subr.bf16.mxu0 %v22363_v62 }
0x150c   :  { %22342 = vmatpush1.bf16.msra.mxu1 %v22341_v5  ;;  %v22365_v5 = vpack.c.bf16 %v14729_v7, %v14728_v49 }
0x150d   :  { %22344 = vmatprep.subr.bf16.mxu1 %v22343_v26  ;;  %v22367_v26 = vpack.c.bf16 %v14747_v46, %v14746_v50 }
0x1510   :  { %22346 = vmatpush1.bf16.msra.mxu1 %v22345_v28  ;;  %v22369_v28 = vpack.c.bf16 %v14731_v33, %v14730_v14 }
0x1511   :  { %22348 = vmatprep.subr.bf16.mxu1 %v22347_v60  ;;  %v22371_v60 = vpack.c.bf16 %v14749_v1, %v14748_v31 }
0x1514   :  { %22350 = vmatpush1.bf16.msra.mxu1 %v22349_v63  ;;  %v22373_v63 = vpack.c.bf16 %v14733_v52, %v14732_v40 }
0x1515   :  { %22352 = vmatprep.subr.bf16.mxu1 %v22351_v41  ;;  %v22375_v41 = vpack.c.bf16 %v14751_v36, %v14750_v25 }
0x1518   :  { %22354 = vmatpush1.bf16.msra.mxu1 %v22353_v22  ;;  %v14752_v22 = vld [vmem:[%s23149_s27 + $0xc0] sm:$0xff] }
0x1519   :  { %22356 = vmatprep.subr.bf16.mxu1 %v22355_v56  ;;  %v22391_v56 = vpack.c.bf16 %v14759_v48, %v14758_v57 }
0x151c   :  { %22358 = vmatpush1.bf16.msra.mxu1 %v22357_v21  ;;  %v22393_v21 = vpack.c.bf16 %v14743_v44, %v14742_v6 }
0x151d   :  { %22360 = vmatprep.subr.bf16.mxu1 %v22359_v34  ;;  %v14643_v34 = vld [vmem:[%s23144_s29] sm:$0x3]  ;;  %s22900_s29 = smov [#allocation17]  }
0x1520   :  { %22362 = vmatpush1.bf16.msra.mxu1 %v22361_v58  ;;  %v14652_v58 = vrot.slane %v14643_v34, %v14651_v39 }
0x15b3   :  { %v13811_v54 = vpop.f32.mrb[152].mxu1 }
0x15b4   :  { %v20680_v30 = vpop.f32.mrb[153].mxu1 }
0x15b5   :  { %v14426_v59 = vpop.f32.mrb[18].mxu0  ;;  %v22377_v30 = vpack.c.bf16 %v14735_v32, %v14734_v20 }
0x15b6   :  { %v20720_v18 = vpop.f32.mrb[19].mxu0 }
0x15b7   :  { %v13887_v3 = vpop.f32.mrb[154].mxu1  ;;  %v14736_v18 = vld [vmem:[%s23149_s27 + $0x40] sm:$0xff] }
0x15b8   :  { %v13891_v13 = vmax.f32 %v13811_v54, %v13887_v3  ;;  %v20685_v4 = vpop.f32.mrb[155].mxu1  ;;  %v14753_v54 = vld [vmem:[%s23149_s27 + $0xc8] sm:$0xff] }
0x15b9   :  { %v14737_v3 = vld [vmem:[%s23149_s27 + $0x48] sm:$0xff]  ;;  %v14755_v4 = vld [vmem:[%s23149_s27 + $0xd8] sm:$0xff] }
0x15bb   :  { %v13964_v61 = vpop.f32.mrb[156].mxu1 }
0x15bc   :  { %v13968_v45 = vmax.f32 %v13891_v13, %v13964_v61  ;;  %v20690_v11 = vpop.f32.mrb[157].mxu1  ;;  %v14754_v13 = vld [vmem:[%s23149_s27 + $0xd0] sm:$0xff]  ;;  %v22381_v61 = vpack.c.bf16 %v14737_v3, %v14736_v18 }
0x15bd   :  { %v14738_v11 = vld [vmem:[%s23149_s27 + $0x50] sm:$0xff] }
0x15bf   :  { %v14041_v10 = vpop.f32.mrb[158].mxu1 }
0x15c0   :  { %v14045_v15 = vmax.f32 %v13968_v45, %v14041_v10  ;;  %v20695_v29 = vpop.f32.mrb[159].mxu1  ;;  %v22383_v45 = vpack.c.bf16 %v14755_v4, %v14754_v13  ;;  %v14739_v10 = vld [vmem:[%s23149_s27 + $0x58] sm:$0xff] }
0x15c1   :  { %v14757_v29 = vld [vmem:[%s23149_s27 + $0xe8] sm:$0xff] }
0x15c3   :  { %v14118_v43 = vpop.f32.mrb[160].mxu1 }
0x15c4   :  { %v14122_v55 = vmax.f32 %v14045_v15, %v14118_v43  ;;  %v20700_v8 = vpop.f32.mrb[161].mxu1  ;;  %v14756_v15 = vld [vmem:[%s23149_s27 + $0xe0] sm:$0xff]  ;;  %v22385_v43 = vpack.c.bf16 %v14739_v10, %v14738_v11 }
0x15c5   :  { %v15601_v8 = vld [vmem:[#allocation13] ss:$0 sm:$0xff] }
0x15c7   :  { %v14195_v12 = vpop.f32.mrb[162].mxu1 }
0x15c8   :  { %v14199_v27 = vmax.f32 %v14122_v55, %v14195_v12  ;;  %v20705_v19 = vpop.f32.mrb[163].mxu1  ;;  %v22387_v55 = vpack.c.bf16 %v14757_v29, %v14756_v15 }
0x15cb   :  { %v14272_v42 = vpop.f32.mrb[164].mxu1 }
0x15cc   :  { %v14276_v0 = vmax.f32 %v14199_v27, %v14272_v42  ;;  %v20710_v47 = vpop.f32.mrb[165].mxu1  ;;  %v15603_v42 = vld [vmem:[%s27323_s21] ss:$0 sm:$0xff] }
0x15cd   :  { %v15604_v47 = vld [vmem:[#allocation14] ss:$0 sm:$0xff] }
0x15cf   :  { %v14349_v17 = vpop.f32.mrb[166].mxu1 }
0x15d0   :  { %v14353_v35 = vmax.f32 %v14276_v0, %v14349_v17  ;;  %v20715_v9 = vpop.f32.mrb[167].mxu1 }
0x15d1   :  { %v14740_v9 = vld [vmem:[%s23149_s27 + $0x60] sm:$0xff] }
0x15d2   :  { %v26555_v23 = vmax.f32 %v14353_v35, %v14426_v59  ;;  %v22379_v59 = vpack.c.bf16 %v14753_v54, %v14752_v22 }
0x15d3   :  { %v14502_v53 = vpop.f32.mrb[168].mxu1 }
0x15d4   :  { %20743 = vmatmul.mubr.msk.f32.vlgmr.msra.gmra.mrb[20].mxu0 %vm5783_vm1, %v14502_v53  ;;  %v20725_v37 = vpop.f32.mrb[169].mxu1  ;;  %v14741_v53 = vld [vmem:[%s23149_s27 + $0x68] sm:$0xff]  ;;  %s14856_s27 = sshll.u32 %s22900_s29, 4  ;;  %s14857_s27 = int_to_ptr.vmem [resolvable:$true] %s14856_s27 }
0x15d5   :  { %22366 = vmatpush3.bf16.msra.mxu0 %v22365_v5  ;;  %v22389_v37 = vpack.c.bf16 %v14741_v53, %v14740_v9  ;;  %s22804_s25 = scalar_lea.vmem %s14857_s27, 32  ;;  %p22809_p3 = scmp.lt.s32.totalorder %s14857_s27, %s14857_s27 }
0x15d6   :  { %22368 = vmatprep.subr.bf16.mxu0 %v22367_v26  ;;  %v15605_v26 = vld [vmem:[#allocation16] ss:$0 sm:$0xff]  ;;  %p22805_p2 = scmp.ne.s32.totalorder %s14857_s27, %s22804_s25  ;;  %p22810_p4 = scmp.lt.s32.totalorder %s22804_s25, %s22804_s25 }
0x15d8   :  { %p22811_p5 = por %p22810_p4, %p22809_p3 }
0x15d9   :  { %22370 = vmatpush3.bf16.msra.mxu0 %v22369_v28 }
0x15da   :  { %22372 = vmatprep.subr.bf16.mxu0 %v22371_v60  ;;  %p22812_p6 = pnand %p22811_p5, %p22805_p2 }
0x15dd   :  { %22374 = vmatpush3.bf16.msra.mxu0 %v22373_v63 }
0x15de   :  { %22376 = vmatprep.subr.bf16.mxu0 %v22375_v41 }
0x15e1   :  { %22378 = vmatpush3.bf16.msra.mxu0 %v22377_v30 }
0x15e2   :  { %22380 = vmatprep.subr.bf16.mxu0 %v22379_v59 }
0x15e5   :  { %22382 = vmatpush3.bf16.msra.mxu0 %v22381_v61 }
0x15e6   :  { %22384 = vmatprep.subr.bf16.mxu0 %v22383_v45 }
0x15e9   :  { %22386 = vmatpush3.bf16.msra.mxu0 %v22385_v43 }
0x15ea   :  { %22388 = vmatprep.subr.bf16.mxu0 %v22387_v55 }
0x15ed   :  { %22390 = vmatpush3.bf16.msra.mxu0 %v22389_v37 }
0x15ee   :  { %22392 = vmatprep.subr.bf16.mxu0 %v22391_v56 }
0x15f1   :  { %22394 = vmatpush3.bf16.msra.mxu0 %v22393_v21 }
0x16a7   :  { %v14590_v12 = vpop.f32.mrb[20].mxu0 }
0x16a8   :  { %v14591_v27 = vadd.f32 %v15601_v8, %v14590_v12  ;;  %v20744_v19 = vpop.f32.mrb[21].mxu0 }
0x16aa   :  { %v14594_v0 = vadd.f32 %v14591_v27, %v26555_v23  ;;  %v14647_v23 = vsub.s32 0, %v14646_v16 }
0x16ac   :  { %v14602_v17 = vmul.f32 %v15603_v42, %v14594_v0  ;;  %v14648_v2 = vrot.slane %v14643_v34, %v14647_v23 }
0x16ae   :  { %v14610_v35 = vadd.f32 %v15604_v47, %v14602_v17 }
0x16b0   :  { %14720 = vmatmul.mubr.f32.vlgmr.msra.gmra.mrb[170].mxu1 %v14610_v35 }
0x1783   :  { %v14721_v24 = vpop.f32.mrb[170].mxu1 }
0x1784   :  { %v14722_v51 = vadd.f32 %v14721_v24, %v14648_v2  ;;  %v14723_v49 = vpop.f32.mrb[171].mxu1 }
0x1785   :  { %v14724_v62 = vadd.f32 %v14723_v49, %v14652_v58 }
0x1786   :  { %v14726_v50 = vmax.f32 %v14722_v51, 0.0 }
0x1787   :  { %v14727_v7 = vmax.f32 %v14724_v62, 0.0 }
0x1789   :  { %14831 = vmatprep.mubr.f32.mxu0 %v14727_v7 }
0x178a   :  { %14832 = vmatmul.mubr.f32.vlgmr.msra.gmra.mrb[22].mxu0 %v14726_v50 }
0x185d   :  { %v17814_v46 = vpop.f32.mrb[22].mxu0 }
0x185e   :  { %v17815_v5 = vpop.f32.mrb[23].mxu0 }
0x185f   :  { %v17816_v14 = vadd.f32 %v17815_v5, %v17814_v46 }
0x1861   :  { %v14834_v33 = vadd.f32 %v17816_v14, %v15605_v26 }
0x1863   :  { %v14838_v31 = vsel %vm14837_vm4, %v14834_v33, -inf }
0x1864   :  { %14839 = vmax.xlane.f32.xlu0 %v14838_v31 }
0x18f1   :  { %v14840_v1 = vpop.xlane.xlu0 %14839 }
0x18f2   :  { %v14841_v28 = vsub.f32 %v14834_v33, %v14840_v1 }
0x18f4   :  { %v14842_v60 = vmul.f32 1.442695, %v14841_v28 }
0x18f6   :  { %22602 = vpow2.f32 %v14842_v60 }
0x1900   :  { %v22603_v40 = vpop.eup %22602 }
0x1901   :  { %v14844_v52 = vsel %vm14837_vm4, %v22603_v40, 0.0 }
0x1902   :  { %14845 = vadd.xlane.f32.xlu0 %v14844_v52 }
0x198f   :  { %v14846_v25 = vpop.xlane.xlu0 %14845 }
0x1990   :  { %22604 = vrcp.f32 %v14846_v25 }
0x199a   :  { %v22605_v36 = vpop.eup %22604 }
0x199b   :  { %v14848_v63 = vmul.f32 %v22605_v36, %v22603_v40 }
0x199d   :  { %14849 = vst.msk [vmem:[#allocation17] sm:$0x3] %vm14837_vm4, %v14848_v63 }
0x199e   :  { %22815 = shalt.err (!%p22812_p6)
}
0x199f   :  { %s22816_s3 = scalar_lea.hbm %s23159_s24, 32 }
0x19a0   :  { %p22817_p7 = scmp.ne.s32.totalorder %s23159_s24, %s22816_s3  ;;  %p22820_p8 = scmp.lt.u32.totalorder %s22816_s3, %s23159_s24 }
0x19a2   :  { %p22822_p9 = pnand %p22820_p8, %p22817_p7 }
0x19a4   :  { %22825 = shalt.err (!%p22822_p9)
}
0x19a5   :  { %14859 = dma.vmem_to_hbm [thread:$0]  %s14857_s27, 32, %s23159_s24, [#allocation4]  }
0x19a6   :  { %22836 = dma.done.wait [#allocation4], 32  }
0x19a7   :  { %22837 = vsyncadd [#allocation4], 4294967264 }
0x19a8   :  { %14863 = vsyncpa [#allocation3], 1 }
0x19a9   :  { %14864 = vsyncpa [#allocation6], 1 }
0x19aa   :  { %14865 = vsyncpa [#allocation9], 1 }
0x19ab   :  { %14866 = vsyncpa [#allocation12], 1 }
0x19ac   :  { %14867 = vsyncpa [#allocation15], 1 }
0x19ad   :  { %14868 = vsyncpa [#allocation4], 1 }

</bundles_post_ra>
